<compile_context>
chip_gen: v7x
topology: tpu7x:2x2x1
jax: 0.10.0
libtpu: 0.0.40
codegen_flags: <defaults>
</compile_context>

<pallas_src>
import functools
import math

import jax
import jax.numpy as jnp
from jax.experimental import pallas as pl
from jax.experimental.pallas import tpu as pltpu

LANE = 128


# ---------------------------------------------------------------------------
# Pallas kernel: fused (P @ W [+ b]) [-> per-sample InstanceNorm] [-> LeakyReLU]
# ---------------------------------------------------------------------------
def _conv_block_kernel(*refs, groups, hw, use_norm, use_act, has_bias,
                       eps=1e-5, negative_slope=0.2):
    if has_bias:
        p_ref, w_ref, b_ref, o_ref = refs
    else:
        p_ref, w_ref, o_ref = refs

    # One MXU matmul for all samples in the block: (G*HW, Kc) @ (Kc, Tn).
    y = jnp.dot(p_ref[...], w_ref[...], preferred_element_type=jnp.float32)
    if has_bias:
        y = y + b_ref[...]

    if use_norm:
        # InstanceNorm2d (affine=False): per-sample, per-channel stats over the
        # HW rows of each sample.  Single-pass moments on the in-register f32
        # value (no VMEM scratch round-trip, one full-block store at the end).
        tn = y.shape[-1]
        yg = y.reshape(groups, hw, tn)
        mean = jnp.mean(yg, axis=1, keepdims=True)
        ex2 = jnp.mean(yg * yg, axis=1, keepdims=True)
        var = jnp.maximum(ex2 - mean * mean, 0.0)
        yg = (yg - mean) * jax.lax.rsqrt(var + eps)
        y = yg.reshape(groups * hw, tn)

    if use_act:
        y = jnp.where(y > 0, y, negative_slope * y)

    o_ref[...] = y.astype(o_ref.dtype)


# ---------------------------------------------------------------------------
# Glue: channels-last im2col (static python loop over the 4x4 window)
# ---------------------------------------------------------------------------
def _im2col_nhwc(x, k, stride, pad):
    # x: [N, H, W, C] -> patches [N, Ho*Wo, k*k*C], element order (kh, kw, C).
    n, h, w, c = x.shape
    xp = jnp.pad(x, ((0, 0), (pad, pad), (pad, pad), (0, 0)))
    hp, wp = h + 2 * pad, w + 2 * pad
    ho = (hp - k) // stride + 1
    wo = (wp - k) // stride + 1
    cols = []
    for di in range(k):
        for dj in range(k):
            cols.append(xp[:, di:di + stride * ho:stride,
                           dj:dj + stride * wo:stride, :])
    p = jnp.stack(cols, axis=3)                    # [N, Ho, Wo, k*k, C]
    # TODO(synk): at real pix2pix resolutions, fold the k*k taps into the
    # Pallas kernel as a reduction grid axis (manual DMA of shifted windows)
    # instead of materializing the ~4x-expanded patch matrix in HBM.
    return p.reshape(n, ho * wo, k * k * c), ho, wo


def _vmem_budget():
    """(block-selection budget, vmem_limit cap), derived from the chip."""
    try:
        cap = int(pltpu.get_tpu_info().vmem_capacity_bytes)
    except Exception:
        cap = 64 * 1024 * 1024                     # conservative: v7x per-TC
    budget = int(cap * 0.45)                       # per-step working-set target
    limit = min(int(cap * 0.78), cap - (8 << 20))  # leave Mosaic headroom
    return budget, max(limit, 16 * 1024 * 1024)


def _choose_cout_tile(cout):
    # Tile Cout on the wide layers: shrinks the resident W block and adds a
    # second parallel grid axis.  Lane-dense (>=128) tiles only.
    for tn in (256, 128):
        if cout > tn and cout % tn == 0:
            return tn
    return cout


def _choose_group(n, hw, kc, tn, out_itemsize, budget):
    """#samples per M block.  Prefers >= 2 grid steps on the batch axis."""
    def working_set(g):
        m = g * hw
        return (2 * (m * kc * 2 + m * tn * out_itemsize + kc * tn * 2)
                + m * tn * 4)                      # dbl-buffered tiles + f32 y
    cands = [g for g in range(1, n + 1)
             if n % g == 0 and ((g * hw) % 8 == 0 or g == n)]
    fitting = [g for g in cands if working_set(g) <= budget]
    multi_step = [g for g in fitting if n // g >= 2]
    if multi_step:
        return max(multi_step)
    if fitting:
        return max(fitting)
    return min(cands)


def conv_block(x, w, b, *, stride, pad, use_norm, use_act,
               out_dtype=jnp.bfloat16):
    """Conv2d(k=4) [+ InstanceNorm2d] [+ LeakyReLU(0.2)] on an NHWC input."""
    n = x.shape[0]
    cout, cin, k, _ = w.shape

    # Lane-align Kc by padding Cin on the small pre-im2col tensors (layer 1:
    # 3 -> 8 so Kc = 4*4*8 = 128 exactly) instead of padding the patch matrix.
    if (cin * k * k) % LANE != 0:
        mult = LANE // math.gcd(LANE, k * k)
        cin_pad = -(-cin // mult) * mult
        w = jnp.pad(w, ((0, 0), (0, cin_pad - cin), (0, 0), (0, 0)))
        x = jnp.pad(x, ((0, 0), (0, 0), (0, 0), (0, cin_pad - cin)))
        cin = cin_pad

    # bf16 MXU operands (cast BEFORE im2col so the expanded patch matrix is
    # produced directly in bf16); accumulation / bias / norm stay in f32.
    x = x.astype(jnp.bfloat16)
    p, ho, wo = _im2col_nhwc(x, k, stride, pad)          # [N, HW, Kc] bf16
    hw = ho * wo
    kc = cin * k * k
    p = p.reshape(n * hw, kc)

    # Weight [Cout, Cin, kh, kw] -> [kh*kw*Cin, Cout] to match im2col order.
    w_mat = w.transpose(2, 3, 1, 0).reshape(kc, cout).astype(jnp.bfloat16)

    out_itemsize = jnp.dtype(out_dtype).itemsize
    budget, vmem_cap = _vmem_budget()
    tn = _choose_cout_tile(cout)
    g = _choose_group(n, hw, kc, tn, out_itemsize, budget)
    m_blk = g * hw

    est = (2 * (m_blk * kc * 2 + m_blk * tn * out_itemsize + kc * tn * 2
                + tn * 4)
           + m_blk * tn * 4 + (2 << 20))
    vmem_limit = int(min(vmem_cap, max(est, 16 * 1024 * 1024)))

    has_bias = not use_norm        # InstanceNorm cancels a per-channel bias
    kern = functools.partial(_conv_block_kernel, groups=g, hw=hw,
                             use_norm=use_norm, use_act=use_act,
                             has_bias=has_bias)

    in_specs = [
        # P block index is constant across the inner Cout axis -> no re-DMA;
        # W / bias block indices are constant across the batch-group axis.
        pl.BlockSpec((m_blk, kc), lambda i, j: (i, 0)),
        pl.BlockSpec((kc, tn), lambda i, j: (0, j)),
    ]
    args = [p, w_mat]
    if has_bias:
        in_specs.append(pl.BlockSpec((1, tn), lambda i, j: (0, j)))
        args.append(b.reshape(1, cout).astype(jnp.float32))

    # NOTE: layer 1's Cout=64 output block is lane-width 64 (masked stores);
    # folding spatial into lanes would cost more relayout than it saves here.
    # TODO(synk): add an HW-row tile axis (with a separate stats pass for the
    # InstanceNorm layers) for resolutions where one sample exceeds the budget.
    out = pl.pallas_call(
        kern,
        out_shape=jax.ShapeDtypeStruct((n * hw, cout), out_dtype),
        grid=(n // g, cout // tn),
        in_specs=in_specs,
        out_specs=pl.BlockSpec((m_blk, tn), lambda i, j: (i, j)),
        compiler_params=pltpu.CompilerParams(
            dimension_semantics=("parallel", "parallel"),
            vmem_limit_bytes=vmem_limit,
        ),
    )(*args)
    return out.reshape(n, ho, wo, cout)                  # stays NHWC


def _final_conv_plain(x, w, b):
    # Final Conv2d(512, 1, 4, 1, 1): Cout=1 gives zero MXU utilization and
    # lane-width-1 stores, so it is computed as a plain (bandwidth-bound)
    # einsum with bf16 operands and an f32 accumulator.
    n = x.shape[0]
    cout, cin, k, _ = w.shape
    p, ho, wo = _im2col_nhwc(x, k, 1, 1)                  # x is already bf16
    w_mat = w.transpose(2, 3, 1, 0).reshape(cin * k * k, cout).astype(p.dtype)
    y = jnp.einsum('nmk,kc->nmc', p, w_mat,
                   preferred_element_type=jnp.float32)
    y = y + b.reshape(1, 1, cout).astype(jnp.float32)
    return y.reshape(n, ho, wo, cout).transpose(0, 3, 1, 2)   # back to NCHW


# ---------------------------------------------------------------------------
# PatchDiscriminator parameters + forward
# ---------------------------------------------------------------------------
def init_params(key):
    # Conv2d weight shapes: [Cout, Cin, 4, 4]; deterministic small normal init.
    specs = [(3, 64), (64, 128), (128, 256), (256, 512), (512, 1)]
    params = []
    for i, (cin, cout) in enumerate(specs):
        kw, kb = jax.random.split(jax.random.fold_in(key, i))
        w = 0.05 * jax.random.normal(kw, (cout, cin, 4, 4), jnp.float32)
        b = 0.01 * jax.random.normal(kb, (cout,), jnp.float32)
        params.append((w, b))
    return params


def patch_discriminator_forward(x, params):
    # x arrives NCHW (PyTorch layout); convert once to channels-last and keep
    # activations NHWC between layers (no per-layer HBM relayouts).
    x = jnp.transpose(x, (0, 2, 3, 1))
    # down(3, 64, norm=False)
    x = conv_block(x, *params[0], stride=2, pad=1, use_norm=False, use_act=True)
    # down(64, 128), down(128, 256), down(256, 512)
    x = conv_block(x, *params[1], stride=2, pad=1, use_norm=True, use_act=True)
    x = conv_block(x, *params[2], stride=2, pad=1, use_norm=True, use_act=True)
    x = conv_block(x, *params[3], stride=2, pad=1, use_norm=True, use_act=True)
    # final Conv2d(512, 1, 4, 1, 1) -- no norm, no activation
    return _final_conv_plain(x, *params[4])


if __name__ == "__main__":
    key = jax.random.PRNGKey(0)
    kx, kp = jax.random.split(key)
    # Small NCHW input; 32x32 spatial -> 16 -> 8 -> 4 -> 2 -> final 1x1 patch map.
    x = jax.random.normal(kx, (2, 3, 32, 32), jnp.float32)
    params = init_params(kp)

    fwd = jax.jit(patch_discriminator_forward)
    out = fwd(x, params)
    jax.block_until_ready(out)
    assert out.shape == (2, 1, 1, 1), out.shape
    assert out.dtype == jnp.float32
    print("KERNEL_OK")
</pallas_src>

<mosaic_0001>
module attributes {stable_mosaic.version = 11 : i64} {
  func.func @_conv_block_kernel(%arg0: i32, %arg1: i32, %arg2: memref<256x128xbf16, #tpu.memory_space<vmem>>, %arg3: memref<128x64xbf16, #tpu.memory_space<vmem>>, %arg4: memref<1x64xf32, #tpu.memory_space<vmem>>, %arg5: memref<256x64xbf16, #tpu.memory_space<vmem>>) attributes {dimension_semantics = [#tpu.dimension_semantics<parallel>, #tpu.dimension_semantics<parallel>], iteration_bounds = array<i64: 2, 1>, scalar_prefetch = 0 : i64, scratch_operands = 0 : i64, tpu.core_type = #tpu.core_type<tc>, window_params = [{transform_indices = @transform_0, window_bounds = array<i64: 256, 128>}, {transform_indices = @transform_1, window_bounds = array<i64: 128, 64>}, {transform_indices = @transform_2, window_bounds = array<i64: 1, 64>}, {transform_indices = @transform_3, window_bounds = array<i64: 256, 64>}]} {
    %c0 = arith.constant 0 : index
    %c0_0 = arith.constant 0 : index
    %0 = vector.load %arg2[%c0, %c0_0] : memref<256x128xbf16, #tpu.memory_space<vmem>>, vector<256x128xbf16>
    %c0_1 = arith.constant 0 : index
    %c0_2 = arith.constant 0 : index
    %1 = vector.load %arg3[%c0_1, %c0_2] : memref<128x64xbf16, #tpu.memory_space<vmem>>, vector<128x64xbf16>
    %cst = arith.constant dense<0.000000e+00> : vector<256x64xf32>
    %2 = tpu.matmul %0, %1, %cst {dimension_numbers = #tpu.dot_dimension_numbers<[1], [0], [0], [1], [0, 0, 1, 1], [], []>} : vector<256x128xbf16>, vector<128x64xbf16>, vector<256x64xf32> -> vector<256x64xf32>
    %c0_3 = arith.constant 0 : index
    %c0_4 = arith.constant 0 : index
    %3 = vector.load %arg4[%c0_3, %c0_4] : memref<1x64xf32, #tpu.memory_space<vmem>>, vector<1x64xf32>
    %4 = vector.broadcast %3 : vector<1x64xf32> to vector<256x64xf32>
    %5 = arith.addf %2, %4 : vector<256x64xf32>
    %cst_5 = arith.constant 0.000000e+00 : f32
    %6 = vector.broadcast %cst_5 : f32 to vector<256x64xf32>
    %7 = arith.cmpf ogt, %5, %6 : vector<256x64xf32>
    %cst_6 = arith.constant 2.000000e-01 : f32
    %8 = vector.broadcast %cst_6 : f32 to vector<256x64xf32>
    %9 = arith.mulf %8, %5 : vector<256x64xf32>
    %10 = arith.select %7, %5, %9 : vector<256x64xi1>, vector<256x64xf32>
    %11 = arith.truncf %10 : vector<256x64xf32> to vector<256x64xbf16>
    %c0_7 = arith.constant 0 : index
    %c0_8 = arith.constant 0 : index
    %12 = vector.load %arg5[%c0_7, %c0_8] : memref<256x64xbf16, #tpu.memory_space<vmem>>, vector<256x64xbf16>
    tpu.vector_store %arg5[%c0_7, %c0_8], %11 {strides = array<i32>} : memref<256x64xbf16, #tpu.memory_space<vmem>>, vector<256x64xbf16>,
    return
  }
  func.func @transform_0(%arg0: i32, %arg1: i32) -> (i32, i32) {
    %c0_i32 = arith.constant 0 : i32
    %c0_i32_0 = arith.constant 0 : i32
    return %arg0, %c0_i32 : i32, i32
  }
  func.func @transform_1(%arg0: i32, %arg1: i32) -> (i32, i32) {
    %c0_i32 = arith.constant 0 : i32
    %c0_i32_0 = arith.constant 0 : i32
    return %c0_i32, %arg1 : i32, i32
  }
  func.func @transform_2(%arg0: i32, %arg1: i32) -> (i32, i32) {
    %c0_i32 = arith.constant 0 : i32
    %c0_i32_0 = arith.constant 0 : i32
    return %c0_i32, %arg1 : i32, i32
  }
  func.func @transform_3(%arg0: i32, %arg1: i32) -> (i32, i32) {
    %c0_i32 = arith.constant 0 : i32
    return %arg0, %arg1 : i32, i32
  }
}

module attributes {stable_mosaic.version = 11 : i64} {
  func.func @_conv_block_kernel(%arg0: i32, %arg1: i32, %arg2: memref<64x1024xbf16, #tpu.memory_space<vmem>>, %arg3: memref<1024x128xbf16, #tpu.memory_space<vmem>>, %arg4: memref<64x128xbf16, #tpu.memory_space<vmem>>) attributes {dimension_semantics = [#tpu.dimension_semantics<parallel>, #tpu.dimension_semantics<parallel>], iteration_bounds = array<i64: 2, 1>, scalar_prefetch = 0 : i64, scratch_operands = 0 : i64, tpu.core_type = #tpu.core_type<tc>, window_params = [{transform_indices = @transform_0, window_bounds = array<i64: 64, 1024>}, {transform_indices = @transform_1, window_bounds = array<i64: 1024, 128>}, {transform_indices = @transform_2, window_bounds = array<i64: 64, 128>}]} {
    %c0 = arith.constant 0 : index
    %c0_0 = arith.constant 0 : index
    %0 = vector.load %arg2[%c0, %c0_0] : memref<64x1024xbf16, #tpu.memory_space<vmem>>, vector<64x1024xbf16>
    %c0_1 = arith.constant 0 : index
    %c0_2 = arith.constant 0 : index
    %1 = vector.load %arg3[%c0_1, %c0_2] : memref<1024x128xbf16, #tpu.memory_space<vmem>>, vector<1024x128xbf16>
    %cst = arith.constant dense<0.000000e+00> : vector<64x128xf32>
    %2 = tpu.matmul %0, %1, %cst {dimension_numbers = #tpu.dot_dimension_numbers<[1], [0], [0], [1], [0, 0, 1, 1], [], []>} : vector<64x1024xbf16>, vector<1024x128xbf16>, vector<64x128xf32> -> vector<64x128xf32>
    %3 = vector.shape_cast %2 : vector<64x128xf32> to vector<1x64x128xf32>
    %cst_3 = arith.constant dense<0.000000e+00> : vector<1x128xf32>
    %4 = vector.multi_reduction <add>, %3, %cst_3 [1] : vector<1x64x128xf32> to vector<1x128xf32>
    %5 = vector.shape_cast %4 : vector<1x128xf32> to vector<1x1x128xf32>
    %cst_4 = arith.constant 6.400000e+01 : f32
    %6 = vector.broadcast %cst_4 : f32 to vector<1x1x128xf32>
    %7 = arith.divf %5, %6 : vector<1x1x128xf32>
    %8 = arith.mulf %3, %3 : vector<1x64x128xf32>
    %cst_5 = arith.constant dense<0.000000e+00> : vector<1x128xf32>
    %9 = vector.multi_reduction <add>, %8, %cst_5 [1] : vector<1x64x128xf32> to vector<1x128xf32>
    %10 = vector.shape_cast %9 : vector<1x128xf32> to vector<1x1x128xf32>
    %cst_6 = arith.constant 6.400000e+01 : f32
    %11 = vector.broadcast %cst_6 : f32 to vector<1x1x128xf32>
    %12 = arith.divf %10, %11 : vector<1x1x128xf32>
    %13 = arith.mulf %7, %7 : vector<1x1x128xf32>
    %14 = arith.subf %12, %13 : vector<1x1x128xf32>
    %cst_7 = arith.constant 0.000000e+00 : f32
    %15 = vector.broadcast %cst_7 : f32 to vector<1x1x128xf32>
    %16 = arith.maximumf %14, %15 : vector<1x1x128xf32>
    %17 = vector.broadcast %7 : vector<1x1x128xf32> to vector<1x64x128xf32>
    %18 = arith.subf %3, %17 : vector<1x64x128xf32>
    %cst_8 = arith.constant 9.99999974E-6 : f32
    %19 = vector.broadcast %cst_8 : f32 to vector<1x1x128xf32>
    %20 = arith.addf %16, %19 : vector<1x1x128xf32>
    %21 = math.rsqrt %20 : vector<1x1x128xf32>
    %22 = vector.broadcast %21 : vector<1x1x128xf32> to vector<1x64x128xf32>
    %23 = arith.mulf %18, %22 : vector<1x64x128xf32>
    %24 = vector.shape_cast %23 : vector<1x64x128xf32> to vector<64x128xf32>
    %cst_9 = arith.constant 0.000000e+00 : f32
    %25 = vector.broadcast %cst_9 : f32 to vector<64x128xf32>
    %26 = arith.cmpf ogt, %24, %25 : vector<64x128xf32>
    %cst_10 = arith.constant 2.000000e-01 : f32
    %27 = vector.broadcast %cst_10 : f32 to vector<64x128xf32>
    %28 = arith.mulf %27, %24 : vector<64x128xf32>
    %29 = arith.select %26, %24, %28 : vector<64x128xi1>, vector<64x128xf32>
    %30 = arith.truncf %29 : vector<64x128xf32> to vector<64x128xbf16>
    %c0_11 = arith.constant 0 : index
    %c0_12 = arith.constant 0 : index
    %31 = vector.load %arg4[%c0_11, %c0_12] : memref<64x128xbf16, #tpu.memory_space<vmem>>, vector<64x128xbf16>
    tpu.vector_store %arg4[%c0_11, %c0_12], %30 {strides = array<i32>} : memref<64x128xbf16, #tpu.memory_space<vmem>>, vector<64x128xbf16>,
    return
  }
  func.func @transform_0(%arg0: i32, %arg1: i32) -> (i32, i32) {
    %c0_i32 = arith.constant 0 : i32
    %c0_i32_0 = arith.constant 0 : i32
    return %arg0, %c0_i32 : i32, i32
  }
  func.func @transform_1(%arg0: i32, %arg1: i32) -> (i32, i32) {
    %c0_i32 = arith.constant 0 : i32
    %c0_i32_0 = arith.constant 0 : i32
    return %c0_i32, %arg1 : i32, i32
  }
  func.func @transform_2(%arg0: i32, %arg1: i32) -> (i32, i32) {
    %c0_i32 = arith.constant 0 : i32
    return %arg0, %arg1 : i32, i32
  }
}

module attributes {stable_mosaic.version = 11 : i64} {
  func.func @_conv_block_kernel(%arg0: i32, %arg1: i32, %arg2: memref<16x2048xbf16, #tpu.memory_space<vmem>>, %arg3: memref<2048x128xbf16, #tpu.memory_space<vmem>>, %arg4: memref<16x128xbf16, #tpu.memory_space<vmem>>) attributes {dimension_semantics = [#tpu.dimension_semantics<parallel>, #tpu.dimension_semantics<parallel>], iteration_bounds = array<i64: 2, 2>, scalar_prefetch = 0 : i64, scratch_operands = 0 : i64, tpu.core_type = #tpu.core_type<tc>, window_params = [{transform_indices = @transform_0, window_bounds = array<i64: 16, 2048>}, {transform_indices = @transform_1, window_bounds = array<i64: 2048, 128>}, {transform_indices = @transform_2, window_bounds = array<i64: 16, 128>}]} {
    %c0 = arith.constant 0 : index
    %c0_0 = arith.constant 0 : index
    %0 = vector.load %arg2[%c0, %c0_0] : memref<16x2048xbf16, #tpu.memory_space<vmem>>, vector<16x2048xbf16>
    %c0_1 = arith.constant 0 : index
    %c0_2 = arith.constant 0 : index
    %1 = vector.load %arg3[%c0_1, %c0_2] : memref<2048x128xbf16, #tpu.memory_space<vmem>>, vector<2048x128xbf16>
    %cst = arith.constant dense<0.000000e+00> : vector<16x128xf32>
    %2 = tpu.matmul %0, %1, %cst {dimension_numbers = #tpu.dot_dimension_numbers<[1], [0], [0], [1], [0, 0, 1, 1], [], []>} : vector<16x2048xbf16>, vector<2048x128xbf16>, vector<16x128xf32> -> vector<16x128xf32>
    %3 = vector.shape_cast %2 : vector<16x128xf32> to vector<1x16x128xf32>
    %cst_3 = arith.constant dense<0.000000e+00> : vector<1x128xf32>
    %4 = vector.multi_reduction <add>, %3, %cst_3 [1] : vector<1x16x128xf32> to vector<1x128xf32>
    %5 = vector.shape_cast %4 : vector<1x128xf32> to vector<1x1x128xf32>
    %cst_4 = arith.constant 1.600000e+01 : f32
    %6 = vector.broadcast %cst_4 : f32 to vector<1x1x128xf32>
    %7 = arith.divf %5, %6 : vector<1x1x128xf32>
    %8 = arith.mulf %3, %3 : vector<1x16x128xf32>
    %cst_5 = arith.constant dense<0.000000e+00> : vector<1x128xf32>
    %9 = vector.multi_reduction <add>, %8, %cst_5 [1] : vector<1x16x128xf32> to vector<1x128xf32>
    %10 = vector.shape_cast %9 : vector<1x128xf32> to vector<1x1x128xf32>
    %cst_6 = arith.constant 1.600000e+01 : f32
    %11 = vector.broadcast %cst_6 : f32 to vector<1x1x128xf32>
    %12 = arith.divf %10, %11 : vector<1x1x128xf32>
    %13 = arith.mulf %7, %7 : vector<1x1x128xf32>
    %14 = arith.subf %12, %13 : vector<1x1x128xf32>
    %cst_7 = arith.constant 0.000000e+00 : f32
    %15 = vector.broadcast %cst_7 : f32 to vector<1x1x128xf32>
    %16 = arith.maximumf %14, %15 : vector<1x1x128xf32>
    %17 = vector.broadcast %7 : vector<1x1x128xf32> to vector<1x16x128xf32>
    %18 = arith.subf %3, %17 : vector<1x16x128xf32>
    %cst_8 = arith.constant 9.99999974E-6 : f32
    %19 = vector.broadcast %cst_8 : f32 to vector<1x1x128xf32>
    %20 = arith.addf %16, %19 : vector<1x1x128xf32>
    %21 = math.rsqrt %20 : vector<1x1x128xf32>
    %22 = vector.broadcast %21 : vector<1x1x128xf32> to vector<1x16x128xf32>
    %23 = arith.mulf %18, %22 : vector<1x16x128xf32>
    %24 = vector.shape_cast %23 : vector<1x16x128xf32> to vector<16x128xf32>
    %cst_9 = arith.constant 0.000000e+00 : f32
    %25 = vector.broadcast %cst_9 : f32 to vector<16x128xf32>
    %26 = arith.cmpf ogt, %24, %25 : vector<16x128xf32>
    %cst_10 = arith.constant 2.000000e-01 : f32
    %27 = vector.broadcast %cst_10 : f32 to vector<16x128xf32>
    %28 = arith.mulf %27, %24 : vector<16x128xf32>
    %29 = arith.select %26, %24, %28 : vector<16x128xi1>, vector<16x128xf32>
    %30 = arith.truncf %29 : vector<16x128xf32> to vector<16x128xbf16>
    %c0_11 = arith.constant 0 : index
    %c0_12 = arith.constant 0 : index
    %31 = vector.load %arg4[%c0_11, %c0_12] : memref<16x128xbf16, #tpu.memory_space<vmem>>, vector<16x128xbf16>
    tpu.vector_store %arg4[%c0_11, %c0_12], %30 {strides = array<i32>} : memref<16x128xbf16, #tpu.memory_space<vmem>>, vector<16x128xbf16>,
    return
  }
  func.func @transform_0(%arg0: i32, %arg1: i32) -> (i32, i32) {
    %c0_i32 = arith.constant 0 : i32
    %c0_i32_0 = arith.constant 0 : i32
    return %arg0, %c0_i32 : i32, i32
  }
  func.func @transform_1(%arg0: i32, %arg1: i32) -> (i32, i32) {
    %c0_i32 = arith.constant 0 : i32
    %c0_i32_0 = arith.constant 0 : i32
    return %c0_i32, %arg1 : i32, i32
  }
  func.func @transform_2(%arg0: i32, %arg1: i32) -> (i32, i32) {
    %c0_i32 = arith.constant 0 : i32
    return %arg0, %arg1 : i32, i32
  }
}

module attributes {stable_mosaic.version = 11 : i64} {
  func.func @_conv_block_kernel(%arg0: i32, %arg1: i32, %arg2: memref<8x4096xbf16, #tpu.memory_space<vmem>>, %arg3: memref<4096x256xbf16, #tpu.memory_space<vmem>>, %arg4: memref<8x256xbf16, #tpu.memory_space<vmem>>) attributes {dimension_semantics = [#tpu.dimension_semantics<parallel>, #tpu.dimension_semantics<parallel>], iteration_bounds = array<i64: 1, 2>, scalar_prefetch = 0 : i64, scratch_operands = 0 : i64, tpu.core_type = #tpu.core_type<tc>, window_params = [{transform_indices = @transform_0, window_bounds = array<i64: 8, 4096>}, {transform_indices = @transform_1, window_bounds = array<i64: 4096, 256>}, {transform_indices = @transform_2, window_bounds = array<i64: 8, 256>}]} {
    %c0 = arith.constant 0 : index
    %c0_0 = arith.constant 0 : index
    %0 = vector.load %arg2[%c0, %c0_0] : memref<8x4096xbf16, #tpu.memory_space<vmem>>, vector<8x4096xbf16>
    %c0_1 = arith.constant 0 : index
    %c0_2 = arith.constant 0 : index
    %1 = vector.load %arg3[%c0_1, %c0_2] : memref<4096x256xbf16, #tpu.memory_space<vmem>>, vector<4096x256xbf16>
    %cst = arith.constant dense<0.000000e+00> : vector<8x256xf32>
    %2 = tpu.matmul %0, %1, %cst {dimension_numbers = #tpu.dot_dimension_numbers<[1], [0], [0], [1], [0, 0, 1, 1], [], []>} : vector<8x4096xbf16>, vector<4096x256xbf16>, vector<8x256xf32> -> vector<8x256xf32>
    %3 = vector.shape_cast %2 : vector<8x256xf32> to vector<2x4x256xf32>
    %cst_3 = arith.constant dense<0.000000e+00> : vector<2x256xf32>
    %4 = vector.multi_reduction <add>, %3, %cst_3 [1] : vector<2x4x256xf32> to vector<2x256xf32>
    %5 = vector.shape_cast %4 : vector<2x256xf32> to vector<2x1x256xf32>
    %cst_4 = arith.constant 4.000000e+00 : f32
    %6 = vector.broadcast %cst_4 : f32 to vector<2x1x256xf32>
    %7 = arith.divf %5, %6 : vector<2x1x256xf32>
    %8 = arith.mulf %3, %3 : vector<2x4x256xf32>
    %cst_5 = arith.constant dense<0.000000e+00> : vector<2x256xf32>
    %9 = vector.multi_reduction <add>, %8, %cst_5 [1] : vector<2x4x256xf32> to vector<2x256xf32>
    %10 = vector.shape_cast %9 : vector<2x256xf32> to vector<2x1x256xf32>
    %cst_6 = arith.constant 4.000000e+00 : f32
    %11 = vector.broadcast %cst_6 : f32 to vector<2x1x256xf32>
    %12 = arith.divf %10, %11 : vector<2x1x256xf32>
    %13 = arith.mulf %7, %7 : vector<2x1x256xf32>
    %14 = arith.subf %12, %13 : vector<2x1x256xf32>
    %cst_7 = arith.constant 0.000000e+00 : f32
    %15 = vector.broadcast %cst_7 : f32 to vector<2x1x256xf32>
    %16 = arith.maximumf %14, %15 : vector<2x1x256xf32>
    %17 = vector.broadcast %7 : vector<2x1x256xf32> to vector<2x4x256xf32>
    %18 = arith.subf %3, %17 : vector<2x4x256xf32>
    %cst_8 = arith.constant 9.99999974E-6 : f32
    %19 = vector.broadcast %cst_8 : f32 to vector<2x1x256xf32>
    %20 = arith.addf %16, %19 : vector<2x1x256xf32>
    %21 = math.rsqrt %20 : vector<2x1x256xf32>
    %22 = vector.broadcast %21 : vector<2x1x256xf32> to vector<2x4x256xf32>
    %23 = arith.mulf %18, %22 : vector<2x4x256xf32>
    %24 = vector.shape_cast %23 : vector<2x4x256xf32> to vector<8x256xf32>
    %cst_9 = arith.constant 0.000000e+00 : f32
    %25 = vector.broadcast %cst_9 : f32 to vector<8x256xf32>
    %26 = arith.cmpf ogt, %24, %25 : vector<8x256xf32>
    %cst_10 = arith.constant 2.000000e-01 : f32
    %27 = vector.broadcast %cst_10 : f32 to vector<8x256xf32>
    %28 = arith.mulf %27, %24 : vector<8x256xf32>
    %29 = arith.select %26, %24, %28 : vector<8x256xi1>, vector<8x256xf32>
    %30 = arith.truncf %29 : vector<8x256xf32> to vector<8x256xbf16>
    %c0_11 = arith.constant 0 : index
    %c0_12 = arith.constant 0 : index
    %31 = vector.load %arg4[%c0_11, %c0_12] : memref<8x256xbf16, #tpu.memory_space<vmem>>, vector<8x256xbf16>
    tpu.vector_store %arg4[%c0_11, %c0_12], %30 {strides = array<i32>} : memref<8x256xbf16, #tpu.memory_space<vmem>>, vector<8x256xbf16>,
    return
  }
  func.func @transform_0(%arg0: i32, %arg1: i32) -> (i32, i32) {
    %c0_i32 = arith.constant 0 : i32
    %c0_i32_0 = arith.constant 0 : i32
    return %arg0, %c0_i32 : i32, i32
  }
  func.func @transform_1(%arg0: i32, %arg1: i32) -> (i32, i32) {
    %c0_i32 = arith.constant 0 : i32
    %c0_i32_0 = arith.constant 0 : i32
    return %c0_i32, %arg1 : i32, i32
  }
  func.func @transform_2(%arg0: i32, %arg1: i32) -> (i32, i32) {
    %c0_i32 = arith.constant 0 : i32
    return %arg0, %arg1 : i32, i32
  }
}

</mosaic_0001>

<bundles_post_ra>
// kernel: patch_discriminator_forward.4
= control target key start
LH: loop header
LB: loop body
LE: loop exit
PB: predicated region body
PF: predicated region fallthrough
CT: control target
= control target key end

     0   :  { %s1227_s12 = smov 0   ;;  %s1229_s13 = smov 0   ;;  %s1413_s0 = inlined_call_operand.vmem [shape: bf16[512,128], index: 0, kind: input, shape index: {}]   ;;  %s1414_s1 = inlined_call_operand.vmem [shape: bf16[128,64], index: 1, kind: input, shape index: {}]   ;;  %s1415_s2 = inlined_call_operand.vmem [shape: f32[1,64], index: 2, kind: input, shape index: {}]   ;;  %s1416_s3 = inlined_call_operand.vmem [shape: bf16[512,64], index: 3, kind: output, shape index: {}]  }
   0x1   :  { %s1231_s14 = smov 0  }
   0x2 LB: > { %s25_s15 = sadd.s32 1, %s1201_s13  ;;  %p951_p0 = scmp.ge.s32.totalorder %s1205_s14, 1  ;;  %s1205_s14 = sphi %s1231_s14, %s13_s14   ;;  %s1201_s13 = sphi %s1229_s13, %s1418_s13   ;;  %s1197_s12 = sphi %s1227_s12, %s1417_s12  }
   0x3   : > { %p27_p1 = scmp.ge.s32.totalorder %s25_s15, 2  ;;  %p169_p2 = scmp.lt.s32.totalorder %s1205_s14, 3 }
   0x5   : > { %s1420_s15 = smov (%p27_p1, %s25_s15), 0  ;;  %p170_p3 = pnand %p951_p0, %p169_p2 }
   0x6   : > { %v1159_v0 = vld [vmem:[%s1414_s1] sm:$0xff] (!%p170_p3)   ;;  %s952_s18 = sshll.u32 (!%p170_p3), %s1197_s12, 5  ;;  %v1160_v1 = vld [vmem:[%s1414_s1 + $0x8] sm:$0xff] (!%p170_p3)   ;;  %v1161_v2 = vld [vmem:[%s1414_s1 + $0x10] sm:$0xff] (!%p170_p3)   ;;  %vm810_vm0 = vcmask (!%p170_p3), 519168  }
   0x7   : > { %173 = sbr.rel (%p170_p3) target bundleno = 297 (0x129), region = 32  ;;  %p204_p4 = scmp.lt.s32.totalorder (!%p170_p3), %s952_s18, 63  ;;  %1071 = vmatprep.subr.bf16.mxu0 (!%p170_p3), %v1159_v0  ;;  %1119 = vmatprep.subr.bf16.mxu1 (!%p170_p3), %v1159_v0  ;;  %v1162_v3 = vld [vmem:[%s1414_s1 + $0x18] sm:$0xff] (!%p170_p3)   ;;  %v1163_v6 = vld [vmem:[%s1414_s1 + $0x20] sm:$0xff] (!%p170_p3)   ;;  %v1164_v7 = vld [vmem:[%s1414_s1 + $0x28] sm:$0xff] (!%p170_p3)  }
   0x8   : > { %1072 = vmatpush3.bf16.msra.mxu0 (!%p170_p3), %v1159_v0  ;;  %1127 = vmatpush3.bf16.msra.mxu1 (!%p170_p3), %v1159_v0  ;;  %v1165_v8 = vld [vmem:[%s1414_s1 + $0x30] sm:$0xff] (!%p170_p3)   ;;  %v1166_v9 = vld [vmem:[%s1414_s1 + $0x38] sm:$0xff] (!%p170_p3)   ;;  %v1298_v24 = vld [vmem:[%s1415_s2] ss:$0 sm:$0xff] (!%p170_p3) }
   0x9   : > { %1073 = vmatprep.subr.bf16.mxu0 (!%p170_p3), %v1160_v1  ;;  %1120 = vmatprep.subr.bf16.mxu1 (!%p170_p3), %v1160_v1 }
   0xc   : > { %1074 = vmatpush3.bf16.msra.mxu0 (!%p170_p3), %v1160_v1  ;;  %1128 = vmatpush3.bf16.msra.mxu1 (!%p170_p3), %v1160_v1 }
   0xd   : > { %1075 = vmatprep.subr.bf16.mxu0 (!%p170_p3), %v1161_v2  ;;  %1121 = vmatprep.subr.bf16.mxu1 (!%p170_p3), %v1161_v2 }
   0xe   : > { %s1422_s18 = smov (!%p204_p4, %s952_s18), 63 }
   0xf   : > { %s953_s23 = sshll.u32 %s1422_s18, 2 }
  0x10   : > { %s1262_s26 = scalar_lea.vmem %s1413_s0, %s953_s23  ;;  %1076 = vmatpush3.bf16.msra.mxu0 %v1161_v2  ;;  %1129 = vmatpush3.bf16.msra.mxu1 %v1161_v2  ;;  %s1309_s17 = scalar_lea.vmem %s1416_s3, %s953_s23 }
  0x11   : > { %v1167_v4 = vld [vmem:[%s1262_s26] sm:$0xff]   ;;  %1077 = vmatprep.subr.bf16.mxu0 %v1162_v3  ;;  %1122 = vmatprep.subr.bf16.mxu1 %v1162_v3  ;;  %v1169_v10 = vld [vmem:[%s1262_s26 + $0x8] sm:$0xff]   ;;  %v1171_v12 = vld [vmem:[%s1262_s26 + $0x10] sm:$0xff]  }
  0x12   : > { %v1168_v5 = vld [vmem:[%s1262_s26 + $0x40] sm:$0xff]   ;;  %1087 = vmatprep.mubr.bf16.mxu0 %v1167_v4  ;;  %v1170_v11 = vld [vmem:[%s1262_s26 + $0x48] sm:$0xff]   ;;  %v1172_v13 = vld [vmem:[%s1262_s26 + $0x50] sm:$0xff]  }
  0x13   : > { %1103 = vmatprep.mubr.bf16.mxu1 %v1168_v5  ;;  %v1173_v14 = vld [vmem:[%s1262_s26 + $0x18] sm:$0xff]   ;;  %v1175_v16 = vld [vmem:[%s1262_s26 + $0x20] sm:$0xff]   ;;  %v1177_v18 = vld [vmem:[%s1262_s26 + $0x28] sm:$0xff]  }
  0x14   : > { %1078 = vmatpush3.bf16.msra.mxu0 %v1162_v3  ;;  %1130 = vmatpush3.bf16.msra.mxu1 %v1162_v3  ;;  %v1174_v15 = vld [vmem:[%s1262_s26 + $0x58] sm:$0xff]   ;;  %v1176_v17 = vld [vmem:[%s1262_s26 + $0x60] sm:$0xff]   ;;  %v1178_v19 = vld [vmem:[%s1262_s26 + $0x68] sm:$0xff]  }
  0x15   : > { %1079 = vmatprep.subr.bf16.mxu0 %v1163_v6  ;;  %1123 = vmatprep.subr.bf16.mxu1 %v1163_v6  ;;  %v1179_v20 = vld [vmem:[%s1262_s26 + $0x30] sm:$0xff]   ;;  %v1181_v22 = vld [vmem:[%s1262_s26 + $0x38] sm:$0xff]  }
  0x16   : > { %v1180_v21 = vld [vmem:[%s1262_s26 + $0x70] sm:$0xff]   ;;  %v1182_v23 = vld [vmem:[%s1262_s26 + $0x78] sm:$0xff]  }
  0x18   : > { %1080 = vmatpush3.bf16.msra.mxu0 %v1163_v6  ;;  %1131 = vmatpush3.bf16.msra.mxu1 %v1163_v6 }
  0x19   : > { %1081 = vmatprep.subr.bf16.mxu0 %v1164_v7  ;;  %1124 = vmatprep.subr.bf16.mxu1 %v1164_v7 }
  0x1c   : > { %1082 = vmatpush3.bf16.msra.mxu0 %v1164_v7  ;;  %1132 = vmatpush3.bf16.msra.mxu1 %v1164_v7 }
  0x1d   : > { %1083 = vmatprep.subr.bf16.mxu0 %v1165_v8  ;;  %1125 = vmatprep.subr.bf16.mxu1 %v1165_v8 }
  0x20   : > { %1084 = vmatpush3.bf16.msra.mxu0 %v1165_v8  ;;  %1133 = vmatpush3.bf16.msra.mxu1 %v1165_v8 }
  0x21   : > { %1085 = vmatprep.subr.bf16.mxu0 %v1166_v9  ;;  %1126 = vmatprep.subr.bf16.mxu1 %v1166_v9 }
  0x24   : > { %1086 = vmatpush3.bf16.msra.mxu0 %v1166_v9  ;;  %1134 = vmatpush3.bf16.msra.mxu1 %v1166_v9 }
  0x27   : > { %1088 = vmatmul.mubr.bf16.vlgmr.msra.gmra.mrb[0].mxu0 %v1169_v10  ;;  %1104 = vmatmul.mubr.bf16.vlgmr.msra.gmra.mrb[0].mxu1 %v1170_v11 }
  0x28   : > { %1091 = vmatprep.mubr.bf16.mxu0 %v1171_v12  ;;  %1107 = vmatprep.mubr.bf16.mxu1 %v1172_v13 }
  0x2f   : > { %1092 = vmatmul.mubr.bf16.gmra.mrb[4].mxu0 %v1173_v14  ;;  %1108 = vmatmul.mubr.bf16.gmra.mrb[4].mxu1 %v1174_v15 }
  0x30   : > { %1095 = vmatprep.mubr.bf16.mxu0 %v1175_v16  ;;  %1111 = vmatprep.mubr.bf16.mxu1 %v1176_v17 }
  0x37   : > { %1096 = vmatmul.mubr.bf16.gmra.mrb[8].mxu0 %v1177_v18  ;;  %1112 = vmatmul.mubr.bf16.gmra.mrb[8].mxu1 %v1178_v19 }
  0x38   : > { %1099 = vmatprep.mubr.bf16.mxu0 %v1179_v20  ;;  %1115 = vmatprep.mubr.bf16.mxu1 %v1180_v21 }
  0x3f   : > { %1100 = vmatmul.mubr.bf16.gmra.mrb[12].mxu0 %v1181_v22  ;;  %1116 = vmatmul.mubr.bf16.gmra.mrb[12].mxu1 %v1182_v23 }
  0xfa   : > { %v1089_v25 = vpop.f32.mrb[0].mxu0  ;;  %v1105_v26 = vpop.f32.mrb[0].mxu1 }
  0xfb   : > { %v468_v27 = vadd.f32 %v1089_v25, %v1298_v24  ;;  %v532_v28 = vadd.f32 %v1105_v26, %v1298_v24  ;;  %v459_v29 = vpop.f32.mrb[1].mxu0  ;;  %v523_v30 = vpop.f32.mrb[1].mxu1 }
  0xfc   : > { %v460_v31 = vadd.f32 %v1298_v24, %v459_v29  ;;  %v524_v32 = vadd.f32 %v1298_v24, %v523_v30  ;;  %v1090_v33 = vpop.f32.mrb[2].mxu0  ;;  %v1106_v34 = vpop.f32.mrb[2].mxu1 }
  0xfd   : > { %vm588_vm1 = vcmp.gt.f32.partialorder %v468_v27, 0.0  ;;  %v620_v35 = vmul.f32 0.2, %v468_v27  ;;  %vm604_vm2 = vcmp.gt.f32.partialorder %v532_v28, 0.0  ;;  %v636_v36 = vmul.f32 0.2, %v532_v28 }
  0xfe   : > { %vm586_vm3 = vcmp.gt.f32.partialorder %v460_v31, 0.0  ;;  %v618_v37 = vmul.f32 0.2, %v460_v31  ;;  %vm602_vm4 = vcmp.gt.f32.partialorder %v524_v32, 0.0  ;;  %v634_v38 = vmul.f32 0.2, %v524_v32 }
  0xff   : > { %v652_v39 = vsel %vm588_vm1, %v468_v27, %v620_v35  ;;  %v668_v40 = vsel %vm604_vm2, %v532_v28, %v636_v36  ;;  %v471_v41 = vadd.f32 %v1090_v33, %v1298_v24  ;;  %v535_v42 = vadd.f32 %v1106_v34, %v1298_v24  ;;  %v462_v43 = vpop.f32.mrb[3].mxu0  ;;  %v526_v44 = vpop.f32.mrb[3].mxu1 }
 0x100   : > { %v1017_v45 = vpack.c.bf16 %v652_v39, %v652_v39  ;;  %v1033_v46 = vpack.c.bf16 %v668_v40, %v668_v40  ;;  %v650_v47 = vsel %vm586_vm3, %v460_v31, %v618_v37  ;;  %v666_v48 = vsel %vm602_vm4, %v524_v32, %v634_v38 }
 0x101   : > { %v1015_v49 = vpack.c.bf16 %v650_v47, %v650_v47  ;;  %v1031_v50 = vpack.c.bf16 %v666_v48, %v666_v48  ;;  %vm589_vm5 = vcmp.gt.f32.partialorder %v471_v41, 0.0  ;;  %v621_v51 = vmul.f32 0.2, %v471_v41 }
 0x102   : > { %813 = vst.msk [vmem:[%s1309_s17 + $0x8] sm:$0xf] %vm810_vm0, %v1017_v45  ;;  %829 = vst.msk [vmem:[%s1309_s17 + $0x48] sm:$0xf] %vm810_vm0, %v1033_v46  ;;  %vm605_vm6 = vcmp.gt.f32.partialorder %v535_v42, 0.0  ;;  %v463_v53 = vadd.f32 %v1298_v24, %v462_v43  ;;  %v527_v54 = vadd.f32 %v1298_v24, %v526_v44  ;;  %v1093_v55 = vpop.f32.mrb[4].mxu0 }
 0x103   : > { %v637_v52 = vmul.f32 0.2, %v535_v42  ;;  %v1109_v56 = vpop.f32.mrb[4].mxu1  ;;  %811 = vst.msk [vmem:[%s1309_s17] sm:$0xf] %vm810_vm0, %v1015_v49  ;;  %v653_v57 = vsel %vm589_vm5, %v471_v41, %v621_v51  ;;  %v484_v58 = vadd.f32 %v1093_v55, %v1298_v24  ;;  %v475_v60 = vpop.f32.mrb[5].mxu0 }
 0x104   : > { %827 = vst.msk [vmem:[%s1309_s17 + $0x40] sm:$0xf] %vm810_vm0, %v1031_v50  ;;  %v548_v59 = vadd.f32 %v1109_v56, %v1298_v24  ;;  %v539_v61 = vpop.f32.mrb[5].mxu1  ;;  %v1018_v62 = vpack.c.bf16 %v653_v57, %v653_v57  ;;  %vm587_vm7 = vcmp.gt.f32.partialorder %v463_v53, 0.0  ;;  %v619_v0 = vmul.f32 0.2, %v463_v53 }
 0x105   : > { %v669_v63 = vsel %vm605_vm6, %v535_v42, %v637_v52  ;;  %v1094_v1 = vpop.f32.mrb[6].mxu0  ;;  %v1110_v2 = vpop.f32.mrb[6].mxu1  ;;  %vm603_vm8 = vcmp.gt.f32.partialorder %v527_v54, 0.0  ;;  %v635_v4 = vmul.f32 0.2, %v527_v54  ;;  %vm592_vm9 = vcmp.gt.f32.partialorder %v484_v58, 0.0 }
 0x106   : > { %v1034_v3 = vpack.c.bf16 %v669_v63, %v669_v63  ;;  %v478_v5 = vpop.f32.mrb[7].mxu0  ;;  %v542_v6 = vpop.f32.mrb[7].mxu1  ;;  %814 = vst.msk [vmem:[%s1309_s17 + $0xc] sm:$0xf] %vm810_vm0, %v1018_v62  ;;  %v651_v7 = vsel %vm587_vm7, %v463_v53, %v619_v0  ;;  %v624_v8 = vmul.f32 0.2, %v484_v58  ;;  %v476_v12 = vadd.f32 %v1298_v24, %v475_v60 }
 0x107   : > { %vm608_vm10 = vcmp.gt.f32.partialorder %v548_v59, 0.0  ;;  %v640_v9 = vmul.f32 0.2, %v548_v59  ;;  %v1016_v10 = vpack.c.bf16 %v651_v7, %v651_v7  ;;  %v667_v11 = vsel %vm603_vm8, %v527_v54, %v635_v4 }
 0x108   : > { %830 = vst.msk [vmem:[%s1309_s17 + $0x4c] sm:$0xf] %vm810_vm0, %v1034_v3  ;;  %v540_v13 = vadd.f32 %v1298_v24, %v539_v61  ;;  %v1032_v14 = vpack.c.bf16 %v667_v11, %v667_v11  ;;  %v656_v15 = vsel %vm592_vm9, %v484_v58, %v624_v8  ;;  %v487_v17 = vadd.f32 %v1094_v1, %v1298_v24 }
 0x109   : > { %v672_v16 = vsel %vm608_vm10, %v548_v59, %v640_v9  ;;  %812 = vst.msk [vmem:[%s1309_s17 + $0x4] sm:$0xf] %vm810_vm0, %v1016_v10  ;;  %v1021_v18 = vpack.c.bf16 %v656_v15, %v656_v15  ;;  %vm590_vm11 = vcmp.gt.f32.partialorder %v476_v12, 0.0  ;;  %v622_v20 = vmul.f32 0.2, %v476_v12 }
 0x10a   : > { %v1037_v19 = vpack.c.bf16 %v672_v16, %v672_v16  ;;  %828 = vst.msk [vmem:[%s1309_s17 + $0x44] sm:$0xf] %vm810_vm0, %v1032_v14  ;;  %vm606_vm12 = vcmp.gt.f32.partialorder %v540_v13, 0.0  ;;  %v638_v21 = vmul.f32 0.2, %v540_v13  ;;  %vm593_vm13 = vcmp.gt.f32.partialorder %v487_v17, 0.0 }
 0x10b   : > { %v625_v22 = vmul.f32 0.2, %v487_v17  ;;  %817 = vst.msk [vmem:[%s1309_s17 + $0x18] sm:$0xf] %vm810_vm0, %v1021_v18  ;;  %v654_v23 = vsel %vm590_vm11, %v476_v12, %v622_v20  ;;  %v551_v25 = vadd.f32 %v1110_v2, %v1298_v24  ;;  %v479_v26 = vadd.f32 %v1298_v24, %v478_v5  ;;  %v1097_v28 = vpop.f32.mrb[8].mxu0  ;;  %v1113_v29 = vpop.f32.mrb[8].mxu1 }
 0x10c   : > { %833 = vst.msk [vmem:[%s1309_s17 + $0x58] sm:$0xf] %vm810_vm0, %v1037_v19  ;;  %v543_v27 = vadd.f32 %v1298_v24, %v542_v6  ;;  %v1019_v30 = vpack.c.bf16 %v654_v23, %v654_v23  ;;  %v670_v31 = vsel %vm606_vm12, %v540_v13, %v638_v21  ;;  %v500_v33 = vadd.f32 %v1097_v28, %v1298_v24  ;;  %v491_v34 = vpop.f32.mrb[9].mxu0  ;;  %v555_v35 = vpop.f32.mrb[9].mxu1 }
 0x10d   : > { %v657_v32 = vsel %vm593_vm13, %v487_v17, %v625_v22  ;;  %v1035_v36 = vpack.c.bf16 %v670_v31, %v670_v31  ;;  %vm609_vm14 = vcmp.gt.f32.partialorder %v551_v25, 0.0  ;;  %v641_v38 = vmul.f32 0.2, %v551_v25  ;;  %v1098_v39 = vpop.f32.mrb[10].mxu0  ;;  %v1114_v40 = vpop.f32.mrb[10].mxu1 }
 0x10e   : > { %v1022_v37 = vpack.c.bf16 %v657_v32, %v657_v32  ;;  %815 = vst.msk [vmem:[%s1309_s17 + $0x10] sm:$0xf] %vm810_vm0, %v1019_v30  ;;  %vm591_vm15 = vcmp.gt.f32.partialorder %v479_v26, 0.0  ;;  %v623_v41 = vmul.f32 0.2, %v479_v26  ;;  %vm607_vm1 = vcmp.gt.f32.partialorder %v543_v27, 0.0 }
 0x10f   : > { %v639_v42 = vmul.f32 0.2, %v543_v27  ;;  %831 = vst.msk [vmem:[%s1309_s17 + $0x50] sm:$0xf] %vm810_vm0, %v1035_v36  ;;  %v673_v43 = vsel %vm609_vm14, %v551_v25, %v641_v38  ;;  %vm596_vm2 = vcmp.gt.f32.partialorder %v500_v33, 0.0  ;;  %v564_v45 = vadd.f32 %v1113_v29, %v1298_v24  ;;  %v494_v46 = vpop.f32.mrb[11].mxu0 }
 0x110   : > { %818 = vst.msk [vmem:[%s1309_s17 + $0x1c] sm:$0xf] %vm810_vm0, %v1022_v37  ;;  %v628_v44 = vmul.f32 0.2, %v500_v33  ;;  %v558_v47 = vpop.f32.mrb[11].mxu1  ;;  %v1038_v48 = vpack.c.bf16 %v673_v43, %v673_v43  ;;  %v655_v49 = vsel %vm591_vm15, %v479_v26, %v623_v41  ;;  %v492_v51 = vadd.f32 %v1298_v24, %v491_v34 }
 0x111   : > { %v671_v50 = vsel %vm607_vm1, %v543_v27, %v639_v42  ;;  %v1020_v52 = vpack.c.bf16 %v655_v49, %v655_v49  ;;  %vm612_vm3 = vcmp.gt.f32.partialorder %v564_v45, 0.0  ;;  %v644_v56 = vmul.f32 0.2, %v564_v45 }
 0x112   : > { %v1036_v53 = vpack.c.bf16 %v671_v50, %v671_v50  ;;  %v660_v54 = vsel %vm596_vm2, %v500_v33, %v628_v44  ;;  %834 = vst.msk [vmem:[%s1309_s17 + $0x5c] sm:$0xf] %vm810_vm0, %v1038_v48  ;;  %vm594_vm4 = vcmp.gt.f32.partialorder %v492_v51, 0.0  ;;  %v626_v57 = vmul.f32 0.2, %v492_v51  ;;  %v1101_v58 = vpop.f32.mrb[12].mxu0 }
 0x113   : > { %v1025_v55 = vpack.c.bf16 %v660_v54, %v660_v54  ;;  %816 = vst.msk [vmem:[%s1309_s17 + $0x14] sm:$0xf] %vm810_vm0, %v1020_v52  ;;  %v556_v59 = vadd.f32 %v1298_v24, %v555_v35  ;;  %v503_v60 = vadd.f32 %v1098_v39, %v1298_v24  ;;  %v567_v61 = vadd.f32 %v1114_v40, %v1298_v24  ;;  %v1117_v63 = vpop.f32.mrb[12].mxu1  ;;  %v507_v0 = vpop.f32.mrb[13].mxu0 }
 0x114   : > { %832 = vst.msk [vmem:[%s1309_s17 + $0x54] sm:$0xf] %vm810_vm0, %v1036_v53  ;;  %v495_v62 = vadd.f32 %v1298_v24, %v494_v46  ;;  %v676_v1 = vsel %vm612_vm3, %v564_v45, %v644_v56  ;;  %v658_v2 = vsel %vm594_vm4, %v492_v51, %v626_v57  ;;  %v559_v3 = vadd.f32 %v1298_v24, %v558_v47  ;;  %v571_v5 = vpop.f32.mrb[13].mxu1  ;;  %v1102_v6 = vpop.f32.mrb[14].mxu0 }
 0x115   : > { %821 = vst.msk [vmem:[%s1309_s17 + $0x28] sm:$0xf] %vm810_vm0, %v1025_v55  ;;  %v516_v4 = vadd.f32 %v1101_v58, %v1298_v24  ;;  %v1041_v7 = vpack.c.bf16 %v676_v1, %v676_v1  ;;  %v1023_v8 = vpack.c.bf16 %v658_v2, %v658_v2  ;;  %vm610_vm5 = vcmp.gt.f32.partialorder %v556_v59, 0.0  ;;  %v1118_v10 = vpop.f32.mrb[14].mxu1  ;;  %v510_v11 = vpop.f32.mrb[15].mxu0 }
 0x116   : > { %v642_v9 = vmul.f32 0.2, %v556_v59  ;;  %vm597_vm6 = vcmp.gt.f32.partialorder %v503_v60, 0.0  ;;  %v629_v12 = vmul.f32 0.2, %v503_v60  ;;  %vm613_vm7 = vcmp.gt.f32.partialorder %v567_v61, 0.0 }
 0x117   : > { %v645_v13 = vmul.f32 0.2, %v567_v61  ;;  %837 = vst.msk [vmem:[%s1309_s17 + $0x68] sm:$0xf] %vm810_vm0, %v1041_v7  ;;  %819 = vst.msk [vmem:[%s1309_s17 + $0x20] sm:$0xf] %vm810_vm0, %v1023_v8  ;;  %v580_v28 = vadd.f32 %v1117_v63, %v1298_v24  ;;  %v508_v30 = vadd.f32 %v1298_v24, %v507_v0  ;;  %v572_v31 = vadd.f32 %v1298_v24, %v571_v5 }
 0x118   : > { %v674_v14 = vsel %vm610_vm5, %v556_v59, %v642_v9  ;;  %vm595_vm8 = vcmp.gt.f32.partialorder %v495_v62, 0.0  ;;  %v627_v15 = vmul.f32 0.2, %v495_v62  ;;  %vm611_vm9 = vcmp.gt.f32.partialorder %v559_v3, 0.0  ;;  %v574_v16 = vpop.f32.mrb[15].mxu1 }
 0x119   : > { %v1039_v17 = vpack.c.bf16 %v674_v14, %v674_v14  ;;  %v661_v18 = vsel %vm597_vm6, %v503_v60, %v629_v12  ;;  %v677_v19 = vsel %vm613_vm7, %v567_v61, %v645_v13  ;;  %v643_v20 = vmul.f32 0.2, %v559_v3 }
 0x11a   : > { %v1026_v21 = vpack.c.bf16 %v661_v18, %v661_v18  ;;  %v1042_v22 = vpack.c.bf16 %v677_v19, %v677_v19  ;;  %v659_v23 = vsel %vm595_vm8, %v495_v62, %v627_v15  ;;  %vm600_vm10 = vcmp.gt.f32.partialorder %v516_v4, 0.0 }
 0x11b   : > { %835 = vst.msk [vmem:[%s1309_s17 + $0x60] sm:$0xf] %vm810_vm0, %v1039_v17  ;;  %v1024_v25 = vpack.c.bf16 %v659_v23, %v659_v23  ;;  %v675_v26 = vsel %vm611_vm9, %v559_v3, %v643_v20  ;;  %v632_v27 = vmul.f32 0.2, %v516_v4  ;;  %v519_v32 = vadd.f32 %v1102_v6, %v1298_v24 }
 0x11c   : > { %822 = vst.msk [vmem:[%s1309_s17 + $0x2c] sm:$0xf] %vm810_vm0, %v1026_v21  ;;  %838 = vst.msk [vmem:[%s1309_s17 + $0x6c] sm:$0xf] %vm810_vm0, %v1042_v22  ;;  %v1040_v29 = vpack.c.bf16 %v675_v26, %v675_v26  ;;  %vm616_vm11 = vcmp.gt.f32.partialorder %v580_v28, 0.0  ;;  %v583_v35 = vadd.f32 %v1118_v10, %v1298_v24  ;;  %vm598_vm12 = vcmp.gt.f32.partialorder %v508_v30, 0.0 }
 0x11d   : > { %820 = vst.msk [vmem:[%s1309_s17 + $0x24] sm:$0xf] %vm810_vm0, %v1024_v25  ;;  %v664_v33 = vsel %vm600_vm10, %v516_v4, %v632_v27  ;;  %v648_v34 = vmul.f32 0.2, %v580_v28  ;;  %v630_v37 = vmul.f32 0.2, %v508_v30  ;;  %v511_v47 = vadd.f32 %v1298_v24, %v510_v11 }
 0x11e   : > { %836 = vst.msk [vmem:[%s1309_s17 + $0x64] sm:$0xf] %vm810_vm0, %v1040_v29  ;;  %v1029_v36 = vpack.c.bf16 %v664_v33, %v664_v33  ;;  %vm614_vm13 = vcmp.gt.f32.partialorder %v572_v31, 0.0  ;;  %v646_v39 = vmul.f32 0.2, %v572_v31  ;;  %vm601_vm14 = vcmp.gt.f32.partialorder %v519_v32, 0.0 }
 0x11f   : > { %v680_v38 = vsel %vm616_vm11, %v580_v28, %v648_v34  ;;  %v633_v40 = vmul.f32 0.2, %v519_v32  ;;  %v662_v42 = vsel %vm598_vm12, %v508_v30, %v630_v37  ;;  %vm617_vm15 = vcmp.gt.f32.partialorder %v583_v35, 0.0 }
 0x120   : > { %825 = vst.msk [vmem:[%s1309_s17 + $0x38] sm:$0xf] %vm810_vm0, %v1029_v36  ;;  %v1045_v41 = vpack.c.bf16 %v680_v38, %v680_v38  ;;  %v649_v43 = vmul.f32 0.2, %v583_v35  ;;  %v1027_v44 = vpack.c.bf16 %v662_v42, %v662_v42  ;;  %v678_v45 = vsel %vm614_vm13, %v572_v31, %v646_v39 }
 0x121   : > { %v665_v46 = vsel %vm601_vm14, %v519_v32, %v633_v40  ;;  %v1043_v48 = vpack.c.bf16 %v678_v45, %v678_v45  ;;  %v575_v51 = vadd.f32 %v1298_v24, %v574_v16  ;;  %vm599_vm1 = vcmp.gt.f32.partialorder %v511_v47, 0.0 }
 0x122   : > { %841 = vst.msk [vmem:[%s1309_s17 + $0x78] sm:$0xf] %vm810_vm0, %v1045_v41  ;;  %v1030_v49 = vpack.c.bf16 %v665_v46, %v665_v46  ;;  %v681_v50 = vsel %vm617_vm15, %v583_v35, %v649_v43  ;;  %823 = vst.msk [vmem:[%s1309_s17 + $0x30] sm:$0xf] %vm810_vm0, %v1027_v44  ;;  %v631_v53 = vmul.f32 0.2, %v511_v47 }
 0x123   : > { %v1046_v52 = vpack.c.bf16 %v681_v50, %v681_v50  ;;  %839 = vst.msk [vmem:[%s1309_s17 + $0x70] sm:$0xf] %vm810_vm0, %v1043_v48  ;;  %vm615_vm2 = vcmp.gt.f32.partialorder %v575_v51, 0.0  ;;  %v647_v54 = vmul.f32 0.2, %v575_v51 }
 0x124   : > { %826 = vst.msk [vmem:[%s1309_s17 + $0x3c] sm:$0xf] %vm810_vm0, %v1030_v49  ;;  %v663_v55 = vsel %vm599_vm1, %v511_v47, %v631_v53 }
 0x125   : > { %842 = vst.msk [vmem:[%s1309_s17 + $0x7c] sm:$0xf] %vm810_vm0, %v1046_v52  ;;  %v1028_v56 = vpack.c.bf16 %v663_v55, %v663_v55  ;;  %v679_v57 = vsel %vm615_vm2, %v575_v51, %v647_v54 }
 0x126   : > { %v1044_v58 = vpack.c.bf16 %v679_v57, %v679_v57 }
 0x127   : > { %824 = vst.msk [vmem:[%s1309_s17 + $0x34] sm:$0xf] %vm810_vm0, %v1028_v56 }
 0x128   : > { %840 = vst.msk [vmem:[%s1309_s17 + $0x74] sm:$0xf] %vm810_vm0, %v1044_v58 }
 0x129 PF: > { %s13_s14 = sadd.s32 1, %s1205_s14   ;;  %s1417_s12 = smov %s1201_s13 }
 0x12a   : > { %p10_p5 = scmp.ge.s32.totalorder %s13_s14, 4   ;;  %s1418_s13 = smov %s1420_s15 }
 0x12c   :  { %12 = sbr.rel (!%p10_p5) target bundleno = 2 (0x2), region = 68 }

// kernel: patch_discriminator_forward.5
= control target key start
LH: loop header
LB: loop body
LE: loop exit
PB: predicated region body
PF: predicated region fallthrough
CT: control target
= control target key end

     0   :  { %s1802_s9 = smov 0   ;;  %s1804_s10 = smov 0   ;;  %s2121_s0 = inlined_call_operand.vmem [shape: bf16[128,1024], index: 0, kind: input, shape index: {}]   ;;  %s2122_s1 = inlined_call_operand.vmem [shape: bf16[1024,128], index: 1, kind: input, shape index: {}]   ;;  %s2123_s2 = inlined_call_operand.vmem [shape: bf16[128,128], index: 2, kind: output, shape index: {}]  }
   0x1   :  { %s1806_s11 = smov 0  }
   0x2 LB: > { %s24_s12 = sadd.s32 1, %s1781_s10  ;;  %p1369_p0 = scmp.ge.s32.totalorder %s1785_s11, 1  ;;  %s1785_s11 = sphi %s1806_s11, %s12_s11   ;;  %s1781_s10 = sphi %s1804_s10, %s2125_s10   ;;  %s1777_s9 = sphi %s1802_s9, %s2124_s9  }
   0x3   : > { %p26_p1 = scmp.ge.s32.totalorder %s24_s12, 2  ;;  %p137_p2 = scmp.lt.s32.totalorder %s1785_s11, 3 }
   0x5   : > { %s2127_s12 = smov (%p26_p1, %s24_s12), 0  ;;  %p138_p3 = pnand %p1369_p0, %p137_p2 }
   0x6   : > { %v1697_v0 = vld [vmem:[%s2122_s1 + $0x40] sm:$0xff] (!%p138_p3)   ;;  %v1701_v4 = vld [vmem:[%s2122_s1 + $0x48] sm:$0xff] (!%p138_p3)   ;;  %v1705_v8 = vld [vmem:[%s2122_s1 + $0x50] sm:$0xff] (!%p138_p3)   ;;  %s1370_s21 = sshll.u32 (!%p138_p3), %s1777_s9, 3 }
   0x7   : > { %141 = sbr.rel (%p138_p3) target bundleno = 364 (0x16c), region = 28  ;;  %v1698_v1 = vld [vmem:[%s2122_s1 + $0xc0] sm:$0xff] (!%p138_p3)   ;;  %1513 = vmatprep.subr.bf16.mxu0 (!%p138_p3), %v1697_v0  ;;  %v1702_v5 = vld [vmem:[%s2122_s1 + $0xc8] sm:$0xff] (!%p138_p3)   ;;  %v1706_v9 = vld [vmem:[%s2122_s1 + $0xd0] sm:$0xff] (!%p138_p3)   ;;  %p168_p4 = scmp.lt.s32.totalorder (!%p138_p3), %s1370_s21, 15 }
   0x8   : > { %v1699_v2 = vld [vmem:[%s2122_s1] sm:$0xff] (!%p138_p3)   ;;  %1553 = vmatprep.subr.bf16.mxu1 (!%p138_p3), %v1698_v1  ;;  %v1703_v6 = vld [vmem:[%s2122_s1 + $0x8] sm:$0xff] (!%p138_p3)   ;;  %v1707_v10 = vld [vmem:[%s2122_s1 + $0x10] sm:$0xff] (!%p138_p3)  }
   0x9   : > { %v1700_v3 = vld [vmem:[%s2122_s1 + $0x80] sm:$0xff] (!%p138_p3)   ;;  %1514 = vmatpush3.bf16.msra.mxu0 (!%p138_p3), %v1699_v2  ;;  %v1704_v7 = vld [vmem:[%s2122_s1 + $0x88] sm:$0xff] (!%p138_p3)   ;;  %v1708_v11 = vld [vmem:[%s2122_s1 + $0x90] sm:$0xff] (!%p138_p3)  }
   0xa   : > { %1554 = vmatpush3.bf16.msra.mxu1 (!%p138_p3), %v1700_v3  ;;  %1515 = vmatprep.subr.bf16.mxu0 (!%p138_p3), %v1701_v4  ;;  %v1709_v12 = vld [vmem:[%s2122_s1 + $0x58] sm:$0xff] (!%p138_p3)   ;;  %v1713_v16 = vld [vmem:[%s2122_s1 + $0x60] sm:$0xff] (!%p138_p3)   ;;  %v1717_v20 = vld [vmem:[%s2122_s1 + $0x68] sm:$0xff] (!%p138_p3)  }
   0xb   : > { %1555 = vmatprep.subr.bf16.mxu1 (!%p138_p3), %v1702_v5  ;;  %v1710_v13 = vld [vmem:[%s2122_s1 + $0xd8] sm:$0xff] (!%p138_p3)   ;;  %v1714_v17 = vld [vmem:[%s2122_s1 + $0xe0] sm:$0xff] (!%p138_p3)   ;;  %v1718_v21 = vld [vmem:[%s2122_s1 + $0xe8] sm:$0xff] (!%p138_p3)  }
   0xc   : > { %v1711_v14 = vld [vmem:[%s2122_s1 + $0x18] sm:$0xff] (!%p138_p3)   ;;  %v1715_v18 = vld [vmem:[%s2122_s1 + $0x20] sm:$0xff] (!%p138_p3)   ;;  %v1719_v22 = vld [vmem:[%s2122_s1 + $0x28] sm:$0xff] (!%p138_p3)  }
   0xd   : > { %1516 = vmatpush3.bf16.msra.mxu0 (!%p138_p3), %v1703_v6  ;;  %v1712_v15 = vld [vmem:[%s2122_s1 + $0x98] sm:$0xff] (!%p138_p3)   ;;  %v1716_v19 = vld [vmem:[%s2122_s1 + $0xa0] sm:$0xff] (!%p138_p3)   ;;  %v1720_v23 = vld [vmem:[%s2122_s1 + $0xa8] sm:$0xff] (!%p138_p3)  }
   0xe   : > { %1556 = vmatpush3.bf16.msra.mxu1 %v1704_v7  ;;  %1517 = vmatprep.subr.bf16.mxu0 %v1705_v8  ;;  %s2129_s21 = smov (!%p168_p4, %s1370_s21), 15  ;;  %v1721_v24 = vld [vmem:[%s2122_s1 + $0x70] sm:$0xff]   ;;  %v1725_v28 = vld [vmem:[%s2122_s1 + $0x78] sm:$0xff]   ;;  %v1729_v40 = vld [vmem:[%s2122_s1 + $0x140] sm:$0xff]  }
   0xf   : > { %1557 = vmatprep.subr.bf16.mxu1 %v1706_v9  ;;  %v1722_v25 = vld [vmem:[%s2122_s1 + $0xf0] sm:$0xff]   ;;  %s1481_s19 = sshll.u32 %s2129_s21, 5  ;;  %v1726_v29 = vld [vmem:[%s2122_s1 + $0xf8] sm:$0xff]   ;;  %v1730_v41 = vld [vmem:[%s2122_s1 + $0x1c0] sm:$0xff]  }
  0x10   : > { %v1723_v26 = vld [vmem:[%s2122_s1 + $0x30] sm:$0xff]   ;;  %s1919_s29 = scalar_lea.vmem %s2121_s0, %s1481_s19  ;;  %v1727_v30 = vld [vmem:[%s2122_s1 + $0x38] sm:$0xff]   ;;  %v1731_v42 = vld [vmem:[%s2122_s1 + $0x100] sm:$0xff]  }
  0x11   : > { %1518 = vmatpush3.bf16.msra.mxu0 %v1707_v10  ;;  %v1724_v27 = vld [vmem:[%s2122_s1 + $0xb0] sm:$0xff]   ;;  %v1728_v31 = vld [vmem:[%s2122_s1 + $0xb8] sm:$0xff]   ;;  %v188_v32 = vld [vmem:[%s1919_s29] sm:$0xff] }
  0x12   : > { %1558 = vmatpush3.bf16.msra.mxu1 %v1708_v11  ;;  %1519 = vmatprep.subr.bf16.mxu0 %v1709_v12  ;;  %v192_v33 = vld [vmem:[%s1919_s29 + $0x20] sm:$0xff]  ;;  %v189_v34 = vld [vmem:[%s1919_s29 + $0x8] sm:$0xff]  ;;  %v1737_v56 = vld [vmem:[%s2122_s1 + $0x150] sm:$0xff]  }
  0x13   : > { %1559 = vmatprep.subr.bf16.mxu1 %v1710_v13  ;;  %v1375_v35 = vcombine.low %v188_v32, %v192_v33  ;;  %v1376_v36 = vcombine.high %v188_v32, %v192_v33  ;;  %v193_v37 = vld [vmem:[%s1919_s29 + $0x28] sm:$0xff]  ;;  %v1732_v43 = vld [vmem:[%s2122_s1 + $0x180] sm:$0xff]   ;;  %v1738_v57 = vld [vmem:[%s2122_s1 + $0x1d0] sm:$0xff]  }
  0x14   : > { %v1377_v38 = vcombine.low %v189_v34, %v193_v37  ;;  %v1378_v39 = vcombine.high %v189_v34, %v193_v37  ;;  %v1733_v44 = vld [vmem:[%s2122_s1 + $0x148] sm:$0xff]   ;;  %v196_v48 = vld [vmem:[%s1919_s29 + $0x40] sm:$0xff]  ;;  %v1739_v58 = vld [vmem:[%s2122_s1 + $0x110] sm:$0xff]  }
  0x15   : > { %1520 = vmatpush3.bf16.msra.mxu0 %v1711_v14  ;;  %924 = vmatprep.mubr.bf16.mxu0 %v1376_v36  ;;  %v1734_v45 = vld [vmem:[%s2122_s1 + $0x1c8] sm:$0xff]   ;;  %v200_v49 = vld [vmem:[%s1919_s29 + $0x60] sm:$0xff]  ;;  %v1740_v59 = vld [vmem:[%s2122_s1 + $0x190] sm:$0xff]  }
  0x16   : > { %1560 = vmatpush3.bf16.msra.mxu1 %v1712_v15  ;;  %1521 = vmatprep.subr.bf16.mxu0 %v1713_v16  ;;  %v1735_v46 = vld [vmem:[%s2122_s1 + $0x108] sm:$0xff]   ;;  %v1384_v50 = vcombine.high %v196_v48, %v200_v49  ;;  %v1383_v53 = vcombine.low %v196_v48, %v200_v49  ;;  %v1741_v60 = vld [vmem:[%s2122_s1 + $0x158] sm:$0xff]   ;;  %v204_v0 = vld [vmem:[%s1919_s29 + $0x80] sm:$0xff] }
  0x17   : > { %1561 = vmatprep.subr.bf16.mxu1 %v1714_v17  ;;  %989 = vmatprep.mubr.bf16.mxu1 %v1378_v39  ;;  %v1736_v47 = vld [vmem:[%s2122_s1 + $0x188] sm:$0xff]   ;;  %v1742_v61 = vld [vmem:[%s2122_s1 + $0x1d8] sm:$0xff]   ;;  %v208_v1 = vld [vmem:[%s1919_s29 + $0xa0] sm:$0xff] }
  0x18   : > { %v197_v51 = vld [vmem:[%s1919_s29 + $0x48] sm:$0xff]  ;;  %v1743_v62 = vld [vmem:[%s2122_s1 + $0x118] sm:$0xff]   ;;  %v1392_v4 = vcombine.high %v204_v0, %v208_v1  ;;  %v1391_v6 = vcombine.low %v204_v0, %v208_v1  ;;  %v1745_v8 = vld [vmem:[%s2122_s1 + $0x160] sm:$0xff]  }
  0x19   : > { %1522 = vmatpush3.bf16.msra.mxu0 %v1715_v18  ;;  %v201_v52 = vld [vmem:[%s1919_s29 + $0x68] sm:$0xff]  ;;  %v1744_v63 = vld [vmem:[%s2122_s1 + $0x198] sm:$0xff]   ;;  %v1746_v9 = vld [vmem:[%s2122_s1 + $0x1e0] sm:$0xff]  }
  0x1a   : > { %1562 = vmatpush3.bf16.msra.mxu1 %v1716_v19  ;;  %1523 = vmatprep.subr.bf16.mxu0 %v1717_v20  ;;  %v1386_v54 = vcombine.high %v197_v51, %v201_v52  ;;  %v1385_v55 = vcombine.low %v197_v51, %v201_v52  ;;  %v205_v2 = vld [vmem:[%s1919_s29 + $0x88] sm:$0xff]  ;;  %v1747_v10 = vld [vmem:[%s2122_s1 + $0x120] sm:$0xff]   ;;  %v190_v32 = vld [vmem:[%s1919_s29 + $0x10] sm:$0xff] }
  0x1b   : > { %1563 = vmatprep.subr.bf16.mxu1 %v1718_v21  ;;  %v209_v3 = vld [vmem:[%s1919_s29 + $0xa8] sm:$0xff]  ;;  %v1748_v11 = vld [vmem:[%s2122_s1 + $0x1a0] sm:$0xff]   ;;  %v194_v33 = vld [vmem:[%s1919_s29 + $0x30] sm:$0xff] }
  0x1c   : > { %v1394_v5 = vcombine.high %v205_v2, %v209_v3  ;;  %v1393_v7 = vcombine.low %v205_v2, %v209_v3  ;;  %v1749_v12 = vld [vmem:[%s2122_s1 + $0x168] sm:$0xff]   ;;  %v212_v16 = vld [vmem:[%s1919_s29 + $0xc0] sm:$0xff]  ;;  %v1379_v34 = vcombine.low %v190_v32, %v194_v33  ;;  %v191_v36 = vld [vmem:[%s1919_s29 + $0x18] sm:$0xff] }
  0x1d   : > { %1524 = vmatpush3.bf16.msra.mxu0 %v1719_v22  ;;  %v1750_v13 = vld [vmem:[%s2122_s1 + $0x1e8] sm:$0xff]   ;;  %v216_v17 = vld [vmem:[%s1919_s29 + $0xe0] sm:$0xff]  ;;  %v195_v37 = vld [vmem:[%s1919_s29 + $0x38] sm:$0xff] }
  0x1e   : > { %1564 = vmatpush3.bf16.msra.mxu1 %v1720_v23  ;;  %1525 = vmatprep.subr.bf16.mxu0 %v1721_v24  ;;  %v1751_v14 = vld [vmem:[%s2122_s1 + $0x128] sm:$0xff]   ;;  %v1400_v19 = vcombine.high %v212_v16, %v216_v17  ;;  %v1399_v21 = vcombine.low %v212_v16, %v216_v17  ;;  %v1753_v24 = vld [vmem:[%s2122_s1 + $0x170] sm:$0xff]   ;;  %v1381_v39 = vcombine.low %v191_v36, %v195_v37  ;;  %v207_v48 = vld [vmem:[%s1919_s29 + $0x98] sm:$0xff] }
  0x1f   : > { %1565 = vmatprep.subr.bf16.mxu1 %v1722_v25  ;;  %v1752_v15 = vld [vmem:[%s2122_s1 + $0x1a8] sm:$0xff]   ;;  %v1754_v25 = vld [vmem:[%s2122_s1 + $0x1f0] sm:$0xff]   ;;  %v211_v49 = vld [vmem:[%s1919_s29 + $0xb8] sm:$0xff] }
  0x20   : > { %v213_v18 = vld [vmem:[%s1919_s29 + $0xc8] sm:$0xff] }
  0x21   : > { %1526 = vmatpush3.bf16.msra.mxu0 %v1723_v26  ;;  %v217_v20 = vld [vmem:[%s1919_s29 + $0xe8] sm:$0xff]  ;;  %v1755_v26 = vld [vmem:[%s2122_s1 + $0x130] sm:$0xff]  }
  0x22   : > { %1566 = vmatpush3.bf16.msra.mxu1 %v1724_v27  ;;  %1527 = vmatprep.subr.bf16.mxu0 %v1725_v28  ;;  %v1402_v22 = vcombine.high %v213_v18, %v217_v20  ;;  %v1401_v23 = vcombine.low %v213_v18, %v217_v20  ;;  %v1756_v27 = vld [vmem:[%s2122_s1 + $0x1b0] sm:$0xff]   ;;  %v1757_v28 = vld [vmem:[%s2122_s1 + $0x178] sm:$0xff]  }
  0x23   : > { %1567 = vmatprep.subr.bf16.mxu1 %v1726_v29  ;;  %v1758_v29 = vld [vmem:[%s2122_s1 + $0x1f8] sm:$0xff]  }
  0x25   : > { %1528 = vmatpush3.bf16.msra.mxu0 %v1727_v30  ;;  %v1759_v30 = vld [vmem:[%s2122_s1 + $0x138] sm:$0xff]  }
  0x26   : > { %1568 = vmatpush3.bf16.msra.mxu1 %v1728_v31  ;;  %1593 = vmatprep.subr.bf16.mxu0 %v1729_v40  ;;  %v1760_v31 = vld [vmem:[%s2122_s1 + $0x1b8] sm:$0xff]   ;;  %v1382_v40 = vcombine.high %v191_v36, %v195_v37 }
  0x27   : > { %1633 = vmatprep.subr.bf16.mxu1 %v1730_v41  ;;  %v202_v41 = vld [vmem:[%s1919_s29 + $0x70] sm:$0xff] }
  0x28   : > { %925 = vmatmul.mubr.bf16.vlgmr.msra.gmra.mrb[0].mxu0 %v1375_v35  ;;  %v1380_v35 = vcombine.high %v190_v32, %v194_v33 }
  0x29   : > { %990 = vmatmul.mubr.bf16.vlgmr.msra.gmra.mrb[0].mxu1 %v1377_v38  ;;  %1594 = vmatpush3.bf16.msra.mxu0 %v1731_v42  ;;  %v198_v38 = vld [vmem:[%s1919_s29 + $0x50] sm:$0xff]  ;;  %v199_v42 = vld [vmem:[%s1919_s29 + $0x58] sm:$0xff] }
  0x2a   : > { %1634 = vmatpush3.bf16.msra.mxu1 %v1732_v43  ;;  %1595 = vmatprep.subr.bf16.mxu0 %v1733_v44  ;;  %v203_v43 = vld [vmem:[%s1919_s29 + $0x78] sm:$0xff]  ;;  %v1388_v44 = vcombine.high %v198_v38, %v202_v41 }
  0x2b   : > { %1635 = vmatprep.subr.bf16.mxu1 %v1734_v45  ;;  %932 = vmatprep.mubr.bf16.mxu0 %v1384_v50  ;;  %v1390_v45 = vcombine.high %v199_v42, %v203_v43  ;;  %v1387_v50 = vcombine.low %v198_v38, %v202_v41  ;;  %v1389_v51 = vcombine.low %v199_v42, %v203_v43 }
  0x2c   : > { %997 = vmatprep.mubr.bf16.mxu1 %v1386_v54  ;;  %v214_v54 = vld [vmem:[%s1919_s29 + $0xd0] sm:$0xff] }
  0x2d   : > { %1596 = vmatpush3.bf16.msra.mxu0 %v1735_v46  ;;  %v206_v46 = vld [vmem:[%s1919_s29 + $0x90] sm:$0xff] }
  0x2e   : > { %1636 = vmatpush3.bf16.msra.mxu1 %v1736_v47  ;;  %1597 = vmatprep.subr.bf16.mxu0 %v1737_v56  ;;  %v210_v47 = vld [vmem:[%s1919_s29 + $0xb0] sm:$0xff]  ;;  %v215_v56 = vld [vmem:[%s1919_s29 + $0xd8] sm:$0xff] }
  0x2f   : > { %1637 = vmatprep.subr.bf16.mxu1 %v1738_v57  ;;  %v1396_v52 = vcombine.high %v206_v46, %v210_v47  ;;  %v219_v57 = vld [vmem:[%s1919_s29 + $0xf8] sm:$0xff] }
  0x30   : > { %933 = vmatmul.mubr.bf16.gmra.mrb[4].mxu0 %v1383_v53  ;;  %v1398_v53 = vcombine.high %v207_v48, %v211_v49 }
  0x31   : > { %998 = vmatmul.mubr.bf16.gmra.mrb[4].mxu1 %v1385_v55  ;;  %1598 = vmatpush3.bf16.msra.mxu0 %v1739_v58  ;;  %v218_v55 = vld [vmem:[%s1919_s29 + $0xf0] sm:$0xff]  ;;  %v1395_v58 = vcombine.low %v206_v46, %v210_v47  ;;  %s1374_s29 = sshll.u32 %s2129_s21, 2 }
  0x32   : > { %1638 = vmatpush3.bf16.msra.mxu1 %v1740_v59  ;;  %1599 = vmatprep.subr.bf16.mxu0 %v1741_v60  ;;  %v1397_v59 = vcombine.low %v207_v48, %v211_v49  ;;  %v1404_v60 = vcombine.high %v214_v54, %v218_v55  ;;  %s185_s21 = scalar_lea.vmem %s2123_s2, %s1374_s29 }
  0x33   : > { %1639 = vmatprep.subr.bf16.mxu1 %v1742_v61  ;;  %940 = vmatprep.mubr.bf16.mxu0 %v1392_v4  ;;  %v1406_v61 = vcombine.high %v215_v56, %v219_v57 }
  0x34   : > { %1005 = vmatprep.mubr.bf16.mxu1 %v1394_v5 }
  0x35   : > { %1600 = vmatpush3.bf16.msra.mxu0 %v1743_v62  ;;  %v1403_v62 = vcombine.low %v214_v54, %v218_v55 }
  0x36   : > { %1640 = vmatpush3.bf16.msra.mxu1 %v1744_v63  ;;  %1601 = vmatprep.subr.bf16.mxu0 %v1745_v8  ;;  %v1405_v63 = vcombine.low %v215_v56, %v219_v57 }
  0x37   : > { %1641 = vmatprep.subr.bf16.mxu1 %v1746_v9 }
  0x38   : > { %941 = vmatmul.mubr.bf16.gmra.mrb[8].mxu0 %v1391_v6 }
  0x39   : > { %1006 = vmatmul.mubr.bf16.gmra.mrb[8].mxu1 %v1393_v7  ;;  %1602 = vmatpush3.bf16.msra.mxu0 %v1747_v10 }
  0x3a   : > { %1642 = vmatpush3.bf16.msra.mxu1 %v1748_v11  ;;  %1603 = vmatprep.subr.bf16.mxu0 %v1749_v12 }
  0x3b   : > { %1643 = vmatprep.subr.bf16.mxu1 %v1750_v13  ;;  %948 = vmatprep.mubr.bf16.mxu0 %v1400_v19 }
  0x3c   : > { %1013 = vmatprep.mubr.bf16.mxu1 %v1402_v22 }
  0x3d   : > { %1604 = vmatpush3.bf16.msra.mxu0 %v1751_v14 }
  0x3e   : > { %1644 = vmatpush3.bf16.msra.mxu1 %v1752_v15  ;;  %1605 = vmatprep.subr.bf16.mxu0 %v1753_v24 }
  0x3f   : > { %1645 = vmatprep.subr.bf16.mxu1 %v1754_v25 }
  0x40   : > { %949 = vmatmul.mubr.bf16.gmra.mrb[12].mxu0 %v1399_v21 }
  0x41   : > { %1014 = vmatmul.mubr.bf16.gmra.mrb[12].mxu1 %v1401_v23  ;;  %1606 = vmatpush3.bf16.msra.mxu0 %v1755_v26 }
  0x42   : > { %1646 = vmatpush3.bf16.msra.mxu1 %v1756_v27  ;;  %1607 = vmatprep.subr.bf16.mxu0 %v1757_v28 }
  0x43   : > { %1647 = vmatprep.subr.bf16.mxu1 %v1758_v29  ;;  %1054 = vmatprep.mubr.bf16.mxu0 %v1380_v35 }
  0x44   : > { %1119 = vmatprep.mubr.bf16.mxu1 %v1382_v40 }
  0x45   : > { %1608 = vmatpush3.bf16.msra.mxu0 %v1759_v30 }
  0x46   : > { %1648 = vmatpush3.bf16.msra.mxu1 %v1760_v31 }
  0x48   : > { %1055 = vmatmul.mubr.bf16.vlgmr.msra.gmra.mrb[16].mxu0 %v1379_v34 }
  0x49   : > { %1120 = vmatmul.mubr.bf16.vlgmr.msra.gmra.mrb[16].mxu1 %v1381_v39  ;;  %1062 = vmatprep.mubr.bf16.mxu0 %v1388_v44 }
  0x4a   : > { %1127 = vmatprep.mubr.bf16.mxu1 %v1390_v45 }
  0x50   : > { %1063 = vmatmul.mubr.bf16.gmra.mrb[20].mxu0 %v1387_v50 }
  0x51   : > { %1128 = vmatmul.mubr.bf16.gmra.mrb[20].mxu1 %v1389_v51  ;;  %1070 = vmatprep.mubr.bf16.mxu0 %v1396_v52 }
  0x52   : > { %1135 = vmatprep.mubr.bf16.mxu1 %v1398_v53 }
  0x58   : > { %1071 = vmatmul.mubr.bf16.gmra.mrb[24].mxu0 %v1395_v58 }
  0x59   : > { %1136 = vmatmul.mubr.bf16.gmra.mrb[24].mxu1 %v1397_v59  ;;  %1078 = vmatprep.mubr.bf16.mxu0 %v1404_v60 }
  0x5a   : > { %1143 = vmatprep.mubr.bf16.mxu1 %v1406_v61 }
  0x60   : > { %1079 = vmatmul.mubr.bf16.gmra.mrb[28].mxu0 %v1403_v62 }
  0x61   : > { %1144 = vmatmul.mubr.bf16.gmra.mrb[28].mxu1 %v1405_v63 }
  0xfb   : > { %v1529_v0 = vpop.f32.mrb[0].mxu0 }
  0xfc   : > { %v1569_v1 = vpop.f32.mrb[0].mxu1  ;;  %v1530_v2 = vpop.f32.mrb[1].mxu0 }
  0xfd   : > { %v1531_v3 = vadd.f32 %v1530_v2, %v1529_v0  ;;  %v1570_v4 = vpop.f32.mrb[1].mxu1  ;;  %v1532_v5 = vpop.f32.mrb[2].mxu0 }
  0xfe   : > { %v1571_v6 = vadd.f32 %v1570_v4, %v1569_v1  ;;  %v1572_v7 = vpop.f32.mrb[2].mxu1  ;;  %v1533_v8 = vpop.f32.mrb[3].mxu0 }
  0xff   : > { %v1534_v9 = vadd.f32 %v1533_v8, %v1532_v5  ;;  %v1573_v10 = vpop.f32.mrb[3].mxu1 }
 0x100   : > { %v992_v11 = vadd.f32 %v1571_v6, %v1531_v3  ;;  %v1574_v12 = vadd.f32 %v1573_v10, %v1572_v7 }
 0x102   : > { %v995_v13 = vadd.f32 %v1574_v12, %v1534_v9 }
 0x103   : > { %v1535_v14 = vpop.f32.mrb[4].mxu0 }
 0x104   : > { %v1575_v15 = vpop.f32.mrb[4].mxu1  ;;  %v1536_v16 = vpop.f32.mrb[5].mxu0 }
 0x105   : > { %v1537_v17 = vadd.f32 %v1536_v16, %v1535_v14  ;;  %v1576_v18 = vpop.f32.mrb[5].mxu1  ;;  %v1538_v19 = vpop.f32.mrb[6].mxu0 }
 0x106   : > { %v1577_v20 = vadd.f32 %v1576_v18, %v1575_v15  ;;  %v1578_v21 = vpop.f32.mrb[6].mxu1  ;;  %v1539_v22 = vpop.f32.mrb[7].mxu0 }
 0x107   : > { %v1540_v23 = vadd.f32 %v1539_v22, %v1538_v19  ;;  %v1579_v24 = vpop.f32.mrb[7].mxu1 }
 0x108   : > { %v1000_v25 = vadd.f32 %v1577_v20, %v1537_v17  ;;  %v1580_v26 = vadd.f32 %v1579_v24, %v1578_v21 }
 0x10a   : > { %v2055_v27 = vadd.f32 %v1580_v26, %v1540_v23 }
 0x10b   : > { %v1541_v28 = vpop.f32.mrb[8].mxu0 }
 0x10c   : > { %v1581_v29 = vpop.f32.mrb[8].mxu1  ;;  %v1542_v30 = vpop.f32.mrb[9].mxu0 }
 0x10d   : > { %v1582_v31 = vpop.f32.mrb[9].mxu1  ;;  %v1543_v32 = vadd.f32 %v1542_v30, %v1541_v28  ;;  %v1544_v34 = vpop.f32.mrb[10].mxu0 }
 0x10e   : > { %v1583_v33 = vadd.f32 %v1582_v31, %v1581_v29  ;;  %v1584_v35 = vpop.f32.mrb[10].mxu1  ;;  %v1545_v36 = vpop.f32.mrb[11].mxu0 }
 0x10f   : > { %v1585_v37 = vpop.f32.mrb[11].mxu1  ;;  %v1546_v39 = vadd.f32 %v1545_v36, %v1544_v34 }
 0x110   : > { %v2057_v38 = vadd.f32 %v1583_v33, %v1543_v32  ;;  %v1586_v40 = vadd.f32 %v1585_v37, %v1584_v35 }
 0x112   : > { %v2059_v41 = vadd.f32 %v1586_v40, %v1546_v39 }
 0x113   : > { %v1547_v42 = vpop.f32.mrb[12].mxu0 }
 0x114   : > { %v1587_v43 = vpop.f32.mrb[12].mxu1  ;;  %v1548_v44 = vpop.f32.mrb[13].mxu0 }
 0x115   : > { %v1549_v45 = vadd.f32 %v1548_v44, %v1547_v42  ;;  %v1588_v46 = vpop.f32.mrb[13].mxu1  ;;  %v1550_v47 = vpop.f32.mrb[14].mxu0 }
 0x116   : > { %v1589_v48 = vadd.f32 %v1588_v46, %v1587_v43  ;;  %v1590_v49 = vpop.f32.mrb[14].mxu1  ;;  %v1551_v50 = vpop.f32.mrb[15].mxu0 }
 0x117   : > { %v1552_v51 = vadd.f32 %v1551_v50, %v1550_v47  ;;  %v1591_v52 = vpop.f32.mrb[15].mxu1 }
 0x118   : > { %v2061_v53 = vadd.f32 %v1589_v48, %v1549_v45  ;;  %v1592_v54 = vadd.f32 %v1591_v52, %v1590_v49 }
 0x11a   : > { %v2063_v55 = vadd.f32 %v1592_v54, %v1552_v51 }
 0x11b   : > { %v1609_v56 = vpop.f32.mrb[16].mxu0 }
 0x11c   : > { %v1649_v57 = vpop.f32.mrb[16].mxu1  ;;  %v1610_v58 = vpop.f32.mrb[17].mxu0 }
 0x11d   : > { %v1611_v59 = vadd.f32 %v1610_v58, %v1609_v56  ;;  %v1650_v60 = vpop.f32.mrb[17].mxu1  ;;  %v1612_v61 = vpop.f32.mrb[18].mxu0 }
 0x11e   : > { %v1651_v62 = vadd.f32 %v1650_v60, %v1649_v57  ;;  %v1652_v63 = vpop.f32.mrb[18].mxu1  ;;  %v1613_v0 = vpop.f32.mrb[19].mxu0 }
 0x11f   : > { %v1057_v1 = vadd.f32 %v1611_v59, %v992_v11  ;;  %v1614_v2 = vadd.f32 %v1613_v0, %v1612_v61  ;;  %v1653_v3 = vpop.f32.mrb[19].mxu1 }
 0x120   : > { %v1654_v4 = vadd.f32 %v1653_v3, %v1652_v63 }
 0x121   : > { %v2065_v5 = vadd.f32 %v1651_v62, %v1057_v1  ;;  %v1060_v6 = vadd.f32 %v1614_v2, %v995_v13 }
 0x123   : > { %v2067_v7 = vadd.f32 %v1654_v4, %v1060_v6  ;;  %v1615_v8 = vpop.f32.mrb[20].mxu0  ;;  %v1167_v12 = vmul.f32 %v2065_v5, %v2065_v5 }
 0x124   : > { %v1655_v9 = vpop.f32.mrb[20].mxu1  ;;  %v1616_v10 = vpop.f32.mrb[21].mxu0 }
 0x125   : > { %v1152_v14 = vadd.f32 %v2067_v7, %v2065_v5  ;;  %v1168_v11 = vmul.f32 %v2067_v7, %v2067_v7  ;;  %v1617_v15 = vadd.f32 %v1616_v10, %v1615_v8  ;;  %v1656_v16 = vpop.f32.mrb[21].mxu1  ;;  %v1618_v17 = vpop.f32.mrb[22].mxu0 }
 0x126   : > { %v1657_v18 = vadd.f32 %v1656_v16, %v1655_v9  ;;  %v1658_v19 = vpop.f32.mrb[22].mxu1  ;;  %v1619_v13 = vpop.f32.mrb[23].mxu0 }
 0x127   : > { %v1175_v20 = vadd.f32 %v1168_v11, %v1167_v12  ;;  %v1065_v21 = vadd.f32 %v1617_v15, %v1000_v25  ;;  %v1620_v22 = vadd.f32 %v1619_v13, %v1618_v17  ;;  %v1659_v23 = vpop.f32.mrb[23].mxu1 }
 0x128   : > { %v1660_v24 = vadd.f32 %v1659_v23, %v1658_v19 }
 0x129   : > { %v2075_v26 = vadd.f32 %v1657_v18, %v1065_v21  ;;  %v1068_v28 = vadd.f32 %v1620_v22, %v2055_v27 }
 0x12b   : > { %v1153_v29 = vadd.f32 %v1152_v14, %v2075_v26  ;;  %v1169_v30 = vmul.f32 %v2075_v26, %v2075_v26  ;;  %v2081_v31 = vadd.f32 %v1660_v24, %v1068_v28  ;;  %v1621_v32 = vpop.f32.mrb[24].mxu0 }
 0x12c   : > { %v1661_v33 = vpop.f32.mrb[24].mxu1  ;;  %v1622_v34 = vpop.f32.mrb[25].mxu0 }
 0x12d   : > { %v1176_v35 = vadd.f32 %v1175_v20, %v1169_v30  ;;  %v1154_v25 = vadd.f32 %v1153_v29, %v2081_v31  ;;  %v1170_v36 = vmul.f32 %v2081_v31, %v2081_v31  ;;  %v1623_v37 = vadd.f32 %v1622_v34, %v1621_v32  ;;  %v1662_v39 = vpop.f32.mrb[25].mxu1  ;;  %v1624_v40 = vpop.f32.mrb[26].mxu0 }
 0x12e   : > { %v1663_v27 = vadd.f32 %v1662_v39, %v1661_v33  ;;  %v1664_v42 = vpop.f32.mrb[26].mxu1  ;;  %v1625_v43 = vpop.f32.mrb[27].mxu0 }
 0x12f   : > { %v1177_v44 = vadd.f32 %v1176_v35, %v1170_v36  ;;  %v1073_v45 = vadd.f32 %v1623_v37, %v2057_v38  ;;  %v1626_v46 = vadd.f32 %v1625_v43, %v1624_v40  ;;  %v1665_v47 = vpop.f32.mrb[27].mxu1 }
 0x130   : > { %v1666_v48 = vadd.f32 %v1665_v47, %v1664_v42 }
 0x131   : > { %v2087_v49 = vadd.f32 %v1663_v27, %v1073_v45  ;;  %v1076_v50 = vadd.f32 %v1626_v46, %v2059_v41 }
 0x133   : > { %v1155_v51 = vadd.f32 %v1154_v25, %v2087_v49  ;;  %v1171_v52 = vmul.f32 %v2087_v49, %v2087_v49  ;;  %v1141_v54 = vadd.f32 %v1666_v48, %v1076_v50  ;;  %v1627_v56 = vpop.f32.mrb[28].mxu0 }
 0x134   : > { %v1667_v57 = vpop.f32.mrb[28].mxu1  ;;  %v1628_v58 = vpop.f32.mrb[29].mxu0 }
 0x135   : > { %v1178_v59 = vadd.f32 %v1177_v44, %v1171_v52  ;;  %v1156_v60 = vadd.f32 %v1155_v51, %v1141_v54  ;;  %v1172_v61 = vmul.f32 %v1141_v54, %v1141_v54  ;;  %v1629_v38 = vadd.f32 %v1628_v58, %v1627_v56  ;;  %v1668_v62 = vpop.f32.mrb[29].mxu1  ;;  %v1630_v63 = vpop.f32.mrb[30].mxu0 }
 0x136   : > { %v1669_v0 = vadd.f32 %v1668_v62, %v1667_v57  ;;  %v1670_v1 = vpop.f32.mrb[30].mxu1  ;;  %v1631_v2 = vpop.f32.mrb[31].mxu0 }
 0x137   : > { %v1179_v3 = vadd.f32 %v1178_v59, %v1172_v61  ;;  %v1081_v41 = vadd.f32 %v1629_v38, %v2061_v53  ;;  %v1632_v4 = vadd.f32 %v1631_v2, %v1630_v63  ;;  %v1671_v6 = vpop.f32.mrb[31].mxu1 }
 0x138   : > { %v1672_v8 = vadd.f32 %v1671_v6, %v1670_v1 }
 0x139   : > { %v1146_v9 = vadd.f32 %v1669_v0, %v1081_v41  ;;  %v1084_v10 = vadd.f32 %v1632_v4, %v2063_v55 }
 0x13b   : > { %v1157_v12 = vadd.f32 %v1156_v60, %v1146_v9  ;;  %v1173_v14 = vmul.f32 %v1146_v9, %v1146_v9  ;;  %v1149_v11 = vadd.f32 %v1672_v8, %v1084_v10 }
 0x13d   : > { %v1180_v15 = vadd.f32 %v1179_v3, %v1173_v14  ;;  %v1158_v16 = vadd.f32 %v1157_v12, %v1149_v11  ;;  %v1174_v17 = vmul.f32 %v1149_v11, %v1149_v11 }
 0x13f   : > { %v1159_v18 = vrot.slane %v1158_v16, 4  ;;  %v1181_v19 = vadd.f32 %v1180_v15, %v1174_v17 }
 0x141   : > { %v1160_v13 = vadd.f32 %v1159_v18, %v1158_v16  ;;  %v1182_v20 = vrot.slane %v1181_v19, 4 }
 0x143   : > { %v1161_v21 = vrot.slane %v1160_v13, 2  ;;  %v1183_v22 = vadd.f32 %v1182_v20, %v1181_v19 }
 0x145   : > { %v1162_v23 = vadd.f32 %v1161_v21, %v1160_v13  ;;  %v1184_v53 = vrot.slane %v1183_v22, 2 }
 0x147   : > { %v1163_v24 = vrot.slane %v1162_v23, 1  ;;  %v1185_v28 = vadd.f32 %v1184_v53, %v1183_v22 }
 0x149   : > { %v1164_v29 = vadd.f32 %v1163_v24, %v1162_v23  ;;  %v1186_v30 = vrot.slane %v1185_v28, 1 }
 0x14b   : > { %v1166_v32 = vmul.f32 0.015625, %v1164_v29  ;;  %v1187_v55 = vadd.f32 %v1186_v30, %v1185_v28 }
 0x14d   : > { %v1188_v33 = vmul.f32 0.015625, %v1187_v55  ;;  %v1189_v34 = vmul.f32 %v1166_v32, %v1166_v32  ;;  %v1192_v35 = vsub.f32 %v2065_v5, %v1166_v32  ;;  %v1193_v25 = vsub.f32 %v2067_v7, %v1166_v32 }
 0x14e   : > { %v1194_v36 = vsub.f32 %v2075_v26, %v1166_v32  ;;  %v1195_v37 = vsub.f32 %v2081_v31, %v1166_v32  ;;  %v1196_v39 = vsub.f32 %v2087_v49, %v1166_v32  ;;  %v1197_v40 = vsub.f32 %v1141_v54, %v1166_v32 }
 0x14f   : > { %v1190_v27 = vsub.f32 %v1188_v33, %v1189_v34  ;;  %v1198_v42 = vsub.f32 %v1146_v9, %v1166_v32  ;;  %v1199_v43 = vsub.f32 %v1149_v11, %v1166_v32 }
 0x151   : > { %v1191_v44 = vmax.f32 %v1190_v27, 0.0 }
 0x153   : > { %v1200_v45 = vadd.f32 1e-05, %v1191_v44 }
 0x155   : > { %1761 = vrsqrt.f32 %v1200_v45 }
 0x15f   : > { %v1762_v46 = vpop.eup %1761 }
 0x160   : > { %v1202_v47 = vmul.f32 %v1762_v46, %v1192_v35  ;;  %v1203_v48 = vmul.f32 %v1762_v46, %v1193_v25  ;;  %v1204_v5 = vmul.f32 %v1762_v46, %v1194_v36  ;;  %v1205_v50 = vmul.f32 %v1762_v46, %v1195_v37 }
 0x161   : > { %v1206_v7 = vmul.f32 %v1762_v46, %v1196_v39  ;;  %v1207_v51 = vmul.f32 %v1762_v46, %v1197_v40  ;;  %v1208_v26 = vmul.f32 %v1762_v46, %v1198_v42  ;;  %v1209_v52 = vmul.f32 %v1762_v46, %v1199_v43 }
 0x162   : > { %vm1210_vm0 = vcmp.gt.f32.partialorder %v1202_v47, 0.0  ;;  %vm1211_vm1 = vcmp.gt.f32.partialorder %v1203_v48, 0.0  ;;  %vm1212_vm2 = vcmp.gt.f32.partialorder %v1204_v5, 0.0  ;;  %vm1213_vm3 = vcmp.gt.f32.partialorder %v1205_v50, 0.0 }
 0x163   : > { %vm1214_vm4 = vcmp.gt.f32.partialorder %v1206_v7, 0.0  ;;  %vm1215_vm5 = vcmp.gt.f32.partialorder %v1207_v51, 0.0  ;;  %vm1216_vm6 = vcmp.gt.f32.partialorder %v1208_v26, 0.0  ;;  %vm1217_vm7 = vcmp.gt.f32.partialorder %v1209_v52, 0.0 }
 0x164   : > { %v1218_v31 = vmul.f32 0.2, %v1202_v47  ;;  %v1219_v49 = vmul.f32 0.2, %v1203_v48  ;;  %v1220_v54 = vmul.f32 0.2, %v1204_v5 }
 0x165   : > { %v1221_v56 = vmul.f32 0.2, %v1205_v50  ;;  %v1222_v57 = vmul.f32 0.2, %v1206_v7  ;;  %v1223_v58 = vmul.f32 0.2, %v1207_v51 }
 0x166   : > { %v1224_v59 = vmul.f32 0.2, %v1208_v26  ;;  %v1225_v60 = vmul.f32 0.2, %v1209_v52  ;;  %v1226_v61 = vsel %vm1210_vm0, %v1202_v47, %v1218_v31  ;;  %v1227_v38 = vsel %vm1211_vm1, %v1203_v48, %v1219_v49 }
 0x167   : > { %v1228_v62 = vsel %vm1212_vm2, %v1204_v5, %v1220_v54  ;;  %v1229_v63 = vsel %vm1213_vm3, %v1205_v50, %v1221_v56  ;;  %v1230_v0 = vsel %vm1214_vm4, %v1206_v7, %v1222_v57  ;;  %v1231_v1 = vsel %vm1215_vm5, %v1207_v51, %v1223_v58 }
 0x168   : > { %v1232_v2 = vsel %vm1216_vm6, %v1208_v26, %v1224_v59  ;;  %v1233_v3 = vsel %vm1217_vm7, %v1209_v52, %v1225_v60  ;;  %v1493_v41 = vpack.c.bf16 %v1227_v38, %v1226_v61  ;;  %v1498_v4 = vpack.c.bf16 %v1229_v63, %v1228_v62 }
 0x169   : > { %v1503_v6 = vpack.c.bf16 %v1231_v1, %v1230_v0  ;;  %v1508_v8 = vpack.c.bf16 %v1233_v3, %v1232_v2 }
 0x16a   : > { %1494 = vst [vmem:[%s185_s21] sm:$0xff] %v1493_v41   ;;  %1510 = vst [vmem:[%s185_s21 + $0x8] sm:$0xff] %v1498_v4  }
 0x16b   : > { %1511 = vst [vmem:[%s185_s21 + $0x10] sm:$0xff] %v1503_v6   ;;  %1512 = vst [vmem:[%s185_s21 + $0x18] sm:$0xff] %v1508_v8  }
 0x16c PF: > { %s12_s11 = sadd.s32 1, %s1785_s11   ;;  %s2124_s9 = smov %s1781_s10 }
 0x16d   : > { %p9_p5 = scmp.ge.s32.totalorder %s12_s11, 4   ;;  %s2125_s10 = smov %s2127_s12 }
 0x16f   :  { %11 = sbr.rel (!%p9_p5) target bundleno = 2 (0x2), region = 61 }

// kernel: patch_discriminator_forward.6
= control target key start
LH: loop header
LB: loop body
LE: loop exit
PB: predicated region body
PF: predicated region fallthrough
CT: control target
= control target key end

     0   :  { %s3507_s9 = smov 0   ;;  %s3509_s10 = smov 0   ;;  %s4293_s0 = inlined_call_operand.vmem [shape: bf16[32,2048], index: 0, kind: input, shape index: {}]   ;;  %s4294_s1 = inlined_call_operand.vmem [shape: bf16[2048,256], index: 1, kind: input, shape index: {}]   ;;  %s4295_s2 = inlined_call_operand.vmem [shape: bf16[32,256], index: 2, kind: output, shape index: {}]  }
   0x1   :  { %s3511_s11 = smov 0   ;;  %s3513_s12 = smov 0  }
   0x2   :  { %s3515_s13 = smov 0   ;;  %s3517_s14 = smov 0  }
   0x3   :  { %s3519_s15 = smov 0   ;;  %s3521_s16 = smov 0  }
   0x4   :  { %s3523_s17 = smov 0  }
   0x5 LB: > { %s2869_s18 = sadd.s32 4294967295, %s3490_s17   ;;  %s21_s19 = sadd.s32 1, %s3482_s15  ;;  %s3490_s17 = sphi %s3523_s17, %s12_s17   ;;  %s3486_s16 = sphi %s3521_s16, %s4304_s16   ;;  %s3482_s15 = sphi %s3519_s15, %s4303_s15   ;;  %s3478_s14 = sphi %s3517_s14, %s4302_s14   ;;  %s3474_s13 = sphi %s3515_s13, %s4301_s13   ;;  %s3470_s12 = sphi %s3513_s12, %s4300_s12   ;;  %s3466_s11 = sphi %s3511_s11, %s4299_s11   ;;  %s3462_s10 = sphi %s3509_s10, %s4298_s10   ;;  %s3458_s9 = sphi %s3507_s9, %s4297_s9  }
   0x6   : > { %p22_p0 = scmp.ge.s32.totalorder %s21_s19, 2  ;;  %s24_s20 = sadd.s32 1, %s3486_s16 }
   0x7   : > { %s57_s21 = sadd.s32 1, %s3470_s12  ;;  %p64_p1 = scmp.ne.s32.totalorder %s3470_s12, %s3466_s11 }
   0x8   : > { %s4306_s19 = smov (%p22_p0, %s21_s19), 0  ;;  %s4308_s20 = smov (!%p22_p0, %s24_s20), %s3486_s16 }
   0x9   : > { %s54_s22 = ssub.s32 %s3482_s15, %s4306_s19  ;;  %p65_p2 = scmp.eq.s32.totalorder %s3490_s17, 0 }
   0xa   : > { %p26_p3 = scmp.ge.s32.totalorder %s4308_s20, 2  ;;  %p55_p4 = scmp.eq.s32.totalorder %s54_s22, 0 }
   0xb   : > { %p66_p5 = por %p65_p2, %p64_p1  ;;  %s85_s23 = sadd.s32 1, %s3462_s10 }
   0xc   : > { %s4310_s20 = smov (%p26_p3, %s4308_s20), 0  ;;  %p95_p6 = scmp.ne.s32.totalorder %s3462_s10, %s3458_s9 }
   0xd   : > { %s3568_s24 = scalar_select %p55_p4, %s3470_s12, %s57_s21  }
   0xe   : > { %s80_s25 = ssub.s32 %s3486_s16, %s4310_s20  ;;  %p96_p7 = scmp.eq.s32.totalorder %s2869_s18, 3 }
   0xf   : > { %s82_s26 = sor.u32 %s80_s25, %s54_s22  ;;  %p2872_p10 = scmp.ge.s32.totalorder %s3490_s17, 4 }
  0x10   : > { %p83_p8 = scmp.eq.s32.totalorder %s82_s26, 0  ;;  %p3574_p9 = por %p96_p7, %p95_p6 }
  0x11   : > { %118 = sbr.rel (%p2872_p10) target bundleno = 198 (0xc6), region = 16 }
  0x12   : > { %s3579_s28 = scalar_select %p83_p8, %s3462_s10, %s85_s23  }
  0x18   : > { %131 = sbr.rel (!%p66_p5) target bundleno = 198 (0xc6), region = 24  ;;  %s133_s29 = sand.u32 (%p66_p5), 1, %s3470_s12  }
  0x19   : > { %s2874_s30 = sshll.u32 (%p66_p5), %s3482_s15, 2  ;;  %s2873_s3 = sshll.u32 (%p66_p5), %s133_s29, 10 }
  0x1a   : > { %s3587_s6 = scalar_lea.vmem (%p66_p5), %s4294_s1, %s2874_s30  ;;  %s3591_s7 = scalar_lea.vmem (%p66_p5), [#allocation2], %s2873_s3 }
  0x1b   : > { %v153_v0 = vld [vmem:[%s3587_s6] sm:$0xf] (%p66_p5)  ;;  %v155_v1 = vld [vmem:[%s3587_s6 + $0x8] sm:$0xf] (%p66_p5)  ;;  %v157_v2 = vld [vmem:[%s3587_s6 + $0x10] sm:$0xf] (%p66_p5) }
  0x1c   : > { %154 = vst [vmem:[%s3591_s7] sm:$0xf] (%p66_p5), %v153_v0  ;;  %156 = vst [vmem:[%s3591_s7 + $0x4] sm:$0xf] (%p66_p5), %v155_v1  ;;  %v159_v3 = vld [vmem:[%s3587_s6 + $0x18] sm:$0xf] (%p66_p5) }
  0x1d   : > { %v161_v4 = vld [vmem:[%s3587_s6 + $0x20] sm:$0xf] (%p66_p5)  ;;  %158 = vst [vmem:[%s3591_s7 + $0x8] sm:$0xf] (%p66_p5), %v157_v2  ;;  %160 = vst [vmem:[%s3591_s7 + $0xc] sm:$0xf] (%p66_p5), %v159_v3 }
  0x1e   : > { %162 = vst [vmem:[%s3591_s7 + $0x10] sm:$0xf] (%p66_p5), %v161_v4  ;;  %v163_v5 = vld [vmem:[%s3587_s6 + $0x28] sm:$0xf] (%p66_p5)  ;;  %v165_v6 = vld [vmem:[%s3587_s6 + $0x30] sm:$0xf] (%p66_p5) }
  0x1f   : > { %v167_v7 = vld [vmem:[%s3587_s6 + $0x38] sm:$0xf]  ;;  %164 = vst [vmem:[%s3591_s7 + $0x14] sm:$0xf] %v163_v5  ;;  %166 = vst [vmem:[%s3591_s7 + $0x18] sm:$0xf] %v165_v6 }
  0x20   : > { %168 = vst [vmem:[%s3591_s7 + $0x1c] sm:$0xf] %v167_v7  ;;  %v169_v8 = vld [vmem:[%s3587_s6 + $0x40] sm:$0xf]  ;;  %v171_v9 = vld [vmem:[%s3587_s6 + $0x48] sm:$0xf] }
  0x21   : > { %v173_v10 = vld [vmem:[%s3587_s6 + $0x50] sm:$0xf]  ;;  %170 = vst [vmem:[%s3591_s7 + $0x20] sm:$0xf] %v169_v8  ;;  %172 = vst [vmem:[%s3591_s7 + $0x24] sm:$0xf] %v171_v9 }
  0x22   : > { %174 = vst [vmem:[%s3591_s7 + $0x28] sm:$0xf] %v173_v10  ;;  %v175_v11 = vld [vmem:[%s3587_s6 + $0x58] sm:$0xf]  ;;  %v177_v12 = vld [vmem:[%s3587_s6 + $0x60] sm:$0xf] }
  0x23   : > { %v179_v13 = vld [vmem:[%s3587_s6 + $0x68] sm:$0xf]  ;;  %176 = vst [vmem:[%s3591_s7 + $0x2c] sm:$0xf] %v175_v11  ;;  %178 = vst [vmem:[%s3591_s7 + $0x30] sm:$0xf] %v177_v12 }
  0x24   : > { %180 = vst [vmem:[%s3591_s7 + $0x34] sm:$0xf] %v179_v13  ;;  %v181_v14 = vld [vmem:[%s3587_s6 + $0x70] sm:$0xf]  ;;  %v183_v15 = vld [vmem:[%s3587_s6 + $0x78] sm:$0xf] }
  0x25   : > { %v185_v16 = vld [vmem:[%s3587_s6 + $0x80] sm:$0xf]  ;;  %182 = vst [vmem:[%s3591_s7 + $0x38] sm:$0xf] %v181_v14  ;;  %184 = vst [vmem:[%s3591_s7 + $0x3c] sm:$0xf] %v183_v15 }
  0x26   : > { %186 = vst [vmem:[%s3591_s7 + $0x40] sm:$0xf] %v185_v16  ;;  %v187_v17 = vld [vmem:[%s3587_s6 + $0x88] sm:$0xf]  ;;  %v189_v18 = vld [vmem:[%s3587_s6 + $0x90] sm:$0xf] }
  0x27   : > { %v191_v19 = vld [vmem:[%s3587_s6 + $0x98] sm:$0xf]  ;;  %188 = vst [vmem:[%s3591_s7 + $0x44] sm:$0xf] %v187_v17  ;;  %190 = vst [vmem:[%s3591_s7 + $0x48] sm:$0xf] %v189_v18 }
  0x28   : > { %192 = vst [vmem:[%s3591_s7 + $0x4c] sm:$0xf] %v191_v19  ;;  %v193_v20 = vld [vmem:[%s3587_s6 + $0xa0] sm:$0xf]  ;;  %v195_v21 = vld [vmem:[%s3587_s6 + $0xa8] sm:$0xf] }
  0x29   : > { %v197_v22 = vld [vmem:[%s3587_s6 + $0xb0] sm:$0xf]  ;;  %194 = vst [vmem:[%s3591_s7 + $0x50] sm:$0xf] %v193_v20  ;;  %196 = vst [vmem:[%s3591_s7 + $0x54] sm:$0xf] %v195_v21 }
  0x2a   : > { %198 = vst [vmem:[%s3591_s7 + $0x58] sm:$0xf] %v197_v22  ;;  %v199_v23 = vld [vmem:[%s3587_s6 + $0xb8] sm:$0xf]  ;;  %v201_v24 = vld [vmem:[%s3587_s6 + $0xc0] sm:$0xf] }
  0x2b   : > { %v203_v25 = vld [vmem:[%s3587_s6 + $0xc8] sm:$0xf]  ;;  %200 = vst [vmem:[%s3591_s7 + $0x5c] sm:$0xf] %v199_v23  ;;  %202 = vst [vmem:[%s3591_s7 + $0x60] sm:$0xf] %v201_v24 }
  0x2c   : > { %204 = vst [vmem:[%s3591_s7 + $0x64] sm:$0xf] %v203_v25  ;;  %v205_v26 = vld [vmem:[%s3587_s6 + $0xd0] sm:$0xf]  ;;  %v207_v27 = vld [vmem:[%s3587_s6 + $0xd8] sm:$0xf] }
  0x2d   : > { %v209_v28 = vld [vmem:[%s3587_s6 + $0xe0] sm:$0xf]  ;;  %206 = vst [vmem:[%s3591_s7 + $0x68] sm:$0xf] %v205_v26  ;;  %208 = vst [vmem:[%s3591_s7 + $0x6c] sm:$0xf] %v207_v27 }
  0x2e   : > { %210 = vst [vmem:[%s3591_s7 + $0x70] sm:$0xf] %v209_v28  ;;  %v211_v29 = vld [vmem:[%s3587_s6 + $0xe8] sm:$0xf]  ;;  %v213_v30 = vld [vmem:[%s3587_s6 + $0xf0] sm:$0xf] }
  0x2f   : > { %v215_v31 = vld [vmem:[%s3587_s6 + $0xf8] sm:$0xf]  ;;  %212 = vst [vmem:[%s3591_s7 + $0x74] sm:$0xf] %v211_v29  ;;  %214 = vst [vmem:[%s3591_s7 + $0x78] sm:$0xf] %v213_v30 }
  0x30   : > { %216 = vst [vmem:[%s3591_s7 + $0x7c] sm:$0xf] %v215_v31  ;;  %v217_v32 = vld [vmem:[%s3587_s6 + $0x100] sm:$0xf]  ;;  %v219_v33 = vld [vmem:[%s3587_s6 + $0x108] sm:$0xf] }
  0x31   : > { %v221_v34 = vld [vmem:[%s3587_s6 + $0x110] sm:$0xf]  ;;  %218 = vst [vmem:[%s3591_s7 + $0x80] sm:$0xf] %v217_v32  ;;  %220 = vst [vmem:[%s3591_s7 + $0x84] sm:$0xf] %v219_v33 }
  0x32   : > { %222 = vst [vmem:[%s3591_s7 + $0x88] sm:$0xf] %v221_v34  ;;  %v223_v35 = vld [vmem:[%s3587_s6 + $0x118] sm:$0xf]  ;;  %v225_v36 = vld [vmem:[%s3587_s6 + $0x120] sm:$0xf] }
  0x33   : > { %v227_v37 = vld [vmem:[%s3587_s6 + $0x128] sm:$0xf]  ;;  %224 = vst [vmem:[%s3591_s7 + $0x8c] sm:$0xf] %v223_v35  ;;  %226 = vst [vmem:[%s3591_s7 + $0x90] sm:$0xf] %v225_v36 }
  0x34   : > { %228 = vst [vmem:[%s3591_s7 + $0x94] sm:$0xf] %v227_v37  ;;  %v229_v38 = vld [vmem:[%s3587_s6 + $0x130] sm:$0xf]  ;;  %v231_v39 = vld [vmem:[%s3587_s6 + $0x138] sm:$0xf] }
  0x35   : > { %v233_v40 = vld [vmem:[%s3587_s6 + $0x140] sm:$0xf]  ;;  %230 = vst [vmem:[%s3591_s7 + $0x98] sm:$0xf] %v229_v38  ;;  %232 = vst [vmem:[%s3591_s7 + $0x9c] sm:$0xf] %v231_v39 }
  0x36   : > { %234 = vst [vmem:[%s3591_s7 + $0xa0] sm:$0xf] %v233_v40  ;;  %v235_v41 = vld [vmem:[%s3587_s6 + $0x148] sm:$0xf]  ;;  %v237_v42 = vld [vmem:[%s3587_s6 + $0x150] sm:$0xf] }
  0x37   : > { %v239_v43 = vld [vmem:[%s3587_s6 + $0x158] sm:$0xf]  ;;  %236 = vst [vmem:[%s3591_s7 + $0xa4] sm:$0xf] %v235_v41  ;;  %238 = vst [vmem:[%s3591_s7 + $0xa8] sm:$0xf] %v237_v42 }
  0x38   : > { %240 = vst [vmem:[%s3591_s7 + $0xac] sm:$0xf] %v239_v43  ;;  %v241_v44 = vld [vmem:[%s3587_s6 + $0x160] sm:$0xf]  ;;  %v243_v45 = vld [vmem:[%s3587_s6 + $0x168] sm:$0xf] }
  0x39   : > { %v245_v46 = vld [vmem:[%s3587_s6 + $0x170] sm:$0xf]  ;;  %242 = vst [vmem:[%s3591_s7 + $0xb0] sm:$0xf] %v241_v44  ;;  %244 = vst [vmem:[%s3591_s7 + $0xb4] sm:$0xf] %v243_v45 }
  0x3a   : > { %246 = vst [vmem:[%s3591_s7 + $0xb8] sm:$0xf] %v245_v46  ;;  %v247_v47 = vld [vmem:[%s3587_s6 + $0x178] sm:$0xf]  ;;  %v249_v48 = vld [vmem:[%s3587_s6 + $0x180] sm:$0xf] }
  0x3b   : > { %v251_v49 = vld [vmem:[%s3587_s6 + $0x188] sm:$0xf]  ;;  %248 = vst [vmem:[%s3591_s7 + $0xbc] sm:$0xf] %v247_v47  ;;  %250 = vst [vmem:[%s3591_s7 + $0xc0] sm:$0xf] %v249_v48 }
  0x3c   : > { %252 = vst [vmem:[%s3591_s7 + $0xc4] sm:$0xf] %v251_v49  ;;  %v253_v50 = vld [vmem:[%s3587_s6 + $0x190] sm:$0xf]  ;;  %v255_v51 = vld [vmem:[%s3587_s6 + $0x198] sm:$0xf] }
  0x3d   : > { %v257_v52 = vld [vmem:[%s3587_s6 + $0x1a0] sm:$0xf]  ;;  %254 = vst [vmem:[%s3591_s7 + $0xc8] sm:$0xf] %v253_v50  ;;  %256 = vst [vmem:[%s3591_s7 + $0xcc] sm:$0xf] %v255_v51 }
  0x3e   : > { %258 = vst [vmem:[%s3591_s7 + $0xd0] sm:$0xf] %v257_v52  ;;  %v259_v53 = vld [vmem:[%s3587_s6 + $0x1a8] sm:$0xf]  ;;  %v261_v54 = vld [vmem:[%s3587_s6 + $0x1b0] sm:$0xf] }
  0x3f   : > { %v263_v55 = vld [vmem:[%s3587_s6 + $0x1b8] sm:$0xf]  ;;  %260 = vst [vmem:[%s3591_s7 + $0xd4] sm:$0xf] %v259_v53  ;;  %262 = vst [vmem:[%s3591_s7 + $0xd8] sm:$0xf] %v261_v54 }
  0x40   : > { %264 = vst [vmem:[%s3591_s7 + $0xdc] sm:$0xf] %v263_v55  ;;  %v265_v56 = vld [vmem:[%s3587_s6 + $0x1c0] sm:$0xf]  ;;  %v267_v57 = vld [vmem:[%s3587_s6 + $0x1c8] sm:$0xf] }
  0x41   : > { %v269_v58 = vld [vmem:[%s3587_s6 + $0x1d0] sm:$0xf]  ;;  %266 = vst [vmem:[%s3591_s7 + $0xe0] sm:$0xf] %v265_v56  ;;  %268 = vst [vmem:[%s3591_s7 + $0xe4] sm:$0xf] %v267_v57 }
  0x42   : > { %270 = vst [vmem:[%s3591_s7 + $0xe8] sm:$0xf] %v269_v58  ;;  %v271_v59 = vld [vmem:[%s3587_s6 + $0x1d8] sm:$0xf]  ;;  %v273_v60 = vld [vmem:[%s3587_s6 + $0x1e0] sm:$0xf] }
  0x43   : > { %v275_v61 = vld [vmem:[%s3587_s6 + $0x1e8] sm:$0xf]  ;;  %272 = vst [vmem:[%s3591_s7 + $0xec] sm:$0xf] %v271_v59  ;;  %274 = vst [vmem:[%s3591_s7 + $0xf0] sm:$0xf] %v273_v60 }
  0x44   : > { %276 = vst [vmem:[%s3591_s7 + $0xf4] sm:$0xf] %v275_v61  ;;  %v277_v62 = vld [vmem:[%s3587_s6 + $0x1f0] sm:$0xf]  ;;  %v279_v63 = vld [vmem:[%s3587_s6 + $0x1f8] sm:$0xf] }
  0x45   : > { %v281_v0 = vld [vmem:[%s3587_s6 + $0x200] sm:$0xf]  ;;  %278 = vst [vmem:[%s3591_s7 + $0xf8] sm:$0xf] %v277_v62  ;;  %280 = vst [vmem:[%s3591_s7 + $0xfc] sm:$0xf] %v279_v63 }
  0x46   : > { %282 = vst [vmem:[%s3591_s7 + $0x100] sm:$0xf] %v281_v0  ;;  %v283_v1 = vld [vmem:[%s3587_s6 + $0x208] sm:$0xf]  ;;  %v285_v2 = vld [vmem:[%s3587_s6 + $0x210] sm:$0xf] }
  0x47   : > { %v287_v3 = vld [vmem:[%s3587_s6 + $0x218] sm:$0xf]  ;;  %284 = vst [vmem:[%s3591_s7 + $0x104] sm:$0xf] %v283_v1  ;;  %286 = vst [vmem:[%s3591_s7 + $0x108] sm:$0xf] %v285_v2 }
  0x48   : > { %288 = vst [vmem:[%s3591_s7 + $0x10c] sm:$0xf] %v287_v3  ;;  %v289_v4 = vld [vmem:[%s3587_s6 + $0x220] sm:$0xf]  ;;  %v291_v5 = vld [vmem:[%s3587_s6 + $0x228] sm:$0xf] }
  0x49   : > { %v293_v6 = vld [vmem:[%s3587_s6 + $0x230] sm:$0xf]  ;;  %290 = vst [vmem:[%s3591_s7 + $0x110] sm:$0xf] %v289_v4  ;;  %292 = vst [vmem:[%s3591_s7 + $0x114] sm:$0xf] %v291_v5 }
  0x4a   : > { %294 = vst [vmem:[%s3591_s7 + $0x118] sm:$0xf] %v293_v6  ;;  %v295_v7 = vld [vmem:[%s3587_s6 + $0x238] sm:$0xf]  ;;  %v297_v8 = vld [vmem:[%s3587_s6 + $0x240] sm:$0xf] }
  0x4b   : > { %v299_v9 = vld [vmem:[%s3587_s6 + $0x248] sm:$0xf]  ;;  %296 = vst [vmem:[%s3591_s7 + $0x11c] sm:$0xf] %v295_v7  ;;  %298 = vst [vmem:[%s3591_s7 + $0x120] sm:$0xf] %v297_v8 }
  0x4c   : > { %300 = vst [vmem:[%s3591_s7 + $0x124] sm:$0xf] %v299_v9  ;;  %v301_v10 = vld [vmem:[%s3587_s6 + $0x250] sm:$0xf]  ;;  %v303_v11 = vld [vmem:[%s3587_s6 + $0x258] sm:$0xf] }
  0x4d   : > { %v305_v12 = vld [vmem:[%s3587_s6 + $0x260] sm:$0xf]  ;;  %302 = vst [vmem:[%s3591_s7 + $0x128] sm:$0xf] %v301_v10  ;;  %304 = vst [vmem:[%s3591_s7 + $0x12c] sm:$0xf] %v303_v11 }
  0x4e   : > { %306 = vst [vmem:[%s3591_s7 + $0x130] sm:$0xf] %v305_v12  ;;  %v307_v13 = vld [vmem:[%s3587_s6 + $0x268] sm:$0xf]  ;;  %v309_v14 = vld [vmem:[%s3587_s6 + $0x270] sm:$0xf] }
  0x4f   : > { %v311_v15 = vld [vmem:[%s3587_s6 + $0x278] sm:$0xf]  ;;  %308 = vst [vmem:[%s3591_s7 + $0x134] sm:$0xf] %v307_v13  ;;  %310 = vst [vmem:[%s3591_s7 + $0x138] sm:$0xf] %v309_v14 }
  0x50   : > { %312 = vst [vmem:[%s3591_s7 + $0x13c] sm:$0xf] %v311_v15  ;;  %v313_v16 = vld [vmem:[%s3587_s6 + $0x280] sm:$0xf]  ;;  %v315_v17 = vld [vmem:[%s3587_s6 + $0x288] sm:$0xf] }
  0x51   : > { %v317_v18 = vld [vmem:[%s3587_s6 + $0x290] sm:$0xf]  ;;  %314 = vst [vmem:[%s3591_s7 + $0x140] sm:$0xf] %v313_v16  ;;  %316 = vst [vmem:[%s3591_s7 + $0x144] sm:$0xf] %v315_v17 }
  0x52   : > { %318 = vst [vmem:[%s3591_s7 + $0x148] sm:$0xf] %v317_v18  ;;  %v319_v19 = vld [vmem:[%s3587_s6 + $0x298] sm:$0xf]  ;;  %v321_v20 = vld [vmem:[%s3587_s6 + $0x2a0] sm:$0xf] }
  0x53   : > { %v323_v21 = vld [vmem:[%s3587_s6 + $0x2a8] sm:$0xf]  ;;  %320 = vst [vmem:[%s3591_s7 + $0x14c] sm:$0xf] %v319_v19  ;;  %322 = vst [vmem:[%s3591_s7 + $0x150] sm:$0xf] %v321_v20 }
  0x54   : > { %324 = vst [vmem:[%s3591_s7 + $0x154] sm:$0xf] %v323_v21  ;;  %v325_v22 = vld [vmem:[%s3587_s6 + $0x2b0] sm:$0xf]  ;;  %v327_v23 = vld [vmem:[%s3587_s6 + $0x2b8] sm:$0xf] }
  0x55   : > { %v329_v24 = vld [vmem:[%s3587_s6 + $0x2c0] sm:$0xf]  ;;  %326 = vst [vmem:[%s3591_s7 + $0x158] sm:$0xf] %v325_v22  ;;  %328 = vst [vmem:[%s3591_s7 + $0x15c] sm:$0xf] %v327_v23 }
  0x56   : > { %330 = vst [vmem:[%s3591_s7 + $0x160] sm:$0xf] %v329_v24  ;;  %v331_v25 = vld [vmem:[%s3587_s6 + $0x2c8] sm:$0xf]  ;;  %v333_v26 = vld [vmem:[%s3587_s6 + $0x2d0] sm:$0xf] }
  0x57   : > { %v335_v27 = vld [vmem:[%s3587_s6 + $0x2d8] sm:$0xf]  ;;  %332 = vst [vmem:[%s3591_s7 + $0x164] sm:$0xf] %v331_v25  ;;  %334 = vst [vmem:[%s3591_s7 + $0x168] sm:$0xf] %v333_v26 }
  0x58   : > { %336 = vst [vmem:[%s3591_s7 + $0x16c] sm:$0xf] %v335_v27  ;;  %v337_v28 = vld [vmem:[%s3587_s6 + $0x2e0] sm:$0xf]  ;;  %v339_v29 = vld [vmem:[%s3587_s6 + $0x2e8] sm:$0xf] }
  0x59   : > { %v341_v30 = vld [vmem:[%s3587_s6 + $0x2f0] sm:$0xf]  ;;  %338 = vst [vmem:[%s3591_s7 + $0x170] sm:$0xf] %v337_v28  ;;  %340 = vst [vmem:[%s3591_s7 + $0x174] sm:$0xf] %v339_v29 }
  0x5a   : > { %342 = vst [vmem:[%s3591_s7 + $0x178] sm:$0xf] %v341_v30  ;;  %v343_v31 = vld [vmem:[%s3587_s6 + $0x2f8] sm:$0xf]  ;;  %v345_v32 = vld [vmem:[%s3587_s6 + $0x300] sm:$0xf] }
  0x5b   : > { %v347_v33 = vld [vmem:[%s3587_s6 + $0x308] sm:$0xf]  ;;  %344 = vst [vmem:[%s3591_s7 + $0x17c] sm:$0xf] %v343_v31  ;;  %346 = vst [vmem:[%s3591_s7 + $0x180] sm:$0xf] %v345_v32 }
  0x5c   : > { %348 = vst [vmem:[%s3591_s7 + $0x184] sm:$0xf] %v347_v33  ;;  %v349_v34 = vld [vmem:[%s3587_s6 + $0x310] sm:$0xf]  ;;  %v351_v35 = vld [vmem:[%s3587_s6 + $0x318] sm:$0xf] }
  0x5d   : > { %v353_v36 = vld [vmem:[%s3587_s6 + $0x320] sm:$0xf]  ;;  %350 = vst [vmem:[%s3591_s7 + $0x188] sm:$0xf] %v349_v34  ;;  %352 = vst [vmem:[%s3591_s7 + $0x18c] sm:$0xf] %v351_v35 }
  0x5e   : > { %354 = vst [vmem:[%s3591_s7 + $0x190] sm:$0xf] %v353_v36  ;;  %v355_v37 = vld [vmem:[%s3587_s6 + $0x328] sm:$0xf]  ;;  %v357_v38 = vld [vmem:[%s3587_s6 + $0x330] sm:$0xf] }
  0x5f   : > { %v359_v39 = vld [vmem:[%s3587_s6 + $0x338] sm:$0xf]  ;;  %356 = vst [vmem:[%s3591_s7 + $0x194] sm:$0xf] %v355_v37  ;;  %358 = vst [vmem:[%s3591_s7 + $0x198] sm:$0xf] %v357_v38 }
  0x60   : > { %360 = vst [vmem:[%s3591_s7 + $0x19c] sm:$0xf] %v359_v39  ;;  %v361_v40 = vld [vmem:[%s3587_s6 + $0x340] sm:$0xf]  ;;  %v363_v41 = vld [vmem:[%s3587_s6 + $0x348] sm:$0xf] }
  0x61   : > { %v365_v42 = vld [vmem:[%s3587_s6 + $0x350] sm:$0xf]  ;;  %362 = vst [vmem:[%s3591_s7 + $0x1a0] sm:$0xf] %v361_v40  ;;  %364 = vst [vmem:[%s3591_s7 + $0x1a4] sm:$0xf] %v363_v41 }
  0x62   : > { %366 = vst [vmem:[%s3591_s7 + $0x1a8] sm:$0xf] %v365_v42  ;;  %v367_v43 = vld [vmem:[%s3587_s6 + $0x358] sm:$0xf]  ;;  %v369_v44 = vld [vmem:[%s3587_s6 + $0x360] sm:$0xf] }
  0x63   : > { %v371_v45 = vld [vmem:[%s3587_s6 + $0x368] sm:$0xf]  ;;  %368 = vst [vmem:[%s3591_s7 + $0x1ac] sm:$0xf] %v367_v43  ;;  %370 = vst [vmem:[%s3591_s7 + $0x1b0] sm:$0xf] %v369_v44 }
  0x64   : > { %372 = vst [vmem:[%s3591_s7 + $0x1b4] sm:$0xf] %v371_v45  ;;  %v373_v46 = vld [vmem:[%s3587_s6 + $0x370] sm:$0xf]  ;;  %v375_v47 = vld [vmem:[%s3587_s6 + $0x378] sm:$0xf] }
  0x65   : > { %v377_v48 = vld [vmem:[%s3587_s6 + $0x380] sm:$0xf]  ;;  %374 = vst [vmem:[%s3591_s7 + $0x1b8] sm:$0xf] %v373_v46  ;;  %376 = vst [vmem:[%s3591_s7 + $0x1bc] sm:$0xf] %v375_v47 }
  0x66   : > { %378 = vst [vmem:[%s3591_s7 + $0x1c0] sm:$0xf] %v377_v48  ;;  %v379_v49 = vld [vmem:[%s3587_s6 + $0x388] sm:$0xf]  ;;  %v381_v50 = vld [vmem:[%s3587_s6 + $0x390] sm:$0xf] }
  0x67   : > { %v383_v51 = vld [vmem:[%s3587_s6 + $0x398] sm:$0xf]  ;;  %380 = vst [vmem:[%s3591_s7 + $0x1c4] sm:$0xf] %v379_v49  ;;  %382 = vst [vmem:[%s3591_s7 + $0x1c8] sm:$0xf] %v381_v50 }
  0x68   : > { %384 = vst [vmem:[%s3591_s7 + $0x1cc] sm:$0xf] %v383_v51  ;;  %v385_v52 = vld [vmem:[%s3587_s6 + $0x3a0] sm:$0xf]  ;;  %v387_v53 = vld [vmem:[%s3587_s6 + $0x3a8] sm:$0xf] }
  0x69   : > { %v389_v54 = vld [vmem:[%s3587_s6 + $0x3b0] sm:$0xf]  ;;  %386 = vst [vmem:[%s3591_s7 + $0x1d0] sm:$0xf] %v385_v52  ;;  %388 = vst [vmem:[%s3591_s7 + $0x1d4] sm:$0xf] %v387_v53 }
  0x6a   : > { %390 = vst [vmem:[%s3591_s7 + $0x1d8] sm:$0xf] %v389_v54  ;;  %v391_v55 = vld [vmem:[%s3587_s6 + $0x3b8] sm:$0xf]  ;;  %v393_v56 = vld [vmem:[%s3587_s6 + $0x3c0] sm:$0xf] }
  0x6b   : > { %v395_v57 = vld [vmem:[%s3587_s6 + $0x3c8] sm:$0xf]  ;;  %392 = vst [vmem:[%s3591_s7 + $0x1dc] sm:$0xf] %v391_v55  ;;  %394 = vst [vmem:[%s3591_s7 + $0x1e0] sm:$0xf] %v393_v56 }
  0x6c   : > { %396 = vst [vmem:[%s3591_s7 + $0x1e4] sm:$0xf] %v395_v57  ;;  %v397_v58 = vld [vmem:[%s3587_s6 + $0x3d0] sm:$0xf]  ;;  %v399_v59 = vld [vmem:[%s3587_s6 + $0x3d8] sm:$0xf] }
  0x6d   : > { %v401_v60 = vld [vmem:[%s3587_s6 + $0x3e0] sm:$0xf]  ;;  %398 = vst [vmem:[%s3591_s7 + $0x1e8] sm:$0xf] %v397_v58  ;;  %400 = vst [vmem:[%s3591_s7 + $0x1ec] sm:$0xf] %v399_v59 }
  0x6e   : > { %402 = vst [vmem:[%s3591_s7 + $0x1f0] sm:$0xf] %v401_v60  ;;  %v403_v61 = vld [vmem:[%s3587_s6 + $0x3e8] sm:$0xf]  ;;  %v405_v62 = vld [vmem:[%s3587_s6 + $0x3f0] sm:$0xf] }
  0x6f   : > { %v407_v63 = vld [vmem:[%s3587_s6 + $0x3f8] sm:$0xf]  ;;  %404 = vst [vmem:[%s3591_s7 + $0x1f4] sm:$0xf] %v403_v61  ;;  %406 = vst [vmem:[%s3591_s7 + $0x1f8] sm:$0xf] %v405_v62 }
  0x70   : > { %408 = vst [vmem:[%s3591_s7 + $0x1fc] sm:$0xf] %v407_v63  ;;  %v409_v0 = vld [vmem:[%s3587_s6 + $0x400] sm:$0xf]  ;;  %v411_v1 = vld [vmem:[%s3587_s6 + $0x408] sm:$0xf] }
  0x71   : > { %v413_v2 = vld [vmem:[%s3587_s6 + $0x410] sm:$0xf]  ;;  %410 = vst [vmem:[%s3591_s7 + $0x200] sm:$0xf] %v409_v0  ;;  %412 = vst [vmem:[%s3591_s7 + $0x204] sm:$0xf] %v411_v1 }
  0x72   : > { %414 = vst [vmem:[%s3591_s7 + $0x208] sm:$0xf] %v413_v2  ;;  %v415_v3 = vld [vmem:[%s3587_s6 + $0x418] sm:$0xf]  ;;  %v417_v4 = vld [vmem:[%s3587_s6 + $0x420] sm:$0xf] }
  0x73   : > { %v419_v5 = vld [vmem:[%s3587_s6 + $0x428] sm:$0xf]  ;;  %416 = vst [vmem:[%s3591_s7 + $0x20c] sm:$0xf] %v415_v3  ;;  %418 = vst [vmem:[%s3591_s7 + $0x210] sm:$0xf] %v417_v4 }
  0x74   : > { %420 = vst [vmem:[%s3591_s7 + $0x214] sm:$0xf] %v419_v5  ;;  %v421_v6 = vld [vmem:[%s3587_s6 + $0x430] sm:$0xf]  ;;  %v423_v7 = vld [vmem:[%s3587_s6 + $0x438] sm:$0xf] }
  0x75   : > { %v425_v8 = vld [vmem:[%s3587_s6 + $0x440] sm:$0xf]  ;;  %422 = vst [vmem:[%s3591_s7 + $0x218] sm:$0xf] %v421_v6  ;;  %424 = vst [vmem:[%s3591_s7 + $0x21c] sm:$0xf] %v423_v7 }
  0x76   : > { %426 = vst [vmem:[%s3591_s7 + $0x220] sm:$0xf] %v425_v8  ;;  %v427_v9 = vld [vmem:[%s3587_s6 + $0x448] sm:$0xf]  ;;  %v429_v10 = vld [vmem:[%s3587_s6 + $0x450] sm:$0xf] }
  0x77   : > { %v431_v11 = vld [vmem:[%s3587_s6 + $0x458] sm:$0xf]  ;;  %428 = vst [vmem:[%s3591_s7 + $0x224] sm:$0xf] %v427_v9  ;;  %430 = vst [vmem:[%s3591_s7 + $0x228] sm:$0xf] %v429_v10 }
  0x78   : > { %432 = vst [vmem:[%s3591_s7 + $0x22c] sm:$0xf] %v431_v11  ;;  %v433_v12 = vld [vmem:[%s3587_s6 + $0x460] sm:$0xf]  ;;  %v435_v13 = vld [vmem:[%s3587_s6 + $0x468] sm:$0xf] }
  0x79   : > { %v437_v14 = vld [vmem:[%s3587_s6 + $0x470] sm:$0xf]  ;;  %434 = vst [vmem:[%s3591_s7 + $0x230] sm:$0xf] %v433_v12  ;;  %436 = vst [vmem:[%s3591_s7 + $0x234] sm:$0xf] %v435_v13 }
  0x7a   : > { %438 = vst [vmem:[%s3591_s7 + $0x238] sm:$0xf] %v437_v14  ;;  %v439_v15 = vld [vmem:[%s3587_s6 + $0x478] sm:$0xf]  ;;  %v441_v16 = vld [vmem:[%s3587_s6 + $0x480] sm:$0xf] }
  0x7b   : > { %v443_v17 = vld [vmem:[%s3587_s6 + $0x488] sm:$0xf]  ;;  %440 = vst [vmem:[%s3591_s7 + $0x23c] sm:$0xf] %v439_v15  ;;  %442 = vst [vmem:[%s3591_s7 + $0x240] sm:$0xf] %v441_v16 }
  0x7c   : > { %444 = vst [vmem:[%s3591_s7 + $0x244] sm:$0xf] %v443_v17  ;;  %v445_v18 = vld [vmem:[%s3587_s6 + $0x490] sm:$0xf]  ;;  %v447_v19 = vld [vmem:[%s3587_s6 + $0x498] sm:$0xf] }
  0x7d   : > { %v449_v20 = vld [vmem:[%s3587_s6 + $0x4a0] sm:$0xf]  ;;  %446 = vst [vmem:[%s3591_s7 + $0x248] sm:$0xf] %v445_v18  ;;  %448 = vst [vmem:[%s3591_s7 + $0x24c] sm:$0xf] %v447_v19 }
  0x7e   : > { %450 = vst [vmem:[%s3591_s7 + $0x250] sm:$0xf] %v449_v20  ;;  %v451_v21 = vld [vmem:[%s3587_s6 + $0x4a8] sm:$0xf]  ;;  %v453_v22 = vld [vmem:[%s3587_s6 + $0x4b0] sm:$0xf] }
  0x7f   : > { %v455_v23 = vld [vmem:[%s3587_s6 + $0x4b8] sm:$0xf]  ;;  %452 = vst [vmem:[%s3591_s7 + $0x254] sm:$0xf] %v451_v21  ;;  %454 = vst [vmem:[%s3591_s7 + $0x258] sm:$0xf] %v453_v22 }
  0x80   : > { %456 = vst [vmem:[%s3591_s7 + $0x25c] sm:$0xf] %v455_v23  ;;  %v457_v24 = vld [vmem:[%s3587_s6 + $0x4c0] sm:$0xf]  ;;  %v459_v25 = vld [vmem:[%s3587_s6 + $0x4c8] sm:$0xf] }
  0x81   : > { %v461_v26 = vld [vmem:[%s3587_s6 + $0x4d0] sm:$0xf]  ;;  %458 = vst [vmem:[%s3591_s7 + $0x260] sm:$0xf] %v457_v24  ;;  %460 = vst [vmem:[%s3591_s7 + $0x264] sm:$0xf] %v459_v25 }
  0x82   : > { %462 = vst [vmem:[%s3591_s7 + $0x268] sm:$0xf] %v461_v26  ;;  %v463_v27 = vld [vmem:[%s3587_s6 + $0x4d8] sm:$0xf]  ;;  %v465_v28 = vld [vmem:[%s3587_s6 + $0x4e0] sm:$0xf] }
  0x83   : > { %v467_v29 = vld [vmem:[%s3587_s6 + $0x4e8] sm:$0xf]  ;;  %464 = vst [vmem:[%s3591_s7 + $0x26c] sm:$0xf] %v463_v27  ;;  %466 = vst [vmem:[%s3591_s7 + $0x270] sm:$0xf] %v465_v28 }
  0x84   : > { %468 = vst [vmem:[%s3591_s7 + $0x274] sm:$0xf] %v467_v29  ;;  %v469_v30 = vld [vmem:[%s3587_s6 + $0x4f0] sm:$0xf]  ;;  %v471_v31 = vld [vmem:[%s3587_s6 + $0x4f8] sm:$0xf] }
  0x85   : > { %v473_v32 = vld [vmem:[%s3587_s6 + $0x500] sm:$0xf]  ;;  %470 = vst [vmem:[%s3591_s7 + $0x278] sm:$0xf] %v469_v30  ;;  %472 = vst [vmem:[%s3591_s7 + $0x27c] sm:$0xf] %v471_v31 }
  0x86   : > { %474 = vst [vmem:[%s3591_s7 + $0x280] sm:$0xf] %v473_v32  ;;  %v475_v33 = vld [vmem:[%s3587_s6 + $0x508] sm:$0xf]  ;;  %v477_v34 = vld [vmem:[%s3587_s6 + $0x510] sm:$0xf] }
  0x87   : > { %v479_v35 = vld [vmem:[%s3587_s6 + $0x518] sm:$0xf]  ;;  %476 = vst [vmem:[%s3591_s7 + $0x284] sm:$0xf] %v475_v33  ;;  %478 = vst [vmem:[%s3591_s7 + $0x288] sm:$0xf] %v477_v34 }
  0x88   : > { %480 = vst [vmem:[%s3591_s7 + $0x28c] sm:$0xf] %v479_v35  ;;  %v481_v36 = vld [vmem:[%s3587_s6 + $0x520] sm:$0xf]  ;;  %v483_v37 = vld [vmem:[%s3587_s6 + $0x528] sm:$0xf] }
  0x89   : > { %v485_v38 = vld [vmem:[%s3587_s6 + $0x530] sm:$0xf]  ;;  %482 = vst [vmem:[%s3591_s7 + $0x290] sm:$0xf] %v481_v36  ;;  %484 = vst [vmem:[%s3591_s7 + $0x294] sm:$0xf] %v483_v37 }
  0x8a   : > { %486 = vst [vmem:[%s3591_s7 + $0x298] sm:$0xf] %v485_v38  ;;  %v487_v39 = vld [vmem:[%s3587_s6 + $0x538] sm:$0xf]  ;;  %v489_v40 = vld [vmem:[%s3587_s6 + $0x540] sm:$0xf] }
  0x8b   : > { %v491_v41 = vld [vmem:[%s3587_s6 + $0x548] sm:$0xf]  ;;  %488 = vst [vmem:[%s3591_s7 + $0x29c] sm:$0xf] %v487_v39  ;;  %490 = vst [vmem:[%s3591_s7 + $0x2a0] sm:$0xf] %v489_v40 }
  0x8c   : > { %492 = vst [vmem:[%s3591_s7 + $0x2a4] sm:$0xf] %v491_v41  ;;  %v493_v42 = vld [vmem:[%s3587_s6 + $0x550] sm:$0xf]  ;;  %v495_v43 = vld [vmem:[%s3587_s6 + $0x558] sm:$0xf] }
  0x8d   : > { %v497_v44 = vld [vmem:[%s3587_s6 + $0x560] sm:$0xf]  ;;  %494 = vst [vmem:[%s3591_s7 + $0x2a8] sm:$0xf] %v493_v42  ;;  %496 = vst [vmem:[%s3591_s7 + $0x2ac] sm:$0xf] %v495_v43 }
  0x8e   : > { %498 = vst [vmem:[%s3591_s7 + $0x2b0] sm:$0xf] %v497_v44  ;;  %v499_v45 = vld [vmem:[%s3587_s6 + $0x568] sm:$0xf]  ;;  %v501_v46 = vld [vmem:[%s3587_s6 + $0x570] sm:$0xf] }
  0x8f   : > { %v503_v47 = vld [vmem:[%s3587_s6 + $0x578] sm:$0xf]  ;;  %500 = vst [vmem:[%s3591_s7 + $0x2b4] sm:$0xf] %v499_v45  ;;  %502 = vst [vmem:[%s3591_s7 + $0x2b8] sm:$0xf] %v501_v46 }
  0x90   : > { %504 = vst [vmem:[%s3591_s7 + $0x2bc] sm:$0xf] %v503_v47  ;;  %v505_v48 = vld [vmem:[%s3587_s6 + $0x580] sm:$0xf]  ;;  %v507_v49 = vld [vmem:[%s3587_s6 + $0x588] sm:$0xf] }
  0x91   : > { %v509_v50 = vld [vmem:[%s3587_s6 + $0x590] sm:$0xf]  ;;  %506 = vst [vmem:[%s3591_s7 + $0x2c0] sm:$0xf] %v505_v48  ;;  %508 = vst [vmem:[%s3591_s7 + $0x2c4] sm:$0xf] %v507_v49 }
  0x92   : > { %510 = vst [vmem:[%s3591_s7 + $0x2c8] sm:$0xf] %v509_v50  ;;  %v511_v51 = vld [vmem:[%s3587_s6 + $0x598] sm:$0xf]  ;;  %v513_v52 = vld [vmem:[%s3587_s6 + $0x5a0] sm:$0xf] }
  0x93   : > { %v515_v53 = vld [vmem:[%s3587_s6 + $0x5a8] sm:$0xf]  ;;  %512 = vst [vmem:[%s3591_s7 + $0x2cc] sm:$0xf] %v511_v51  ;;  %514 = vst [vmem:[%s3591_s7 + $0x2d0] sm:$0xf] %v513_v52 }
  0x94   : > { %516 = vst [vmem:[%s3591_s7 + $0x2d4] sm:$0xf] %v515_v53  ;;  %v517_v54 = vld [vmem:[%s3587_s6 + $0x5b0] sm:$0xf]  ;;  %v519_v55 = vld [vmem:[%s3587_s6 + $0x5b8] sm:$0xf] }
  0x95   : > { %v521_v56 = vld [vmem:[%s3587_s6 + $0x5c0] sm:$0xf]  ;;  %518 = vst [vmem:[%s3591_s7 + $0x2d8] sm:$0xf] %v517_v54  ;;  %520 = vst [vmem:[%s3591_s7 + $0x2dc] sm:$0xf] %v519_v55 }
  0x96   : > { %522 = vst [vmem:[%s3591_s7 + $0x2e0] sm:$0xf] %v521_v56  ;;  %v523_v57 = vld [vmem:[%s3587_s6 + $0x5c8] sm:$0xf]  ;;  %v525_v58 = vld [vmem:[%s3587_s6 + $0x5d0] sm:$0xf] }
  0x97   : > { %v527_v59 = vld [vmem:[%s3587_s6 + $0x5d8] sm:$0xf]  ;;  %524 = vst [vmem:[%s3591_s7 + $0x2e4] sm:$0xf] %v523_v57  ;;  %526 = vst [vmem:[%s3591_s7 + $0x2e8] sm:$0xf] %v525_v58 }
  0x98   : > { %528 = vst [vmem:[%s3591_s7 + $0x2ec] sm:$0xf] %v527_v59  ;;  %v529_v60 = vld [vmem:[%s3587_s6 + $0x5e0] sm:$0xf]  ;;  %v531_v61 = vld [vmem:[%s3587_s6 + $0x5e8] sm:$0xf] }
  0x99   : > { %v533_v62 = vld [vmem:[%s3587_s6 + $0x5f0] sm:$0xf]  ;;  %530 = vst [vmem:[%s3591_s7 + $0x2f0] sm:$0xf] %v529_v60  ;;  %532 = vst [vmem:[%s3591_s7 + $0x2f4] sm:$0xf] %v531_v61 }
  0x9a   : > { %534 = vst [vmem:[%s3591_s7 + $0x2f8] sm:$0xf] %v533_v62  ;;  %v535_v63 = vld [vmem:[%s3587_s6 + $0x5f8] sm:$0xf]  ;;  %v537_v0 = vld [vmem:[%s3587_s6 + $0x600] sm:$0xf] }
  0x9b   : > { %v539_v1 = vld [vmem:[%s3587_s6 + $0x608] sm:$0xf]  ;;  %536 = vst [vmem:[%s3591_s7 + $0x2fc] sm:$0xf] %v535_v63  ;;  %538 = vst [vmem:[%s3591_s7 + $0x300] sm:$0xf] %v537_v0 }
  0x9c   : > { %540 = vst [vmem:[%s3591_s7 + $0x304] sm:$0xf] %v539_v1  ;;  %v541_v2 = vld [vmem:[%s3587_s6 + $0x610] sm:$0xf]  ;;  %v543_v3 = vld [vmem:[%s3587_s6 + $0x618] sm:$0xf] }
  0x9d   : > { %v545_v4 = vld [vmem:[%s3587_s6 + $0x620] sm:$0xf]  ;;  %542 = vst [vmem:[%s3591_s7 + $0x308] sm:$0xf] %v541_v2  ;;  %544 = vst [vmem:[%s3591_s7 + $0x30c] sm:$0xf] %v543_v3 }
  0x9e   : > { %546 = vst [vmem:[%s3591_s7 + $0x310] sm:$0xf] %v545_v4  ;;  %v547_v5 = vld [vmem:[%s3587_s6 + $0x628] sm:$0xf]  ;;  %v549_v6 = vld [vmem:[%s3587_s6 + $0x630] sm:$0xf] }
  0x9f   : > { %v551_v7 = vld [vmem:[%s3587_s6 + $0x638] sm:$0xf]  ;;  %548 = vst [vmem:[%s3591_s7 + $0x314] sm:$0xf] %v547_v5  ;;  %550 = vst [vmem:[%s3591_s7 + $0x318] sm:$0xf] %v549_v6 }
  0xa0   : > { %552 = vst [vmem:[%s3591_s7 + $0x31c] sm:$0xf] %v551_v7  ;;  %v553_v8 = vld [vmem:[%s3587_s6 + $0x640] sm:$0xf]  ;;  %v555_v9 = vld [vmem:[%s3587_s6 + $0x648] sm:$0xf] }
  0xa1   : > { %v557_v10 = vld [vmem:[%s3587_s6 + $0x650] sm:$0xf]  ;;  %554 = vst [vmem:[%s3591_s7 + $0x320] sm:$0xf] %v553_v8  ;;  %556 = vst [vmem:[%s3591_s7 + $0x324] sm:$0xf] %v555_v9 }
  0xa2   : > { %558 = vst [vmem:[%s3591_s7 + $0x328] sm:$0xf] %v557_v10  ;;  %v559_v11 = vld [vmem:[%s3587_s6 + $0x658] sm:$0xf]  ;;  %v561_v12 = vld [vmem:[%s3587_s6 + $0x660] sm:$0xf] }
  0xa3   : > { %v563_v13 = vld [vmem:[%s3587_s6 + $0x668] sm:$0xf]  ;;  %560 = vst [vmem:[%s3591_s7 + $0x32c] sm:$0xf] %v559_v11  ;;  %562 = vst [vmem:[%s3591_s7 + $0x330] sm:$0xf] %v561_v12 }
  0xa4   : > { %564 = vst [vmem:[%s3591_s7 + $0x334] sm:$0xf] %v563_v13  ;;  %v565_v14 = vld [vmem:[%s3587_s6 + $0x670] sm:$0xf]  ;;  %v567_v15 = vld [vmem:[%s3587_s6 + $0x678] sm:$0xf] }
  0xa5   : > { %v569_v16 = vld [vmem:[%s3587_s6 + $0x680] sm:$0xf]  ;;  %566 = vst [vmem:[%s3591_s7 + $0x338] sm:$0xf] %v565_v14  ;;  %568 = vst [vmem:[%s3591_s7 + $0x33c] sm:$0xf] %v567_v15 }
  0xa6   : > { %570 = vst [vmem:[%s3591_s7 + $0x340] sm:$0xf] %v569_v16  ;;  %v571_v17 = vld [vmem:[%s3587_s6 + $0x688] sm:$0xf]  ;;  %v573_v18 = vld [vmem:[%s3587_s6 + $0x690] sm:$0xf] }
  0xa7   : > { %v575_v19 = vld [vmem:[%s3587_s6 + $0x698] sm:$0xf]  ;;  %572 = vst [vmem:[%s3591_s7 + $0x344] sm:$0xf] %v571_v17  ;;  %574 = vst [vmem:[%s3591_s7 + $0x348] sm:$0xf] %v573_v18 }
  0xa8   : > { %576 = vst [vmem:[%s3591_s7 + $0x34c] sm:$0xf] %v575_v19  ;;  %v577_v20 = vld [vmem:[%s3587_s6 + $0x6a0] sm:$0xf]  ;;  %v579_v21 = vld [vmem:[%s3587_s6 + $0x6a8] sm:$0xf] }
  0xa9   : > { %v581_v22 = vld [vmem:[%s3587_s6 + $0x6b0] sm:$0xf]  ;;  %578 = vst [vmem:[%s3591_s7 + $0x350] sm:$0xf] %v577_v20  ;;  %580 = vst [vmem:[%s3591_s7 + $0x354] sm:$0xf] %v579_v21 }
  0xaa   : > { %582 = vst [vmem:[%s3591_s7 + $0x358] sm:$0xf] %v581_v22  ;;  %v583_v23 = vld [vmem:[%s3587_s6 + $0x6b8] sm:$0xf]  ;;  %v585_v24 = vld [vmem:[%s3587_s6 + $0x6c0] sm:$0xf] }
  0xab   : > { %v587_v25 = vld [vmem:[%s3587_s6 + $0x6c8] sm:$0xf]  ;;  %584 = vst [vmem:[%s3591_s7 + $0x35c] sm:$0xf] %v583_v23  ;;  %586 = vst [vmem:[%s3591_s7 + $0x360] sm:$0xf] %v585_v24 }
  0xac   : > { %588 = vst [vmem:[%s3591_s7 + $0x364] sm:$0xf] %v587_v25  ;;  %v589_v26 = vld [vmem:[%s3587_s6 + $0x6d0] sm:$0xf]  ;;  %v591_v27 = vld [vmem:[%s3587_s6 + $0x6d8] sm:$0xf] }
  0xad   : > { %v593_v28 = vld [vmem:[%s3587_s6 + $0x6e0] sm:$0xf]  ;;  %590 = vst [vmem:[%s3591_s7 + $0x368] sm:$0xf] %v589_v26  ;;  %592 = vst [vmem:[%s3591_s7 + $0x36c] sm:$0xf] %v591_v27 }
  0xae   : > { %594 = vst [vmem:[%s3591_s7 + $0x370] sm:$0xf] %v593_v28  ;;  %v595_v29 = vld [vmem:[%s3587_s6 + $0x6e8] sm:$0xf]  ;;  %v597_v30 = vld [vmem:[%s3587_s6 + $0x6f0] sm:$0xf] }
  0xaf   : > { %v599_v31 = vld [vmem:[%s3587_s6 + $0x6f8] sm:$0xf]  ;;  %596 = vst [vmem:[%s3591_s7 + $0x374] sm:$0xf] %v595_v29  ;;  %598 = vst [vmem:[%s3591_s7 + $0x378] sm:$0xf] %v597_v30 }
  0xb0   : > { %600 = vst [vmem:[%s3591_s7 + $0x37c] sm:$0xf] %v599_v31  ;;  %v601_v32 = vld [vmem:[%s3587_s6 + $0x700] sm:$0xf]  ;;  %v603_v33 = vld [vmem:[%s3587_s6 + $0x708] sm:$0xf] }
  0xb1   : > { %v605_v34 = vld [vmem:[%s3587_s6 + $0x710] sm:$0xf]  ;;  %602 = vst [vmem:[%s3591_s7 + $0x380] sm:$0xf] %v601_v32  ;;  %604 = vst [vmem:[%s3591_s7 + $0x384] sm:$0xf] %v603_v33 }
  0xb2   : > { %606 = vst [vmem:[%s3591_s7 + $0x388] sm:$0xf] %v605_v34  ;;  %v607_v35 = vld [vmem:[%s3587_s6 + $0x718] sm:$0xf]  ;;  %v609_v36 = vld [vmem:[%s3587_s6 + $0x720] sm:$0xf] }
  0xb3   : > { %v611_v37 = vld [vmem:[%s3587_s6 + $0x728] sm:$0xf]  ;;  %608 = vst [vmem:[%s3591_s7 + $0x38c] sm:$0xf] %v607_v35  ;;  %610 = vst [vmem:[%s3591_s7 + $0x390] sm:$0xf] %v609_v36 }
  0xb4   : > { %612 = vst [vmem:[%s3591_s7 + $0x394] sm:$0xf] %v611_v37  ;;  %v613_v38 = vld [vmem:[%s3587_s6 + $0x730] sm:$0xf]  ;;  %v615_v39 = vld [vmem:[%s3587_s6 + $0x738] sm:$0xf] }
  0xb5   : > { %v617_v40 = vld [vmem:[%s3587_s6 + $0x740] sm:$0xf]  ;;  %614 = vst [vmem:[%s3591_s7 + $0x398] sm:$0xf] %v613_v38  ;;  %616 = vst [vmem:[%s3591_s7 + $0x39c] sm:$0xf] %v615_v39 }
  0xb6   : > { %618 = vst [vmem:[%s3591_s7 + $0x3a0] sm:$0xf] %v617_v40  ;;  %v619_v41 = vld [vmem:[%s3587_s6 + $0x748] sm:$0xf]  ;;  %v621_v42 = vld [vmem:[%s3587_s6 + $0x750] sm:$0xf] }
  0xb7   : > { %v623_v43 = vld [vmem:[%s3587_s6 + $0x758] sm:$0xf]  ;;  %620 = vst [vmem:[%s3591_s7 + $0x3a4] sm:$0xf] %v619_v41  ;;  %622 = vst [vmem:[%s3591_s7 + $0x3a8] sm:$0xf] %v621_v42 }
  0xb8   : > { %624 = vst [vmem:[%s3591_s7 + $0x3ac] sm:$0xf] %v623_v43  ;;  %v625_v44 = vld [vmem:[%s3587_s6 + $0x760] sm:$0xf]  ;;  %v627_v45 = vld [vmem:[%s3587_s6 + $0x768] sm:$0xf] }
  0xb9   : > { %v629_v46 = vld [vmem:[%s3587_s6 + $0x770] sm:$0xf]  ;;  %626 = vst [vmem:[%s3591_s7 + $0x3b0] sm:$0xf] %v625_v44  ;;  %628 = vst [vmem:[%s3591_s7 + $0x3b4] sm:$0xf] %v627_v45 }
  0xba   : > { %630 = vst [vmem:[%s3591_s7 + $0x3b8] sm:$0xf] %v629_v46  ;;  %v631_v47 = vld [vmem:[%s3587_s6 + $0x778] sm:$0xf]  ;;  %v633_v48 = vld [vmem:[%s3587_s6 + $0x780] sm:$0xf] }
  0xbb   : > { %v635_v49 = vld [vmem:[%s3587_s6 + $0x788] sm:$0xf]  ;;  %632 = vst [vmem:[%s3591_s7 + $0x3bc] sm:$0xf] %v631_v47  ;;  %634 = vst [vmem:[%s3591_s7 + $0x3c0] sm:$0xf] %v633_v48 }
  0xbc   : > { %636 = vst [vmem:[%s3591_s7 + $0x3c4] sm:$0xf] %v635_v49  ;;  %v637_v50 = vld [vmem:[%s3587_s6 + $0x790] sm:$0xf]  ;;  %v639_v51 = vld [vmem:[%s3587_s6 + $0x798] sm:$0xf] }
  0xbd   : > { %v641_v52 = vld [vmem:[%s3587_s6 + $0x7a0] sm:$0xf]  ;;  %638 = vst [vmem:[%s3591_s7 + $0x3c8] sm:$0xf] %v637_v50  ;;  %640 = vst [vmem:[%s3591_s7 + $0x3cc] sm:$0xf] %v639_v51 }
  0xbe   : > { %642 = vst [vmem:[%s3591_s7 + $0x3d0] sm:$0xf] %v641_v52  ;;  %v643_v53 = vld [vmem:[%s3587_s6 + $0x7a8] sm:$0xf]  ;;  %v645_v54 = vld [vmem:[%s3587_s6 + $0x7b0] sm:$0xf] }
  0xbf   : > { %v647_v55 = vld [vmem:[%s3587_s6 + $0x7b8] sm:$0xf]  ;;  %644 = vst [vmem:[%s3591_s7 + $0x3d4] sm:$0xf] %v643_v53  ;;  %646 = vst [vmem:[%s3591_s7 + $0x3d8] sm:$0xf] %v645_v54 }
  0xc0   : > { %648 = vst [vmem:[%s3591_s7 + $0x3dc] sm:$0xf] %v647_v55  ;;  %v649_v56 = vld [vmem:[%s3587_s6 + $0x7c0] sm:$0xf]  ;;  %v651_v57 = vld [vmem:[%s3587_s6 + $0x7c8] sm:$0xf] }
  0xc1   : > { %v653_v58 = vld [vmem:[%s3587_s6 + $0x7d0] sm:$0xf]  ;;  %650 = vst [vmem:[%s3591_s7 + $0x3e0] sm:$0xf] %v649_v56  ;;  %652 = vst [vmem:[%s3591_s7 + $0x3e4] sm:$0xf] %v651_v57 }
  0xc2   : > { %654 = vst [vmem:[%s3591_s7 + $0x3e8] sm:$0xf] %v653_v58  ;;  %v655_v59 = vld [vmem:[%s3587_s6 + $0x7d8] sm:$0xf]  ;;  %v657_v60 = vld [vmem:[%s3587_s6 + $0x7e0] sm:$0xf] }
  0xc3   : > { %v659_v61 = vld [vmem:[%s3587_s6 + $0x7e8] sm:$0xf]  ;;  %656 = vst [vmem:[%s3591_s7 + $0x3ec] sm:$0xf] %v655_v59  ;;  %658 = vst [vmem:[%s3591_s7 + $0x3f0] sm:$0xf] %v657_v60 }
  0xc4   : > { %660 = vst [vmem:[%s3591_s7 + $0x3f4] sm:$0xf] %v659_v61  ;;  %v661_v62 = vld [vmem:[%s3587_s6 + $0x7f0] sm:$0xf]  ;;  %v663_v63 = vld [vmem:[%s3587_s6 + $0x7f8] sm:$0xf] }
  0xc5   : > { %662 = vst [vmem:[%s3591_s7 + $0x3f8] sm:$0xf] %v661_v62  ;;  %664 = vst [vmem:[%s3591_s7 + $0x3fc] sm:$0xf] %v663_v63 }
  0xc6 PF: > { %p2875_p11 = scmp.ge.s32.totalorder %s3490_s17, 1  ;;  %p1198_p12 = scmp.lt.s32.totalorder %s3490_s17, 5 }
  0xc8   : > { %p1199_p13 = pnand %p2875_p11, %p1198_p12 }
  0xc9   : > { %s1205_s8 = sand.u32 (!%p1199_p13), 1, %s3466_s11   ;;  %s2878_s11 = sshll.u32 (!%p1199_p13), %s3478_s14, 1 }
  0xca   : > { %1202 = sbr.rel (%p1199_p13) target bundleno = 606 (0x25e), region = 65  ;;  %s2876_s18 = sshll.u32 (!%p1199_p13), %s1205_s8, 10 }
  0xcb   : > { %s4106_s21 = scalar_lea.vmem (!%p1199_p13), [#allocation2], %s2876_s18  ;;  %p1232_p0 = scmp.lt.s32.totalorder (!%p1199_p13), %s2878_s11, 3 }
  0xcc   : > { %v3290_v0 = vld [vmem:[%s4106_s21 + $0x40] sm:$0xff] (!%p1199_p13)   ;;  %v3294_v4 = vld [vmem:[%s4106_s21 + $0x48] sm:$0xff] (!%p1199_p13)   ;;  %v3298_v8 = vld [vmem:[%s4106_s21 + $0x50] sm:$0xff] (!%p1199_p13)   ;;  %s1228_s29 = sand.u32 (!%p1199_p13), 1, %s3458_s9  }
  0xcd   : > { %v3291_v1 = vld [vmem:[%s4106_s21 + $0xc0] sm:$0xff] (!%p1199_p13)   ;;  %3042 = vmatprep.subr.bf16.mxu0 (!%p1199_p13), %v3290_v0  ;;  %v3295_v5 = vld [vmem:[%s4106_s21 + $0xc8] sm:$0xff] (!%p1199_p13)   ;;  %v3299_v9 = vld [vmem:[%s4106_s21 + $0xd0] sm:$0xff] (!%p1199_p13)   ;;  %s2877_s30 = sshll.u32 (!%p1199_p13), %s1228_s29, 3 }
  0xce   : > { %v3292_v2 = vld [vmem:[%s4106_s21] sm:$0xff] (!%p1199_p13)   ;;  %3064 = vmatprep.subr.bf16.mxu1 (!%p1199_p13), %v3291_v1  ;;  %v3296_v6 = vld [vmem:[%s4106_s21 + $0x8] sm:$0xff] (!%p1199_p13)   ;;  %v3300_v10 = vld [vmem:[%s4106_s21 + $0x10] sm:$0xff] (!%p1199_p13)   ;;  %s1230_s3 = scalar_lea.vmem (!%p1199_p13), [#allocation3], %s2877_s30 }
  0xcf   : > { %v3293_v3 = vld [vmem:[%s4106_s21 + $0x80] sm:$0xff] (!%p1199_p13)   ;;  %3043 = vmatpush3.bf16.msra.mxu0 (!%p1199_p13), %v3292_v2  ;;  %v3297_v7 = vld [vmem:[%s4106_s21 + $0x88] sm:$0xff] (!%p1199_p13)   ;;  %v3301_v11 = vld [vmem:[%s4106_s21 + $0x90] sm:$0xff] (!%p1199_p13)  }
  0xd0   : > { %3065 = vmatpush3.bf16.msra.mxu1 (!%p1199_p13), %v3293_v3  ;;  %3044 = vmatprep.subr.bf16.mxu0 (!%p1199_p13), %v3294_v4  ;;  %v3302_v12 = vld [vmem:[%s4106_s21 + $0x58] sm:$0xff] (!%p1199_p13)   ;;  %v3306_v16 = vld [vmem:[%s4106_s21 + $0x60] sm:$0xff] (!%p1199_p13)   ;;  %v3310_v20 = vld [vmem:[%s4106_s21 + $0x68] sm:$0xff] (!%p1199_p13)  }
  0xd1   : > { %3066 = vmatprep.subr.bf16.mxu1 %v3295_v5  ;;  %v3303_v13 = vld [vmem:[%s4106_s21 + $0xd8] sm:$0xff]   ;;  %v3307_v17 = vld [vmem:[%s4106_s21 + $0xe0] sm:$0xff]   ;;  %v3311_v21 = vld [vmem:[%s4106_s21 + $0xe8] sm:$0xff]   ;;  %s4312_s11 = smov (!%p1232_p0, %s2878_s11), 3  ;;  %s3036_s4 = sshll.u32 (%p3574_p9), %s3478_s14, 2 }
  0xd2   : > { %v3304_v14 = vld [vmem:[%s4106_s21 + $0x18] sm:$0xff]   ;;  %v3308_v18 = vld [vmem:[%s4106_s21 + $0x20] sm:$0xff]   ;;  %v3312_v22 = vld [vmem:[%s4106_s21 + $0x28] sm:$0xff]   ;;  %s3033_s22 = sshll.u32 %s4312_s11, 6  ;;  %s2741_s9 = sadd.s32 (%p3574_p9), %s3474_s13, %s3036_s4 }
  0xd3   : > { %3045 = vmatpush3.bf16.msra.mxu0 %v3296_v6  ;;  %v3305_v15 = vld [vmem:[%s4106_s21 + $0x98] sm:$0xff]   ;;  %v3309_v19 = vld [vmem:[%s4106_s21 + $0xa0] sm:$0xff]   ;;  %v3313_v23 = vld [vmem:[%s4106_s21 + $0xa8] sm:$0xff]   ;;  %s4142_s26 = scalar_lea.vmem %s4293_s0, %s3033_s22  ;;  %s3030_s5 = sshll.u32 (%p3574_p9), %s2741_s9, 2 }
  0xd4   : > { %3067 = vmatpush3.bf16.msra.mxu1 %v3297_v7  ;;  %3046 = vmatprep.subr.bf16.mxu0 %v3298_v8  ;;  %v3314_v24 = vld [vmem:[%s4106_s21 + $0x70] sm:$0xff]   ;;  %v3318_v28 = vld [vmem:[%s4106_s21 + $0x78] sm:$0xff]   ;;  %v1240_v32 = vld [vmem:[%s4142_s26] sm:$0xff]  ;;  %s2743_s8 = scalar_lea.vmem (%p3574_p9), %s4295_s2, %s3030_s5 }
  0xd5   : > { %3068 = vmatprep.subr.bf16.mxu1 %v3299_v9  ;;  %v3315_v25 = vld [vmem:[%s4106_s21 + $0xf0] sm:$0xff]   ;;  %v3319_v29 = vld [vmem:[%s4106_s21 + $0xf8] sm:$0xff]   ;;  %v1248_v33 = vld [vmem:[%s4142_s26 + $0x40] sm:$0xff] }
  0xd6   : > { %v3316_v26 = vld [vmem:[%s4106_s21 + $0x30] sm:$0xff]   ;;  %v3320_v30 = vld [vmem:[%s4106_s21 + $0x38] sm:$0xff]   ;;  %v1241_v34 = vld [vmem:[%s4142_s26 + $0x8] sm:$0xff]  ;;  %v2881_v35 = vcombine.low %v1240_v32, %v1248_v33  ;;  %v2882_v36 = vcombine.high %v1240_v32, %v1248_v33 }
  0xd7   : > { %3047 = vmatpush3.bf16.msra.mxu0 %v3300_v10  ;;  %v3317_v27 = vld [vmem:[%s4106_s21 + $0xb0] sm:$0xff]   ;;  %v3321_v31 = vld [vmem:[%s4106_s21 + $0xb8] sm:$0xff]   ;;  %v1249_v37 = vld [vmem:[%s4142_s26 + $0x48] sm:$0xff] }
  0xd8   : > { %3069 = vmatpush3.bf16.msra.mxu1 %v3301_v11  ;;  %3048 = vmatprep.subr.bf16.mxu0 %v3302_v12  ;;  %v2883_v38 = vcombine.low %v1241_v34, %v1249_v37  ;;  %v2884_v39 = vcombine.high %v1241_v34, %v1249_v37  ;;  %v3322_v40 = vld [vmem:[%s4106_s21 + $0x140] sm:$0xff]   ;;  %v3326_v44 = vld [vmem:[%s4106_s21 + $0x148] sm:$0xff]   ;;  %v3330_v48 = vld [vmem:[%s4106_s21 + $0x150] sm:$0xff]  }
  0xd9   : > { %3070 = vmatprep.subr.bf16.mxu1 %v3303_v13  ;;  %2392 = vmatprep.mubr.bf16.mxu0 %v2882_v36  ;;  %v3323_v41 = vld [vmem:[%s4106_s21 + $0x1c0] sm:$0xff]   ;;  %v3327_v45 = vld [vmem:[%s4106_s21 + $0x1c8] sm:$0xff]   ;;  %v3331_v49 = vld [vmem:[%s4106_s21 + $0x1d0] sm:$0xff]  }
  0xda   : > { %2433 = vmatprep.mubr.bf16.mxu1 %v2884_v39  ;;  %v3324_v42 = vld [vmem:[%s4106_s21 + $0x100] sm:$0xff]   ;;  %v3328_v46 = vld [vmem:[%s4106_s21 + $0x108] sm:$0xff]   ;;  %v3332_v50 = vld [vmem:[%s4106_s21 + $0x110] sm:$0xff]  }
  0xdb   : > { %3049 = vmatpush3.bf16.msra.mxu0 %v3304_v14  ;;  %v3325_v43 = vld [vmem:[%s4106_s21 + $0x180] sm:$0xff]   ;;  %v3329_v47 = vld [vmem:[%s4106_s21 + $0x188] sm:$0xff]   ;;  %v3333_v51 = vld [vmem:[%s4106_s21 + $0x190] sm:$0xff]  }
  0xdc   : > { %3071 = vmatpush3.bf16.msra.mxu1 %v3305_v15  ;;  %3050 = vmatprep.subr.bf16.mxu0 %v3306_v16  ;;  %v3334_v52 = vld [vmem:[%s4106_s21 + $0x158] sm:$0xff]   ;;  %v3338_v56 = vld [vmem:[%s4106_s21 + $0x160] sm:$0xff]   ;;  %v3342_v60 = vld [vmem:[%s4106_s21 + $0x168] sm:$0xff]  }
  0xdd   : > { %3072 = vmatprep.subr.bf16.mxu1 %v3307_v17  ;;  %v3335_v53 = vld [vmem:[%s4106_s21 + $0x1d8] sm:$0xff]   ;;  %v3339_v57 = vld [vmem:[%s4106_s21 + $0x1e0] sm:$0xff]   ;;  %v3343_v61 = vld [vmem:[%s4106_s21 + $0x1e8] sm:$0xff]  }
  0xde   : > { %v3336_v54 = vld [vmem:[%s4106_s21 + $0x118] sm:$0xff]   ;;  %v3340_v58 = vld [vmem:[%s4106_s21 + $0x120] sm:$0xff]   ;;  %v3344_v62 = vld [vmem:[%s4106_s21 + $0x128] sm:$0xff]  }
  0xdf   : > { %3051 = vmatpush3.bf16.msra.mxu0 %v3308_v18  ;;  %v3337_v55 = vld [vmem:[%s4106_s21 + $0x198] sm:$0xff]   ;;  %v3341_v59 = vld [vmem:[%s4106_s21 + $0x1a0] sm:$0xff]   ;;  %v3345_v63 = vld [vmem:[%s4106_s21 + $0x1a8] sm:$0xff]  }
  0xe0   : > { %3073 = vmatpush3.bf16.msra.mxu1 %v3309_v19  ;;  %3052 = vmatprep.subr.bf16.mxu0 %v3310_v20  ;;  %v3346_v0 = vld [vmem:[%s4106_s21 + $0x170] sm:$0xff]   ;;  %v3350_v4 = vld [vmem:[%s4106_s21 + $0x178] sm:$0xff]   ;;  %v3354_v16 = vld [vmem:[%s4106_s21 + $0x240] sm:$0xff]  }
  0xe1   : > { %3074 = vmatprep.subr.bf16.mxu1 %v3311_v21  ;;  %v3347_v1 = vld [vmem:[%s4106_s21 + $0x1f0] sm:$0xff]   ;;  %v3351_v5 = vld [vmem:[%s4106_s21 + $0x1f8] sm:$0xff]   ;;  %v3355_v17 = vld [vmem:[%s4106_s21 + $0x2c0] sm:$0xff]  }
  0xe2   : > { %v3348_v2 = vld [vmem:[%s4106_s21 + $0x130] sm:$0xff]   ;;  %v3352_v6 = vld [vmem:[%s4106_s21 + $0x138] sm:$0xff]   ;;  %v3356_v18 = vld [vmem:[%s4106_s21 + $0x200] sm:$0xff]  }
  0xe3   : > { %3053 = vmatpush3.bf16.msra.mxu0 %v3312_v22  ;;  %v3349_v3 = vld [vmem:[%s4106_s21 + $0x1b0] sm:$0xff]   ;;  %v3353_v7 = vld [vmem:[%s4106_s21 + $0x1b8] sm:$0xff]   ;;  %v3357_v19 = vld [vmem:[%s4106_s21 + $0x280] sm:$0xff]  }
  0xe4   : > { %3075 = vmatpush3.bf16.msra.mxu1 %v3313_v23  ;;  %3054 = vmatprep.subr.bf16.mxu0 %v3314_v24  ;;  %v1242_v8 = vld [vmem:[%s4142_s26 + $0x10] sm:$0xff]  ;;  %v1243_v12 = vld [vmem:[%s4142_s26 + $0x18] sm:$0xff]  ;;  %v3358_v20 = vld [vmem:[%s4106_s21 + $0x248] sm:$0xff]  }
  0xe5   : > { %3076 = vmatprep.subr.bf16.mxu1 %v3315_v25  ;;  %v1250_v9 = vld [vmem:[%s4142_s26 + $0x50] sm:$0xff]  ;;  %v1251_v13 = vld [vmem:[%s4142_s26 + $0x58] sm:$0xff]  ;;  %v3359_v21 = vld [vmem:[%s4106_s21 + $0x2c8] sm:$0xff]  }
  0xe6   : > { %v2885_v10 = vcombine.low %v1242_v8, %v1250_v9  ;;  %v2886_v11 = vcombine.high %v1242_v8, %v1250_v9  ;;  %v2887_v14 = vcombine.low %v1243_v12, %v1251_v13  ;;  %v2888_v15 = vcombine.high %v1243_v12, %v1251_v13  ;;  %v3360_v22 = vld [vmem:[%s4106_s21 + $0x208] sm:$0xff]   ;;  %v3362_v24 = vld [vmem:[%s4106_s21 + $0x250] sm:$0xff]   ;;  %v3370_v32 = vld [vmem:[%s4106_s21 + $0x260] sm:$0xff]  }
  0xe7   : > { %3055 = vmatpush3.bf16.msra.mxu0 %v3316_v26  ;;  %v3361_v23 = vld [vmem:[%s4106_s21 + $0x288] sm:$0xff]   ;;  %v3363_v25 = vld [vmem:[%s4106_s21 + $0x2d0] sm:$0xff]   ;;  %v3371_v33 = vld [vmem:[%s4106_s21 + $0x2e0] sm:$0xff]  }
  0xe8   : > { %3077 = vmatpush3.bf16.msra.mxu1 %v3317_v27  ;;  %3056 = vmatprep.subr.bf16.mxu0 %v3318_v28  ;;  %v3364_v26 = vld [vmem:[%s4106_s21 + $0x210] sm:$0xff]   ;;  %v3366_v28 = vld [vmem:[%s4106_s21 + $0x258] sm:$0xff]   ;;  %v3372_v34 = vld [vmem:[%s4106_s21 + $0x220] sm:$0xff]  }
  0xe9   : > { %3078 = vmatprep.subr.bf16.mxu1 %v3319_v29  ;;  %v3365_v27 = vld [vmem:[%s4106_s21 + $0x290] sm:$0xff]   ;;  %v3367_v29 = vld [vmem:[%s4106_s21 + $0x2d8] sm:$0xff]   ;;  %v3374_v36 = vld [vmem:[%s4106_s21 + $0x268] sm:$0xff]  }
  0xea   : > { %v3375_v37 = vld [vmem:[%s4106_s21 + $0x2e8] sm:$0xff]   ;;  %v3402_v8 = vld [vmem:[%s4106_s21 + $0x360] sm:$0xff]  }
  0xeb   : > { %3057 = vmatpush3.bf16.msra.mxu0 %v3320_v30  ;;  %v3368_v30 = vld [vmem:[%s4106_s21 + $0x218] sm:$0xff]   ;;  %v3377_v39 = vld [vmem:[%s4106_s21 + $0x2a8] sm:$0xff]   ;;  %v3403_v9 = vld [vmem:[%s4106_s21 + $0x3e0] sm:$0xff]  }
  0xec   : > { %3079 = vmatpush3.bf16.msra.mxu1 %v3321_v31  ;;  %3086 = vmatprep.subr.bf16.mxu0 %v3322_v40  ;;  %v3369_v31 = vld [vmem:[%s4106_s21 + $0x298] sm:$0xff]   ;;  %v3378_v40 = vld [vmem:[%s4106_s21 + $0x270] sm:$0xff]   ;;  %v3406_v12 = vld [vmem:[%s4106_s21 + $0x368] sm:$0xff]  }
  0xed   : > { %3108 = vmatprep.subr.bf16.mxu1 %v3323_v41  ;;  %v3379_v41 = vld [vmem:[%s4106_s21 + $0x2f0] sm:$0xff]   ;;  %v3407_v13 = vld [vmem:[%s4106_s21 + $0x3e8] sm:$0xff]  }
  0xee   : > { %2393 = vmatmul.mubr.bf16.vlgmr.msra.gmra.mrb[0].mxu0 %v2881_v35  ;;  %v3373_v35 = vld [vmem:[%s4106_s21 + $0x2a0] sm:$0xff]  }
  0xef   : > { %2434 = vmatmul.mubr.bf16.vlgmr.msra.gmra.mrb[0].mxu1 %v2883_v38  ;;  %3087 = vmatpush3.bf16.msra.mxu0 %v3324_v42  ;;  %v3376_v38 = vld [vmem:[%s4106_s21 + $0x228] sm:$0xff]   ;;  %v3380_v42 = vld [vmem:[%s4106_s21 + $0x230] sm:$0xff]  }
  0xf0   : > { %3109 = vmatpush3.bf16.msra.mxu1 %v3325_v43  ;;  %3088 = vmatprep.subr.bf16.mxu0 %v3326_v44  ;;  %v3381_v43 = vld [vmem:[%s4106_s21 + $0x2b0] sm:$0xff]   ;;  %v3382_v44 = vld [vmem:[%s4106_s21 + $0x278] sm:$0xff]  }
  0xf1   : > { %3110 = vmatprep.subr.bf16.mxu1 %v3327_v45  ;;  %2474 = vmatprep.mubr.bf16.mxu0 %v2886_v11  ;;  %v3383_v45 = vld [vmem:[%s4106_s21 + $0x2f8] sm:$0xff]   ;;  %v3405_v11 = vld [vmem:[%s4106_s21 + $0x3a0] sm:$0xff]  }
  0xf2   : > { %2515 = vmatprep.mubr.bf16.mxu1 %v2888_v15  ;;  %v3409_v15 = vld [vmem:[%s4106_s21 + $0x3a8] sm:$0xff]  }
  0xf3   : > { %3089 = vmatpush3.bf16.msra.mxu0 %v3328_v46  ;;  %v3384_v46 = vld [vmem:[%s4106_s21 + $0x238] sm:$0xff]  }
  0xf4   : > { %3111 = vmatpush3.bf16.msra.mxu1 %v3329_v47  ;;  %3090 = vmatprep.subr.bf16.mxu0 %v3330_v48  ;;  %v3385_v47 = vld [vmem:[%s4106_s21 + $0x2b8] sm:$0xff]   ;;  %v1244_v48 = vld [vmem:[%s4142_s26 + $0x20] sm:$0xff] }
  0xf5   : > { %3112 = vmatprep.subr.bf16.mxu1 %v3331_v49  ;;  %v1252_v49 = vld [vmem:[%s4142_s26 + $0x60] sm:$0xff] }
  0xf7   : > { %3091 = vmatpush3.bf16.msra.mxu0 %v3332_v50  ;;  %v1245_v50 = vld [vmem:[%s4142_s26 + $0x28] sm:$0xff] }
  0xf8   : > { %3113 = vmatpush3.bf16.msra.mxu1 %v3333_v51  ;;  %3092 = vmatprep.subr.bf16.mxu0 %v3334_v52  ;;  %v1253_v51 = vld [vmem:[%s4142_s26 + $0x68] sm:$0xff]  ;;  %v2889_v52 = vcombine.low %v1244_v48, %v1252_v49 }
  0xf9   : > { %3114 = vmatprep.subr.bf16.mxu1 %v3335_v53  ;;  %v2890_v53 = vcombine.high %v1244_v48, %v1252_v49 }
  0xfb   : > { %3093 = vmatpush3.bf16.msra.mxu0 %v3336_v54  ;;  %v2891_v54 = vcombine.low %v1245_v50, %v1253_v51 }
  0xfc   : > { %3115 = vmatpush3.bf16.msra.mxu1 %v3337_v55  ;;  %3094 = vmatprep.subr.bf16.mxu0 %v3338_v56  ;;  %v2892_v55 = vcombine.high %v1245_v50, %v1253_v51  ;;  %v3386_v56 = vld [vmem:[%s4106_s21 + $0x340] sm:$0xff]  }
  0xfd   : > { %3116 = vmatprep.subr.bf16.mxu1 %v3339_v57  ;;  %v3387_v57 = vld [vmem:[%s4106_s21 + $0x3c0] sm:$0xff]  }
  0xff   : > { %3095 = vmatpush3.bf16.msra.mxu0 %v3340_v58  ;;  %v3388_v58 = vld [vmem:[%s4106_s21 + $0x300] sm:$0xff]  }
 0x100   : > { %3117 = vmatpush3.bf16.msra.mxu1 %v3341_v59  ;;  %3096 = vmatprep.subr.bf16.mxu0 %v3342_v60  ;;  %v3389_v59 = vld [vmem:[%s4106_s21 + $0x380] sm:$0xff]   ;;  %v3390_v60 = vld [vmem:[%s4106_s21 + $0x348] sm:$0xff]  }
 0x101   : > { %3118 = vmatprep.subr.bf16.mxu1 %v3343_v61  ;;  %v3391_v61 = vld [vmem:[%s4106_s21 + $0x3c8] sm:$0xff]  }
 0x103   : > { %3097 = vmatpush3.bf16.msra.mxu0 %v3344_v62  ;;  %v3392_v62 = vld [vmem:[%s4106_s21 + $0x308] sm:$0xff]  }
 0x104   : > { %3119 = vmatpush3.bf16.msra.mxu1 %v3345_v63  ;;  %3098 = vmatprep.subr.bf16.mxu0 %v3346_v0  ;;  %v3393_v63 = vld [vmem:[%s4106_s21 + $0x388] sm:$0xff]   ;;  %v3394_v0 = vld [vmem:[%s4106_s21 + $0x350] sm:$0xff]  }
 0x105   : > { %3120 = vmatprep.subr.bf16.mxu1 %v3347_v1  ;;  %v3395_v1 = vld [vmem:[%s4106_s21 + $0x3d0] sm:$0xff]  }
 0x107   : > { %3099 = vmatpush3.bf16.msra.mxu0 %v3348_v2  ;;  %v3396_v2 = vld [vmem:[%s4106_s21 + $0x310] sm:$0xff]  }
 0x108   : > { %3121 = vmatpush3.bf16.msra.mxu1 %v3349_v3  ;;  %3100 = vmatprep.subr.bf16.mxu0 %v3350_v4  ;;  %v3397_v3 = vld [vmem:[%s4106_s21 + $0x390] sm:$0xff]   ;;  %v3398_v4 = vld [vmem:[%s4106_s21 + $0x358] sm:$0xff]  }
 0x109   : > { %3122 = vmatprep.subr.bf16.mxu1 %v3351_v5  ;;  %v3399_v5 = vld [vmem:[%s4106_s21 + $0x3d8] sm:$0xff]  }
 0x10b   : > { %3101 = vmatpush3.bf16.msra.mxu0 %v3352_v6  ;;  %v3400_v6 = vld [vmem:[%s4106_s21 + $0x318] sm:$0xff]  }
 0x10c   : > { %3123 = vmatpush3.bf16.msra.mxu1 %v3353_v7  ;;  %3130 = vmatprep.subr.bf16.mxu0 %v3354_v16  ;;  %v3401_v7 = vld [vmem:[%s4106_s21 + $0x398] sm:$0xff]   ;;  %v3410_v16 = vld [vmem:[%s4106_s21 + $0x370] sm:$0xff]  }
 0x10d   : > { %3152 = vmatprep.subr.bf16.mxu1 %v3355_v17  ;;  %v3411_v17 = vld [vmem:[%s4106_s21 + $0x3f0] sm:$0xff]  }
 0x10e   : > { %2475 = vmatmul.mubr.bf16.vlgmr.msra.gmra.mrb[4].mxu0 %v2885_v10  ;;  %v3404_v10 = vld [vmem:[%s4106_s21 + $0x320] sm:$0xff]  }
 0x10f   : > { %2516 = vmatmul.mubr.bf16.vlgmr.msra.gmra.mrb[4].mxu1 %v2887_v14  ;;  %3131 = vmatpush3.bf16.msra.mxu0 %v3356_v18  ;;  %v3408_v14 = vld [vmem:[%s4106_s21 + $0x328] sm:$0xff]   ;;  %v3412_v18 = vld [vmem:[%s4106_s21 + $0x330] sm:$0xff]  }
 0x110   : > { %3153 = vmatpush3.bf16.msra.mxu1 %v3357_v19  ;;  %3132 = vmatprep.subr.bf16.mxu0 %v3358_v20  ;;  %v3413_v19 = vld [vmem:[%s4106_s21 + $0x3b0] sm:$0xff]   ;;  %v3414_v20 = vld [vmem:[%s4106_s21 + $0x378] sm:$0xff]  }
 0x111   : > { %3154 = vmatprep.subr.bf16.mxu1 %v3359_v21  ;;  %2556 = vmatprep.mubr.bf16.mxu0 %v2890_v53  ;;  %v3415_v21 = vld [vmem:[%s4106_s21 + $0x3f8] sm:$0xff]  }
 0x112   : > { %2597 = vmatprep.mubr.bf16.mxu1 %v2892_v55 }
 0x113   : > { %3133 = vmatpush3.bf16.msra.mxu0 %v3360_v22  ;;  %v3416_v22 = vld [vmem:[%s4106_s21 + $0x338] sm:$0xff]  }
 0x114   : > { %3155 = vmatpush3.bf16.msra.mxu1 %v3361_v23  ;;  %3134 = vmatprep.subr.bf16.mxu0 %v3362_v24  ;;  %v3417_v23 = vld [vmem:[%s4106_s21 + $0x3b8] sm:$0xff]   ;;  %v1246_v24 = vld [vmem:[%s4142_s26 + $0x30] sm:$0xff] }
 0x115   : > { %3156 = vmatprep.subr.bf16.mxu1 %v3363_v25  ;;  %v1254_v25 = vld [vmem:[%s4142_s26 + $0x70] sm:$0xff] }
 0x117   : > { %3135 = vmatpush3.bf16.msra.mxu0 %v3364_v26  ;;  %v1247_v26 = vld [vmem:[%s4142_s26 + $0x38] sm:$0xff] }
 0x118   : > { %3157 = vmatpush3.bf16.msra.mxu1 %v3365_v27  ;;  %3136 = vmatprep.subr.bf16.mxu0 %v3366_v28  ;;  %v2893_v27 = vcombine.low %v1246_v24, %v1254_v25  ;;  %v2894_v28 = vcombine.high %v1246_v24, %v1254_v25 }
 0x119   : > { %3158 = vmatprep.subr.bf16.mxu1 %v3367_v29  ;;  %v1255_v29 = vld [vmem:[%s4142_s26 + $0x78] sm:$0xff] }
 0x11b   : > { %3137 = vmatpush3.bf16.msra.mxu0 %v3368_v30  ;;  %v2895_v30 = vcombine.low %v1247_v26, %v1255_v29 }
 0x11c   : > { %3159 = vmatpush3.bf16.msra.mxu1 %v3369_v31  ;;  %3138 = vmatprep.subr.bf16.mxu0 %v3370_v32  ;;  %v2896_v31 = vcombine.high %v1247_v26, %v1255_v29 }
 0x11d   : > { %3160 = vmatprep.subr.bf16.mxu1 %v3371_v33 }
 0x11f   : > { %3139 = vmatpush3.bf16.msra.mxu0 %v3372_v34 }
 0x120   : > { %3161 = vmatpush3.bf16.msra.mxu1 %v3373_v35  ;;  %3140 = vmatprep.subr.bf16.mxu0 %v3374_v36 }
 0x121   : > { %3162 = vmatprep.subr.bf16.mxu1 %v3375_v37 }
 0x123   : > { %3141 = vmatpush3.bf16.msra.mxu0 %v3376_v38 }
 0x124   : > { %3163 = vmatpush3.bf16.msra.mxu1 %v3377_v39  ;;  %3142 = vmatprep.subr.bf16.mxu0 %v3378_v40 }
 0x125   : > { %3164 = vmatprep.subr.bf16.mxu1 %v3379_v41 }
 0x127   : > { %3143 = vmatpush3.bf16.msra.mxu0 %v3380_v42 }
 0x128   : > { %3165 = vmatpush3.bf16.msra.mxu1 %v3381_v43  ;;  %3144 = vmatprep.subr.bf16.mxu0 %v3382_v44 }
 0x129   : > { %3166 = vmatprep.subr.bf16.mxu1 %v3383_v45 }
 0x12b   : > { %3145 = vmatpush3.bf16.msra.mxu0 %v3384_v46 }
 0x12c   : > { %3167 = vmatpush3.bf16.msra.mxu1 %v3385_v47  ;;  %3174 = vmatprep.subr.bf16.mxu0 %v3386_v56 }
 0x12d   : > { %3196 = vmatprep.subr.bf16.mxu1 %v3387_v57 }
 0x12e   : > { %2557 = vmatmul.mubr.bf16.vlgmr.msra.gmra.mrb[8].mxu0 %v2889_v52 }
 0x12f   : > { %2598 = vmatmul.mubr.bf16.vlgmr.msra.gmra.mrb[8].mxu1 %v2891_v54  ;;  %3175 = vmatpush3.bf16.msra.mxu0 %v3388_v58 }
 0x130   : > { %3197 = vmatpush3.bf16.msra.mxu1 %v3389_v59  ;;  %3176 = vmatprep.subr.bf16.mxu0 %v3390_v60 }
 0x131   : > { %3198 = vmatprep.subr.bf16.mxu1 %v3391_v61  ;;  %2638 = vmatprep.mubr.bf16.mxu0 %v2894_v28 }
 0x132   : > { %2679 = vmatprep.mubr.bf16.mxu1 %v2896_v31 }
 0x133   : > { %3177 = vmatpush3.bf16.msra.mxu0 %v3392_v62 }
 0x134   : > { %3199 = vmatpush3.bf16.msra.mxu1 %v3393_v63  ;;  %3178 = vmatprep.subr.bf16.mxu0 %v3394_v0 }
 0x135   : > { %3200 = vmatprep.subr.bf16.mxu1 %v3395_v1 }
 0x137   : > { %3179 = vmatpush3.bf16.msra.mxu0 %v3396_v2 }
 0x138   : > { %3201 = vmatpush3.bf16.msra.mxu1 %v3397_v3  ;;  %3180 = vmatprep.subr.bf16.mxu0 %v3398_v4 }
 0x139   : > { %3202 = vmatprep.subr.bf16.mxu1 %v3399_v5 }
 0x13b   : > { %3181 = vmatpush3.bf16.msra.mxu0 %v3400_v6 }
 0x13c   : > { %3203 = vmatpush3.bf16.msra.mxu1 %v3401_v7  ;;  %3182 = vmatprep.subr.bf16.mxu0 %v3402_v8 }
 0x13d   : > { %3204 = vmatprep.subr.bf16.mxu1 %v3403_v9 }
 0x13f   : > { %3183 = vmatpush3.bf16.msra.mxu0 %v3404_v10 }
 0x140   : > { %3205 = vmatpush3.bf16.msra.mxu1 %v3405_v11  ;;  %3184 = vmatprep.subr.bf16.mxu0 %v3406_v12 }
 0x141   : > { %3206 = vmatprep.subr.bf16.mxu1 %v3407_v13 }
 0x143   : > { %3185 = vmatpush3.bf16.msra.mxu0 %v3408_v14 }
 0x144   : > { %3207 = vmatpush3.bf16.msra.mxu1 %v3409_v15  ;;  %3186 = vmatprep.subr.bf16.mxu0 %v3410_v16 }
 0x145   : > { %3208 = vmatprep.subr.bf16.mxu1 %v3411_v17 }
 0x147   : > { %3187 = vmatpush3.bf16.msra.mxu0 %v3412_v18 }
 0x148   : > { %3209 = vmatpush3.bf16.msra.mxu1 %v3413_v19  ;;  %3188 = vmatprep.subr.bf16.mxu0 %v3414_v20 }
 0x149   : > { %3210 = vmatprep.subr.bf16.mxu1 %v3415_v21 }
 0x14b   : > { %3189 = vmatpush3.bf16.msra.mxu0 %v3416_v22 }
 0x14c   : > { %3211 = vmatpush3.bf16.msra.mxu1 %v3417_v23 }
 0x14e   : > { %2639 = vmatmul.mubr.bf16.vlgmr.msra.gmra.mrb[12].mxu0 %v2893_v27 }
 0x14f   : > { %2680 = vmatmul.mubr.bf16.vlgmr.msra.gmra.mrb[12].mxu1 %v2895_v30 }
 0x1c1   : > { %v3058_v32 = vpop.f32.mrb[0].mxu0 }
 0x1c2   : > { %v3080_v33 = vpop.f32.mrb[0].mxu1  ;;  %v3059_v34 = vpop.f32.mrb[1].mxu0 }
 0x1c3   : > { %v3060_v35 = vadd.f32 %v3059_v34, %v3058_v32  ;;  %v3081_v36 = vpop.f32.mrb[1].mxu1  ;;  %v3061_v37 = vpop.f32.mrb[2].mxu0 }
 0x1c4   : > { %v3082_v38 = vadd.f32 %v3081_v36, %v3080_v33  ;;  %v3083_v39 = vpop.f32.mrb[2].mxu1  ;;  %v3062_v40 = vpop.f32.mrb[3].mxu0 }
 0x1c5   : > { %v3063_v41 = vadd.f32 %v3062_v40, %v3061_v37  ;;  %v3084_v42 = vpop.f32.mrb[3].mxu1 }
 0x1c6   : > { %v2436_v43 = vadd.f32 %v3082_v38, %v3060_v35  ;;  %v3085_v44 = vadd.f32 %v3084_v42, %v3083_v39 }
 0x1c8   : > { %v2439_v45 = vadd.f32 %v3085_v44, %v3063_v41 }
 0x1e1   : > { %v3102_v46 = vpop.f32.mrb[4].mxu0 }
 0x1e2   : > { %v3124_v47 = vpop.f32.mrb[4].mxu1  ;;  %v3103_v48 = vpop.f32.mrb[5].mxu0 }
 0x1e3   : > { %v3104_v49 = vadd.f32 %v3103_v48, %v3102_v46  ;;  %v3125_v50 = vpop.f32.mrb[5].mxu1  ;;  %v3105_v51 = vpop.f32.mrb[6].mxu0 }
 0x1e4   : > { %v3126_v52 = vadd.f32 %v3125_v50, %v3124_v47  ;;  %v3127_v53 = vpop.f32.mrb[6].mxu1  ;;  %v3106_v54 = vpop.f32.mrb[7].mxu0 }
 0x1e5   : > { %v2477_v55 = vadd.f32 %v3104_v49, %v2436_v43  ;;  %v3107_v56 = vadd.f32 %v3106_v54, %v3105_v51  ;;  %v3128_v57 = vpop.f32.mrb[7].mxu1 }
 0x1e6   : > { %v3129_v58 = vadd.f32 %v3128_v57, %v3127_v53 }
 0x1e7   : > { %v2518_v59 = vadd.f32 %v3126_v52, %v2477_v55  ;;  %v2480_v60 = vadd.f32 %v3107_v56, %v2439_v45 }
 0x1e9   : > { %v2521_v61 = vadd.f32 %v3129_v58, %v2480_v60 }
 0x201   : > { %v3146_v62 = vpop.f32.mrb[8].mxu0 }
 0x202   : > { %v3168_v63 = vpop.f32.mrb[8].mxu1  ;;  %v3147_v0 = vpop.f32.mrb[9].mxu0 }
 0x203   : > { %v3169_v1 = vpop.f32.mrb[9].mxu1  ;;  %v3148_v2 = vadd.f32 %v3147_v0, %v3146_v62  ;;  %v3149_v4 = vpop.f32.mrb[10].mxu0 }
 0x204   : > { %v3170_v3 = vadd.f32 %v3169_v1, %v3168_v63  ;;  %v3171_v5 = vpop.f32.mrb[10].mxu1  ;;  %v3150_v6 = vpop.f32.mrb[11].mxu0 }
 0x205   : > { %v3172_v7 = vpop.f32.mrb[11].mxu1  ;;  %v2559_v8 = vadd.f32 %v3148_v2, %v2518_v59  ;;  %v3151_v9 = vadd.f32 %v3150_v6, %v3149_v4 }
 0x206   : > { %v3173_v10 = vadd.f32 %v3172_v7, %v3171_v5 }
 0x207   : > { %v2600_v11 = vadd.f32 %v3170_v3, %v2559_v8  ;;  %v2562_v12 = vadd.f32 %v3151_v9, %v2521_v61 }
 0x209   : > { %v2603_v13 = vadd.f32 %v3173_v10, %v2562_v12 }
 0x221   : > { %v3190_v14 = vpop.f32.mrb[12].mxu0 }
 0x222   : > { %v3212_v15 = vpop.f32.mrb[12].mxu1  ;;  %v3191_v16 = vpop.f32.mrb[13].mxu0 }
 0x223   : > { %v3192_v17 = vadd.f32 %v3191_v16, %v3190_v14  ;;  %v3213_v18 = vpop.f32.mrb[13].mxu1  ;;  %v3193_v19 = vpop.f32.mrb[14].mxu0 }
 0x224   : > { %v3214_v20 = vadd.f32 %v3213_v18, %v3212_v15  ;;  %v3215_v21 = vpop.f32.mrb[14].mxu1  ;;  %v3194_v22 = vpop.f32.mrb[15].mxu0 }
 0x225   : > { %v2641_v23 = vadd.f32 %v3192_v17, %v2600_v11  ;;  %v3195_v24 = vadd.f32 %v3194_v22, %v3193_v19  ;;  %v3216_v25 = vpop.f32.mrb[15].mxu1 }
 0x226   : > { %v3217_v26 = vadd.f32 %v3216_v25, %v3215_v21 }
 0x227   : > { %v2682_v27 = vadd.f32 %v3214_v20, %v2641_v23  ;;  %v2644_v28 = vadd.f32 %v3195_v24, %v2603_v13 }
 0x229   : > { %v2685_v29 = vadd.f32 %v3217_v26, %v2644_v28  ;;  %v2697_v30 = vmul.f32 %v2682_v27, %v2682_v27 }
 0x22b   : > { %v2688_v31 = vadd.f32 %v2685_v29, %v2682_v27  ;;  %v2698_v32 = vmul.f32 %v2685_v29, %v2685_v29 }
 0x22d   : > { %v2689_v33 = vrot.slane %v2688_v31, 4  ;;  %v2699_v34 = vadd.f32 %v2698_v32, %v2697_v30 }
 0x22f   : > { %v2690_v35 = vadd.f32 %v2689_v33, %v2688_v31  ;;  %v2700_v36 = vrot.slane %v2699_v34, 4 }
 0x231   : > { %v2691_v37 = vrot.slane %v2690_v35, 2  ;;  %v2701_v38 = vadd.f32 %v2700_v36, %v2699_v34 }
 0x233   : > { %v2692_v39 = vadd.f32 %v2691_v37, %v2690_v35  ;;  %v2702_v40 = vrot.slane %v2701_v38, 2 }
 0x235   : > { %v2693_v41 = vrot.slane %v2692_v39, 1  ;;  %v2703_v42 = vadd.f32 %v2702_v40, %v2701_v38 }
 0x237   : > { %v2694_v43 = vadd.f32 %v2693_v41, %v2692_v39  ;;  %v2704_v44 = vrot.slane %v2703_v42, 1 }
 0x239   : > { %v2696_v45 = vmul.f32 0.0625, %v2694_v43  ;;  %v2705_v46 = vadd.f32 %v2704_v44, %v2703_v42 }
 0x23b   : > { %v2706_v47 = vmul.f32 0.0625, %v2705_v46  ;;  %v2707_v48 = vmul.f32 %v2696_v45, %v2696_v45  ;;  %v2710_v49 = vsub.f32 %v2682_v27, %v2696_v45  ;;  %v2711_v50 = vsub.f32 %v2685_v29, %v2696_v45 }
 0x23d   : > { %v2708_v51 = vsub.f32 %v2706_v47, %v2707_v48 }
 0x23f   : > { %v2709_v52 = vmax.f32 %v2708_v51, 0.0 }
 0x241   : > { %v2712_v53 = vadd.f32 1e-05, %v2709_v52 }
 0x243   : > { %3418 = vrsqrt.f32 %v2712_v53 }
 0x24d   : > { %v3419_v54 = vpop.eup %3418 }
 0x24e   : > { %v2714_v55 = vmul.f32 %v3419_v54, %v2710_v49  ;;  %v2715_v56 = vmul.f32 %v3419_v54, %v2711_v50 }
 0x24f   : > { %2738 = sbr.rel (!%p3574_p9) target bundleno = 606 (0x25e), region = 73 }
 0x250   : > { %vm2716_vm0 = vcmp.gt.f32.partialorder %v2714_v55, 0.0  ;;  %vm2717_vm1 = vcmp.gt.f32.partialorder %v2715_v56, 0.0  ;;  %v2718_v57 = vmul.f32 0.2, %v2714_v55  ;;  %v2719_v58 = vmul.f32 0.2, %v2715_v56 }
 0x252   : > { %v2720_v59 = vsel %vm2716_vm0, %v2714_v55, %v2718_v57  ;;  %v2721_v60 = vsel %vm2717_vm1, %v2715_v56, %v2719_v58 }
 0x253   : > { %v3040_v61 = vpack.c.bf16 %v2721_v60, %v2720_v59 }
 0x255   : > { %3041 = vst [vmem:[%s1230_s3] sm:$0xff] %v3040_v61  }
 0x25c   : > { %v2759_v62 = vld [vmem:[%s1230_s3] sm:$0xf]  ;;  %v2761_v63 = vld [vmem:[%s1230_s3 + $0x4] sm:$0xf] }
 0x25d   : > { %2760 = vst [vmem:[%s2743_s8] sm:$0xf] %v2759_v62  ;;  %2762 = vst [vmem:[%s2743_s8 + $0x8] sm:$0xf] %v2761_v63 }
 0x25e PF: > { %s12_s17 = sadd.s32 1, %s3490_s17   ;;  %s4297_s9 = smov %s3462_s10 }
 0x25f   : > { %p9_p1 = scmp.ge.s32.totalorder %s12_s17, 6   ;;  %s4298_s10 = smov %s3579_s28 }
 0x260   : > { %s4299_s11 = smov %s3470_s12  ;;  %s4300_s12 = smov %s3568_s24 }
 0x261   : > { %s4301_s13 = smov %s3482_s15  ;;  %s4302_s14 = smov %s3486_s16 }
 0x262   : > { %s4303_s15 = smov %s4306_s19  ;;  %s4304_s16 = smov %s4310_s20 }
 0x263   :  { %11 = sbr.rel (!%p9_p1) target bundleno = 5 (0x5), region = 148 }

// kernel: patch_discriminator_forward.7
= control target key start
LH: loop header
LB: loop body
LE: loop exit
PB: predicated region body
PF: predicated region fallthrough
CT: control target
= control target key end

     0   :  { %s9990_s9 = smov 0   ;;  %s9992_s10 = smov 0   ;;  %s11761_s0 = inlined_call_operand.vmem [shape: bf16[8,4096], index: 0, kind: input, shape index: {}]   ;;  %s11762_s1 = inlined_call_operand.vmem [shape: bf16[4096,512], index: 1, kind: input, shape index: {}]   ;;  %s11763_s2 = inlined_call_operand.vmem [shape: bf16[8,512], index: 2, kind: output, shape index: {}]  }
   0x1   :  { %s9994_s11 = smov 0   ;;  %s9996_s12 = smov 0  }
   0x2   :  { %s9998_s13 = smov 0  }
   0x3 LB: > { %s21_s14 = sadd.s32 1, %s9969_s12  ;;  %p64_p1 = scmp.ne.s32.totalorder %s9961_s10, %s9957_s9  ;;  %s9973_s13 = sphi %s9998_s13, %s12_s13   ;;  %s9969_s12 = sphi %s9996_s12, %s11767_s12   ;;  %s9965_s11 = sphi %s9994_s11, %s11766_s11   ;;  %s9961_s10 = sphi %s9992_s10, %s11765_s10   ;;  %s9957_s9 = sphi %s9990_s9, %s11764_s9  }
   0x4   : > { %p22_p0 = scmp.ge.s32.totalorder %s21_s14, 2  ;;  %p65_p2 = scmp.eq.s32.totalorder %s9973_s13, 0 }
   0x5   : > { %s57_s16 = sadd.s32 1, %s9961_s10  ;;  %p8470_p5 = scmp.ge.s32.totalorder %s9973_s13, 2 }
   0x6   : > { %s11769_s14 = smov (%p22_p0, %s21_s14), 0  ;;  %p66_p3 = por %p65_p2, %p64_p1 }
   0x7   : > { %s54_s15 = ssub.s32 %s9969_s12, %s11769_s14  ;;  %126 = sbr.rel (%p8470_p5) target bundleno = 274 (0x112), region = 20 }
   0x8   : > { %p55_p4 = scmp.eq.s32.totalorder %s54_s15, 0 }
   0xa   : > { %s10025_s17 = scalar_select %p55_p4, %s9961_s10, %s57_s16  }
   0xe   : > { %129 = sbr.rel (!%p66_p3) target bundleno = 274 (0x112), region = 24  ;;  %s131_s18 = sand.u32 (%p66_p3), 1, %s9961_s10  }
   0xf   : > { %s9027_s19 = sshll.u32 (%p66_p3), %s9969_s12, 3  ;;  %s8471_s20 = sshll.u32 (%p66_p3), %s131_s18, 12 }
  0x10   : > { %s10033_s23 = scalar_lea.vmem (%p66_p3), %s11762_s1, %s9027_s19  ;;  %s10038_s24 = scalar_lea.vmem (%p66_p3), [#allocation2], %s8471_s20 }
  0x11   : > { %v1189_v0 = vld [vmem:[%s10033_s23] sm:$0xff] (%p66_p3)  ;;  %v1191_v1 = vld [vmem:[%s10033_s23 + $0x10] sm:$0xff] (%p66_p3) }
  0x12   : > { %v1193_v2 = vld [vmem:[%s10033_s23 + $0x20] sm:$0xff] (%p66_p3)  ;;  %1190 = vst [vmem:[%s10038_s24] sm:$0xff] (%p66_p3), %v1189_v0  ;;  %1192 = vst [vmem:[%s10038_s24 + $0x8] sm:$0xff] (%p66_p3), %v1191_v1  ;;  %v1195_v3 = vld [vmem:[%s10033_s23 + $0x30] sm:$0xff] (%p66_p3) }
  0x13   : > { %1194 = vst [vmem:[%s10038_s24 + $0x10] sm:$0xff] (%p66_p3), %v1193_v2  ;;  %v1197_v4 = vld [vmem:[%s10033_s23 + $0x40] sm:$0xff] (%p66_p3)  ;;  %v1199_v5 = vld [vmem:[%s10033_s23 + $0x50] sm:$0xff] (%p66_p3)  ;;  %1196 = vst [vmem:[%s10038_s24 + $0x18] sm:$0xff] (%p66_p3), %v1195_v3 }
  0x14   : > { %1198 = vst [vmem:[%s10038_s24 + $0x20] sm:$0xff] (%p66_p3), %v1197_v4  ;;  %1200 = vst [vmem:[%s10038_s24 + $0x28] sm:$0xff] (%p66_p3), %v1199_v5  ;;  %v1201_v6 = vld [vmem:[%s10033_s23 + $0x60] sm:$0xff] (%p66_p3)  ;;  %v1203_v7 = vld [vmem:[%s10033_s23 + $0x70] sm:$0xff] (%p66_p3) }
  0x15   : > { %v1205_v8 = vld [vmem:[%s10033_s23 + $0x80] sm:$0xff]  ;;  %1202 = vst [vmem:[%s10038_s24 + $0x30] sm:$0xff] %v1201_v6  ;;  %1204 = vst [vmem:[%s10038_s24 + $0x38] sm:$0xff] %v1203_v7  ;;  %v1207_v9 = vld [vmem:[%s10033_s23 + $0x90] sm:$0xff] }
  0x16   : > { %1206 = vst [vmem:[%s10038_s24 + $0x40] sm:$0xff] %v1205_v8  ;;  %v1209_v10 = vld [vmem:[%s10033_s23 + $0xa0] sm:$0xff]  ;;  %v1211_v11 = vld [vmem:[%s10033_s23 + $0xb0] sm:$0xff]  ;;  %1208 = vst [vmem:[%s10038_s24 + $0x48] sm:$0xff] %v1207_v9 }
  0x17   : > { %1210 = vst [vmem:[%s10038_s24 + $0x50] sm:$0xff] %v1209_v10  ;;  %1212 = vst [vmem:[%s10038_s24 + $0x58] sm:$0xff] %v1211_v11  ;;  %v1213_v12 = vld [vmem:[%s10033_s23 + $0xc0] sm:$0xff]  ;;  %v1215_v13 = vld [vmem:[%s10033_s23 + $0xd0] sm:$0xff] }
  0x18   : > { %v1217_v14 = vld [vmem:[%s10033_s23 + $0xe0] sm:$0xff]  ;;  %1214 = vst [vmem:[%s10038_s24 + $0x60] sm:$0xff] %v1213_v12  ;;  %1216 = vst [vmem:[%s10038_s24 + $0x68] sm:$0xff] %v1215_v13  ;;  %v1219_v15 = vld [vmem:[%s10033_s23 + $0xf0] sm:$0xff] }
  0x19   : > { %1218 = vst [vmem:[%s10038_s24 + $0x70] sm:$0xff] %v1217_v14  ;;  %v1221_v16 = vld [vmem:[%s10033_s23 + $0x100] sm:$0xff]  ;;  %v1223_v17 = vld [vmem:[%s10033_s23 + $0x110] sm:$0xff]  ;;  %1220 = vst [vmem:[%s10038_s24 + $0x78] sm:$0xff] %v1219_v15 }
  0x1a   : > { %1222 = vst [vmem:[%s10038_s24 + $0x80] sm:$0xff] %v1221_v16  ;;  %1224 = vst [vmem:[%s10038_s24 + $0x88] sm:$0xff] %v1223_v17  ;;  %v1225_v18 = vld [vmem:[%s10033_s23 + $0x120] sm:$0xff]  ;;  %v1227_v19 = vld [vmem:[%s10033_s23 + $0x130] sm:$0xff] }
  0x1b   : > { %v1229_v20 = vld [vmem:[%s10033_s23 + $0x140] sm:$0xff]  ;;  %1226 = vst [vmem:[%s10038_s24 + $0x90] sm:$0xff] %v1225_v18  ;;  %1228 = vst [vmem:[%s10038_s24 + $0x98] sm:$0xff] %v1227_v19  ;;  %v1231_v21 = vld [vmem:[%s10033_s23 + $0x150] sm:$0xff] }
  0x1c   : > { %1230 = vst [vmem:[%s10038_s24 + $0xa0] sm:$0xff] %v1229_v20  ;;  %v1233_v22 = vld [vmem:[%s10033_s23 + $0x160] sm:$0xff]  ;;  %v1235_v23 = vld [vmem:[%s10033_s23 + $0x170] sm:$0xff]  ;;  %1232 = vst [vmem:[%s10038_s24 + $0xa8] sm:$0xff] %v1231_v21 }
  0x1d   : > { %1234 = vst [vmem:[%s10038_s24 + $0xb0] sm:$0xff] %v1233_v22  ;;  %1236 = vst [vmem:[%s10038_s24 + $0xb8] sm:$0xff] %v1235_v23  ;;  %v1237_v24 = vld [vmem:[%s10033_s23 + $0x180] sm:$0xff]  ;;  %v1239_v25 = vld [vmem:[%s10033_s23 + $0x190] sm:$0xff] }
  0x1e   : > { %v1241_v26 = vld [vmem:[%s10033_s23 + $0x1a0] sm:$0xff]  ;;  %1238 = vst [vmem:[%s10038_s24 + $0xc0] sm:$0xff] %v1237_v24  ;;  %1240 = vst [vmem:[%s10038_s24 + $0xc8] sm:$0xff] %v1239_v25  ;;  %v1243_v27 = vld [vmem:[%s10033_s23 + $0x1b0] sm:$0xff] }
  0x1f   : > { %1242 = vst [vmem:[%s10038_s24 + $0xd0] sm:$0xff] %v1241_v26  ;;  %v1245_v28 = vld [vmem:[%s10033_s23 + $0x1c0] sm:$0xff]  ;;  %v1247_v29 = vld [vmem:[%s10033_s23 + $0x1d0] sm:$0xff]  ;;  %1244 = vst [vmem:[%s10038_s24 + $0xd8] sm:$0xff] %v1243_v27 }
  0x20   : > { %1246 = vst [vmem:[%s10038_s24 + $0xe0] sm:$0xff] %v1245_v28  ;;  %1248 = vst [vmem:[%s10038_s24 + $0xe8] sm:$0xff] %v1247_v29  ;;  %v1249_v30 = vld [vmem:[%s10033_s23 + $0x1e0] sm:$0xff]  ;;  %v1251_v31 = vld [vmem:[%s10033_s23 + $0x1f0] sm:$0xff] }
  0x21   : > { %v1253_v32 = vld [vmem:[%s10033_s23 + $0x200] sm:$0xff]  ;;  %1250 = vst [vmem:[%s10038_s24 + $0xf0] sm:$0xff] %v1249_v30  ;;  %1252 = vst [vmem:[%s10038_s24 + $0xf8] sm:$0xff] %v1251_v31  ;;  %v1255_v33 = vld [vmem:[%s10033_s23 + $0x210] sm:$0xff] }
  0x22   : > { %1254 = vst [vmem:[%s10038_s24 + $0x100] sm:$0xff] %v1253_v32  ;;  %v1257_v34 = vld [vmem:[%s10033_s23 + $0x220] sm:$0xff]  ;;  %v1259_v35 = vld [vmem:[%s10033_s23 + $0x230] sm:$0xff]  ;;  %1256 = vst [vmem:[%s10038_s24 + $0x108] sm:$0xff] %v1255_v33 }
  0x23   : > { %1258 = vst [vmem:[%s10038_s24 + $0x110] sm:$0xff] %v1257_v34  ;;  %1260 = vst [vmem:[%s10038_s24 + $0x118] sm:$0xff] %v1259_v35  ;;  %v1261_v36 = vld [vmem:[%s10033_s23 + $0x240] sm:$0xff]  ;;  %v1263_v37 = vld [vmem:[%s10033_s23 + $0x250] sm:$0xff] }
  0x24   : > { %v1265_v38 = vld [vmem:[%s10033_s23 + $0x260] sm:$0xff]  ;;  %1262 = vst [vmem:[%s10038_s24 + $0x120] sm:$0xff] %v1261_v36  ;;  %1264 = vst [vmem:[%s10038_s24 + $0x128] sm:$0xff] %v1263_v37  ;;  %v1267_v39 = vld [vmem:[%s10033_s23 + $0x270] sm:$0xff] }
  0x25   : > { %1266 = vst [vmem:[%s10038_s24 + $0x130] sm:$0xff] %v1265_v38  ;;  %v1269_v40 = vld [vmem:[%s10033_s23 + $0x280] sm:$0xff]  ;;  %v1271_v41 = vld [vmem:[%s10033_s23 + $0x290] sm:$0xff]  ;;  %1268 = vst [vmem:[%s10038_s24 + $0x138] sm:$0xff] %v1267_v39 }
  0x26   : > { %1270 = vst [vmem:[%s10038_s24 + $0x140] sm:$0xff] %v1269_v40  ;;  %1272 = vst [vmem:[%s10038_s24 + $0x148] sm:$0xff] %v1271_v41  ;;  %v1273_v42 = vld [vmem:[%s10033_s23 + $0x2a0] sm:$0xff]  ;;  %v1275_v43 = vld [vmem:[%s10033_s23 + $0x2b0] sm:$0xff] }
  0x27   : > { %v1277_v44 = vld [vmem:[%s10033_s23 + $0x2c0] sm:$0xff]  ;;  %1274 = vst [vmem:[%s10038_s24 + $0x150] sm:$0xff] %v1273_v42  ;;  %1276 = vst [vmem:[%s10038_s24 + $0x158] sm:$0xff] %v1275_v43  ;;  %v1279_v45 = vld [vmem:[%s10033_s23 + $0x2d0] sm:$0xff] }
  0x28   : > { %1278 = vst [vmem:[%s10038_s24 + $0x160] sm:$0xff] %v1277_v44  ;;  %v1281_v46 = vld [vmem:[%s10033_s23 + $0x2e0] sm:$0xff]  ;;  %v1283_v47 = vld [vmem:[%s10033_s23 + $0x2f0] sm:$0xff]  ;;  %1280 = vst [vmem:[%s10038_s24 + $0x168] sm:$0xff] %v1279_v45 }
  0x29   : > { %1282 = vst [vmem:[%s10038_s24 + $0x170] sm:$0xff] %v1281_v46  ;;  %1284 = vst [vmem:[%s10038_s24 + $0x178] sm:$0xff] %v1283_v47  ;;  %v1285_v48 = vld [vmem:[%s10033_s23 + $0x300] sm:$0xff]  ;;  %v1287_v49 = vld [vmem:[%s10033_s23 + $0x310] sm:$0xff] }
  0x2a   : > { %v1289_v50 = vld [vmem:[%s10033_s23 + $0x320] sm:$0xff]  ;;  %1286 = vst [vmem:[%s10038_s24 + $0x180] sm:$0xff] %v1285_v48  ;;  %1288 = vst [vmem:[%s10038_s24 + $0x188] sm:$0xff] %v1287_v49  ;;  %v1291_v51 = vld [vmem:[%s10033_s23 + $0x330] sm:$0xff] }
  0x2b   : > { %1290 = vst [vmem:[%s10038_s24 + $0x190] sm:$0xff] %v1289_v50  ;;  %v1293_v52 = vld [vmem:[%s10033_s23 + $0x340] sm:$0xff]  ;;  %v1295_v53 = vld [vmem:[%s10033_s23 + $0x350] sm:$0xff]  ;;  %1292 = vst [vmem:[%s10038_s24 + $0x198] sm:$0xff] %v1291_v51 }
  0x2c   : > { %1294 = vst [vmem:[%s10038_s24 + $0x1a0] sm:$0xff] %v1293_v52  ;;  %1296 = vst [vmem:[%s10038_s24 + $0x1a8] sm:$0xff] %v1295_v53  ;;  %v1297_v54 = vld [vmem:[%s10033_s23 + $0x360] sm:$0xff]  ;;  %v1299_v55 = vld [vmem:[%s10033_s23 + $0x370] sm:$0xff] }
  0x2d   : > { %v1301_v56 = vld [vmem:[%s10033_s23 + $0x380] sm:$0xff]  ;;  %1298 = vst [vmem:[%s10038_s24 + $0x1b0] sm:$0xff] %v1297_v54  ;;  %1300 = vst [vmem:[%s10038_s24 + $0x1b8] sm:$0xff] %v1299_v55  ;;  %v1303_v57 = vld [vmem:[%s10033_s23 + $0x390] sm:$0xff] }
  0x2e   : > { %1302 = vst [vmem:[%s10038_s24 + $0x1c0] sm:$0xff] %v1301_v56  ;;  %v1305_v58 = vld [vmem:[%s10033_s23 + $0x3a0] sm:$0xff]  ;;  %v1307_v59 = vld [vmem:[%s10033_s23 + $0x3b0] sm:$0xff]  ;;  %1304 = vst [vmem:[%s10038_s24 + $0x1c8] sm:$0xff] %v1303_v57 }
  0x2f   : > { %1306 = vst [vmem:[%s10038_s24 + $0x1d0] sm:$0xff] %v1305_v58  ;;  %1308 = vst [vmem:[%s10038_s24 + $0x1d8] sm:$0xff] %v1307_v59  ;;  %v1309_v60 = vld [vmem:[%s10033_s23 + $0x3c0] sm:$0xff]  ;;  %v1311_v61 = vld [vmem:[%s10033_s23 + $0x3d0] sm:$0xff] }
  0x30   : > { %v1313_v62 = vld [vmem:[%s10033_s23 + $0x3e0] sm:$0xff]  ;;  %1310 = vst [vmem:[%s10038_s24 + $0x1e0] sm:$0xff] %v1309_v60  ;;  %1312 = vst [vmem:[%s10038_s24 + $0x1e8] sm:$0xff] %v1311_v61  ;;  %v1315_v63 = vld [vmem:[%s10033_s23 + $0x3f0] sm:$0xff] }
  0x31   : > { %1314 = vst [vmem:[%s10038_s24 + $0x1f0] sm:$0xff] %v1313_v62  ;;  %v1317_v0 = vld [vmem:[%s10033_s23 + $0x400] sm:$0xff]  ;;  %v1319_v1 = vld [vmem:[%s10033_s23 + $0x410] sm:$0xff]  ;;  %1316 = vst [vmem:[%s10038_s24 + $0x1f8] sm:$0xff] %v1315_v63 }
  0x32   : > { %1318 = vst [vmem:[%s10038_s24 + $0x200] sm:$0xff] %v1317_v0  ;;  %1320 = vst [vmem:[%s10038_s24 + $0x208] sm:$0xff] %v1319_v1  ;;  %v1321_v2 = vld [vmem:[%s10033_s23 + $0x420] sm:$0xff]  ;;  %v1323_v3 = vld [vmem:[%s10033_s23 + $0x430] sm:$0xff] }
  0x33   : > { %v1325_v4 = vld [vmem:[%s10033_s23 + $0x440] sm:$0xff]  ;;  %1322 = vst [vmem:[%s10038_s24 + $0x210] sm:$0xff] %v1321_v2  ;;  %1324 = vst [vmem:[%s10038_s24 + $0x218] sm:$0xff] %v1323_v3  ;;  %v1327_v5 = vld [vmem:[%s10033_s23 + $0x450] sm:$0xff] }
  0x34   : > { %1326 = vst [vmem:[%s10038_s24 + $0x220] sm:$0xff] %v1325_v4  ;;  %v1329_v6 = vld [vmem:[%s10033_s23 + $0x460] sm:$0xff]  ;;  %v1331_v7 = vld [vmem:[%s10033_s23 + $0x470] sm:$0xff]  ;;  %1328 = vst [vmem:[%s10038_s24 + $0x228] sm:$0xff] %v1327_v5 }
  0x35   : > { %1330 = vst [vmem:[%s10038_s24 + $0x230] sm:$0xff] %v1329_v6  ;;  %1332 = vst [vmem:[%s10038_s24 + $0x238] sm:$0xff] %v1331_v7  ;;  %v1333_v8 = vld [vmem:[%s10033_s23 + $0x480] sm:$0xff]  ;;  %v1335_v9 = vld [vmem:[%s10033_s23 + $0x490] sm:$0xff] }
  0x36   : > { %v1337_v10 = vld [vmem:[%s10033_s23 + $0x4a0] sm:$0xff]  ;;  %1334 = vst [vmem:[%s10038_s24 + $0x240] sm:$0xff] %v1333_v8  ;;  %1336 = vst [vmem:[%s10038_s24 + $0x248] sm:$0xff] %v1335_v9  ;;  %v1339_v11 = vld [vmem:[%s10033_s23 + $0x4b0] sm:$0xff] }
  0x37   : > { %1338 = vst [vmem:[%s10038_s24 + $0x250] sm:$0xff] %v1337_v10  ;;  %v1341_v12 = vld [vmem:[%s10033_s23 + $0x4c0] sm:$0xff]  ;;  %v1343_v13 = vld [vmem:[%s10033_s23 + $0x4d0] sm:$0xff]  ;;  %1340 = vst [vmem:[%s10038_s24 + $0x258] sm:$0xff] %v1339_v11 }
  0x38   : > { %1342 = vst [vmem:[%s10038_s24 + $0x260] sm:$0xff] %v1341_v12  ;;  %1344 = vst [vmem:[%s10038_s24 + $0x268] sm:$0xff] %v1343_v13  ;;  %v1345_v14 = vld [vmem:[%s10033_s23 + $0x4e0] sm:$0xff]  ;;  %v1347_v15 = vld [vmem:[%s10033_s23 + $0x4f0] sm:$0xff] }
  0x39   : > { %v1349_v16 = vld [vmem:[%s10033_s23 + $0x500] sm:$0xff]  ;;  %1346 = vst [vmem:[%s10038_s24 + $0x270] sm:$0xff] %v1345_v14  ;;  %1348 = vst [vmem:[%s10038_s24 + $0x278] sm:$0xff] %v1347_v15  ;;  %v1351_v17 = vld [vmem:[%s10033_s23 + $0x510] sm:$0xff] }
  0x3a   : > { %1350 = vst [vmem:[%s10038_s24 + $0x280] sm:$0xff] %v1349_v16  ;;  %v1353_v18 = vld [vmem:[%s10033_s23 + $0x520] sm:$0xff]  ;;  %v1355_v19 = vld [vmem:[%s10033_s23 + $0x530] sm:$0xff]  ;;  %1352 = vst [vmem:[%s10038_s24 + $0x288] sm:$0xff] %v1351_v17 }
  0x3b   : > { %1354 = vst [vmem:[%s10038_s24 + $0x290] sm:$0xff] %v1353_v18  ;;  %1356 = vst [vmem:[%s10038_s24 + $0x298] sm:$0xff] %v1355_v19  ;;  %v1357_v20 = vld [vmem:[%s10033_s23 + $0x540] sm:$0xff]  ;;  %v1359_v21 = vld [vmem:[%s10033_s23 + $0x550] sm:$0xff] }
  0x3c   : > { %v1361_v22 = vld [vmem:[%s10033_s23 + $0x560] sm:$0xff]  ;;  %1358 = vst [vmem:[%s10038_s24 + $0x2a0] sm:$0xff] %v1357_v20  ;;  %1360 = vst [vmem:[%s10038_s24 + $0x2a8] sm:$0xff] %v1359_v21  ;;  %v1363_v23 = vld [vmem:[%s10033_s23 + $0x570] sm:$0xff] }
  0x3d   : > { %1362 = vst [vmem:[%s10038_s24 + $0x2b0] sm:$0xff] %v1361_v22  ;;  %v1365_v24 = vld [vmem:[%s10033_s23 + $0x580] sm:$0xff]  ;;  %v1367_v25 = vld [vmem:[%s10033_s23 + $0x590] sm:$0xff]  ;;  %1364 = vst [vmem:[%s10038_s24 + $0x2b8] sm:$0xff] %v1363_v23 }
  0x3e   : > { %1366 = vst [vmem:[%s10038_s24 + $0x2c0] sm:$0xff] %v1365_v24  ;;  %1368 = vst [vmem:[%s10038_s24 + $0x2c8] sm:$0xff] %v1367_v25  ;;  %v1369_v26 = vld [vmem:[%s10033_s23 + $0x5a0] sm:$0xff]  ;;  %v1371_v27 = vld [vmem:[%s10033_s23 + $0x5b0] sm:$0xff] }
  0x3f   : > { %v1373_v28 = vld [vmem:[%s10033_s23 + $0x5c0] sm:$0xff]  ;;  %1370 = vst [vmem:[%s10038_s24 + $0x2d0] sm:$0xff] %v1369_v26  ;;  %1372 = vst [vmem:[%s10038_s24 + $0x2d8] sm:$0xff] %v1371_v27  ;;  %v1375_v29 = vld [vmem:[%s10033_s23 + $0x5d0] sm:$0xff] }
  0x40   : > { %1374 = vst [vmem:[%s10038_s24 + $0x2e0] sm:$0xff] %v1373_v28  ;;  %v1377_v30 = vld [vmem:[%s10033_s23 + $0x5e0] sm:$0xff]  ;;  %v1379_v31 = vld [vmem:[%s10033_s23 + $0x5f0] sm:$0xff]  ;;  %1376 = vst [vmem:[%s10038_s24 + $0x2e8] sm:$0xff] %v1375_v29 }
  0x41   : > { %1378 = vst [vmem:[%s10038_s24 + $0x2f0] sm:$0xff] %v1377_v30  ;;  %1380 = vst [vmem:[%s10038_s24 + $0x2f8] sm:$0xff] %v1379_v31  ;;  %v1381_v32 = vld [vmem:[%s10033_s23 + $0x600] sm:$0xff]  ;;  %v1383_v33 = vld [vmem:[%s10033_s23 + $0x610] sm:$0xff] }
  0x42   : > { %v1385_v34 = vld [vmem:[%s10033_s23 + $0x620] sm:$0xff]  ;;  %1382 = vst [vmem:[%s10038_s24 + $0x300] sm:$0xff] %v1381_v32  ;;  %1384 = vst [vmem:[%s10038_s24 + $0x308] sm:$0xff] %v1383_v33  ;;  %v1387_v35 = vld [vmem:[%s10033_s23 + $0x630] sm:$0xff] }
  0x43   : > { %1386 = vst [vmem:[%s10038_s24 + $0x310] sm:$0xff] %v1385_v34  ;;  %v1389_v36 = vld [vmem:[%s10033_s23 + $0x640] sm:$0xff]  ;;  %v1391_v37 = vld [vmem:[%s10033_s23 + $0x650] sm:$0xff]  ;;  %1388 = vst [vmem:[%s10038_s24 + $0x318] sm:$0xff] %v1387_v35 }
  0x44   : > { %1390 = vst [vmem:[%s10038_s24 + $0x320] sm:$0xff] %v1389_v36  ;;  %1392 = vst [vmem:[%s10038_s24 + $0x328] sm:$0xff] %v1391_v37  ;;  %v1393_v38 = vld [vmem:[%s10033_s23 + $0x660] sm:$0xff]  ;;  %v1395_v39 = vld [vmem:[%s10033_s23 + $0x670] sm:$0xff] }
  0x45   : > { %v1397_v40 = vld [vmem:[%s10033_s23 + $0x680] sm:$0xff]  ;;  %1394 = vst [vmem:[%s10038_s24 + $0x330] sm:$0xff] %v1393_v38  ;;  %1396 = vst [vmem:[%s10038_s24 + $0x338] sm:$0xff] %v1395_v39  ;;  %v1399_v41 = vld [vmem:[%s10033_s23 + $0x690] sm:$0xff] }
  0x46   : > { %1398 = vst [vmem:[%s10038_s24 + $0x340] sm:$0xff] %v1397_v40  ;;  %v1401_v42 = vld [vmem:[%s10033_s23 + $0x6a0] sm:$0xff]  ;;  %v1403_v43 = vld [vmem:[%s10033_s23 + $0x6b0] sm:$0xff]  ;;  %1400 = vst [vmem:[%s10038_s24 + $0x348] sm:$0xff] %v1399_v41 }
  0x47   : > { %1402 = vst [vmem:[%s10038_s24 + $0x350] sm:$0xff] %v1401_v42  ;;  %1404 = vst [vmem:[%s10038_s24 + $0x358] sm:$0xff] %v1403_v43  ;;  %v1405_v44 = vld [vmem:[%s10033_s23 + $0x6c0] sm:$0xff]  ;;  %v1407_v45 = vld [vmem:[%s10033_s23 + $0x6d0] sm:$0xff] }
  0x48   : > { %v1409_v46 = vld [vmem:[%s10033_s23 + $0x6e0] sm:$0xff]  ;;  %1406 = vst [vmem:[%s10038_s24 + $0x360] sm:$0xff] %v1405_v44  ;;  %1408 = vst [vmem:[%s10038_s24 + $0x368] sm:$0xff] %v1407_v45  ;;  %v1411_v47 = vld [vmem:[%s10033_s23 + $0x6f0] sm:$0xff] }
  0x49   : > { %1410 = vst [vmem:[%s10038_s24 + $0x370] sm:$0xff] %v1409_v46  ;;  %v1413_v48 = vld [vmem:[%s10033_s23 + $0x700] sm:$0xff]  ;;  %v1415_v49 = vld [vmem:[%s10033_s23 + $0x710] sm:$0xff]  ;;  %1412 = vst [vmem:[%s10038_s24 + $0x378] sm:$0xff] %v1411_v47 }
  0x4a   : > { %1414 = vst [vmem:[%s10038_s24 + $0x380] sm:$0xff] %v1413_v48  ;;  %1416 = vst [vmem:[%s10038_s24 + $0x388] sm:$0xff] %v1415_v49  ;;  %v1417_v50 = vld [vmem:[%s10033_s23 + $0x720] sm:$0xff]  ;;  %v1419_v51 = vld [vmem:[%s10033_s23 + $0x730] sm:$0xff] }
  0x4b   : > { %v1421_v52 = vld [vmem:[%s10033_s23 + $0x740] sm:$0xff]  ;;  %1418 = vst [vmem:[%s10038_s24 + $0x390] sm:$0xff] %v1417_v50  ;;  %1420 = vst [vmem:[%s10038_s24 + $0x398] sm:$0xff] %v1419_v51  ;;  %v1423_v53 = vld [vmem:[%s10033_s23 + $0x750] sm:$0xff] }
  0x4c   : > { %1422 = vst [vmem:[%s10038_s24 + $0x3a0] sm:$0xff] %v1421_v52  ;;  %v1425_v54 = vld [vmem:[%s10033_s23 + $0x760] sm:$0xff]  ;;  %v1427_v55 = vld [vmem:[%s10033_s23 + $0x770] sm:$0xff]  ;;  %1424 = vst [vmem:[%s10038_s24 + $0x3a8] sm:$0xff] %v1423_v53 }
  0x4d   : > { %1426 = vst [vmem:[%s10038_s24 + $0x3b0] sm:$0xff] %v1425_v54  ;;  %1428 = vst [vmem:[%s10038_s24 + $0x3b8] sm:$0xff] %v1427_v55  ;;  %v1429_v56 = vld [vmem:[%s10033_s23 + $0x780] sm:$0xff]  ;;  %v1431_v57 = vld [vmem:[%s10033_s23 + $0x790] sm:$0xff] }
  0x4e   : > { %v1433_v58 = vld [vmem:[%s10033_s23 + $0x7a0] sm:$0xff]  ;;  %1430 = vst [vmem:[%s10038_s24 + $0x3c0] sm:$0xff] %v1429_v56  ;;  %1432 = vst [vmem:[%s10038_s24 + $0x3c8] sm:$0xff] %v1431_v57  ;;  %v1435_v59 = vld [vmem:[%s10033_s23 + $0x7b0] sm:$0xff] }
  0x4f   : > { %1434 = vst [vmem:[%s10038_s24 + $0x3d0] sm:$0xff] %v1433_v58  ;;  %v1437_v60 = vld [vmem:[%s10033_s23 + $0x7c0] sm:$0xff]  ;;  %v1439_v61 = vld [vmem:[%s10033_s23 + $0x7d0] sm:$0xff]  ;;  %1436 = vst [vmem:[%s10038_s24 + $0x3d8] sm:$0xff] %v1435_v59 }
  0x50   : > { %1438 = vst [vmem:[%s10038_s24 + $0x3e0] sm:$0xff] %v1437_v60  ;;  %1440 = vst [vmem:[%s10038_s24 + $0x3e8] sm:$0xff] %v1439_v61  ;;  %v1441_v62 = vld [vmem:[%s10033_s23 + $0x7e0] sm:$0xff]  ;;  %v1443_v63 = vld [vmem:[%s10033_s23 + $0x7f0] sm:$0xff] }
  0x51   : > { %v1445_v0 = vld [vmem:[%s10033_s23 + $0x800] sm:$0xff]  ;;  %1442 = vst [vmem:[%s10038_s24 + $0x3f0] sm:$0xff] %v1441_v62  ;;  %1444 = vst [vmem:[%s10038_s24 + $0x3f8] sm:$0xff] %v1443_v63  ;;  %v1447_v1 = vld [vmem:[%s10033_s23 + $0x810] sm:$0xff] }
  0x52   : > { %1446 = vst [vmem:[%s10038_s24 + $0x400] sm:$0xff] %v1445_v0  ;;  %v1449_v2 = vld [vmem:[%s10033_s23 + $0x820] sm:$0xff]  ;;  %v1451_v3 = vld [vmem:[%s10033_s23 + $0x830] sm:$0xff]  ;;  %1448 = vst [vmem:[%s10038_s24 + $0x408] sm:$0xff] %v1447_v1 }
  0x53   : > { %1450 = vst [vmem:[%s10038_s24 + $0x410] sm:$0xff] %v1449_v2  ;;  %1452 = vst [vmem:[%s10038_s24 + $0x418] sm:$0xff] %v1451_v3  ;;  %v1453_v4 = vld [vmem:[%s10033_s23 + $0x840] sm:$0xff]  ;;  %v1455_v5 = vld [vmem:[%s10033_s23 + $0x850] sm:$0xff] }
  0x54   : > { %v1457_v6 = vld [vmem:[%s10033_s23 + $0x860] sm:$0xff]  ;;  %1454 = vst [vmem:[%s10038_s24 + $0x420] sm:$0xff] %v1453_v4  ;;  %1456 = vst [vmem:[%s10038_s24 + $0x428] sm:$0xff] %v1455_v5  ;;  %v1459_v7 = vld [vmem:[%s10033_s23 + $0x870] sm:$0xff] }
  0x55   : > { %1458 = vst [vmem:[%s10038_s24 + $0x430] sm:$0xff] %v1457_v6  ;;  %v1461_v8 = vld [vmem:[%s10033_s23 + $0x880] sm:$0xff]  ;;  %v1463_v9 = vld [vmem:[%s10033_s23 + $0x890] sm:$0xff]  ;;  %1460 = vst [vmem:[%s10038_s24 + $0x438] sm:$0xff] %v1459_v7 }
  0x56   : > { %1462 = vst [vmem:[%s10038_s24 + $0x440] sm:$0xff] %v1461_v8  ;;  %1464 = vst [vmem:[%s10038_s24 + $0x448] sm:$0xff] %v1463_v9  ;;  %v1465_v10 = vld [vmem:[%s10033_s23 + $0x8a0] sm:$0xff]  ;;  %v1467_v11 = vld [vmem:[%s10033_s23 + $0x8b0] sm:$0xff] }
  0x57   : > { %v1469_v12 = vld [vmem:[%s10033_s23 + $0x8c0] sm:$0xff]  ;;  %1466 = vst [vmem:[%s10038_s24 + $0x450] sm:$0xff] %v1465_v10  ;;  %1468 = vst [vmem:[%s10038_s24 + $0x458] sm:$0xff] %v1467_v11  ;;  %v1471_v13 = vld [vmem:[%s10033_s23 + $0x8d0] sm:$0xff] }
  0x58   : > { %1470 = vst [vmem:[%s10038_s24 + $0x460] sm:$0xff] %v1469_v12  ;;  %v1473_v14 = vld [vmem:[%s10033_s23 + $0x8e0] sm:$0xff]  ;;  %v1475_v15 = vld [vmem:[%s10033_s23 + $0x8f0] sm:$0xff]  ;;  %1472 = vst [vmem:[%s10038_s24 + $0x468] sm:$0xff] %v1471_v13 }
  0x59   : > { %1474 = vst [vmem:[%s10038_s24 + $0x470] sm:$0xff] %v1473_v14  ;;  %1476 = vst [vmem:[%s10038_s24 + $0x478] sm:$0xff] %v1475_v15  ;;  %v1477_v16 = vld [vmem:[%s10033_s23 + $0x900] sm:$0xff]  ;;  %v1479_v17 = vld [vmem:[%s10033_s23 + $0x910] sm:$0xff] }
  0x5a   : > { %v1481_v18 = vld [vmem:[%s10033_s23 + $0x920] sm:$0xff]  ;;  %1478 = vst [vmem:[%s10038_s24 + $0x480] sm:$0xff] %v1477_v16  ;;  %1480 = vst [vmem:[%s10038_s24 + $0x488] sm:$0xff] %v1479_v17  ;;  %v1483_v19 = vld [vmem:[%s10033_s23 + $0x930] sm:$0xff] }
  0x5b   : > { %1482 = vst [vmem:[%s10038_s24 + $0x490] sm:$0xff] %v1481_v18  ;;  %v1485_v20 = vld [vmem:[%s10033_s23 + $0x940] sm:$0xff]  ;;  %v1487_v21 = vld [vmem:[%s10033_s23 + $0x950] sm:$0xff]  ;;  %1484 = vst [vmem:[%s10038_s24 + $0x498] sm:$0xff] %v1483_v19 }
  0x5c   : > { %1486 = vst [vmem:[%s10038_s24 + $0x4a0] sm:$0xff] %v1485_v20  ;;  %1488 = vst [vmem:[%s10038_s24 + $0x4a8] sm:$0xff] %v1487_v21  ;;  %v1489_v22 = vld [vmem:[%s10033_s23 + $0x960] sm:$0xff]  ;;  %v1491_v23 = vld [vmem:[%s10033_s23 + $0x970] sm:$0xff] }
  0x5d   : > { %v1493_v24 = vld [vmem:[%s10033_s23 + $0x980] sm:$0xff]  ;;  %1490 = vst [vmem:[%s10038_s24 + $0x4b0] sm:$0xff] %v1489_v22  ;;  %1492 = vst [vmem:[%s10038_s24 + $0x4b8] sm:$0xff] %v1491_v23  ;;  %v1495_v25 = vld [vmem:[%s10033_s23 + $0x990] sm:$0xff] }
  0x5e   : > { %1494 = vst [vmem:[%s10038_s24 + $0x4c0] sm:$0xff] %v1493_v24  ;;  %v1497_v26 = vld [vmem:[%s10033_s23 + $0x9a0] sm:$0xff]  ;;  %v1499_v27 = vld [vmem:[%s10033_s23 + $0x9b0] sm:$0xff]  ;;  %1496 = vst [vmem:[%s10038_s24 + $0x4c8] sm:$0xff] %v1495_v25 }
  0x5f   : > { %1498 = vst [vmem:[%s10038_s24 + $0x4d0] sm:$0xff] %v1497_v26  ;;  %1500 = vst [vmem:[%s10038_s24 + $0x4d8] sm:$0xff] %v1499_v27  ;;  %v1501_v28 = vld [vmem:[%s10033_s23 + $0x9c0] sm:$0xff]  ;;  %v1503_v29 = vld [vmem:[%s10033_s23 + $0x9d0] sm:$0xff] }
  0x60   : > { %v1505_v30 = vld [vmem:[%s10033_s23 + $0x9e0] sm:$0xff]  ;;  %1502 = vst [vmem:[%s10038_s24 + $0x4e0] sm:$0xff] %v1501_v28  ;;  %1504 = vst [vmem:[%s10038_s24 + $0x4e8] sm:$0xff] %v1503_v29  ;;  %v1507_v31 = vld [vmem:[%s10033_s23 + $0x9f0] sm:$0xff] }
  0x61   : > { %1506 = vst [vmem:[%s10038_s24 + $0x4f0] sm:$0xff] %v1505_v30  ;;  %v1509_v32 = vld [vmem:[%s10033_s23 + $0xa00] sm:$0xff]  ;;  %v1511_v33 = vld [vmem:[%s10033_s23 + $0xa10] sm:$0xff]  ;;  %1508 = vst [vmem:[%s10038_s24 + $0x4f8] sm:$0xff] %v1507_v31 }
  0x62   : > { %1510 = vst [vmem:[%s10038_s24 + $0x500] sm:$0xff] %v1509_v32  ;;  %1512 = vst [vmem:[%s10038_s24 + $0x508] sm:$0xff] %v1511_v33  ;;  %v1513_v34 = vld [vmem:[%s10033_s23 + $0xa20] sm:$0xff]  ;;  %v1515_v35 = vld [vmem:[%s10033_s23 + $0xa30] sm:$0xff] }
  0x63   : > { %v1517_v36 = vld [vmem:[%s10033_s23 + $0xa40] sm:$0xff]  ;;  %1514 = vst [vmem:[%s10038_s24 + $0x510] sm:$0xff] %v1513_v34  ;;  %1516 = vst [vmem:[%s10038_s24 + $0x518] sm:$0xff] %v1515_v35  ;;  %v1519_v37 = vld [vmem:[%s10033_s23 + $0xa50] sm:$0xff] }
  0x64   : > { %1518 = vst [vmem:[%s10038_s24 + $0x520] sm:$0xff] %v1517_v36  ;;  %v1521_v38 = vld [vmem:[%s10033_s23 + $0xa60] sm:$0xff]  ;;  %v1523_v39 = vld [vmem:[%s10033_s23 + $0xa70] sm:$0xff]  ;;  %1520 = vst [vmem:[%s10038_s24 + $0x528] sm:$0xff] %v1519_v37 }
  0x65   : > { %1522 = vst [vmem:[%s10038_s24 + $0x530] sm:$0xff] %v1521_v38  ;;  %1524 = vst [vmem:[%s10038_s24 + $0x538] sm:$0xff] %v1523_v39  ;;  %v1525_v40 = vld [vmem:[%s10033_s23 + $0xa80] sm:$0xff]  ;;  %v1527_v41 = vld [vmem:[%s10033_s23 + $0xa90] sm:$0xff] }
  0x66   : > { %v1529_v42 = vld [vmem:[%s10033_s23 + $0xaa0] sm:$0xff]  ;;  %1526 = vst [vmem:[%s10038_s24 + $0x540] sm:$0xff] %v1525_v40  ;;  %1528 = vst [vmem:[%s10038_s24 + $0x548] sm:$0xff] %v1527_v41  ;;  %v1531_v43 = vld [vmem:[%s10033_s23 + $0xab0] sm:$0xff] }
  0x67   : > { %1530 = vst [vmem:[%s10038_s24 + $0x550] sm:$0xff] %v1529_v42  ;;  %v1533_v44 = vld [vmem:[%s10033_s23 + $0xac0] sm:$0xff]  ;;  %v1535_v45 = vld [vmem:[%s10033_s23 + $0xad0] sm:$0xff]  ;;  %1532 = vst [vmem:[%s10038_s24 + $0x558] sm:$0xff] %v1531_v43 }
  0x68   : > { %1534 = vst [vmem:[%s10038_s24 + $0x560] sm:$0xff] %v1533_v44  ;;  %1536 = vst [vmem:[%s10038_s24 + $0x568] sm:$0xff] %v1535_v45  ;;  %v1537_v46 = vld [vmem:[%s10033_s23 + $0xae0] sm:$0xff]  ;;  %v1539_v47 = vld [vmem:[%s10033_s23 + $0xaf0] sm:$0xff] }
  0x69   : > { %v1541_v48 = vld [vmem:[%s10033_s23 + $0xb00] sm:$0xff]  ;;  %1538 = vst [vmem:[%s10038_s24 + $0x570] sm:$0xff] %v1537_v46  ;;  %1540 = vst [vmem:[%s10038_s24 + $0x578] sm:$0xff] %v1539_v47  ;;  %v1543_v49 = vld [vmem:[%s10033_s23 + $0xb10] sm:$0xff] }
  0x6a   : > { %1542 = vst [vmem:[%s10038_s24 + $0x580] sm:$0xff] %v1541_v48  ;;  %v1545_v50 = vld [vmem:[%s10033_s23 + $0xb20] sm:$0xff]  ;;  %v1547_v51 = vld [vmem:[%s10033_s23 + $0xb30] sm:$0xff]  ;;  %1544 = vst [vmem:[%s10038_s24 + $0x588] sm:$0xff] %v1543_v49 }
  0x6b   : > { %1546 = vst [vmem:[%s10038_s24 + $0x590] sm:$0xff] %v1545_v50  ;;  %1548 = vst [vmem:[%s10038_s24 + $0x598] sm:$0xff] %v1547_v51  ;;  %v1549_v52 = vld [vmem:[%s10033_s23 + $0xb40] sm:$0xff]  ;;  %v1551_v53 = vld [vmem:[%s10033_s23 + $0xb50] sm:$0xff] }
  0x6c   : > { %v1553_v54 = vld [vmem:[%s10033_s23 + $0xb60] sm:$0xff]  ;;  %1550 = vst [vmem:[%s10038_s24 + $0x5a0] sm:$0xff] %v1549_v52  ;;  %1552 = vst [vmem:[%s10038_s24 + $0x5a8] sm:$0xff] %v1551_v53  ;;  %v1555_v55 = vld [vmem:[%s10033_s23 + $0xb70] sm:$0xff] }
  0x6d   : > { %1554 = vst [vmem:[%s10038_s24 + $0x5b0] sm:$0xff] %v1553_v54  ;;  %v1557_v56 = vld [vmem:[%s10033_s23 + $0xb80] sm:$0xff]  ;;  %v1559_v57 = vld [vmem:[%s10033_s23 + $0xb90] sm:$0xff]  ;;  %1556 = vst [vmem:[%s10038_s24 + $0x5b8] sm:$0xff] %v1555_v55 }
  0x6e   : > { %1558 = vst [vmem:[%s10038_s24 + $0x5c0] sm:$0xff] %v1557_v56  ;;  %1560 = vst [vmem:[%s10038_s24 + $0x5c8] sm:$0xff] %v1559_v57  ;;  %v1561_v58 = vld [vmem:[%s10033_s23 + $0xba0] sm:$0xff]  ;;  %v1563_v59 = vld [vmem:[%s10033_s23 + $0xbb0] sm:$0xff] }
  0x6f   : > { %v1565_v60 = vld [vmem:[%s10033_s23 + $0xbc0] sm:$0xff]  ;;  %1562 = vst [vmem:[%s10038_s24 + $0x5d0] sm:$0xff] %v1561_v58  ;;  %1564 = vst [vmem:[%s10038_s24 + $0x5d8] sm:$0xff] %v1563_v59  ;;  %v1567_v61 = vld [vmem:[%s10033_s23 + $0xbd0] sm:$0xff] }
  0x70   : > { %1566 = vst [vmem:[%s10038_s24 + $0x5e0] sm:$0xff] %v1565_v60  ;;  %v1569_v62 = vld [vmem:[%s10033_s23 + $0xbe0] sm:$0xff]  ;;  %v1571_v63 = vld [vmem:[%s10033_s23 + $0xbf0] sm:$0xff]  ;;  %1568 = vst [vmem:[%s10038_s24 + $0x5e8] sm:$0xff] %v1567_v61 }
  0x71   : > { %1570 = vst [vmem:[%s10038_s24 + $0x5f0] sm:$0xff] %v1569_v62  ;;  %1572 = vst [vmem:[%s10038_s24 + $0x5f8] sm:$0xff] %v1571_v63  ;;  %v1573_v0 = vld [vmem:[%s10033_s23 + $0xc00] sm:$0xff]  ;;  %v1575_v1 = vld [vmem:[%s10033_s23 + $0xc10] sm:$0xff] }
  0x72   : > { %v1577_v2 = vld [vmem:[%s10033_s23 + $0xc20] sm:$0xff]  ;;  %1574 = vst [vmem:[%s10038_s24 + $0x600] sm:$0xff] %v1573_v0  ;;  %1576 = vst [vmem:[%s10038_s24 + $0x608] sm:$0xff] %v1575_v1  ;;  %v1579_v3 = vld [vmem:[%s10033_s23 + $0xc30] sm:$0xff] }
  0x73   : > { %1578 = vst [vmem:[%s10038_s24 + $0x610] sm:$0xff] %v1577_v2  ;;  %v1581_v4 = vld [vmem:[%s10033_s23 + $0xc40] sm:$0xff]  ;;  %v1583_v5 = vld [vmem:[%s10033_s23 + $0xc50] sm:$0xff]  ;;  %1580 = vst [vmem:[%s10038_s24 + $0x618] sm:$0xff] %v1579_v3 }
  0x74   : > { %1582 = vst [vmem:[%s10038_s24 + $0x620] sm:$0xff] %v1581_v4  ;;  %1584 = vst [vmem:[%s10038_s24 + $0x628] sm:$0xff] %v1583_v5  ;;  %v1585_v6 = vld [vmem:[%s10033_s23 + $0xc60] sm:$0xff]  ;;  %v1587_v7 = vld [vmem:[%s10033_s23 + $0xc70] sm:$0xff] }
  0x75   : > { %v1589_v8 = vld [vmem:[%s10033_s23 + $0xc80] sm:$0xff]  ;;  %1586 = vst [vmem:[%s10038_s24 + $0x630] sm:$0xff] %v1585_v6  ;;  %1588 = vst [vmem:[%s10038_s24 + $0x638] sm:$0xff] %v1587_v7  ;;  %v1591_v9 = vld [vmem:[%s10033_s23 + $0xc90] sm:$0xff] }
  0x76   : > { %1590 = vst [vmem:[%s10038_s24 + $0x640] sm:$0xff] %v1589_v8  ;;  %v1593_v10 = vld [vmem:[%s10033_s23 + $0xca0] sm:$0xff]  ;;  %v1595_v11 = vld [vmem:[%s10033_s23 + $0xcb0] sm:$0xff]  ;;  %1592 = vst [vmem:[%s10038_s24 + $0x648] sm:$0xff] %v1591_v9 }
  0x77   : > { %1594 = vst [vmem:[%s10038_s24 + $0x650] sm:$0xff] %v1593_v10  ;;  %1596 = vst [vmem:[%s10038_s24 + $0x658] sm:$0xff] %v1595_v11  ;;  %v1597_v12 = vld [vmem:[%s10033_s23 + $0xcc0] sm:$0xff]  ;;  %v1599_v13 = vld [vmem:[%s10033_s23 + $0xcd0] sm:$0xff] }
  0x78   : > { %v1601_v14 = vld [vmem:[%s10033_s23 + $0xce0] sm:$0xff]  ;;  %1598 = vst [vmem:[%s10038_s24 + $0x660] sm:$0xff] %v1597_v12  ;;  %1600 = vst [vmem:[%s10038_s24 + $0x668] sm:$0xff] %v1599_v13  ;;  %v1603_v15 = vld [vmem:[%s10033_s23 + $0xcf0] sm:$0xff] }
  0x79   : > { %1602 = vst [vmem:[%s10038_s24 + $0x670] sm:$0xff] %v1601_v14  ;;  %v1605_v16 = vld [vmem:[%s10033_s23 + $0xd00] sm:$0xff]  ;;  %v1607_v17 = vld [vmem:[%s10033_s23 + $0xd10] sm:$0xff]  ;;  %1604 = vst [vmem:[%s10038_s24 + $0x678] sm:$0xff] %v1603_v15 }
  0x7a   : > { %1606 = vst [vmem:[%s10038_s24 + $0x680] sm:$0xff] %v1605_v16  ;;  %1608 = vst [vmem:[%s10038_s24 + $0x688] sm:$0xff] %v1607_v17  ;;  %v1609_v18 = vld [vmem:[%s10033_s23 + $0xd20] sm:$0xff]  ;;  %v1611_v19 = vld [vmem:[%s10033_s23 + $0xd30] sm:$0xff] }
  0x7b   : > { %v1613_v20 = vld [vmem:[%s10033_s23 + $0xd40] sm:$0xff]  ;;  %1610 = vst [vmem:[%s10038_s24 + $0x690] sm:$0xff] %v1609_v18  ;;  %1612 = vst [vmem:[%s10038_s24 + $0x698] sm:$0xff] %v1611_v19  ;;  %v1615_v21 = vld [vmem:[%s10033_s23 + $0xd50] sm:$0xff] }
  0x7c   : > { %1614 = vst [vmem:[%s10038_s24 + $0x6a0] sm:$0xff] %v1613_v20  ;;  %v1617_v22 = vld [vmem:[%s10033_s23 + $0xd60] sm:$0xff]  ;;  %v1619_v23 = vld [vmem:[%s10033_s23 + $0xd70] sm:$0xff]  ;;  %1616 = vst [vmem:[%s10038_s24 + $0x6a8] sm:$0xff] %v1615_v21 }
  0x7d   : > { %1618 = vst [vmem:[%s10038_s24 + $0x6b0] sm:$0xff] %v1617_v22  ;;  %1620 = vst [vmem:[%s10038_s24 + $0x6b8] sm:$0xff] %v1619_v23  ;;  %v1621_v24 = vld [vmem:[%s10033_s23 + $0xd80] sm:$0xff]  ;;  %v1623_v25 = vld [vmem:[%s10033_s23 + $0xd90] sm:$0xff] }
  0x7e   : > { %v1625_v26 = vld [vmem:[%s10033_s23 + $0xda0] sm:$0xff]  ;;  %1622 = vst [vmem:[%s10038_s24 + $0x6c0] sm:$0xff] %v1621_v24  ;;  %1624 = vst [vmem:[%s10038_s24 + $0x6c8] sm:$0xff] %v1623_v25  ;;  %v1627_v27 = vld [vmem:[%s10033_s23 + $0xdb0] sm:$0xff] }
  0x7f   : > { %1626 = vst [vmem:[%s10038_s24 + $0x6d0] sm:$0xff] %v1625_v26  ;;  %v1629_v28 = vld [vmem:[%s10033_s23 + $0xdc0] sm:$0xff]  ;;  %v1631_v29 = vld [vmem:[%s10033_s23 + $0xdd0] sm:$0xff]  ;;  %1628 = vst [vmem:[%s10038_s24 + $0x6d8] sm:$0xff] %v1627_v27 }
  0x80   : > { %1630 = vst [vmem:[%s10038_s24 + $0x6e0] sm:$0xff] %v1629_v28  ;;  %1632 = vst [vmem:[%s10038_s24 + $0x6e8] sm:$0xff] %v1631_v29  ;;  %v1633_v30 = vld [vmem:[%s10033_s23 + $0xde0] sm:$0xff]  ;;  %v1635_v31 = vld [vmem:[%s10033_s23 + $0xdf0] sm:$0xff] }
  0x81   : > { %v1637_v32 = vld [vmem:[%s10033_s23 + $0xe00] sm:$0xff]  ;;  %1634 = vst [vmem:[%s10038_s24 + $0x6f0] sm:$0xff] %v1633_v30  ;;  %1636 = vst [vmem:[%s10038_s24 + $0x6f8] sm:$0xff] %v1635_v31  ;;  %v1639_v33 = vld [vmem:[%s10033_s23 + $0xe10] sm:$0xff] }
  0x82   : > { %1638 = vst [vmem:[%s10038_s24 + $0x700] sm:$0xff] %v1637_v32  ;;  %v1641_v34 = vld [vmem:[%s10033_s23 + $0xe20] sm:$0xff]  ;;  %v1643_v35 = vld [vmem:[%s10033_s23 + $0xe30] sm:$0xff]  ;;  %1640 = vst [vmem:[%s10038_s24 + $0x708] sm:$0xff] %v1639_v33 }
  0x83   : > { %1642 = vst [vmem:[%s10038_s24 + $0x710] sm:$0xff] %v1641_v34  ;;  %1644 = vst [vmem:[%s10038_s24 + $0x718] sm:$0xff] %v1643_v35  ;;  %v1645_v36 = vld [vmem:[%s10033_s23 + $0xe40] sm:$0xff]  ;;  %v1647_v37 = vld [vmem:[%s10033_s23 + $0xe50] sm:$0xff] }
  0x84   : > { %v1649_v38 = vld [vmem:[%s10033_s23 + $0xe60] sm:$0xff]  ;;  %1646 = vst [vmem:[%s10038_s24 + $0x720] sm:$0xff] %v1645_v36  ;;  %1648 = vst [vmem:[%s10038_s24 + $0x728] sm:$0xff] %v1647_v37  ;;  %v1651_v39 = vld [vmem:[%s10033_s23 + $0xe70] sm:$0xff] }
  0x85   : > { %1650 = vst [vmem:[%s10038_s24 + $0x730] sm:$0xff] %v1649_v38  ;;  %v1653_v40 = vld [vmem:[%s10033_s23 + $0xe80] sm:$0xff]  ;;  %v1655_v41 = vld [vmem:[%s10033_s23 + $0xe90] sm:$0xff]  ;;  %1652 = vst [vmem:[%s10038_s24 + $0x738] sm:$0xff] %v1651_v39 }
  0x86   : > { %1654 = vst [vmem:[%s10038_s24 + $0x740] sm:$0xff] %v1653_v40  ;;  %1656 = vst [vmem:[%s10038_s24 + $0x748] sm:$0xff] %v1655_v41  ;;  %v1657_v42 = vld [vmem:[%s10033_s23 + $0xea0] sm:$0xff]  ;;  %v1659_v43 = vld [vmem:[%s10033_s23 + $0xeb0] sm:$0xff] }
  0x87   : > { %v1661_v44 = vld [vmem:[%s10033_s23 + $0xec0] sm:$0xff]  ;;  %1658 = vst [vmem:[%s10038_s24 + $0x750] sm:$0xff] %v1657_v42  ;;  %1660 = vst [vmem:[%s10038_s24 + $0x758] sm:$0xff] %v1659_v43  ;;  %v1663_v45 = vld [vmem:[%s10033_s23 + $0xed0] sm:$0xff] }
  0x88   : > { %1662 = vst [vmem:[%s10038_s24 + $0x760] sm:$0xff] %v1661_v44  ;;  %v1665_v46 = vld [vmem:[%s10033_s23 + $0xee0] sm:$0xff]  ;;  %v1667_v47 = vld [vmem:[%s10033_s23 + $0xef0] sm:$0xff]  ;;  %1664 = vst [vmem:[%s10038_s24 + $0x768] sm:$0xff] %v1663_v45 }
  0x89   : > { %1666 = vst [vmem:[%s10038_s24 + $0x770] sm:$0xff] %v1665_v46  ;;  %1668 = vst [vmem:[%s10038_s24 + $0x778] sm:$0xff] %v1667_v47  ;;  %v1669_v48 = vld [vmem:[%s10033_s23 + $0xf00] sm:$0xff]  ;;  %v1671_v49 = vld [vmem:[%s10033_s23 + $0xf10] sm:$0xff] }
  0x8a   : > { %v1673_v50 = vld [vmem:[%s10033_s23 + $0xf20] sm:$0xff]  ;;  %1670 = vst [vmem:[%s10038_s24 + $0x780] sm:$0xff] %v1669_v48  ;;  %1672 = vst [vmem:[%s10038_s24 + $0x788] sm:$0xff] %v1671_v49  ;;  %v1675_v51 = vld [vmem:[%s10033_s23 + $0xf30] sm:$0xff] }
  0x8b   : > { %1674 = vst [vmem:[%s10038_s24 + $0x790] sm:$0xff] %v1673_v50  ;;  %v1677_v52 = vld [vmem:[%s10033_s23 + $0xf40] sm:$0xff]  ;;  %v1679_v53 = vld [vmem:[%s10033_s23 + $0xf50] sm:$0xff]  ;;  %1676 = vst [vmem:[%s10038_s24 + $0x798] sm:$0xff] %v1675_v51 }
  0x8c   : > { %1678 = vst [vmem:[%s10038_s24 + $0x7a0] sm:$0xff] %v1677_v52  ;;  %1680 = vst [vmem:[%s10038_s24 + $0x7a8] sm:$0xff] %v1679_v53  ;;  %v1681_v54 = vld [vmem:[%s10033_s23 + $0xf60] sm:$0xff]  ;;  %v1683_v55 = vld [vmem:[%s10033_s23 + $0xf70] sm:$0xff] }
  0x8d   : > { %v1685_v56 = vld [vmem:[%s10033_s23 + $0xf80] sm:$0xff]  ;;  %1682 = vst [vmem:[%s10038_s24 + $0x7b0] sm:$0xff] %v1681_v54  ;;  %1684 = vst [vmem:[%s10038_s24 + $0x7b8] sm:$0xff] %v1683_v55  ;;  %v1687_v57 = vld [vmem:[%s10033_s23 + $0xf90] sm:$0xff] }
  0x8e   : > { %1686 = vst [vmem:[%s10038_s24 + $0x7c0] sm:$0xff] %v1685_v56  ;;  %v1689_v58 = vld [vmem:[%s10033_s23 + $0xfa0] sm:$0xff]  ;;  %v1691_v59 = vld [vmem:[%s10033_s23 + $0xfb0] sm:$0xff]  ;;  %1688 = vst [vmem:[%s10038_s24 + $0x7c8] sm:$0xff] %v1687_v57 }
  0x8f   : > { %1690 = vst [vmem:[%s10038_s24 + $0x7d0] sm:$0xff] %v1689_v58  ;;  %1692 = vst [vmem:[%s10038_s24 + $0x7d8] sm:$0xff] %v1691_v59  ;;  %v1693_v60 = vld [vmem:[%s10033_s23 + $0xfc0] sm:$0xff]  ;;  %v1695_v61 = vld [vmem:[%s10033_s23 + $0xfd0] sm:$0xff] }
  0x90   : > { %v1697_v62 = vld [vmem:[%s10033_s23 + $0xfe0] sm:$0xff]  ;;  %1694 = vst [vmem:[%s10038_s24 + $0x7e0] sm:$0xff] %v1693_v60  ;;  %1696 = vst [vmem:[%s10038_s24 + $0x7e8] sm:$0xff] %v1695_v61  ;;  %v1699_v63 = vld [vmem:[%s10033_s23 + $0xff0] sm:$0xff] }
  0x91   : > { %1698 = vst [vmem:[%s10038_s24 + $0x7f0] sm:$0xff] %v1697_v62  ;;  %v1701_v0 = vld [vmem:[%s10033_s23 + $0x1000] sm:$0xff]  ;;  %v1703_v1 = vld [vmem:[%s10033_s23 + $0x1010] sm:$0xff]  ;;  %1700 = vst [vmem:[%s10038_s24 + $0x7f8] sm:$0xff] %v1699_v63 }
  0x92   : > { %1702 = vst [vmem:[%s10038_s24 + $0x800] sm:$0xff] %v1701_v0  ;;  %1704 = vst [vmem:[%s10038_s24 + $0x808] sm:$0xff] %v1703_v1  ;;  %v1705_v2 = vld [vmem:[%s10033_s23 + $0x1020] sm:$0xff]  ;;  %v1707_v3 = vld [vmem:[%s10033_s23 + $0x1030] sm:$0xff] }
  0x93   : > { %v1709_v4 = vld [vmem:[%s10033_s23 + $0x1040] sm:$0xff]  ;;  %1706 = vst [vmem:[%s10038_s24 + $0x810] sm:$0xff] %v1705_v2  ;;  %1708 = vst [vmem:[%s10038_s24 + $0x818] sm:$0xff] %v1707_v3  ;;  %v1711_v5 = vld [vmem:[%s10033_s23 + $0x1050] sm:$0xff] }
  0x94   : > { %1710 = vst [vmem:[%s10038_s24 + $0x820] sm:$0xff] %v1709_v4  ;;  %v1713_v6 = vld [vmem:[%s10033_s23 + $0x1060] sm:$0xff]  ;;  %v1715_v7 = vld [vmem:[%s10033_s23 + $0x1070] sm:$0xff]  ;;  %1712 = vst [vmem:[%s10038_s24 + $0x828] sm:$0xff] %v1711_v5 }
  0x95   : > { %1714 = vst [vmem:[%s10038_s24 + $0x830] sm:$0xff] %v1713_v6  ;;  %1716 = vst [vmem:[%s10038_s24 + $0x838] sm:$0xff] %v1715_v7  ;;  %v1717_v8 = vld [vmem:[%s10033_s23 + $0x1080] sm:$0xff]  ;;  %v1719_v9 = vld [vmem:[%s10033_s23 + $0x1090] sm:$0xff] }
  0x96   : > { %v1721_v10 = vld [vmem:[%s10033_s23 + $0x10a0] sm:$0xff]  ;;  %1718 = vst [vmem:[%s10038_s24 + $0x840] sm:$0xff] %v1717_v8  ;;  %1720 = vst [vmem:[%s10038_s24 + $0x848] sm:$0xff] %v1719_v9  ;;  %v1723_v11 = vld [vmem:[%s10033_s23 + $0x10b0] sm:$0xff] }
  0x97   : > { %1722 = vst [vmem:[%s10038_s24 + $0x850] sm:$0xff] %v1721_v10  ;;  %v1725_v12 = vld [vmem:[%s10033_s23 + $0x10c0] sm:$0xff]  ;;  %v1727_v13 = vld [vmem:[%s10033_s23 + $0x10d0] sm:$0xff]  ;;  %1724 = vst [vmem:[%s10038_s24 + $0x858] sm:$0xff] %v1723_v11 }
  0x98   : > { %1726 = vst [vmem:[%s10038_s24 + $0x860] sm:$0xff] %v1725_v12  ;;  %1728 = vst [vmem:[%s10038_s24 + $0x868] sm:$0xff] %v1727_v13  ;;  %v1729_v14 = vld [vmem:[%s10033_s23 + $0x10e0] sm:$0xff]  ;;  %v1731_v15 = vld [vmem:[%s10033_s23 + $0x10f0] sm:$0xff] }
  0x99   : > { %v1733_v16 = vld [vmem:[%s10033_s23 + $0x1100] sm:$0xff]  ;;  %1730 = vst [vmem:[%s10038_s24 + $0x870] sm:$0xff] %v1729_v14  ;;  %1732 = vst [vmem:[%s10038_s24 + $0x878] sm:$0xff] %v1731_v15  ;;  %v1735_v17 = vld [vmem:[%s10033_s23 + $0x1110] sm:$0xff] }
  0x9a   : > { %1734 = vst [vmem:[%s10038_s24 + $0x880] sm:$0xff] %v1733_v16  ;;  %v1737_v18 = vld [vmem:[%s10033_s23 + $0x1120] sm:$0xff]  ;;  %v1739_v19 = vld [vmem:[%s10033_s23 + $0x1130] sm:$0xff]  ;;  %1736 = vst [vmem:[%s10038_s24 + $0x888] sm:$0xff] %v1735_v17 }
  0x9b   : > { %1738 = vst [vmem:[%s10038_s24 + $0x890] sm:$0xff] %v1737_v18  ;;  %1740 = vst [vmem:[%s10038_s24 + $0x898] sm:$0xff] %v1739_v19  ;;  %v1741_v20 = vld [vmem:[%s10033_s23 + $0x1140] sm:$0xff]  ;;  %v1743_v21 = vld [vmem:[%s10033_s23 + $0x1150] sm:$0xff] }
  0x9c   : > { %v1745_v22 = vld [vmem:[%s10033_s23 + $0x1160] sm:$0xff]  ;;  %1742 = vst [vmem:[%s10038_s24 + $0x8a0] sm:$0xff] %v1741_v20  ;;  %1744 = vst [vmem:[%s10038_s24 + $0x8a8] sm:$0xff] %v1743_v21  ;;  %v1747_v23 = vld [vmem:[%s10033_s23 + $0x1170] sm:$0xff] }
  0x9d   : > { %1746 = vst [vmem:[%s10038_s24 + $0x8b0] sm:$0xff] %v1745_v22  ;;  %v1749_v24 = vld [vmem:[%s10033_s23 + $0x1180] sm:$0xff]  ;;  %v1751_v25 = vld [vmem:[%s10033_s23 + $0x1190] sm:$0xff]  ;;  %1748 = vst [vmem:[%s10038_s24 + $0x8b8] sm:$0xff] %v1747_v23 }
  0x9e   : > { %1750 = vst [vmem:[%s10038_s24 + $0x8c0] sm:$0xff] %v1749_v24  ;;  %1752 = vst [vmem:[%s10038_s24 + $0x8c8] sm:$0xff] %v1751_v25  ;;  %v1753_v26 = vld [vmem:[%s10033_s23 + $0x11a0] sm:$0xff]  ;;  %v1755_v27 = vld [vmem:[%s10033_s23 + $0x11b0] sm:$0xff] }
  0x9f   : > { %v1757_v28 = vld [vmem:[%s10033_s23 + $0x11c0] sm:$0xff]  ;;  %1754 = vst [vmem:[%s10038_s24 + $0x8d0] sm:$0xff] %v1753_v26  ;;  %1756 = vst [vmem:[%s10038_s24 + $0x8d8] sm:$0xff] %v1755_v27  ;;  %v1759_v29 = vld [vmem:[%s10033_s23 + $0x11d0] sm:$0xff] }
  0xa0   : > { %1758 = vst [vmem:[%s10038_s24 + $0x8e0] sm:$0xff] %v1757_v28  ;;  %v1761_v30 = vld [vmem:[%s10033_s23 + $0x11e0] sm:$0xff]  ;;  %v1763_v31 = vld [vmem:[%s10033_s23 + $0x11f0] sm:$0xff]  ;;  %1760 = vst [vmem:[%s10038_s24 + $0x8e8] sm:$0xff] %v1759_v29 }
  0xa1   : > { %1762 = vst [vmem:[%s10038_s24 + $0x8f0] sm:$0xff] %v1761_v30  ;;  %1764 = vst [vmem:[%s10038_s24 + $0x8f8] sm:$0xff] %v1763_v31  ;;  %v1765_v32 = vld [vmem:[%s10033_s23 + $0x1200] sm:$0xff]  ;;  %v1767_v33 = vld [vmem:[%s10033_s23 + $0x1210] sm:$0xff] }
  0xa2   : > { %v1769_v34 = vld [vmem:[%s10033_s23 + $0x1220] sm:$0xff]  ;;  %1766 = vst [vmem:[%s10038_s24 + $0x900] sm:$0xff] %v1765_v32  ;;  %1768 = vst [vmem:[%s10038_s24 + $0x908] sm:$0xff] %v1767_v33  ;;  %v1771_v35 = vld [vmem:[%s10033_s23 + $0x1230] sm:$0xff] }
  0xa3   : > { %1770 = vst [vmem:[%s10038_s24 + $0x910] sm:$0xff] %v1769_v34  ;;  %v1773_v36 = vld [vmem:[%s10033_s23 + $0x1240] sm:$0xff]  ;;  %v1775_v37 = vld [vmem:[%s10033_s23 + $0x1250] sm:$0xff]  ;;  %1772 = vst [vmem:[%s10038_s24 + $0x918] sm:$0xff] %v1771_v35 }
  0xa4   : > { %1774 = vst [vmem:[%s10038_s24 + $0x920] sm:$0xff] %v1773_v36  ;;  %1776 = vst [vmem:[%s10038_s24 + $0x928] sm:$0xff] %v1775_v37  ;;  %v1777_v38 = vld [vmem:[%s10033_s23 + $0x1260] sm:$0xff]  ;;  %v1779_v39 = vld [vmem:[%s10033_s23 + $0x1270] sm:$0xff] }
  0xa5   : > { %v1781_v40 = vld [vmem:[%s10033_s23 + $0x1280] sm:$0xff]  ;;  %1778 = vst [vmem:[%s10038_s24 + $0x930] sm:$0xff] %v1777_v38  ;;  %1780 = vst [vmem:[%s10038_s24 + $0x938] sm:$0xff] %v1779_v39  ;;  %v1783_v41 = vld [vmem:[%s10033_s23 + $0x1290] sm:$0xff] }
  0xa6   : > { %1782 = vst [vmem:[%s10038_s24 + $0x940] sm:$0xff] %v1781_v40  ;;  %v1785_v42 = vld [vmem:[%s10033_s23 + $0x12a0] sm:$0xff]  ;;  %v1787_v43 = vld [vmem:[%s10033_s23 + $0x12b0] sm:$0xff]  ;;  %1784 = vst [vmem:[%s10038_s24 + $0x948] sm:$0xff] %v1783_v41 }
  0xa7   : > { %1786 = vst [vmem:[%s10038_s24 + $0x950] sm:$0xff] %v1785_v42  ;;  %1788 = vst [vmem:[%s10038_s24 + $0x958] sm:$0xff] %v1787_v43  ;;  %v1789_v44 = vld [vmem:[%s10033_s23 + $0x12c0] sm:$0xff]  ;;  %v1791_v45 = vld [vmem:[%s10033_s23 + $0x12d0] sm:$0xff] }
  0xa8   : > { %v1793_v46 = vld [vmem:[%s10033_s23 + $0x12e0] sm:$0xff]  ;;  %1790 = vst [vmem:[%s10038_s24 + $0x960] sm:$0xff] %v1789_v44  ;;  %1792 = vst [vmem:[%s10038_s24 + $0x968] sm:$0xff] %v1791_v45  ;;  %v1795_v47 = vld [vmem:[%s10033_s23 + $0x12f0] sm:$0xff] }
  0xa9   : > { %1794 = vst [vmem:[%s10038_s24 + $0x970] sm:$0xff] %v1793_v46  ;;  %v1797_v48 = vld [vmem:[%s10033_s23 + $0x1300] sm:$0xff]  ;;  %v1799_v49 = vld [vmem:[%s10033_s23 + $0x1310] sm:$0xff]  ;;  %1796 = vst [vmem:[%s10038_s24 + $0x978] sm:$0xff] %v1795_v47 }
  0xaa   : > { %1798 = vst [vmem:[%s10038_s24 + $0x980] sm:$0xff] %v1797_v48  ;;  %1800 = vst [vmem:[%s10038_s24 + $0x988] sm:$0xff] %v1799_v49  ;;  %v1801_v50 = vld [vmem:[%s10033_s23 + $0x1320] sm:$0xff]  ;;  %v1803_v51 = vld [vmem:[%s10033_s23 + $0x1330] sm:$0xff] }
  0xab   : > { %v1805_v52 = vld [vmem:[%s10033_s23 + $0x1340] sm:$0xff]  ;;  %1802 = vst [vmem:[%s10038_s24 + $0x990] sm:$0xff] %v1801_v50  ;;  %1804 = vst [vmem:[%s10038_s24 + $0x998] sm:$0xff] %v1803_v51  ;;  %v1807_v53 = vld [vmem:[%s10033_s23 + $0x1350] sm:$0xff] }
  0xac   : > { %1806 = vst [vmem:[%s10038_s24 + $0x9a0] sm:$0xff] %v1805_v52  ;;  %v1809_v54 = vld [vmem:[%s10033_s23 + $0x1360] sm:$0xff]  ;;  %v1811_v55 = vld [vmem:[%s10033_s23 + $0x1370] sm:$0xff]  ;;  %1808 = vst [vmem:[%s10038_s24 + $0x9a8] sm:$0xff] %v1807_v53 }
  0xad   : > { %1810 = vst [vmem:[%s10038_s24 + $0x9b0] sm:$0xff] %v1809_v54  ;;  %1812 = vst [vmem:[%s10038_s24 + $0x9b8] sm:$0xff] %v1811_v55  ;;  %v1813_v56 = vld [vmem:[%s10033_s23 + $0x1380] sm:$0xff]  ;;  %v1815_v57 = vld [vmem:[%s10033_s23 + $0x1390] sm:$0xff] }
  0xae   : > { %v1817_v58 = vld [vmem:[%s10033_s23 + $0x13a0] sm:$0xff]  ;;  %1814 = vst [vmem:[%s10038_s24 + $0x9c0] sm:$0xff] %v1813_v56  ;;  %1816 = vst [vmem:[%s10038_s24 + $0x9c8] sm:$0xff] %v1815_v57  ;;  %v1819_v59 = vld [vmem:[%s10033_s23 + $0x13b0] sm:$0xff] }
  0xaf   : > { %1818 = vst [vmem:[%s10038_s24 + $0x9d0] sm:$0xff] %v1817_v58  ;;  %v1821_v60 = vld [vmem:[%s10033_s23 + $0x13c0] sm:$0xff]  ;;  %v1823_v61 = vld [vmem:[%s10033_s23 + $0x13d0] sm:$0xff]  ;;  %1820 = vst [vmem:[%s10038_s24 + $0x9d8] sm:$0xff] %v1819_v59 }
  0xb0   : > { %1822 = vst [vmem:[%s10038_s24 + $0x9e0] sm:$0xff] %v1821_v60  ;;  %1824 = vst [vmem:[%s10038_s24 + $0x9e8] sm:$0xff] %v1823_v61  ;;  %v1825_v62 = vld [vmem:[%s10033_s23 + $0x13e0] sm:$0xff]  ;;  %v1827_v63 = vld [vmem:[%s10033_s23 + $0x13f0] sm:$0xff] }
  0xb1   : > { %v1829_v0 = vld [vmem:[%s10033_s23 + $0x1400] sm:$0xff]  ;;  %1826 = vst [vmem:[%s10038_s24 + $0x9f0] sm:$0xff] %v1825_v62  ;;  %1828 = vst [vmem:[%s10038_s24 + $0x9f8] sm:$0xff] %v1827_v63  ;;  %v1831_v1 = vld [vmem:[%s10033_s23 + $0x1410] sm:$0xff] }
  0xb2   : > { %1830 = vst [vmem:[%s10038_s24 + $0xa00] sm:$0xff] %v1829_v0  ;;  %v1833_v2 = vld [vmem:[%s10033_s23 + $0x1420] sm:$0xff]  ;;  %v1835_v3 = vld [vmem:[%s10033_s23 + $0x1430] sm:$0xff]  ;;  %1832 = vst [vmem:[%s10038_s24 + $0xa08] sm:$0xff] %v1831_v1 }
  0xb3   : > { %1834 = vst [vmem:[%s10038_s24 + $0xa10] sm:$0xff] %v1833_v2  ;;  %1836 = vst [vmem:[%s10038_s24 + $0xa18] sm:$0xff] %v1835_v3  ;;  %v1837_v4 = vld [vmem:[%s10033_s23 + $0x1440] sm:$0xff]  ;;  %v1839_v5 = vld [vmem:[%s10033_s23 + $0x1450] sm:$0xff] }
  0xb4   : > { %v1841_v6 = vld [vmem:[%s10033_s23 + $0x1460] sm:$0xff]  ;;  %1838 = vst [vmem:[%s10038_s24 + $0xa20] sm:$0xff] %v1837_v4  ;;  %1840 = vst [vmem:[%s10038_s24 + $0xa28] sm:$0xff] %v1839_v5  ;;  %v1843_v7 = vld [vmem:[%s10033_s23 + $0x1470] sm:$0xff] }
  0xb5   : > { %1842 = vst [vmem:[%s10038_s24 + $0xa30] sm:$0xff] %v1841_v6  ;;  %v1845_v8 = vld [vmem:[%s10033_s23 + $0x1480] sm:$0xff]  ;;  %v1847_v9 = vld [vmem:[%s10033_s23 + $0x1490] sm:$0xff]  ;;  %1844 = vst [vmem:[%s10038_s24 + $0xa38] sm:$0xff] %v1843_v7 }
  0xb6   : > { %1846 = vst [vmem:[%s10038_s24 + $0xa40] sm:$0xff] %v1845_v8  ;;  %1848 = vst [vmem:[%s10038_s24 + $0xa48] sm:$0xff] %v1847_v9  ;;  %v1849_v10 = vld [vmem:[%s10033_s23 + $0x14a0] sm:$0xff]  ;;  %v1851_v11 = vld [vmem:[%s10033_s23 + $0x14b0] sm:$0xff] }
  0xb7   : > { %v1853_v12 = vld [vmem:[%s10033_s23 + $0x14c0] sm:$0xff]  ;;  %1850 = vst [vmem:[%s10038_s24 + $0xa50] sm:$0xff] %v1849_v10  ;;  %1852 = vst [vmem:[%s10038_s24 + $0xa58] sm:$0xff] %v1851_v11  ;;  %v1855_v13 = vld [vmem:[%s10033_s23 + $0x14d0] sm:$0xff] }
  0xb8   : > { %1854 = vst [vmem:[%s10038_s24 + $0xa60] sm:$0xff] %v1853_v12  ;;  %v1857_v14 = vld [vmem:[%s10033_s23 + $0x14e0] sm:$0xff]  ;;  %v1859_v15 = vld [vmem:[%s10033_s23 + $0x14f0] sm:$0xff]  ;;  %1856 = vst [vmem:[%s10038_s24 + $0xa68] sm:$0xff] %v1855_v13 }
  0xb9   : > { %1858 = vst [vmem:[%s10038_s24 + $0xa70] sm:$0xff] %v1857_v14  ;;  %1860 = vst [vmem:[%s10038_s24 + $0xa78] sm:$0xff] %v1859_v15  ;;  %v1861_v16 = vld [vmem:[%s10033_s23 + $0x1500] sm:$0xff]  ;;  %v1863_v17 = vld [vmem:[%s10033_s23 + $0x1510] sm:$0xff] }
  0xba   : > { %v1865_v18 = vld [vmem:[%s10033_s23 + $0x1520] sm:$0xff]  ;;  %1862 = vst [vmem:[%s10038_s24 + $0xa80] sm:$0xff] %v1861_v16  ;;  %1864 = vst [vmem:[%s10038_s24 + $0xa88] sm:$0xff] %v1863_v17  ;;  %v1867_v19 = vld [vmem:[%s10033_s23 + $0x1530] sm:$0xff] }
  0xbb   : > { %1866 = vst [vmem:[%s10038_s24 + $0xa90] sm:$0xff] %v1865_v18  ;;  %v1869_v20 = vld [vmem:[%s10033_s23 + $0x1540] sm:$0xff]  ;;  %v1871_v21 = vld [vmem:[%s10033_s23 + $0x1550] sm:$0xff]  ;;  %1868 = vst [vmem:[%s10038_s24 + $0xa98] sm:$0xff] %v1867_v19 }
  0xbc   : > { %1870 = vst [vmem:[%s10038_s24 + $0xaa0] sm:$0xff] %v1869_v20  ;;  %1872 = vst [vmem:[%s10038_s24 + $0xaa8] sm:$0xff] %v1871_v21  ;;  %v1873_v22 = vld [vmem:[%s10033_s23 + $0x1560] sm:$0xff]  ;;  %v1875_v23 = vld [vmem:[%s10033_s23 + $0x1570] sm:$0xff] }
  0xbd   : > { %v1877_v24 = vld [vmem:[%s10033_s23 + $0x1580] sm:$0xff]  ;;  %1874 = vst [vmem:[%s10038_s24 + $0xab0] sm:$0xff] %v1873_v22  ;;  %1876 = vst [vmem:[%s10038_s24 + $0xab8] sm:$0xff] %v1875_v23  ;;  %v1879_v25 = vld [vmem:[%s10033_s23 + $0x1590] sm:$0xff] }
  0xbe   : > { %1878 = vst [vmem:[%s10038_s24 + $0xac0] sm:$0xff] %v1877_v24  ;;  %v1881_v26 = vld [vmem:[%s10033_s23 + $0x15a0] sm:$0xff]  ;;  %v1883_v27 = vld [vmem:[%s10033_s23 + $0x15b0] sm:$0xff]  ;;  %1880 = vst [vmem:[%s10038_s24 + $0xac8] sm:$0xff] %v1879_v25 }
  0xbf   : > { %1882 = vst [vmem:[%s10038_s24 + $0xad0] sm:$0xff] %v1881_v26  ;;  %1884 = vst [vmem:[%s10038_s24 + $0xad8] sm:$0xff] %v1883_v27  ;;  %v1885_v28 = vld [vmem:[%s10033_s23 + $0x15c0] sm:$0xff]  ;;  %v1887_v29 = vld [vmem:[%s10033_s23 + $0x15d0] sm:$0xff] }
  0xc0   : > { %v1889_v30 = vld [vmem:[%s10033_s23 + $0x15e0] sm:$0xff]  ;;  %1886 = vst [vmem:[%s10038_s24 + $0xae0] sm:$0xff] %v1885_v28  ;;  %1888 = vst [vmem:[%s10038_s24 + $0xae8] sm:$0xff] %v1887_v29  ;;  %v1891_v31 = vld [vmem:[%s10033_s23 + $0x15f0] sm:$0xff] }
  0xc1   : > { %1890 = vst [vmem:[%s10038_s24 + $0xaf0] sm:$0xff] %v1889_v30  ;;  %v1893_v32 = vld [vmem:[%s10033_s23 + $0x1600] sm:$0xff]  ;;  %v1895_v33 = vld [vmem:[%s10033_s23 + $0x1610] sm:$0xff]  ;;  %1892 = vst [vmem:[%s10038_s24 + $0xaf8] sm:$0xff] %v1891_v31 }
  0xc2   : > { %1894 = vst [vmem:[%s10038_s24 + $0xb00] sm:$0xff] %v1893_v32  ;;  %1896 = vst [vmem:[%s10038_s24 + $0xb08] sm:$0xff] %v1895_v33  ;;  %v1897_v34 = vld [vmem:[%s10033_s23 + $0x1620] sm:$0xff]  ;;  %v1899_v35 = vld [vmem:[%s10033_s23 + $0x1630] sm:$0xff] }
  0xc3   : > { %v1901_v36 = vld [vmem:[%s10033_s23 + $0x1640] sm:$0xff]  ;;  %1898 = vst [vmem:[%s10038_s24 + $0xb10] sm:$0xff] %v1897_v34  ;;  %1900 = vst [vmem:[%s10038_s24 + $0xb18] sm:$0xff] %v1899_v35  ;;  %v1903_v37 = vld [vmem:[%s10033_s23 + $0x1650] sm:$0xff] }
  0xc4   : > { %1902 = vst [vmem:[%s10038_s24 + $0xb20] sm:$0xff] %v1901_v36  ;;  %v1905_v38 = vld [vmem:[%s10033_s23 + $0x1660] sm:$0xff]  ;;  %v1907_v39 = vld [vmem:[%s10033_s23 + $0x1670] sm:$0xff]  ;;  %1904 = vst [vmem:[%s10038_s24 + $0xb28] sm:$0xff] %v1903_v37 }
  0xc5   : > { %1906 = vst [vmem:[%s10038_s24 + $0xb30] sm:$0xff] %v1905_v38  ;;  %1908 = vst [vmem:[%s10038_s24 + $0xb38] sm:$0xff] %v1907_v39  ;;  %v1909_v40 = vld [vmem:[%s10033_s23 + $0x1680] sm:$0xff]  ;;  %v1911_v41 = vld [vmem:[%s10033_s23 + $0x1690] sm:$0xff] }
  0xc6   : > { %v1913_v42 = vld [vmem:[%s10033_s23 + $0x16a0] sm:$0xff]  ;;  %1910 = vst [vmem:[%s10038_s24 + $0xb40] sm:$0xff] %v1909_v40  ;;  %1912 = vst [vmem:[%s10038_s24 + $0xb48] sm:$0xff] %v1911_v41  ;;  %v1915_v43 = vld [vmem:[%s10033_s23 + $0x16b0] sm:$0xff] }
  0xc7   : > { %1914 = vst [vmem:[%s10038_s24 + $0xb50] sm:$0xff] %v1913_v42  ;;  %v1917_v44 = vld [vmem:[%s10033_s23 + $0x16c0] sm:$0xff]  ;;  %v1919_v45 = vld [vmem:[%s10033_s23 + $0x16d0] sm:$0xff]  ;;  %1916 = vst [vmem:[%s10038_s24 + $0xb58] sm:$0xff] %v1915_v43 }
  0xc8   : > { %1918 = vst [vmem:[%s10038_s24 + $0xb60] sm:$0xff] %v1917_v44  ;;  %1920 = vst [vmem:[%s10038_s24 + $0xb68] sm:$0xff] %v1919_v45  ;;  %v1921_v46 = vld [vmem:[%s10033_s23 + $0x16e0] sm:$0xff]  ;;  %v1923_v47 = vld [vmem:[%s10033_s23 + $0x16f0] sm:$0xff] }
  0xc9   : > { %v1925_v48 = vld [vmem:[%s10033_s23 + $0x1700] sm:$0xff]  ;;  %1922 = vst [vmem:[%s10038_s24 + $0xb70] sm:$0xff] %v1921_v46  ;;  %1924 = vst [vmem:[%s10038_s24 + $0xb78] sm:$0xff] %v1923_v47  ;;  %v1927_v49 = vld [vmem:[%s10033_s23 + $0x1710] sm:$0xff] }
  0xca   : > { %1926 = vst [vmem:[%s10038_s24 + $0xb80] sm:$0xff] %v1925_v48  ;;  %v1929_v50 = vld [vmem:[%s10033_s23 + $0x1720] sm:$0xff]  ;;  %v1931_v51 = vld [vmem:[%s10033_s23 + $0x1730] sm:$0xff]  ;;  %1928 = vst [vmem:[%s10038_s24 + $0xb88] sm:$0xff] %v1927_v49 }
  0xcb   : > { %1930 = vst [vmem:[%s10038_s24 + $0xb90] sm:$0xff] %v1929_v50  ;;  %1932 = vst [vmem:[%s10038_s24 + $0xb98] sm:$0xff] %v1931_v51  ;;  %v1933_v52 = vld [vmem:[%s10033_s23 + $0x1740] sm:$0xff]  ;;  %v1935_v53 = vld [vmem:[%s10033_s23 + $0x1750] sm:$0xff] }
  0xcc   : > { %v1937_v54 = vld [vmem:[%s10033_s23 + $0x1760] sm:$0xff]  ;;  %1934 = vst [vmem:[%s10038_s24 + $0xba0] sm:$0xff] %v1933_v52  ;;  %1936 = vst [vmem:[%s10038_s24 + $0xba8] sm:$0xff] %v1935_v53  ;;  %v1939_v55 = vld [vmem:[%s10033_s23 + $0x1770] sm:$0xff] }
  0xcd   : > { %1938 = vst [vmem:[%s10038_s24 + $0xbb0] sm:$0xff] %v1937_v54  ;;  %v1941_v56 = vld [vmem:[%s10033_s23 + $0x1780] sm:$0xff]  ;;  %v1943_v57 = vld [vmem:[%s10033_s23 + $0x1790] sm:$0xff]  ;;  %1940 = vst [vmem:[%s10038_s24 + $0xbb8] sm:$0xff] %v1939_v55 }
  0xce   : > { %1942 = vst [vmem:[%s10038_s24 + $0xbc0] sm:$0xff] %v1941_v56  ;;  %1944 = vst [vmem:[%s10038_s24 + $0xbc8] sm:$0xff] %v1943_v57  ;;  %v1945_v58 = vld [vmem:[%s10033_s23 + $0x17a0] sm:$0xff]  ;;  %v1947_v59 = vld [vmem:[%s10033_s23 + $0x17b0] sm:$0xff] }
  0xcf   : > { %v1949_v60 = vld [vmem:[%s10033_s23 + $0x17c0] sm:$0xff]  ;;  %1946 = vst [vmem:[%s10038_s24 + $0xbd0] sm:$0xff] %v1945_v58  ;;  %1948 = vst [vmem:[%s10038_s24 + $0xbd8] sm:$0xff] %v1947_v59  ;;  %v1951_v61 = vld [vmem:[%s10033_s23 + $0x17d0] sm:$0xff] }
  0xd0   : > { %1950 = vst [vmem:[%s10038_s24 + $0xbe0] sm:$0xff] %v1949_v60  ;;  %v1953_v62 = vld [vmem:[%s10033_s23 + $0x17e0] sm:$0xff]  ;;  %v1955_v63 = vld [vmem:[%s10033_s23 + $0x17f0] sm:$0xff]  ;;  %1952 = vst [vmem:[%s10038_s24 + $0xbe8] sm:$0xff] %v1951_v61 }
  0xd1   : > { %1954 = vst [vmem:[%s10038_s24 + $0xbf0] sm:$0xff] %v1953_v62  ;;  %1956 = vst [vmem:[%s10038_s24 + $0xbf8] sm:$0xff] %v1955_v63  ;;  %v1957_v0 = vld [vmem:[%s10033_s23 + $0x1800] sm:$0xff]  ;;  %v1959_v1 = vld [vmem:[%s10033_s23 + $0x1810] sm:$0xff] }
  0xd2   : > { %v1961_v2 = vld [vmem:[%s10033_s23 + $0x1820] sm:$0xff]  ;;  %1958 = vst [vmem:[%s10038_s24 + $0xc00] sm:$0xff] %v1957_v0  ;;  %1960 = vst [vmem:[%s10038_s24 + $0xc08] sm:$0xff] %v1959_v1  ;;  %v1963_v3 = vld [vmem:[%s10033_s23 + $0x1830] sm:$0xff] }
  0xd3   : > { %1962 = vst [vmem:[%s10038_s24 + $0xc10] sm:$0xff] %v1961_v2  ;;  %v1965_v4 = vld [vmem:[%s10033_s23 + $0x1840] sm:$0xff]  ;;  %v1967_v5 = vld [vmem:[%s10033_s23 + $0x1850] sm:$0xff]  ;;  %1964 = vst [vmem:[%s10038_s24 + $0xc18] sm:$0xff] %v1963_v3 }
  0xd4   : > { %1966 = vst [vmem:[%s10038_s24 + $0xc20] sm:$0xff] %v1965_v4  ;;  %1968 = vst [vmem:[%s10038_s24 + $0xc28] sm:$0xff] %v1967_v5  ;;  %v1969_v6 = vld [vmem:[%s10033_s23 + $0x1860] sm:$0xff]  ;;  %v1971_v7 = vld [vmem:[%s10033_s23 + $0x1870] sm:$0xff] }
  0xd5   : > { %v1973_v8 = vld [vmem:[%s10033_s23 + $0x1880] sm:$0xff]  ;;  %1970 = vst [vmem:[%s10038_s24 + $0xc30] sm:$0xff] %v1969_v6  ;;  %1972 = vst [vmem:[%s10038_s24 + $0xc38] sm:$0xff] %v1971_v7  ;;  %v1975_v9 = vld [vmem:[%s10033_s23 + $0x1890] sm:$0xff] }
  0xd6   : > { %1974 = vst [vmem:[%s10038_s24 + $0xc40] sm:$0xff] %v1973_v8  ;;  %v1977_v10 = vld [vmem:[%s10033_s23 + $0x18a0] sm:$0xff]  ;;  %v1979_v11 = vld [vmem:[%s10033_s23 + $0x18b0] sm:$0xff]  ;;  %1976 = vst [vmem:[%s10038_s24 + $0xc48] sm:$0xff] %v1975_v9 }
  0xd7   : > { %1978 = vst [vmem:[%s10038_s24 + $0xc50] sm:$0xff] %v1977_v10  ;;  %1980 = vst [vmem:[%s10038_s24 + $0xc58] sm:$0xff] %v1979_v11  ;;  %v1981_v12 = vld [vmem:[%s10033_s23 + $0x18c0] sm:$0xff]  ;;  %v1983_v13 = vld [vmem:[%s10033_s23 + $0x18d0] sm:$0xff] }
  0xd8   : > { %v1985_v14 = vld [vmem:[%s10033_s23 + $0x18e0] sm:$0xff]  ;;  %1982 = vst [vmem:[%s10038_s24 + $0xc60] sm:$0xff] %v1981_v12  ;;  %1984 = vst [vmem:[%s10038_s24 + $0xc68] sm:$0xff] %v1983_v13  ;;  %v1987_v15 = vld [vmem:[%s10033_s23 + $0x18f0] sm:$0xff] }
  0xd9   : > { %1986 = vst [vmem:[%s10038_s24 + $0xc70] sm:$0xff] %v1985_v14  ;;  %v1989_v16 = vld [vmem:[%s10033_s23 + $0x1900] sm:$0xff]  ;;  %v1991_v17 = vld [vmem:[%s10033_s23 + $0x1910] sm:$0xff]  ;;  %1988 = vst [vmem:[%s10038_s24 + $0xc78] sm:$0xff] %v1987_v15 }
  0xda   : > { %1990 = vst [vmem:[%s10038_s24 + $0xc80] sm:$0xff] %v1989_v16  ;;  %1992 = vst [vmem:[%s10038_s24 + $0xc88] sm:$0xff] %v1991_v17  ;;  %v1993_v18 = vld [vmem:[%s10033_s23 + $0x1920] sm:$0xff]  ;;  %v1995_v19 = vld [vmem:[%s10033_s23 + $0x1930] sm:$0xff] }
  0xdb   : > { %v1997_v20 = vld [vmem:[%s10033_s23 + $0x1940] sm:$0xff]  ;;  %1994 = vst [vmem:[%s10038_s24 + $0xc90] sm:$0xff] %v1993_v18  ;;  %1996 = vst [vmem:[%s10038_s24 + $0xc98] sm:$0xff] %v1995_v19  ;;  %v1999_v21 = vld [vmem:[%s10033_s23 + $0x1950] sm:$0xff] }
  0xdc   : > { %1998 = vst [vmem:[%s10038_s24 + $0xca0] sm:$0xff] %v1997_v20  ;;  %v2001_v22 = vld [vmem:[%s10033_s23 + $0x1960] sm:$0xff]  ;;  %v2003_v23 = vld [vmem:[%s10033_s23 + $0x1970] sm:$0xff]  ;;  %2000 = vst [vmem:[%s10038_s24 + $0xca8] sm:$0xff] %v1999_v21 }
  0xdd   : > { %2002 = vst [vmem:[%s10038_s24 + $0xcb0] sm:$0xff] %v2001_v22  ;;  %2004 = vst [vmem:[%s10038_s24 + $0xcb8] sm:$0xff] %v2003_v23  ;;  %v2005_v24 = vld [vmem:[%s10033_s23 + $0x1980] sm:$0xff]  ;;  %v2007_v25 = vld [vmem:[%s10033_s23 + $0x1990] sm:$0xff] }
  0xde   : > { %v2009_v26 = vld [vmem:[%s10033_s23 + $0x19a0] sm:$0xff]  ;;  %2006 = vst [vmem:[%s10038_s24 + $0xcc0] sm:$0xff] %v2005_v24  ;;  %2008 = vst [vmem:[%s10038_s24 + $0xcc8] sm:$0xff] %v2007_v25  ;;  %v2011_v27 = vld [vmem:[%s10033_s23 + $0x19b0] sm:$0xff] }
  0xdf   : > { %2010 = vst [vmem:[%s10038_s24 + $0xcd0] sm:$0xff] %v2009_v26  ;;  %v2013_v28 = vld [vmem:[%s10033_s23 + $0x19c0] sm:$0xff]  ;;  %v2015_v29 = vld [vmem:[%s10033_s23 + $0x19d0] sm:$0xff]  ;;  %2012 = vst [vmem:[%s10038_s24 + $0xcd8] sm:$0xff] %v2011_v27 }
  0xe0   : > { %2014 = vst [vmem:[%s10038_s24 + $0xce0] sm:$0xff] %v2013_v28  ;;  %2016 = vst [vmem:[%s10038_s24 + $0xce8] sm:$0xff] %v2015_v29  ;;  %v2017_v30 = vld [vmem:[%s10033_s23 + $0x19e0] sm:$0xff]  ;;  %v2019_v31 = vld [vmem:[%s10033_s23 + $0x19f0] sm:$0xff] }
  0xe1   : > { %v2021_v32 = vld [vmem:[%s10033_s23 + $0x1a00] sm:$0xff]  ;;  %2018 = vst [vmem:[%s10038_s24 + $0xcf0] sm:$0xff] %v2017_v30  ;;  %2020 = vst [vmem:[%s10038_s24 + $0xcf8] sm:$0xff] %v2019_v31  ;;  %v2023_v33 = vld [vmem:[%s10033_s23 + $0x1a10] sm:$0xff] }
  0xe2   : > { %2022 = vst [vmem:[%s10038_s24 + $0xd00] sm:$0xff] %v2021_v32  ;;  %v2025_v34 = vld [vmem:[%s10033_s23 + $0x1a20] sm:$0xff]  ;;  %v2027_v35 = vld [vmem:[%s10033_s23 + $0x1a30] sm:$0xff]  ;;  %2024 = vst [vmem:[%s10038_s24 + $0xd08] sm:$0xff] %v2023_v33 }
  0xe3   : > { %2026 = vst [vmem:[%s10038_s24 + $0xd10] sm:$0xff] %v2025_v34  ;;  %2028 = vst [vmem:[%s10038_s24 + $0xd18] sm:$0xff] %v2027_v35  ;;  %v2029_v36 = vld [vmem:[%s10033_s23 + $0x1a40] sm:$0xff]  ;;  %v2031_v37 = vld [vmem:[%s10033_s23 + $0x1a50] sm:$0xff] }
  0xe4   : > { %v2033_v38 = vld [vmem:[%s10033_s23 + $0x1a60] sm:$0xff]  ;;  %2030 = vst [vmem:[%s10038_s24 + $0xd20] sm:$0xff] %v2029_v36  ;;  %2032 = vst [vmem:[%s10038_s24 + $0xd28] sm:$0xff] %v2031_v37  ;;  %v2035_v39 = vld [vmem:[%s10033_s23 + $0x1a70] sm:$0xff] }
  0xe5   : > { %2034 = vst [vmem:[%s10038_s24 + $0xd30] sm:$0xff] %v2033_v38  ;;  %v2037_v40 = vld [vmem:[%s10033_s23 + $0x1a80] sm:$0xff]  ;;  %v2039_v41 = vld [vmem:[%s10033_s23 + $0x1a90] sm:$0xff]  ;;  %2036 = vst [vmem:[%s10038_s24 + $0xd38] sm:$0xff] %v2035_v39 }
  0xe6   : > { %2038 = vst [vmem:[%s10038_s24 + $0xd40] sm:$0xff] %v2037_v40  ;;  %2040 = vst [vmem:[%s10038_s24 + $0xd48] sm:$0xff] %v2039_v41  ;;  %v2041_v42 = vld [vmem:[%s10033_s23 + $0x1aa0] sm:$0xff]  ;;  %v2043_v43 = vld [vmem:[%s10033_s23 + $0x1ab0] sm:$0xff] }
  0xe7   : > { %v2045_v44 = vld [vmem:[%s10033_s23 + $0x1ac0] sm:$0xff]  ;;  %2042 = vst [vmem:[%s10038_s24 + $0xd50] sm:$0xff] %v2041_v42  ;;  %2044 = vst [vmem:[%s10038_s24 + $0xd58] sm:$0xff] %v2043_v43  ;;  %v2047_v45 = vld [vmem:[%s10033_s23 + $0x1ad0] sm:$0xff] }
  0xe8   : > { %2046 = vst [vmem:[%s10038_s24 + $0xd60] sm:$0xff] %v2045_v44  ;;  %v2049_v46 = vld [vmem:[%s10033_s23 + $0x1ae0] sm:$0xff]  ;;  %v2051_v47 = vld [vmem:[%s10033_s23 + $0x1af0] sm:$0xff]  ;;  %2048 = vst [vmem:[%s10038_s24 + $0xd68] sm:$0xff] %v2047_v45 }
  0xe9   : > { %2050 = vst [vmem:[%s10038_s24 + $0xd70] sm:$0xff] %v2049_v46  ;;  %2052 = vst [vmem:[%s10038_s24 + $0xd78] sm:$0xff] %v2051_v47  ;;  %v2053_v48 = vld [vmem:[%s10033_s23 + $0x1b00] sm:$0xff]  ;;  %v2055_v49 = vld [vmem:[%s10033_s23 + $0x1b10] sm:$0xff] }
  0xea   : > { %v2057_v50 = vld [vmem:[%s10033_s23 + $0x1b20] sm:$0xff]  ;;  %2054 = vst [vmem:[%s10038_s24 + $0xd80] sm:$0xff] %v2053_v48  ;;  %2056 = vst [vmem:[%s10038_s24 + $0xd88] sm:$0xff] %v2055_v49  ;;  %v2059_v51 = vld [vmem:[%s10033_s23 + $0x1b30] sm:$0xff] }
  0xeb   : > { %2058 = vst [vmem:[%s10038_s24 + $0xd90] sm:$0xff] %v2057_v50  ;;  %v2061_v52 = vld [vmem:[%s10033_s23 + $0x1b40] sm:$0xff]  ;;  %v2063_v53 = vld [vmem:[%s10033_s23 + $0x1b50] sm:$0xff]  ;;  %2060 = vst [vmem:[%s10038_s24 + $0xd98] sm:$0xff] %v2059_v51 }
  0xec   : > { %2062 = vst [vmem:[%s10038_s24 + $0xda0] sm:$0xff] %v2061_v52  ;;  %2064 = vst [vmem:[%s10038_s24 + $0xda8] sm:$0xff] %v2063_v53  ;;  %v2065_v54 = vld [vmem:[%s10033_s23 + $0x1b60] sm:$0xff]  ;;  %v2067_v55 = vld [vmem:[%s10033_s23 + $0x1b70] sm:$0xff] }
  0xed   : > { %v2069_v56 = vld [vmem:[%s10033_s23 + $0x1b80] sm:$0xff]  ;;  %2066 = vst [vmem:[%s10038_s24 + $0xdb0] sm:$0xff] %v2065_v54  ;;  %2068 = vst [vmem:[%s10038_s24 + $0xdb8] sm:$0xff] %v2067_v55  ;;  %v2071_v57 = vld [vmem:[%s10033_s23 + $0x1b90] sm:$0xff] }
  0xee   : > { %2070 = vst [vmem:[%s10038_s24 + $0xdc0] sm:$0xff] %v2069_v56  ;;  %v2073_v58 = vld [vmem:[%s10033_s23 + $0x1ba0] sm:$0xff]  ;;  %v2075_v59 = vld [vmem:[%s10033_s23 + $0x1bb0] sm:$0xff]  ;;  %2072 = vst [vmem:[%s10038_s24 + $0xdc8] sm:$0xff] %v2071_v57 }
  0xef   : > { %2074 = vst [vmem:[%s10038_s24 + $0xdd0] sm:$0xff] %v2073_v58  ;;  %2076 = vst [vmem:[%s10038_s24 + $0xdd8] sm:$0xff] %v2075_v59  ;;  %v2077_v60 = vld [vmem:[%s10033_s23 + $0x1bc0] sm:$0xff]  ;;  %v2079_v61 = vld [vmem:[%s10033_s23 + $0x1bd0] sm:$0xff] }
  0xf0   : > { %v2081_v62 = vld [vmem:[%s10033_s23 + $0x1be0] sm:$0xff]  ;;  %2078 = vst [vmem:[%s10038_s24 + $0xde0] sm:$0xff] %v2077_v60  ;;  %2080 = vst [vmem:[%s10038_s24 + $0xde8] sm:$0xff] %v2079_v61  ;;  %v2083_v63 = vld [vmem:[%s10033_s23 + $0x1bf0] sm:$0xff] }
  0xf1   : > { %2082 = vst [vmem:[%s10038_s24 + $0xdf0] sm:$0xff] %v2081_v62  ;;  %v2085_v0 = vld [vmem:[%s10033_s23 + $0x1c00] sm:$0xff]  ;;  %v2087_v1 = vld [vmem:[%s10033_s23 + $0x1c10] sm:$0xff]  ;;  %2084 = vst [vmem:[%s10038_s24 + $0xdf8] sm:$0xff] %v2083_v63 }
  0xf2   : > { %2086 = vst [vmem:[%s10038_s24 + $0xe00] sm:$0xff] %v2085_v0  ;;  %2088 = vst [vmem:[%s10038_s24 + $0xe08] sm:$0xff] %v2087_v1  ;;  %v2089_v2 = vld [vmem:[%s10033_s23 + $0x1c20] sm:$0xff]  ;;  %v2091_v3 = vld [vmem:[%s10033_s23 + $0x1c30] sm:$0xff] }
  0xf3   : > { %v2093_v4 = vld [vmem:[%s10033_s23 + $0x1c40] sm:$0xff]  ;;  %2090 = vst [vmem:[%s10038_s24 + $0xe10] sm:$0xff] %v2089_v2  ;;  %2092 = vst [vmem:[%s10038_s24 + $0xe18] sm:$0xff] %v2091_v3  ;;  %v2095_v5 = vld [vmem:[%s10033_s23 + $0x1c50] sm:$0xff] }
  0xf4   : > { %2094 = vst [vmem:[%s10038_s24 + $0xe20] sm:$0xff] %v2093_v4  ;;  %v2097_v6 = vld [vmem:[%s10033_s23 + $0x1c60] sm:$0xff]  ;;  %v2099_v7 = vld [vmem:[%s10033_s23 + $0x1c70] sm:$0xff]  ;;  %2096 = vst [vmem:[%s10038_s24 + $0xe28] sm:$0xff] %v2095_v5 }
  0xf5   : > { %2098 = vst [vmem:[%s10038_s24 + $0xe30] sm:$0xff] %v2097_v6  ;;  %2100 = vst [vmem:[%s10038_s24 + $0xe38] sm:$0xff] %v2099_v7  ;;  %v2101_v8 = vld [vmem:[%s10033_s23 + $0x1c80] sm:$0xff]  ;;  %v2103_v9 = vld [vmem:[%s10033_s23 + $0x1c90] sm:$0xff] }
  0xf6   : > { %v2105_v10 = vld [vmem:[%s10033_s23 + $0x1ca0] sm:$0xff]  ;;  %2102 = vst [vmem:[%s10038_s24 + $0xe40] sm:$0xff] %v2101_v8  ;;  %2104 = vst [vmem:[%s10038_s24 + $0xe48] sm:$0xff] %v2103_v9  ;;  %v2107_v11 = vld [vmem:[%s10033_s23 + $0x1cb0] sm:$0xff] }
  0xf7   : > { %2106 = vst [vmem:[%s10038_s24 + $0xe50] sm:$0xff] %v2105_v10  ;;  %v2109_v12 = vld [vmem:[%s10033_s23 + $0x1cc0] sm:$0xff]  ;;  %v2111_v13 = vld [vmem:[%s10033_s23 + $0x1cd0] sm:$0xff]  ;;  %2108 = vst [vmem:[%s10038_s24 + $0xe58] sm:$0xff] %v2107_v11 }
  0xf8   : > { %2110 = vst [vmem:[%s10038_s24 + $0xe60] sm:$0xff] %v2109_v12  ;;  %2112 = vst [vmem:[%s10038_s24 + $0xe68] sm:$0xff] %v2111_v13  ;;  %v2113_v14 = vld [vmem:[%s10033_s23 + $0x1ce0] sm:$0xff]  ;;  %v2115_v15 = vld [vmem:[%s10033_s23 + $0x1cf0] sm:$0xff] }
  0xf9   : > { %v2117_v16 = vld [vmem:[%s10033_s23 + $0x1d00] sm:$0xff]  ;;  %2114 = vst [vmem:[%s10038_s24 + $0xe70] sm:$0xff] %v2113_v14  ;;  %2116 = vst [vmem:[%s10038_s24 + $0xe78] sm:$0xff] %v2115_v15  ;;  %v2119_v17 = vld [vmem:[%s10033_s23 + $0x1d10] sm:$0xff] }
  0xfa   : > { %2118 = vst [vmem:[%s10038_s24 + $0xe80] sm:$0xff] %v2117_v16  ;;  %v2121_v18 = vld [vmem:[%s10033_s23 + $0x1d20] sm:$0xff]  ;;  %v2123_v19 = vld [vmem:[%s10033_s23 + $0x1d30] sm:$0xff]  ;;  %2120 = vst [vmem:[%s10038_s24 + $0xe88] sm:$0xff] %v2119_v17 }
  0xfb   : > { %2122 = vst [vmem:[%s10038_s24 + $0xe90] sm:$0xff] %v2121_v18  ;;  %2124 = vst [vmem:[%s10038_s24 + $0xe98] sm:$0xff] %v2123_v19  ;;  %v2125_v20 = vld [vmem:[%s10033_s23 + $0x1d40] sm:$0xff]  ;;  %v2127_v21 = vld [vmem:[%s10033_s23 + $0x1d50] sm:$0xff] }
  0xfc   : > { %v2129_v22 = vld [vmem:[%s10033_s23 + $0x1d60] sm:$0xff]  ;;  %2126 = vst [vmem:[%s10038_s24 + $0xea0] sm:$0xff] %v2125_v20  ;;  %2128 = vst [vmem:[%s10038_s24 + $0xea8] sm:$0xff] %v2127_v21  ;;  %v2131_v23 = vld [vmem:[%s10033_s23 + $0x1d70] sm:$0xff] }
  0xfd   : > { %2130 = vst [vmem:[%s10038_s24 + $0xeb0] sm:$0xff] %v2129_v22  ;;  %v2133_v24 = vld [vmem:[%s10033_s23 + $0x1d80] sm:$0xff]  ;;  %v2135_v25 = vld [vmem:[%s10033_s23 + $0x1d90] sm:$0xff]  ;;  %2132 = vst [vmem:[%s10038_s24 + $0xeb8] sm:$0xff] %v2131_v23 }
  0xfe   : > { %2134 = vst [vmem:[%s10038_s24 + $0xec0] sm:$0xff] %v2133_v24  ;;  %2136 = vst [vmem:[%s10038_s24 + $0xec8] sm:$0xff] %v2135_v25  ;;  %v2137_v26 = vld [vmem:[%s10033_s23 + $0x1da0] sm:$0xff]  ;;  %v2139_v27 = vld [vmem:[%s10033_s23 + $0x1db0] sm:$0xff] }
  0xff   : > { %v2141_v28 = vld [vmem:[%s10033_s23 + $0x1dc0] sm:$0xff]  ;;  %2138 = vst [vmem:[%s10038_s24 + $0xed0] sm:$0xff] %v2137_v26  ;;  %2140 = vst [vmem:[%s10038_s24 + $0xed8] sm:$0xff] %v2139_v27  ;;  %v2143_v29 = vld [vmem:[%s10033_s23 + $0x1dd0] sm:$0xff] }
 0x100   : > { %2142 = vst [vmem:[%s10038_s24 + $0xee0] sm:$0xff] %v2141_v28  ;;  %v2145_v30 = vld [vmem:[%s10033_s23 + $0x1de0] sm:$0xff]  ;;  %v2147_v31 = vld [vmem:[%s10033_s23 + $0x1df0] sm:$0xff]  ;;  %2144 = vst [vmem:[%s10038_s24 + $0xee8] sm:$0xff] %v2143_v29 }
 0x101   : > { %2146 = vst [vmem:[%s10038_s24 + $0xef0] sm:$0xff] %v2145_v30  ;;  %2148 = vst [vmem:[%s10038_s24 + $0xef8] sm:$0xff] %v2147_v31  ;;  %v2149_v32 = vld [vmem:[%s10033_s23 + $0x1e00] sm:$0xff]  ;;  %v2151_v33 = vld [vmem:[%s10033_s23 + $0x1e10] sm:$0xff] }
 0x102   : > { %v2153_v34 = vld [vmem:[%s10033_s23 + $0x1e20] sm:$0xff]  ;;  %2150 = vst [vmem:[%s10038_s24 + $0xf00] sm:$0xff] %v2149_v32  ;;  %2152 = vst [vmem:[%s10038_s24 + $0xf08] sm:$0xff] %v2151_v33  ;;  %v2155_v35 = vld [vmem:[%s10033_s23 + $0x1e30] sm:$0xff] }
 0x103   : > { %2154 = vst [vmem:[%s10038_s24 + $0xf10] sm:$0xff] %v2153_v34  ;;  %v2157_v36 = vld [vmem:[%s10033_s23 + $0x1e40] sm:$0xff]  ;;  %v2159_v37 = vld [vmem:[%s10033_s23 + $0x1e50] sm:$0xff]  ;;  %2156 = vst [vmem:[%s10038_s24 + $0xf18] sm:$0xff] %v2155_v35 }
 0x104   : > { %2158 = vst [vmem:[%s10038_s24 + $0xf20] sm:$0xff] %v2157_v36  ;;  %2160 = vst [vmem:[%s10038_s24 + $0xf28] sm:$0xff] %v2159_v37  ;;  %v2161_v38 = vld [vmem:[%s10033_s23 + $0x1e60] sm:$0xff]  ;;  %v2163_v39 = vld [vmem:[%s10033_s23 + $0x1e70] sm:$0xff] }
 0x105   : > { %v2165_v40 = vld [vmem:[%s10033_s23 + $0x1e80] sm:$0xff]  ;;  %2162 = vst [vmem:[%s10038_s24 + $0xf30] sm:$0xff] %v2161_v38  ;;  %2164 = vst [vmem:[%s10038_s24 + $0xf38] sm:$0xff] %v2163_v39  ;;  %v2167_v41 = vld [vmem:[%s10033_s23 + $0x1e90] sm:$0xff] }
 0x106   : > { %2166 = vst [vmem:[%s10038_s24 + $0xf40] sm:$0xff] %v2165_v40  ;;  %v2169_v42 = vld [vmem:[%s10033_s23 + $0x1ea0] sm:$0xff]  ;;  %v2171_v43 = vld [vmem:[%s10033_s23 + $0x1eb0] sm:$0xff]  ;;  %2168 = vst [vmem:[%s10038_s24 + $0xf48] sm:$0xff] %v2167_v41 }
 0x107   : > { %2170 = vst [vmem:[%s10038_s24 + $0xf50] sm:$0xff] %v2169_v42  ;;  %2172 = vst [vmem:[%s10038_s24 + $0xf58] sm:$0xff] %v2171_v43  ;;  %v2173_v44 = vld [vmem:[%s10033_s23 + $0x1ec0] sm:$0xff]  ;;  %v2175_v45 = vld [vmem:[%s10033_s23 + $0x1ed0] sm:$0xff] }
 0x108   : > { %v2177_v46 = vld [vmem:[%s10033_s23 + $0x1ee0] sm:$0xff]  ;;  %2174 = vst [vmem:[%s10038_s24 + $0xf60] sm:$0xff] %v2173_v44  ;;  %2176 = vst [vmem:[%s10038_s24 + $0xf68] sm:$0xff] %v2175_v45  ;;  %v2179_v47 = vld [vmem:[%s10033_s23 + $0x1ef0] sm:$0xff] }
 0x109   : > { %2178 = vst [vmem:[%s10038_s24 + $0xf70] sm:$0xff] %v2177_v46  ;;  %v2181_v48 = vld [vmem:[%s10033_s23 + $0x1f00] sm:$0xff]  ;;  %v2183_v49 = vld [vmem:[%s10033_s23 + $0x1f10] sm:$0xff]  ;;  %2180 = vst [vmem:[%s10038_s24 + $0xf78] sm:$0xff] %v2179_v47 }
 0x10a   : > { %2182 = vst [vmem:[%s10038_s24 + $0xf80] sm:$0xff] %v2181_v48  ;;  %2184 = vst [vmem:[%s10038_s24 + $0xf88] sm:$0xff] %v2183_v49  ;;  %v2185_v50 = vld [vmem:[%s10033_s23 + $0x1f20] sm:$0xff]  ;;  %v2187_v51 = vld [vmem:[%s10033_s23 + $0x1f30] sm:$0xff] }
 0x10b   : > { %v2189_v52 = vld [vmem:[%s10033_s23 + $0x1f40] sm:$0xff]  ;;  %2186 = vst [vmem:[%s10038_s24 + $0xf90] sm:$0xff] %v2185_v50  ;;  %2188 = vst [vmem:[%s10038_s24 + $0xf98] sm:$0xff] %v2187_v51  ;;  %v2191_v53 = vld [vmem:[%s10033_s23 + $0x1f50] sm:$0xff] }
 0x10c   : > { %2190 = vst [vmem:[%s10038_s24 + $0xfa0] sm:$0xff] %v2189_v52  ;;  %v2193_v54 = vld [vmem:[%s10033_s23 + $0x1f60] sm:$0xff]  ;;  %v2195_v55 = vld [vmem:[%s10033_s23 + $0x1f70] sm:$0xff]  ;;  %2192 = vst [vmem:[%s10038_s24 + $0xfa8] sm:$0xff] %v2191_v53 }
 0x10d   : > { %2194 = vst [vmem:[%s10038_s24 + $0xfb0] sm:$0xff] %v2193_v54  ;;  %2196 = vst [vmem:[%s10038_s24 + $0xfb8] sm:$0xff] %v2195_v55  ;;  %v2197_v56 = vld [vmem:[%s10033_s23 + $0x1f80] sm:$0xff]  ;;  %v2199_v57 = vld [vmem:[%s10033_s23 + $0x1f90] sm:$0xff] }
 0x10e   : > { %v2201_v58 = vld [vmem:[%s10033_s23 + $0x1fa0] sm:$0xff]  ;;  %2198 = vst [vmem:[%s10038_s24 + $0xfc0] sm:$0xff] %v2197_v56  ;;  %2200 = vst [vmem:[%s10038_s24 + $0xfc8] sm:$0xff] %v2199_v57  ;;  %v2203_v59 = vld [vmem:[%s10033_s23 + $0x1fb0] sm:$0xff] }
 0x10f   : > { %2202 = vst [vmem:[%s10038_s24 + $0xfd0] sm:$0xff] %v2201_v58  ;;  %v2205_v60 = vld [vmem:[%s10033_s23 + $0x1fc0] sm:$0xff]  ;;  %v2207_v61 = vld [vmem:[%s10033_s23 + $0x1fd0] sm:$0xff]  ;;  %2204 = vst [vmem:[%s10038_s24 + $0xfd8] sm:$0xff] %v2203_v59 }
 0x110   : > { %2206 = vst [vmem:[%s10038_s24 + $0xfe0] sm:$0xff] %v2205_v60  ;;  %2208 = vst [vmem:[%s10038_s24 + $0xfe8] sm:$0xff] %v2207_v61  ;;  %v2209_v62 = vld [vmem:[%s10033_s23 + $0x1fe0] sm:$0xff]  ;;  %v2211_v63 = vld [vmem:[%s10033_s23 + $0x1ff0] sm:$0xff] }
 0x111   : > { %2210 = vst [vmem:[%s10038_s24 + $0xff0] sm:$0xff] %v2209_v62  ;;  %2212 = vst [vmem:[%s10038_s24 + $0xff8] sm:$0xff] %v2211_v63 }
 0x112 PF: > { %p8474_p6 = scmp.ge.s32.totalorder %s9973_s13, 1  ;;  %p4301_p7 = scmp.lt.s32.totalorder %s9973_s13, 3 }
 0x114   : > { %p4302_p8 = pnand %p8474_p6, %p4301_p7 }
 0x115   : > { %s4308_s25 = sand.u32 (!%p4302_p8), 1, %s9957_s9   ;;  %v11067_v0 = vld [vmem:[%s11761_s0] sm:$0xff] (!%p4302_p8)  ;;  %vm8220_vm0 = vcmask (!%p4302_p8), 1043456  }
 0x116   : > { %4305 = sbr.rel (%p4302_p8) target bundleno = 1063 (0x427), region = 76  ;;  %v11072_v1 = vld [vmem:[%s11761_s0 + $0x40] sm:$0xff] (!%p4302_p8)  ;;  %s8475_s30 = sshll.u32 (!%p4302_p8), %s4308_s25, 12  ;;  %v8479_v2 = vcombine.high (!%p4302_p8), %v11067_v0, %v11067_v0 }
 0x117   : > { %v8495_v3 = vcombine.high (!%p4302_p8), %v11072_v1, %v11072_v1  ;;  %s11078_s3 = scalar_lea.vmem (!%p4302_p8), [#allocation2], %s8475_s30 }
 0x118   : > { %v9127_v4 = vld [vmem:[%s11078_s3 + $0x4] ss:$8 sps:$4 sm:$0xff] (!%p4302_p8)   ;;  %7586 = vmatprep.mubr.bf16.mxu1 (!%p4302_p8), %v8479_v2  ;;  %v9131_v6 = vld [vmem:[%s11078_s3] ss:$8 sps:$4 sm:$0xff] (!%p4302_p8)   ;;  %v9133_v8 = vld [vmem:[%s11078_s3 + $0x14] ss:$8 sps:$4 sm:$0xff] (!%p4302_p8)  }
 0x119   : > { %7914 = vmatprep.mubr.bf16.mxu0 (!%p4302_p8), %v8495_v3  ;;  %v9129_v5 = vld [vmem:[%s11078_s3 + $0x804] ss:$8 sps:$4 sm:$0xff] (!%p4302_p8)   ;;  %7554 = vmatprep.subr.bf16.mxu1 (!%p4302_p8), %v9127_v4  ;;  %v9132_v7 = vld [vmem:[%s11078_s3 + $0x800] ss:$8 sps:$4 sm:$0xff] (!%p4302_p8)   ;;  %v9135_v9 = vld [vmem:[%s11078_s3 + $0x814] ss:$8 sps:$4 sm:$0xff] (!%p4302_p8)  }
 0x11a   : > { %7882 = vmatprep.subr.bf16.mxu0 (!%p4302_p8), %v9129_v5  ;;  %7555 = vmatpush1.bf16.msra.mxu1 (!%p4302_p8), %v9131_v6  ;;  %v9137_v10 = vld [vmem:[%s11078_s3 + $0x10] ss:$8 sps:$4 sm:$0xff] (!%p4302_p8)   ;;  %v9139_v12 = vld [vmem:[%s11078_s3 + $0x24] ss:$8 sps:$4 sm:$0xff] (!%p4302_p8)   ;;  %v9143_v14 = vld [vmem:[%s11078_s3 + $0x20] ss:$8 sps:$4 sm:$0xff] (!%p4302_p8)  }
 0x11b   : > { %7883 = vmatpush1.bf16.msra.mxu0 (!%p4302_p8), %v9132_v7  ;;  %7556 = vmatprep.subr.bf16.mxu1 (!%p4302_p8), %v9133_v8  ;;  %v9138_v11 = vld [vmem:[%s11078_s3 + $0x810] ss:$8 sps:$4 sm:$0xff] (!%p4302_p8)   ;;  %v9141_v13 = vld [vmem:[%s11078_s3 + $0x824] ss:$8 sps:$4 sm:$0xff] (!%p4302_p8)   ;;  %v9144_v15 = vld [vmem:[%s11078_s3 + $0x820] ss:$8 sps:$4 sm:$0xff] (!%p4302_p8)   ;;  %v8478_v8 = vcombine.low (!%p4302_p8), %v11067_v0, %v11067_v0 }
 0x11c   : > { %7884 = vmatprep.subr.bf16.mxu0 (!%p4302_p8), %v9135_v9  ;;  %v9145_v16 = vld [vmem:[%s11078_s3 + $0x34] ss:$8 sps:$4 sm:$0xff] (!%p4302_p8)   ;;  %v9149_v18 = vld [vmem:[%s11078_s3 + $0x30] ss:$8 sps:$4 sm:$0xff] (!%p4302_p8)   ;;  %v9151_v20 = vld [vmem:[%s11078_s3 + $0x44] ss:$8 sps:$4 sm:$0xff] (!%p4302_p8)  }
 0x11d   : > { %v9147_v17 = vld [vmem:[%s11078_s3 + $0x834] ss:$8 sps:$4 sm:$0xff]   ;;  %v9150_v19 = vld [vmem:[%s11078_s3 + $0x830] ss:$8 sps:$4 sm:$0xff]   ;;  %v9153_v21 = vld [vmem:[%s11078_s3 + $0x844] ss:$8 sps:$4 sm:$0xff]  }
 0x11e   : > { %7557 = vmatpush1.bf16.msra.mxu1 %v9137_v10  ;;  %v9155_v22 = vld [vmem:[%s11078_s3 + $0x40] ss:$8 sps:$4 sm:$0xff]   ;;  %v9157_v24 = vld [vmem:[%s11078_s3 + $0x54] ss:$8 sps:$4 sm:$0xff]   ;;  %v9161_v26 = vld [vmem:[%s11078_s3 + $0x50] ss:$8 sps:$4 sm:$0xff]   ;;  %v8494_v10 = vcombine.low %v11072_v1, %v11072_v1 }
 0x11f   : > { %7885 = vmatpush1.bf16.msra.mxu0 %v9138_v11  ;;  %7558 = vmatprep.subr.bf16.mxu1 %v9139_v12  ;;  %v9156_v23 = vld [vmem:[%s11078_s3 + $0x840] ss:$8 sps:$4 sm:$0xff]   ;;  %v9159_v25 = vld [vmem:[%s11078_s3 + $0x854] ss:$8 sps:$4 sm:$0xff]   ;;  %v9162_v27 = vld [vmem:[%s11078_s3 + $0x850] ss:$8 sps:$4 sm:$0xff]  }
 0x120   : > { %7886 = vmatprep.subr.bf16.mxu0 %v9141_v13  ;;  %v9163_v28 = vld [vmem:[%s11078_s3 + $0x64] ss:$8 sps:$4 sm:$0xff]   ;;  %v9167_v30 = vld [vmem:[%s11078_s3 + $0x60] ss:$8 sps:$4 sm:$0xff]   ;;  %v9169_v32 = vld [vmem:[%s11078_s3 + $0x74] ss:$8 sps:$4 sm:$0xff]  }
 0x121   : > { %v9165_v29 = vld [vmem:[%s11078_s3 + $0x864] ss:$8 sps:$4 sm:$0xff]   ;;  %v9168_v31 = vld [vmem:[%s11078_s3 + $0x860] ss:$8 sps:$4 sm:$0xff]   ;;  %v9171_v33 = vld [vmem:[%s11078_s3 + $0x874] ss:$8 sps:$4 sm:$0xff]  }
 0x122   : > { %7559 = vmatpush1.bf16.msra.mxu1 %v9143_v14  ;;  %v9173_v34 = vld [vmem:[%s11078_s3 + $0x70] ss:$8 sps:$4 sm:$0xff]   ;;  %v9175_v36 = vld [vmem:[%s11078_s3 + $0x84] ss:$8 sps:$4 sm:$0xff]   ;;  %v9179_v38 = vld [vmem:[%s11078_s3 + $0x80] ss:$8 sps:$4 sm:$0xff]  }
 0x123   : > { %7887 = vmatpush1.bf16.msra.mxu0 %v9144_v15  ;;  %7560 = vmatprep.subr.bf16.mxu1 %v9145_v16  ;;  %v9174_v35 = vld [vmem:[%s11078_s3 + $0x870] ss:$8 sps:$4 sm:$0xff]   ;;  %v9177_v37 = vld [vmem:[%s11078_s3 + $0x884] ss:$8 sps:$4 sm:$0xff]   ;;  %v9180_v39 = vld [vmem:[%s11078_s3 + $0x880] ss:$8 sps:$4 sm:$0xff]  }
 0x124   : > { %7888 = vmatprep.subr.bf16.mxu0 %v9147_v17  ;;  %v9181_v40 = vld [vmem:[%s11078_s3 + $0x94] ss:$8 sps:$4 sm:$0xff]   ;;  %v9185_v42 = vld [vmem:[%s11078_s3 + $0x90] ss:$8 sps:$4 sm:$0xff]   ;;  %v9187_v44 = vld [vmem:[%s11078_s3 + $0xa4] ss:$8 sps:$4 sm:$0xff]  }
 0x125   : > { %v9183_v41 = vld [vmem:[%s11078_s3 + $0x894] ss:$8 sps:$4 sm:$0xff]   ;;  %v9186_v43 = vld [vmem:[%s11078_s3 + $0x890] ss:$8 sps:$4 sm:$0xff]   ;;  %v9189_v45 = vld [vmem:[%s11078_s3 + $0x8a4] ss:$8 sps:$4 sm:$0xff]  }
 0x126   : > { %7561 = vmatpush1.bf16.msra.mxu1 %v9149_v18  ;;  %v9191_v46 = vld [vmem:[%s11078_s3 + $0xa0] ss:$8 sps:$4 sm:$0xff]   ;;  %v9193_v48 = vld [vmem:[%s11078_s3 + $0xb4] ss:$8 sps:$4 sm:$0xff]   ;;  %v9197_v50 = vld [vmem:[%s11078_s3 + $0xb0] ss:$8 sps:$4 sm:$0xff]  }
 0x127   : > { %7889 = vmatpush1.bf16.msra.mxu0 %v9150_v19  ;;  %7562 = vmatprep.subr.bf16.mxu1 %v9151_v20  ;;  %v9192_v47 = vld [vmem:[%s11078_s3 + $0x8a0] ss:$8 sps:$4 sm:$0xff]   ;;  %v9195_v49 = vld [vmem:[%s11078_s3 + $0x8b4] ss:$8 sps:$4 sm:$0xff]   ;;  %v9198_v51 = vld [vmem:[%s11078_s3 + $0x8b0] ss:$8 sps:$4 sm:$0xff]  }
 0x128   : > { %7890 = vmatprep.subr.bf16.mxu0 %v9153_v21  ;;  %v9199_v52 = vld [vmem:[%s11078_s3 + $0xc4] ss:$8 sps:$4 sm:$0xff]   ;;  %v9203_v54 = vld [vmem:[%s11078_s3 + $0xc0] ss:$8 sps:$4 sm:$0xff]   ;;  %v9205_v56 = vld [vmem:[%s11078_s3 + $0xd4] ss:$8 sps:$4 sm:$0xff]  }
 0x129   : > { %v9201_v53 = vld [vmem:[%s11078_s3 + $0x8c4] ss:$8 sps:$4 sm:$0xff]   ;;  %v9204_v55 = vld [vmem:[%s11078_s3 + $0x8c0] ss:$8 sps:$4 sm:$0xff]   ;;  %v9207_v57 = vld [vmem:[%s11078_s3 + $0x8d4] ss:$8 sps:$4 sm:$0xff]  }
 0x12a   : > { %7563 = vmatpush1.bf16.msra.mxu1 %v9155_v22  ;;  %v9209_v58 = vld [vmem:[%s11078_s3 + $0xd0] ss:$8 sps:$4 sm:$0xff]   ;;  %v9211_v60 = vld [vmem:[%s11078_s3 + $0xe4] ss:$8 sps:$4 sm:$0xff]   ;;  %v9215_v62 = vld [vmem:[%s11078_s3 + $0xe0] ss:$8 sps:$4 sm:$0xff]  }
 0x12b   : > { %7891 = vmatpush1.bf16.msra.mxu0 %v9156_v23  ;;  %7564 = vmatprep.subr.bf16.mxu1 %v9157_v24  ;;  %v9210_v59 = vld [vmem:[%s11078_s3 + $0x8d0] ss:$8 sps:$4 sm:$0xff]   ;;  %v9213_v61 = vld [vmem:[%s11078_s3 + $0x8e4] ss:$8 sps:$4 sm:$0xff]   ;;  %v9216_v63 = vld [vmem:[%s11078_s3 + $0x8e0] ss:$8 sps:$4 sm:$0xff]  }
 0x12c   : > { %7892 = vmatprep.subr.bf16.mxu0 %v9159_v25  ;;  %v9217_v2 = vld [vmem:[%s11078_s3 + $0xf4] ss:$8 sps:$4 sm:$0xff]   ;;  %v9221_v4 = vld [vmem:[%s11078_s3 + $0xf0] ss:$8 sps:$4 sm:$0xff]   ;;  %v9227_v6 = vld [vmem:[%s11078_s3 + $0x104] ss:$8 sps:$4 sm:$0xff]  }
 0x12d   : > { %v9219_v3 = vld [vmem:[%s11078_s3 + $0x8f4] ss:$8 sps:$4 sm:$0xff]   ;;  %v9222_v5 = vld [vmem:[%s11078_s3 + $0x8f0] ss:$8 sps:$4 sm:$0xff]   ;;  %v9232_v7 = vld [vmem:[%s11078_s3 + $0x904] ss:$8 sps:$4 sm:$0xff]  }
 0x12e   : > { %7565 = vmatpush1.bf16.msra.mxu1 %v9161_v26  ;;  %v9225_v9 = vld [vmem:[%s11078_s3 + $0x100] ss:$8 sps:$4 sm:$0xff]   ;;  %v9235_v12 = vld [vmem:[%s11078_s3 + $0x114] ss:$8 sps:$4 sm:$0xff]   ;;  %v9233_v0 = vld [vmem:[%s11078_s3 + $0x110] ss:$8 sps:$4 sm:$0xff]  }
 0x12f   : > { %7893 = vmatpush1.bf16.msra.mxu0 %v9162_v27  ;;  %7566 = vmatprep.subr.bf16.mxu1 %v9163_v28  ;;  %v9230_v11 = vld [vmem:[%s11078_s3 + $0x900] ss:$8 sps:$4 sm:$0xff]   ;;  %v9238_v13 = vld [vmem:[%s11078_s3 + $0x914] ss:$8 sps:$4 sm:$0xff]   ;;  %v9236_v14 = vld [vmem:[%s11078_s3 + $0x910] ss:$8 sps:$4 sm:$0xff]  }
 0x130   : > { %7894 = vmatprep.subr.bf16.mxu0 %v9165_v29  ;;  %v9241_v1 = vld [vmem:[%s11078_s3 + $0x124] ss:$8 sps:$4 sm:$0xff]   ;;  %v9239_v16 = vld [vmem:[%s11078_s3 + $0x120] ss:$8 sps:$4 sm:$0xff]   ;;  %v9247_v18 = vld [vmem:[%s11078_s3 + $0x134] ss:$8 sps:$4 sm:$0xff]  }
 0x131   : > { %v9244_v15 = vld [vmem:[%s11078_s3 + $0x924] ss:$8 sps:$4 sm:$0xff]   ;;  %v9242_v17 = vld [vmem:[%s11078_s3 + $0x920] ss:$8 sps:$4 sm:$0xff]   ;;  %v9250_v19 = vld [vmem:[%s11078_s3 + $0x934] ss:$8 sps:$4 sm:$0xff]  }
 0x132   : > { %7567 = vmatpush1.bf16.msra.mxu1 %v9167_v30  ;;  %v9245_v20 = vld [vmem:[%s11078_s3 + $0x130] ss:$8 sps:$4 sm:$0xff]   ;;  %v9253_v22 = vld [vmem:[%s11078_s3 + $0x144] ss:$8 sps:$4 sm:$0xff]   ;;  %v9251_v24 = vld [vmem:[%s11078_s3 + $0x140] ss:$8 sps:$4 sm:$0xff]  }
 0x133   : > { %7895 = vmatpush1.bf16.msra.mxu0 %v9168_v31  ;;  %7568 = vmatprep.subr.bf16.mxu1 %v9169_v32  ;;  %v9248_v21 = vld [vmem:[%s11078_s3 + $0x930] ss:$8 sps:$4 sm:$0xff]   ;;  %v9256_v23 = vld [vmem:[%s11078_s3 + $0x944] ss:$8 sps:$4 sm:$0xff]   ;;  %v9254_v25 = vld [vmem:[%s11078_s3 + $0x940] ss:$8 sps:$4 sm:$0xff]  }
 0x134   : > { %7896 = vmatprep.subr.bf16.mxu0 %v9171_v33  ;;  %v9259_v26 = vld [vmem:[%s11078_s3 + $0x154] ss:$8 sps:$4 sm:$0xff]   ;;  %v9257_v28 = vld [vmem:[%s11078_s3 + $0x150] ss:$8 sps:$4 sm:$0xff]   ;;  %v9265_v30 = vld [vmem:[%s11078_s3 + $0x164] ss:$8 sps:$4 sm:$0xff]  }
 0x135   : > { %v9262_v27 = vld [vmem:[%s11078_s3 + $0x954] ss:$8 sps:$4 sm:$0xff]   ;;  %v9260_v29 = vld [vmem:[%s11078_s3 + $0x950] ss:$8 sps:$4 sm:$0xff]   ;;  %v9268_v31 = vld [vmem:[%s11078_s3 + $0x964] ss:$8 sps:$4 sm:$0xff]  }
 0x136   : > { %7569 = vmatpush1.bf16.msra.mxu1 %v9173_v34  ;;  %v11177_v32 = vld [vmem:[%s11761_s0 + $0x8] sm:$0xff] }
 0x137   : > { %7897 = vmatpush1.bf16.msra.mxu0 %v9174_v35  ;;  %7570 = vmatprep.subr.bf16.mxu1 %v9175_v36  ;;  %v8481_v33 = vcombine.high %v11177_v32, %v11177_v32  ;;  %v11184_v34 = vld [vmem:[%s11761_s0 + $0x48] sm:$0xff] }
 0x138   : > { %7898 = vmatprep.subr.bf16.mxu0 %v9177_v37  ;;  %v9263_v35 = vld [vmem:[%s11078_s3 + $0x160] ss:$8 sps:$4 sm:$0xff]   ;;  %v8497_v37 = vcombine.high %v11184_v34, %v11184_v34 }
 0x139   : > { %v9266_v36 = vld [vmem:[%s11078_s3 + $0x960] ss:$8 sps:$4 sm:$0xff]  }
 0x13a   : > { %7571 = vmatpush1.bf16.msra.mxu1 %v9179_v38  ;;  %v9271_v38 = vld [vmem:[%s11078_s3 + $0x174] ss:$8 sps:$4 sm:$0xff]  }
 0x13b   : > { %7899 = vmatpush1.bf16.msra.mxu0 %v9180_v39  ;;  %7572 = vmatprep.subr.bf16.mxu1 %v9181_v40  ;;  %v9274_v39 = vld [vmem:[%s11078_s3 + $0x974] ss:$8 sps:$4 sm:$0xff]   ;;  %v9269_v40 = vld [vmem:[%s11078_s3 + $0x170] ss:$8 sps:$4 sm:$0xff]  }
 0x13c   : > { %7900 = vmatprep.subr.bf16.mxu0 %v9183_v41  ;;  %v9272_v41 = vld [vmem:[%s11078_s3 + $0x970] ss:$8 sps:$4 sm:$0xff]  }
 0x13e   : > { %7573 = vmatpush1.bf16.msra.mxu1 %v9185_v42  ;;  %v9277_v42 = vld [vmem:[%s11078_s3 + $0x184] ss:$8 sps:$4 sm:$0xff]  }
 0x13f   : > { %7901 = vmatpush1.bf16.msra.mxu0 %v9186_v43  ;;  %7574 = vmatprep.subr.bf16.mxu1 %v9187_v44  ;;  %v9280_v43 = vld [vmem:[%s11078_s3 + $0x984] ss:$8 sps:$4 sm:$0xff]   ;;  %v9275_v44 = vld [vmem:[%s11078_s3 + $0x180] ss:$8 sps:$4 sm:$0xff]  }
 0x140   : > { %7902 = vmatprep.subr.bf16.mxu0 %v9189_v45  ;;  %v9278_v45 = vld [vmem:[%s11078_s3 + $0x980] ss:$8 sps:$4 sm:$0xff]  }
 0x142   : > { %7575 = vmatpush1.bf16.msra.mxu1 %v9191_v46  ;;  %v9283_v46 = vld [vmem:[%s11078_s3 + $0x194] ss:$8 sps:$4 sm:$0xff]  }
 0x143   : > { %7903 = vmatpush1.bf16.msra.mxu0 %v9192_v47  ;;  %7576 = vmatprep.subr.bf16.mxu1 %v9193_v48  ;;  %v9286_v47 = vld [vmem:[%s11078_s3 + $0x994] ss:$8 sps:$4 sm:$0xff]   ;;  %v9281_v48 = vld [vmem:[%s11078_s3 + $0x190] ss:$8 sps:$4 sm:$0xff]  }
 0x144   : > { %7904 = vmatprep.subr.bf16.mxu0 %v9195_v49  ;;  %v9284_v49 = vld [vmem:[%s11078_s3 + $0x990] ss:$8 sps:$4 sm:$0xff]  }
 0x146   : > { %7577 = vmatpush1.bf16.msra.mxu1 %v9197_v50  ;;  %v9289_v50 = vld [vmem:[%s11078_s3 + $0x1a4] ss:$8 sps:$4 sm:$0xff]  }
 0x147   : > { %7905 = vmatpush1.bf16.msra.mxu0 %v9198_v51  ;;  %7578 = vmatprep.subr.bf16.mxu1 %v9199_v52  ;;  %v9292_v51 = vld [vmem:[%s11078_s3 + $0x9a4] ss:$8 sps:$4 sm:$0xff]   ;;  %v9287_v52 = vld [vmem:[%s11078_s3 + $0x1a0] ss:$8 sps:$4 sm:$0xff]  }
 0x148   : > { %7906 = vmatprep.subr.bf16.mxu0 %v9201_v53  ;;  %v9290_v53 = vld [vmem:[%s11078_s3 + $0x9a0] ss:$8 sps:$4 sm:$0xff]  }
 0x14a   : > { %7579 = vmatpush1.bf16.msra.mxu1 %v9203_v54  ;;  %v9295_v54 = vld [vmem:[%s11078_s3 + $0x1b4] ss:$8 sps:$4 sm:$0xff]  }
 0x14b   : > { %7907 = vmatpush1.bf16.msra.mxu0 %v9204_v55  ;;  %7580 = vmatprep.subr.bf16.mxu1 %v9205_v56  ;;  %v9298_v55 = vld [vmem:[%s11078_s3 + $0x9b4] ss:$8 sps:$4 sm:$0xff]   ;;  %v9293_v56 = vld [vmem:[%s11078_s3 + $0x1b0] ss:$8 sps:$4 sm:$0xff]  }
 0x14c   : > { %7908 = vmatprep.subr.bf16.mxu0 %v9207_v57  ;;  %v9296_v57 = vld [vmem:[%s11078_s3 + $0x9b0] ss:$8 sps:$4 sm:$0xff]  }
 0x14e   : > { %7581 = vmatpush1.bf16.msra.mxu1 %v9209_v58  ;;  %v9301_v58 = vld [vmem:[%s11078_s3 + $0x1c4] ss:$8 sps:$4 sm:$0xff]  }
 0x14f   : > { %7909 = vmatpush1.bf16.msra.mxu0 %v9210_v59  ;;  %7582 = vmatprep.subr.bf16.mxu1 %v9211_v60  ;;  %v9304_v59 = vld [vmem:[%s11078_s3 + $0x9c4] ss:$8 sps:$4 sm:$0xff]   ;;  %v9299_v60 = vld [vmem:[%s11078_s3 + $0x1c0] ss:$8 sps:$4 sm:$0xff]  }
 0x150   : > { %7910 = vmatprep.subr.bf16.mxu0 %v9213_v61  ;;  %v9302_v61 = vld [vmem:[%s11078_s3 + $0x9c0] ss:$8 sps:$4 sm:$0xff]  }
 0x152   : > { %7583 = vmatpush1.bf16.msra.mxu1 %v9215_v62  ;;  %v9307_v62 = vld [vmem:[%s11078_s3 + $0x1d4] ss:$8 sps:$4 sm:$0xff]  }
 0x153   : > { %7911 = vmatpush1.bf16.msra.mxu0 %v9216_v63  ;;  %7584 = vmatprep.subr.bf16.mxu1 %v9217_v2  ;;  %v9310_v63 = vld [vmem:[%s11078_s3 + $0x9d4] ss:$8 sps:$4 sm:$0xff]   ;;  %v9305_v2 = vld [vmem:[%s11078_s3 + $0x1d0] ss:$8 sps:$4 sm:$0xff]  }
 0x154   : > { %7912 = vmatprep.subr.bf16.mxu0 %v9219_v3  ;;  %v9308_v3 = vld [vmem:[%s11078_s3 + $0x9d0] ss:$8 sps:$4 sm:$0xff]  }
 0x156   : > { %7585 = vmatpush1.bf16.msra.mxu1 %v9221_v4  ;;  %v9313_v4 = vld [vmem:[%s11078_s3 + $0x1e4] ss:$8 sps:$4 sm:$0xff]  }
 0x157   : > { %7913 = vmatpush1.bf16.msra.mxu0 %v9222_v5  ;;  %7595 = vmatprep.subr.bf16.mxu1 %v9227_v6  ;;  %v9316_v5 = vld [vmem:[%s11078_s3 + $0x9e4] ss:$8 sps:$4 sm:$0xff]   ;;  %v9311_v6 = vld [vmem:[%s11078_s3 + $0x1e0] ss:$8 sps:$4 sm:$0xff]  }
 0x158   : > { %7923 = vmatprep.subr.bf16.mxu0 %v9232_v7  ;;  %v9314_v7 = vld [vmem:[%s11078_s3 + $0x9e0] ss:$8 sps:$4 sm:$0xff]  }
 0x159   : > { %7587 = vmatmul.mubr.bf16.vlgmr.msra.gmra.mrb[0].mxu1 %v8478_v8  ;;  %v9319_v8 = vld [vmem:[%s11078_s3 + $0x1f4] ss:$8 sps:$4 sm:$0xff]  }
 0x15a   : > { %7915 = vmatmul.mubr.bf16.vlgmr.msra.gmra.mrb[0].mxu0 %v8494_v10  ;;  %7596 = vmatpush1.bf16.msra.mxu1 %v9225_v9  ;;  %v9322_v9 = vld [vmem:[%s11078_s3 + $0x9f4] ss:$8 sps:$4 sm:$0xff]   ;;  %v9317_v10 = vld [vmem:[%s11078_s3 + $0x1f0] ss:$8 sps:$4 sm:$0xff]  }
 0x15b   : > { %7924 = vmatpush1.bf16.msra.mxu0 %v9230_v11  ;;  %7597 = vmatprep.subr.bf16.mxu1 %v9235_v12  ;;  %v9320_v11 = vld [vmem:[%s11078_s3 + $0x9f0] ss:$8 sps:$4 sm:$0xff]   ;;  %v9327_v12 = vld [vmem:[%s11078_s3 + $0x204] ss:$8 sps:$4 sm:$0xff]  }
 0x15c   : > { %7925 = vmatprep.subr.bf16.mxu0 %v9238_v13  ;;  %7627 = vmatprep.mubr.bf16.mxu1 %v8481_v33  ;;  %v9332_v13 = vld [vmem:[%s11078_s3 + $0xa04] ss:$8 sps:$4 sm:$0xff]  }
 0x15d   : > { %7955 = vmatprep.mubr.bf16.mxu0 %v8497_v37  ;;  %v9356_v33 = vld [vmem:[%s11078_s3 + $0xa44] ss:$8 sps:$4 sm:$0xff]   ;;  %v9362_v37 = vld [vmem:[%s11078_s3 + $0xa54] ss:$8 sps:$4 sm:$0xff]  }
 0x15e   : > { %7598 = vmatpush1.bf16.msra.mxu1 %v9233_v0  ;;  %v8480_v0 = vcombine.low %v11177_v32, %v11177_v32  ;;  %v9353_v32 = vld [vmem:[%s11078_s3 + $0x244] ss:$8 sps:$4 sm:$0xff]  }
 0x15f   : > { %7926 = vmatpush1.bf16.msra.mxu0 %v9236_v14  ;;  %7599 = vmatprep.subr.bf16.mxu1 %v9241_v1  ;;  %v9325_v14 = vld [vmem:[%s11078_s3 + $0x200] ss:$8 sps:$4 sm:$0xff]   ;;  %v8496_v1 = vcombine.low %v11184_v34, %v11184_v34 }
 0x160   : > { %7927 = vmatprep.subr.bf16.mxu0 %v9244_v15  ;;  %v9330_v15 = vld [vmem:[%s11078_s3 + $0xa00] ss:$8 sps:$4 sm:$0xff]  }
 0x161   : > { %v9351_v34 = vld [vmem:[%s11078_s3 + $0x240] ss:$8 sps:$4 sm:$0xff]  }
 0x162   : > { %7600 = vmatpush1.bf16.msra.mxu1 %v9239_v16  ;;  %v9335_v16 = vld [vmem:[%s11078_s3 + $0x214] ss:$8 sps:$4 sm:$0xff]  }
 0x163   : > { %7928 = vmatpush1.bf16.msra.mxu0 %v9242_v17  ;;  %7601 = vmatprep.subr.bf16.mxu1 %v9247_v18  ;;  %v11238_v17 = vld [vmem:[%s11761_s0 + $0x10] sm:$0xff] }
 0x164   : > { %7929 = vmatprep.subr.bf16.mxu0 %v9250_v19  ;;  %v9338_v18 = vld [vmem:[%s11078_s3 + $0xa14] ss:$8 sps:$4 sm:$0xff]   ;;  %v8483_v19 = vcombine.high %v11238_v17, %v11238_v17 }
 0x166   : > { %7602 = vmatpush1.bf16.msra.mxu1 %v9245_v20  ;;  %v11246_v20 = vld [vmem:[%s11761_s0 + $0x50] sm:$0xff] }
 0x167   : > { %7930 = vmatpush1.bf16.msra.mxu0 %v9248_v21  ;;  %7603 = vmatprep.subr.bf16.mxu1 %v9253_v22  ;;  %v9333_v21 = vld [vmem:[%s11078_s3 + $0x210] ss:$8 sps:$4 sm:$0xff]  }
 0x168   : > { %7931 = vmatprep.subr.bf16.mxu0 %v9256_v23  ;;  %v9336_v22 = vld [vmem:[%s11078_s3 + $0xa10] ss:$8 sps:$4 sm:$0xff]   ;;  %v8499_v23 = vcombine.high %v11246_v20, %v11246_v20 }
 0x16a   : > { %7604 = vmatpush1.bf16.msra.mxu1 %v9251_v24  ;;  %v9341_v24 = vld [vmem:[%s11078_s3 + $0x224] ss:$8 sps:$4 sm:$0xff]  }
 0x16b   : > { %7932 = vmatpush1.bf16.msra.mxu0 %v9254_v25  ;;  %7605 = vmatprep.subr.bf16.mxu1 %v9259_v26  ;;  %v9344_v25 = vld [vmem:[%s11078_s3 + $0xa24] ss:$8 sps:$4 sm:$0xff]   ;;  %v9339_v26 = vld [vmem:[%s11078_s3 + $0x220] ss:$8 sps:$4 sm:$0xff]  }
 0x16c   : > { %7933 = vmatprep.subr.bf16.mxu0 %v9262_v27  ;;  %v9342_v27 = vld [vmem:[%s11078_s3 + $0xa20] ss:$8 sps:$4 sm:$0xff]  }
 0x16e   : > { %7606 = vmatpush1.bf16.msra.mxu1 %v9257_v28  ;;  %v9347_v28 = vld [vmem:[%s11078_s3 + $0x234] ss:$8 sps:$4 sm:$0xff]  }
 0x16f   : > { %7934 = vmatpush1.bf16.msra.mxu0 %v9260_v29  ;;  %7607 = vmatprep.subr.bf16.mxu1 %v9265_v30  ;;  %v9350_v29 = vld [vmem:[%s11078_s3 + $0xa34] ss:$8 sps:$4 sm:$0xff]   ;;  %v9345_v30 = vld [vmem:[%s11078_s3 + $0x230] ss:$8 sps:$4 sm:$0xff]  }
 0x170   : > { %7935 = vmatprep.subr.bf16.mxu0 %v9268_v31  ;;  %v9348_v31 = vld [vmem:[%s11078_s3 + $0xa30] ss:$8 sps:$4 sm:$0xff]  }
 0x172   : > { %7608 = vmatpush1.bf16.msra.mxu1 %v9263_v35  ;;  %v9354_v35 = vld [vmem:[%s11078_s3 + $0xa40] ss:$8 sps:$4 sm:$0xff]  }
 0x173   : > { %7936 = vmatpush1.bf16.msra.mxu0 %v9266_v36  ;;  %7609 = vmatprep.subr.bf16.mxu1 %v9271_v38  ;;  %v9359_v36 = vld [vmem:[%s11078_s3 + $0x254] ss:$8 sps:$4 sm:$0xff]   ;;  %v9357_v38 = vld [vmem:[%s11078_s3 + $0x250] ss:$8 sps:$4 sm:$0xff]  }
 0x174   : > { %7937 = vmatprep.subr.bf16.mxu0 %v9274_v39  ;;  %v9360_v39 = vld [vmem:[%s11078_s3 + $0xa50] ss:$8 sps:$4 sm:$0xff]  }
 0x176   : > { %7610 = vmatpush1.bf16.msra.mxu1 %v9269_v40  ;;  %v9365_v40 = vld [vmem:[%s11078_s3 + $0x264] ss:$8 sps:$4 sm:$0xff]  }
 0x177   : > { %7938 = vmatpush1.bf16.msra.mxu0 %v9272_v41  ;;  %7611 = vmatprep.subr.bf16.mxu1 %v9277_v42  ;;  %v9368_v41 = vld [vmem:[%s11078_s3 + $0xa64] ss:$8 sps:$4 sm:$0xff]   ;;  %v9363_v42 = vld [vmem:[%s11078_s3 + $0x260] ss:$8 sps:$4 sm:$0xff]  }
 0x178   : > { %7939 = vmatprep.subr.bf16.mxu0 %v9280_v43  ;;  %v9366_v43 = vld [vmem:[%s11078_s3 + $0xa60] ss:$8 sps:$4 sm:$0xff]  }
 0x17a   : > { %7612 = vmatpush1.bf16.msra.mxu1 %v9275_v44  ;;  %v9371_v44 = vld [vmem:[%s11078_s3 + $0x274] ss:$8 sps:$4 sm:$0xff]  }
 0x17b   : > { %7940 = vmatpush1.bf16.msra.mxu0 %v9278_v45  ;;  %7613 = vmatprep.subr.bf16.mxu1 %v9283_v46  ;;  %v9374_v45 = vld [vmem:[%s11078_s3 + $0xa74] ss:$8 sps:$4 sm:$0xff]   ;;  %v9369_v46 = vld [vmem:[%s11078_s3 + $0x270] ss:$8 sps:$4 sm:$0xff]  }
 0x17c   : > { %7941 = vmatprep.subr.bf16.mxu0 %v9286_v47  ;;  %v9372_v47 = vld [vmem:[%s11078_s3 + $0xa70] ss:$8 sps:$4 sm:$0xff]  }
 0x17e   : > { %7614 = vmatpush1.bf16.msra.mxu1 %v9281_v48  ;;  %v9377_v48 = vld [vmem:[%s11078_s3 + $0x284] ss:$8 sps:$4 sm:$0xff]  }
 0x17f   : > { %7942 = vmatpush1.bf16.msra.mxu0 %v9284_v49  ;;  %7615 = vmatprep.subr.bf16.mxu1 %v9289_v50  ;;  %v9380_v49 = vld [vmem:[%s11078_s3 + $0xa84] ss:$8 sps:$4 sm:$0xff]   ;;  %v9375_v50 = vld [vmem:[%s11078_s3 + $0x280] ss:$8 sps:$4 sm:$0xff]  }
 0x180   : > { %7943 = vmatprep.subr.bf16.mxu0 %v9292_v51  ;;  %v9378_v51 = vld [vmem:[%s11078_s3 + $0xa80] ss:$8 sps:$4 sm:$0xff]  }
 0x182   : > { %7616 = vmatpush1.bf16.msra.mxu1 %v9287_v52  ;;  %v9383_v52 = vld [vmem:[%s11078_s3 + $0x294] ss:$8 sps:$4 sm:$0xff]  }
 0x183   : > { %7944 = vmatpush1.bf16.msra.mxu0 %v9290_v53  ;;  %7617 = vmatprep.subr.bf16.mxu1 %v9295_v54  ;;  %v9386_v53 = vld [vmem:[%s11078_s3 + $0xa94] ss:$8 sps:$4 sm:$0xff]   ;;  %v9381_v54 = vld [vmem:[%s11078_s3 + $0x290] ss:$8 sps:$4 sm:$0xff]  }
 0x184   : > { %7945 = vmatprep.subr.bf16.mxu0 %v9298_v55  ;;  %v9384_v55 = vld [vmem:[%s11078_s3 + $0xa90] ss:$8 sps:$4 sm:$0xff]  }
 0x186   : > { %7618 = vmatpush1.bf16.msra.mxu1 %v9293_v56  ;;  %v9389_v56 = vld [vmem:[%s11078_s3 + $0x2a4] ss:$8 sps:$4 sm:$0xff]  }
 0x187   : > { %7946 = vmatpush1.bf16.msra.mxu0 %v9296_v57  ;;  %7619 = vmatprep.subr.bf16.mxu1 %v9301_v58  ;;  %v9392_v57 = vld [vmem:[%s11078_s3 + $0xaa4] ss:$8 sps:$4 sm:$0xff]   ;;  %v9387_v58 = vld [vmem:[%s11078_s3 + $0x2a0] ss:$8 sps:$4 sm:$0xff]  }
 0x188   : > { %7947 = vmatprep.subr.bf16.mxu0 %v9304_v59  ;;  %v9390_v59 = vld [vmem:[%s11078_s3 + $0xaa0] ss:$8 sps:$4 sm:$0xff]  }
 0x18a   : > { %7620 = vmatpush1.bf16.msra.mxu1 %v9299_v60  ;;  %v9395_v60 = vld [vmem:[%s11078_s3 + $0x2b4] ss:$8 sps:$4 sm:$0xff]  }
 0x18b   : > { %7948 = vmatpush1.bf16.msra.mxu0 %v9302_v61  ;;  %7621 = vmatprep.subr.bf16.mxu1 %v9307_v62  ;;  %v9398_v61 = vld [vmem:[%s11078_s3 + $0xab4] ss:$8 sps:$4 sm:$0xff]   ;;  %v9393_v62 = vld [vmem:[%s11078_s3 + $0x2b0] ss:$8 sps:$4 sm:$0xff]  }
 0x18c   : > { %7949 = vmatprep.subr.bf16.mxu0 %v9310_v63  ;;  %v9396_v63 = vld [vmem:[%s11078_s3 + $0xab0] ss:$8 sps:$4 sm:$0xff]  }
 0x18e   : > { %7622 = vmatpush1.bf16.msra.mxu1 %v9305_v2  ;;  %v9401_v2 = vld [vmem:[%s11078_s3 + $0x2c4] ss:$8 sps:$4 sm:$0xff]  }
 0x18f   : > { %7950 = vmatpush1.bf16.msra.mxu0 %v9308_v3  ;;  %7623 = vmatprep.subr.bf16.mxu1 %v9313_v4  ;;  %v9404_v3 = vld [vmem:[%s11078_s3 + $0xac4] ss:$8 sps:$4 sm:$0xff]   ;;  %v9399_v4 = vld [vmem:[%s11078_s3 + $0x2c0] ss:$8 sps:$4 sm:$0xff]  }
 0x190   : > { %7951 = vmatprep.subr.bf16.mxu0 %v9316_v5  ;;  %v9402_v5 = vld [vmem:[%s11078_s3 + $0xac0] ss:$8 sps:$4 sm:$0xff]  }
 0x192   : > { %7624 = vmatpush1.bf16.msra.mxu1 %v9311_v6  ;;  %v9407_v6 = vld [vmem:[%s11078_s3 + $0x2d4] ss:$8 sps:$4 sm:$0xff]  }
 0x193   : > { %7952 = vmatpush1.bf16.msra.mxu0 %v9314_v7  ;;  %7625 = vmatprep.subr.bf16.mxu1 %v9319_v8  ;;  %v9410_v7 = vld [vmem:[%s11078_s3 + $0xad4] ss:$8 sps:$4 sm:$0xff]   ;;  %v9405_v8 = vld [vmem:[%s11078_s3 + $0x2d0] ss:$8 sps:$4 sm:$0xff]  }
 0x194   : > { %7953 = vmatprep.subr.bf16.mxu0 %v9322_v9  ;;  %v9408_v9 = vld [vmem:[%s11078_s3 + $0xad0] ss:$8 sps:$4 sm:$0xff]  }
 0x196   : > { %7626 = vmatpush1.bf16.msra.mxu1 %v9317_v10  ;;  %v9413_v10 = vld [vmem:[%s11078_s3 + $0x2e4] ss:$8 sps:$4 sm:$0xff]  }
 0x197   : > { %7954 = vmatpush1.bf16.msra.mxu0 %v9320_v11  ;;  %7636 = vmatprep.subr.bf16.mxu1 %v9327_v12  ;;  %v9416_v11 = vld [vmem:[%s11078_s3 + $0xae4] ss:$8 sps:$4 sm:$0xff]   ;;  %v9411_v12 = vld [vmem:[%s11078_s3 + $0x2e0] ss:$8 sps:$4 sm:$0xff]  }
 0x198   : > { %7964 = vmatprep.subr.bf16.mxu0 %v9332_v13  ;;  %v9414_v13 = vld [vmem:[%s11078_s3 + $0xae0] ss:$8 sps:$4 sm:$0xff]  }
 0x199   : > { %7628 = vmatmul.mubr.bf16.vlgmr.msra.gmra.mrb[0].mxu1 %v8480_v0  ;;  %v9419_v0 = vld [vmem:[%s11078_s3 + $0x2f4] ss:$8 sps:$4 sm:$0xff]  }
 0x19a   : > { %7956 = vmatmul.mubr.bf16.vlgmr.msra.gmra.mrb[0].mxu0 %v8496_v1  ;;  %7637 = vmatpush1.bf16.msra.mxu1 %v9325_v14  ;;  %v9422_v14 = vld [vmem:[%s11078_s3 + $0xaf4] ss:$8 sps:$4 sm:$0xff]   ;;  %v9417_v1 = vld [vmem:[%s11078_s3 + $0x2f0] ss:$8 sps:$4 sm:$0xff]  }
 0x19b   : > { %7965 = vmatpush1.bf16.msra.mxu0 %v9330_v15  ;;  %7638 = vmatprep.subr.bf16.mxu1 %v9335_v16  ;;  %v9420_v15 = vld [vmem:[%s11078_s3 + $0xaf0] ss:$8 sps:$4 sm:$0xff]   ;;  %v9427_v16 = vld [vmem:[%s11078_s3 + $0x304] ss:$8 sps:$4 sm:$0xff]  }
 0x19c   : > { %7966 = vmatprep.subr.bf16.mxu0 %v9338_v18  ;;  %7668 = vmatprep.mubr.bf16.mxu1 %v8483_v19  ;;  %v9432_v18 = vld [vmem:[%s11078_s3 + $0xb04] ss:$8 sps:$4 sm:$0xff]   ;;  %v11313_v19 = vld [vmem:[%s11761_s0 + $0x18] sm:$0xff] }
 0x19d   : > { %7996 = vmatprep.mubr.bf16.mxu0 %v8499_v23  ;;  %v11322_v23 = vld [vmem:[%s11761_s0 + $0x58] sm:$0xff] }
 0x19e   : > { %7639 = vmatpush1.bf16.msra.mxu1 %v9333_v21  ;;  %v8482_v21 = vcombine.low %v11238_v17, %v11238_v17  ;;  %v9438_v17 = vld [vmem:[%s11078_s3 + $0xb14] ss:$8 sps:$4 sm:$0xff]  }
 0x19f   : > { %7967 = vmatpush1.bf16.msra.mxu0 %v9336_v22  ;;  %7640 = vmatprep.subr.bf16.mxu1 %v9341_v24  ;;  %v8498_v22 = vcombine.low %v11246_v20, %v11246_v20  ;;  %v9425_v24 = vld [vmem:[%s11078_s3 + $0x300] ss:$8 sps:$4 sm:$0xff]   ;;  %v8485_v20 = vcombine.high %v11313_v19, %v11313_v19 }
 0x1a0   : > { %7968 = vmatprep.subr.bf16.mxu0 %v9344_v25  ;;  %v9430_v25 = vld [vmem:[%s11078_s3 + $0xb00] ss:$8 sps:$4 sm:$0xff]  }
 0x1a2   : > { %7641 = vmatpush1.bf16.msra.mxu1 %v9339_v26  ;;  %v9435_v26 = vld [vmem:[%s11078_s3 + $0x314] ss:$8 sps:$4 sm:$0xff]  }
 0x1a3   : > { %7969 = vmatpush1.bf16.msra.mxu0 %v9342_v27  ;;  %7642 = vmatprep.subr.bf16.mxu1 %v9347_v28  ;;  %v8501_v27 = vcombine.high %v11322_v23, %v11322_v23  ;;  %v9433_v28 = vld [vmem:[%s11078_s3 + $0x310] ss:$8 sps:$4 sm:$0xff]  }
 0x1a4   : > { %7970 = vmatprep.subr.bf16.mxu0 %v9350_v29  ;;  %v9436_v29 = vld [vmem:[%s11078_s3 + $0xb10] ss:$8 sps:$4 sm:$0xff]  }
 0x1a6   : > { %7643 = vmatpush1.bf16.msra.mxu1 %v9345_v30  ;;  %v9441_v30 = vld [vmem:[%s11078_s3 + $0x324] ss:$8 sps:$4 sm:$0xff]  }
 0x1a7   : > { %7971 = vmatpush1.bf16.msra.mxu0 %v9348_v31  ;;  %7644 = vmatprep.subr.bf16.mxu1 %v9353_v32  ;;  %v9444_v31 = vld [vmem:[%s11078_s3 + $0xb24] ss:$8 sps:$4 sm:$0xff]   ;;  %v9439_v32 = vld [vmem:[%s11078_s3 + $0x320] ss:$8 sps:$4 sm:$0xff]  }
 0x1a8   : > { %7972 = vmatprep.subr.bf16.mxu0 %v9356_v33  ;;  %v9442_v33 = vld [vmem:[%s11078_s3 + $0xb20] ss:$8 sps:$4 sm:$0xff]  }
 0x1aa   : > { %7645 = vmatpush1.bf16.msra.mxu1 %v9351_v34  ;;  %v9447_v34 = vld [vmem:[%s11078_s3 + $0x334] ss:$8 sps:$4 sm:$0xff]  }
 0x1ab   : > { %7973 = vmatpush1.bf16.msra.mxu0 %v9354_v35  ;;  %7646 = vmatprep.subr.bf16.mxu1 %v9359_v36  ;;  %v9450_v35 = vld [vmem:[%s11078_s3 + $0xb34] ss:$8 sps:$4 sm:$0xff]   ;;  %v9445_v36 = vld [vmem:[%s11078_s3 + $0x330] ss:$8 sps:$4 sm:$0xff]  }
 0x1ac   : > { %7974 = vmatprep.subr.bf16.mxu0 %v9362_v37  ;;  %v9448_v37 = vld [vmem:[%s11078_s3 + $0xb30] ss:$8 sps:$4 sm:$0xff]  }
 0x1ae   : > { %7647 = vmatpush1.bf16.msra.mxu1 %v9357_v38  ;;  %v9453_v38 = vld [vmem:[%s11078_s3 + $0x344] ss:$8 sps:$4 sm:$0xff]  }
 0x1af   : > { %7975 = vmatpush1.bf16.msra.mxu0 %v9360_v39  ;;  %7648 = vmatprep.subr.bf16.mxu1 %v9365_v40  ;;  %v9456_v39 = vld [vmem:[%s11078_s3 + $0xb44] ss:$8 sps:$4 sm:$0xff]   ;;  %v9451_v40 = vld [vmem:[%s11078_s3 + $0x340] ss:$8 sps:$4 sm:$0xff]  }
 0x1b0   : > { %7976 = vmatprep.subr.bf16.mxu0 %v9368_v41  ;;  %v9454_v41 = vld [vmem:[%s11078_s3 + $0xb40] ss:$8 sps:$4 sm:$0xff]  }
 0x1b2   : > { %7649 = vmatpush1.bf16.msra.mxu1 %v9363_v42  ;;  %v9459_v42 = vld [vmem:[%s11078_s3 + $0x354] ss:$8 sps:$4 sm:$0xff]  }
 0x1b3   : > { %7977 = vmatpush1.bf16.msra.mxu0 %v9366_v43  ;;  %7650 = vmatprep.subr.bf16.mxu1 %v9371_v44  ;;  %v9462_v43 = vld [vmem:[%s11078_s3 + $0xb54] ss:$8 sps:$4 sm:$0xff]   ;;  %v9457_v44 = vld [vmem:[%s11078_s3 + $0x350] ss:$8 sps:$4 sm:$0xff]  }
 0x1b4   : > { %7978 = vmatprep.subr.bf16.mxu0 %v9374_v45  ;;  %v9460_v45 = vld [vmem:[%s11078_s3 + $0xb50] ss:$8 sps:$4 sm:$0xff]  }
 0x1b6   : > { %7651 = vmatpush1.bf16.msra.mxu1 %v9369_v46  ;;  %v9465_v46 = vld [vmem:[%s11078_s3 + $0x364] ss:$8 sps:$4 sm:$0xff]  }
 0x1b7   : > { %7979 = vmatpush1.bf16.msra.mxu0 %v9372_v47  ;;  %7652 = vmatprep.subr.bf16.mxu1 %v9377_v48  ;;  %v9468_v47 = vld [vmem:[%s11078_s3 + $0xb64] ss:$8 sps:$4 sm:$0xff]   ;;  %v9463_v48 = vld [vmem:[%s11078_s3 + $0x360] ss:$8 sps:$4 sm:$0xff]  }
 0x1b8   : > { %7980 = vmatprep.subr.bf16.mxu0 %v9380_v49  ;;  %v9466_v49 = vld [vmem:[%s11078_s3 + $0xb60] ss:$8 sps:$4 sm:$0xff]  }
 0x1ba   : > { %7653 = vmatpush1.bf16.msra.mxu1 %v9375_v50  ;;  %v9471_v50 = vld [vmem:[%s11078_s3 + $0x374] ss:$8 sps:$4 sm:$0xff]  }
 0x1bb   : > { %7981 = vmatpush1.bf16.msra.mxu0 %v9378_v51  ;;  %7654 = vmatprep.subr.bf16.mxu1 %v9383_v52  ;;  %v9474_v51 = vld [vmem:[%s11078_s3 + $0xb74] ss:$8 sps:$4 sm:$0xff]   ;;  %v9469_v52 = vld [vmem:[%s11078_s3 + $0x370] ss:$8 sps:$4 sm:$0xff]  }
 0x1bc   : > { %7982 = vmatprep.subr.bf16.mxu0 %v9386_v53  ;;  %v9472_v53 = vld [vmem:[%s11078_s3 + $0xb70] ss:$8 sps:$4 sm:$0xff]  }
 0x1be   : > { %7655 = vmatpush1.bf16.msra.mxu1 %v9381_v54  ;;  %v9477_v54 = vld [vmem:[%s11078_s3 + $0x384] ss:$8 sps:$4 sm:$0xff]  }
 0x1bf   : > { %7983 = vmatpush1.bf16.msra.mxu0 %v9384_v55  ;;  %7656 = vmatprep.subr.bf16.mxu1 %v9389_v56  ;;  %v9480_v55 = vld [vmem:[%s11078_s3 + $0xb84] ss:$8 sps:$4 sm:$0xff]   ;;  %v9475_v56 = vld [vmem:[%s11078_s3 + $0x380] ss:$8 sps:$4 sm:$0xff]  }
 0x1c0   : > { %7984 = vmatprep.subr.bf16.mxu0 %v9392_v57  ;;  %v9478_v57 = vld [vmem:[%s11078_s3 + $0xb80] ss:$8 sps:$4 sm:$0xff]  }
 0x1c2   : > { %7657 = vmatpush1.bf16.msra.mxu1 %v9387_v58  ;;  %v9483_v58 = vld [vmem:[%s11078_s3 + $0x394] ss:$8 sps:$4 sm:$0xff]  }
 0x1c3   : > { %7985 = vmatpush1.bf16.msra.mxu0 %v9390_v59  ;;  %7658 = vmatprep.subr.bf16.mxu1 %v9395_v60  ;;  %v9486_v59 = vld [vmem:[%s11078_s3 + $0xb94] ss:$8 sps:$4 sm:$0xff]   ;;  %v9481_v60 = vld [vmem:[%s11078_s3 + $0x390] ss:$8 sps:$4 sm:$0xff]  }
 0x1c4   : > { %7986 = vmatprep.subr.bf16.mxu0 %v9398_v61  ;;  %v9484_v61 = vld [vmem:[%s11078_s3 + $0xb90] ss:$8 sps:$4 sm:$0xff]  }
 0x1c6   : > { %7659 = vmatpush1.bf16.msra.mxu1 %v9393_v62  ;;  %v9489_v62 = vld [vmem:[%s11078_s3 + $0x3a4] ss:$8 sps:$4 sm:$0xff]  }
 0x1c7   : > { %7987 = vmatpush1.bf16.msra.mxu0 %v9396_v63  ;;  %7660 = vmatprep.subr.bf16.mxu1 %v9401_v2  ;;  %v9492_v63 = vld [vmem:[%s11078_s3 + $0xba4] ss:$8 sps:$4 sm:$0xff]   ;;  %v9487_v2 = vld [vmem:[%s11078_s3 + $0x3a0] ss:$8 sps:$4 sm:$0xff]  }
 0x1c8   : > { %7988 = vmatprep.subr.bf16.mxu0 %v9404_v3  ;;  %v9490_v3 = vld [vmem:[%s11078_s3 + $0xba0] ss:$8 sps:$4 sm:$0xff]  }
 0x1ca   : > { %7661 = vmatpush1.bf16.msra.mxu1 %v9399_v4  ;;  %v9495_v4 = vld [vmem:[%s11078_s3 + $0x3b4] ss:$8 sps:$4 sm:$0xff]  }
 0x1cb   : > { %7989 = vmatpush1.bf16.msra.mxu0 %v9402_v5  ;;  %7662 = vmatprep.subr.bf16.mxu1 %v9407_v6  ;;  %v9498_v5 = vld [vmem:[%s11078_s3 + $0xbb4] ss:$8 sps:$4 sm:$0xff]   ;;  %v9493_v6 = vld [vmem:[%s11078_s3 + $0x3b0] ss:$8 sps:$4 sm:$0xff]  }
 0x1cc   : > { %7990 = vmatprep.subr.bf16.mxu0 %v9410_v7  ;;  %v9496_v7 = vld [vmem:[%s11078_s3 + $0xbb0] ss:$8 sps:$4 sm:$0xff]  }
 0x1ce   : > { %7663 = vmatpush1.bf16.msra.mxu1 %v9405_v8  ;;  %v9501_v8 = vld [vmem:[%s11078_s3 + $0x3c4] ss:$8 sps:$4 sm:$0xff]  }
 0x1cf   : > { %7991 = vmatpush1.bf16.msra.mxu0 %v9408_v9  ;;  %7664 = vmatprep.subr.bf16.mxu1 %v9413_v10  ;;  %v9504_v9 = vld [vmem:[%s11078_s3 + $0xbc4] ss:$8 sps:$4 sm:$0xff]   ;;  %v9499_v10 = vld [vmem:[%s11078_s3 + $0x3c0] ss:$8 sps:$4 sm:$0xff]  }
 0x1d0   : > { %7992 = vmatprep.subr.bf16.mxu0 %v9416_v11  ;;  %v9502_v11 = vld [vmem:[%s11078_s3 + $0xbc0] ss:$8 sps:$4 sm:$0xff]  }
 0x1d2   : > { %7665 = vmatpush1.bf16.msra.mxu1 %v9411_v12  ;;  %v9507_v12 = vld [vmem:[%s11078_s3 + $0x3d4] ss:$8 sps:$4 sm:$0xff]  }
 0x1d3   : > { %7993 = vmatpush1.bf16.msra.mxu0 %v9414_v13  ;;  %7666 = vmatprep.subr.bf16.mxu1 %v9419_v0  ;;  %v9510_v13 = vld [vmem:[%s11078_s3 + $0xbd4] ss:$8 sps:$4 sm:$0xff]   ;;  %v9505_v0 = vld [vmem:[%s11078_s3 + $0x3d0] ss:$8 sps:$4 sm:$0xff]  }
 0x1d4   : > { %7994 = vmatprep.subr.bf16.mxu0 %v9422_v14  ;;  %v9508_v14 = vld [vmem:[%s11078_s3 + $0xbd0] ss:$8 sps:$4 sm:$0xff]  }
 0x1d6   : > { %7667 = vmatpush1.bf16.msra.mxu1 %v9417_v1  ;;  %v9513_v1 = vld [vmem:[%s11078_s3 + $0x3e4] ss:$8 sps:$4 sm:$0xff]  }
 0x1d7   : > { %7995 = vmatpush1.bf16.msra.mxu0 %v9420_v15  ;;  %7677 = vmatprep.subr.bf16.mxu1 %v9427_v16  ;;  %v9516_v15 = vld [vmem:[%s11078_s3 + $0xbe4] ss:$8 sps:$4 sm:$0xff]   ;;  %v9511_v16 = vld [vmem:[%s11078_s3 + $0x3e0] ss:$8 sps:$4 sm:$0xff]  }
 0x1d8   : > { %8005 = vmatprep.subr.bf16.mxu0 %v9432_v18  ;;  %v9514_v18 = vld [vmem:[%s11078_s3 + $0xbe0] ss:$8 sps:$4 sm:$0xff]  }
 0x1d9   : > { %7669 = vmatmul.mubr.bf16.vlgmr.msra.gmra.mrb[0].mxu1 %v8482_v21  ;;  %v9519_v21 = vld [vmem:[%s11078_s3 + $0x3f4] ss:$8 sps:$4 sm:$0xff]  }
 0x1da   : > { %7997 = vmatmul.mubr.bf16.vlgmr.msra.gmra.mrb[0].mxu0 %v8498_v22  ;;  %7678 = vmatpush1.bf16.msra.mxu1 %v9425_v24  ;;  %v9522_v22 = vld [vmem:[%s11078_s3 + $0xbf4] ss:$8 sps:$4 sm:$0xff]   ;;  %v9517_v24 = vld [vmem:[%s11078_s3 + $0x3f0] ss:$8 sps:$4 sm:$0xff]  }
 0x1db   : > { %8006 = vmatpush1.bf16.msra.mxu0 %v9430_v25  ;;  %7679 = vmatprep.subr.bf16.mxu1 %v9435_v26  ;;  %v9520_v25 = vld [vmem:[%s11078_s3 + $0xbf0] ss:$8 sps:$4 sm:$0xff]   ;;  %v9527_v26 = vld [vmem:[%s11078_s3 + $0x404] ss:$8 sps:$4 sm:$0xff]  }
 0x1dc   : > { %8007 = vmatprep.subr.bf16.mxu0 %v9438_v17  ;;  %7709 = vmatprep.mubr.bf16.mxu1 %v8485_v20  ;;  %v9532_v17 = vld [vmem:[%s11078_s3 + $0xc04] ss:$8 sps:$4 sm:$0xff]   ;;  %v9525_v20 = vld [vmem:[%s11078_s3 + $0x400] ss:$8 sps:$4 sm:$0xff]  }
 0x1dd   : > { %8037 = vmatprep.mubr.bf16.mxu0 %v8501_v27  ;;  %v9530_v27 = vld [vmem:[%s11078_s3 + $0xc00] ss:$8 sps:$4 sm:$0xff]  }
 0x1de   : > { %7680 = vmatpush1.bf16.msra.mxu1 %v9433_v28  ;;  %v8484_v28 = vcombine.low %v11313_v19, %v11313_v19  ;;  %v9535_v19 = vld [vmem:[%s11078_s3 + $0x414] ss:$8 sps:$4 sm:$0xff]  }
 0x1df   : > { %8008 = vmatpush1.bf16.msra.mxu0 %v9436_v29  ;;  %7681 = vmatprep.subr.bf16.mxu1 %v9441_v30  ;;  %v8500_v29 = vcombine.low %v11322_v23, %v11322_v23  ;;  %v11401_v30 = vld [vmem:[%s11761_s0 + $0x20] sm:$0xff] }
 0x1e0   : > { %8009 = vmatprep.subr.bf16.mxu0 %v9444_v31  ;;  %v11406_v31 = vld [vmem:[%s11761_s0 + $0x60] sm:$0xff]  ;;  %v8487_v23 = vcombine.high %v11401_v30, %v11401_v30 }
 0x1e2   : > { %7682 = vmatpush1.bf16.msra.mxu1 %v9439_v32  ;;  %v9538_v32 = vld [vmem:[%s11078_s3 + $0xc14] ss:$8 sps:$4 sm:$0xff]  }
 0x1e3   : > { %8010 = vmatpush1.bf16.msra.mxu0 %v9442_v33  ;;  %7683 = vmatprep.subr.bf16.mxu1 %v9447_v34  ;;  %v8503_v33 = vcombine.high %v11406_v31, %v11406_v31  ;;  %v9533_v34 = vld [vmem:[%s11078_s3 + $0x410] ss:$8 sps:$4 sm:$0xff]  }
 0x1e4   : > { %8011 = vmatprep.subr.bf16.mxu0 %v9450_v35  ;;  %v9536_v35 = vld [vmem:[%s11078_s3 + $0xc10] ss:$8 sps:$4 sm:$0xff]  }
 0x1e6   : > { %7684 = vmatpush1.bf16.msra.mxu1 %v9445_v36  ;;  %v9541_v36 = vld [vmem:[%s11078_s3 + $0x424] ss:$8 sps:$4 sm:$0xff]  }
 0x1e7   : > { %8012 = vmatpush1.bf16.msra.mxu0 %v9448_v37  ;;  %7685 = vmatprep.subr.bf16.mxu1 %v9453_v38  ;;  %v9544_v37 = vld [vmem:[%s11078_s3 + $0xc24] ss:$8 sps:$4 sm:$0xff]   ;;  %v9539_v38 = vld [vmem:[%s11078_s3 + $0x420] ss:$8 sps:$4 sm:$0xff]  }
 0x1e8   : > { %8013 = vmatprep.subr.bf16.mxu0 %v9456_v39  ;;  %v9542_v39 = vld [vmem:[%s11078_s3 + $0xc20] ss:$8 sps:$4 sm:$0xff]  }
 0x1ea   : > { %7686 = vmatpush1.bf16.msra.mxu1 %v9451_v40  ;;  %v9547_v40 = vld [vmem:[%s11078_s3 + $0x434] ss:$8 sps:$4 sm:$0xff]  }
 0x1eb   : > { %8014 = vmatpush1.bf16.msra.mxu0 %v9454_v41  ;;  %7687 = vmatprep.subr.bf16.mxu1 %v9459_v42  ;;  %v9550_v41 = vld [vmem:[%s11078_s3 + $0xc34] ss:$8 sps:$4 sm:$0xff]   ;;  %v9545_v42 = vld [vmem:[%s11078_s3 + $0x430] ss:$8 sps:$4 sm:$0xff]  }
 0x1ec   : > { %8015 = vmatprep.subr.bf16.mxu0 %v9462_v43  ;;  %v9548_v43 = vld [vmem:[%s11078_s3 + $0xc30] ss:$8 sps:$4 sm:$0xff]  }
 0x1ee   : > { %7688 = vmatpush1.bf16.msra.mxu1 %v9457_v44  ;;  %v9553_v44 = vld [vmem:[%s11078_s3 + $0x444] ss:$8 sps:$4 sm:$0xff]  }
 0x1ef   : > { %8016 = vmatpush1.bf16.msra.mxu0 %v9460_v45  ;;  %7689 = vmatprep.subr.bf16.mxu1 %v9465_v46  ;;  %v9556_v45 = vld [vmem:[%s11078_s3 + $0xc44] ss:$8 sps:$4 sm:$0xff]   ;;  %v9551_v46 = vld [vmem:[%s11078_s3 + $0x440] ss:$8 sps:$4 sm:$0xff]  }
 0x1f0   : > { %8017 = vmatprep.subr.bf16.mxu0 %v9468_v47  ;;  %v9554_v47 = vld [vmem:[%s11078_s3 + $0xc40] ss:$8 sps:$4 sm:$0xff]  }
 0x1f2   : > { %7690 = vmatpush1.bf16.msra.mxu1 %v9463_v48  ;;  %v9559_v48 = vld [vmem:[%s11078_s3 + $0x454] ss:$8 sps:$4 sm:$0xff]  }
 0x1f3   : > { %8018 = vmatpush1.bf16.msra.mxu0 %v9466_v49  ;;  %7691 = vmatprep.subr.bf16.mxu1 %v9471_v50  ;;  %v9562_v49 = vld [vmem:[%s11078_s3 + $0xc54] ss:$8 sps:$4 sm:$0xff]   ;;  %v9557_v50 = vld [vmem:[%s11078_s3 + $0x450] ss:$8 sps:$4 sm:$0xff]  }
 0x1f4   : > { %8019 = vmatprep.subr.bf16.mxu0 %v9474_v51  ;;  %v9560_v51 = vld [vmem:[%s11078_s3 + $0xc50] ss:$8 sps:$4 sm:$0xff]  }
 0x1f6   : > { %7692 = vmatpush1.bf16.msra.mxu1 %v9469_v52  ;;  %v9565_v52 = vld [vmem:[%s11078_s3 + $0x464] ss:$8 sps:$4 sm:$0xff]  }
 0x1f7   : > { %8020 = vmatpush1.bf16.msra.mxu0 %v9472_v53  ;;  %7693 = vmatprep.subr.bf16.mxu1 %v9477_v54  ;;  %v9568_v53 = vld [vmem:[%s11078_s3 + $0xc64] ss:$8 sps:$4 sm:$0xff]   ;;  %v9563_v54 = vld [vmem:[%s11078_s3 + $0x460] ss:$8 sps:$4 sm:$0xff]  }
 0x1f8   : > { %8021 = vmatprep.subr.bf16.mxu0 %v9480_v55  ;;  %v9566_v55 = vld [vmem:[%s11078_s3 + $0xc60] ss:$8 sps:$4 sm:$0xff]  }
 0x1fa   : > { %7694 = vmatpush1.bf16.msra.mxu1 %v9475_v56  ;;  %v9571_v56 = vld [vmem:[%s11078_s3 + $0x474] ss:$8 sps:$4 sm:$0xff]  }
 0x1fb   : > { %8022 = vmatpush1.bf16.msra.mxu0 %v9478_v57  ;;  %7695 = vmatprep.subr.bf16.mxu1 %v9483_v58  ;;  %v9574_v57 = vld [vmem:[%s11078_s3 + $0xc74] ss:$8 sps:$4 sm:$0xff]   ;;  %v9569_v58 = vld [vmem:[%s11078_s3 + $0x470] ss:$8 sps:$4 sm:$0xff]  }
 0x1fc   : > { %8023 = vmatprep.subr.bf16.mxu0 %v9486_v59  ;;  %v9572_v59 = vld [vmem:[%s11078_s3 + $0xc70] ss:$8 sps:$4 sm:$0xff]  }
 0x1fe   : > { %7696 = vmatpush1.bf16.msra.mxu1 %v9481_v60  ;;  %v9577_v60 = vld [vmem:[%s11078_s3 + $0x484] ss:$8 sps:$4 sm:$0xff]  }
 0x1ff   : > { %8024 = vmatpush1.bf16.msra.mxu0 %v9484_v61  ;;  %7697 = vmatprep.subr.bf16.mxu1 %v9489_v62  ;;  %v9580_v61 = vld [vmem:[%s11078_s3 + $0xc84] ss:$8 sps:$4 sm:$0xff]   ;;  %v9575_v62 = vld [vmem:[%s11078_s3 + $0x480] ss:$8 sps:$4 sm:$0xff]  }
 0x200   : > { %8025 = vmatprep.subr.bf16.mxu0 %v9492_v63  ;;  %v9578_v63 = vld [vmem:[%s11078_s3 + $0xc80] ss:$8 sps:$4 sm:$0xff]  }
 0x202   : > { %7698 = vmatpush1.bf16.msra.mxu1 %v9487_v2  ;;  %v9583_v2 = vld [vmem:[%s11078_s3 + $0x494] ss:$8 sps:$4 sm:$0xff]  }
 0x203   : > { %8026 = vmatpush1.bf16.msra.mxu0 %v9490_v3  ;;  %7699 = vmatprep.subr.bf16.mxu1 %v9495_v4  ;;  %v9586_v3 = vld [vmem:[%s11078_s3 + $0xc94] ss:$8 sps:$4 sm:$0xff]   ;;  %v9581_v4 = vld [vmem:[%s11078_s3 + $0x490] ss:$8 sps:$4 sm:$0xff]  }
 0x204   : > { %8027 = vmatprep.subr.bf16.mxu0 %v9498_v5  ;;  %v9584_v5 = vld [vmem:[%s11078_s3 + $0xc90] ss:$8 sps:$4 sm:$0xff]  }
 0x206   : > { %7700 = vmatpush1.bf16.msra.mxu1 %v9493_v6  ;;  %v9589_v6 = vld [vmem:[%s11078_s3 + $0x4a4] ss:$8 sps:$4 sm:$0xff]  }
 0x207   : > { %8028 = vmatpush1.bf16.msra.mxu0 %v9496_v7  ;;  %7701 = vmatprep.subr.bf16.mxu1 %v9501_v8  ;;  %v9592_v7 = vld [vmem:[%s11078_s3 + $0xca4] ss:$8 sps:$4 sm:$0xff]   ;;  %v9587_v8 = vld [vmem:[%s11078_s3 + $0x4a0] ss:$8 sps:$4 sm:$0xff]  }
 0x208   : > { %8029 = vmatprep.subr.bf16.mxu0 %v9504_v9  ;;  %v9590_v9 = vld [vmem:[%s11078_s3 + $0xca0] ss:$8 sps:$4 sm:$0xff]  }
 0x20a   : > { %7702 = vmatpush1.bf16.msra.mxu1 %v9499_v10  ;;  %v9595_v10 = vld [vmem:[%s11078_s3 + $0x4b4] ss:$8 sps:$4 sm:$0xff]  }
 0x20b   : > { %8030 = vmatpush1.bf16.msra.mxu0 %v9502_v11  ;;  %7703 = vmatprep.subr.bf16.mxu1 %v9507_v12  ;;  %v9598_v11 = vld [vmem:[%s11078_s3 + $0xcb4] ss:$8 sps:$4 sm:$0xff]   ;;  %v9593_v12 = vld [vmem:[%s11078_s3 + $0x4b0] ss:$8 sps:$4 sm:$0xff]  }
 0x20c   : > { %8031 = vmatprep.subr.bf16.mxu0 %v9510_v13  ;;  %v9596_v13 = vld [vmem:[%s11078_s3 + $0xcb0] ss:$8 sps:$4 sm:$0xff]  }
 0x20e   : > { %7704 = vmatpush1.bf16.msra.mxu1 %v9505_v0  ;;  %v9601_v0 = vld [vmem:[%s11078_s3 + $0x4c4] ss:$8 sps:$4 sm:$0xff]  }
 0x20f   : > { %8032 = vmatpush1.bf16.msra.mxu0 %v9508_v14  ;;  %7705 = vmatprep.subr.bf16.mxu1 %v9513_v1  ;;  %v9604_v14 = vld [vmem:[%s11078_s3 + $0xcc4] ss:$8 sps:$4 sm:$0xff]   ;;  %v9599_v1 = vld [vmem:[%s11078_s3 + $0x4c0] ss:$8 sps:$4 sm:$0xff]  }
 0x210   : > { %8033 = vmatprep.subr.bf16.mxu0 %v9516_v15  ;;  %v9602_v15 = vld [vmem:[%s11078_s3 + $0xcc0] ss:$8 sps:$4 sm:$0xff]  }
 0x212   : > { %7706 = vmatpush1.bf16.msra.mxu1 %v9511_v16  ;;  %v9607_v16 = vld [vmem:[%s11078_s3 + $0x4d4] ss:$8 sps:$4 sm:$0xff]  }
 0x213   : > { %8034 = vmatpush1.bf16.msra.mxu0 %v9514_v18  ;;  %7707 = vmatprep.subr.bf16.mxu1 %v9519_v21  ;;  %v9610_v18 = vld [vmem:[%s11078_s3 + $0xcd4] ss:$8 sps:$4 sm:$0xff]   ;;  %v9605_v21 = vld [vmem:[%s11078_s3 + $0x4d0] ss:$8 sps:$4 sm:$0xff]  }
 0x214   : > { %8035 = vmatprep.subr.bf16.mxu0 %v9522_v22  ;;  %v9608_v22 = vld [vmem:[%s11078_s3 + $0xcd0] ss:$8 sps:$4 sm:$0xff]  }
 0x216   : > { %7708 = vmatpush1.bf16.msra.mxu1 %v9517_v24  ;;  %v9613_v24 = vld [vmem:[%s11078_s3 + $0x4e4] ss:$8 sps:$4 sm:$0xff]  }
 0x217   : > { %8036 = vmatpush1.bf16.msra.mxu0 %v9520_v25  ;;  %7718 = vmatprep.subr.bf16.mxu1 %v9527_v26  ;;  %v9616_v25 = vld [vmem:[%s11078_s3 + $0xce4] ss:$8 sps:$4 sm:$0xff]   ;;  %v9611_v26 = vld [vmem:[%s11078_s3 + $0x4e0] ss:$8 sps:$4 sm:$0xff]  }
 0x218   : > { %8046 = vmatprep.subr.bf16.mxu0 %v9532_v17  ;;  %v9614_v17 = vld [vmem:[%s11078_s3 + $0xce0] ss:$8 sps:$4 sm:$0xff]  }
 0x219   : > { %7710 = vmatmul.mubr.bf16.vlgmr.msra.gmra.mrb[0].mxu1 %v8484_v28  ;;  %v9617_v28 = vld [vmem:[%s11078_s3 + $0x4f0] ss:$8 sps:$4 sm:$0xff]  }
 0x21a   : > { %8038 = vmatmul.mubr.bf16.vlgmr.msra.gmra.mrb[0].mxu0 %v8500_v29  ;;  %7719 = vmatpush1.bf16.msra.mxu1 %v9525_v20  ;;  %v9619_v20 = vld [vmem:[%s11078_s3 + $0x4f4] ss:$8 sps:$4 sm:$0xff]   ;;  %v9620_v29 = vld [vmem:[%s11078_s3 + $0xcf0] ss:$8 sps:$4 sm:$0xff]  }
 0x21b   : > { %8047 = vmatpush1.bf16.msra.mxu0 %v9530_v27  ;;  %7720 = vmatprep.subr.bf16.mxu1 %v9535_v19  ;;  %v9622_v27 = vld [vmem:[%s11078_s3 + $0xcf4] ss:$8 sps:$4 sm:$0xff]   ;;  %v9627_v19 = vld [vmem:[%s11078_s3 + $0x504] ss:$8 sps:$4 sm:$0xff]  }
 0x21c   : > { %8048 = vmatprep.subr.bf16.mxu0 %v9538_v32  ;;  %7750 = vmatprep.mubr.bf16.mxu1 %v8487_v23  ;;  %v9632_v32 = vld [vmem:[%s11078_s3 + $0xd04] ss:$8 sps:$4 sm:$0xff]  }
 0x21d   : > { %8078 = vmatprep.mubr.bf16.mxu0 %v8503_v33  ;;  %v11477_v23 = vld [vmem:[%s11761_s0 + $0x28] sm:$0xff] }
 0x21e   : > { %7721 = vmatpush1.bf16.msra.mxu1 %v9533_v34  ;;  %v11482_v33 = vld [vmem:[%s11761_s0 + $0x68] sm:$0xff]  ;;  %v8486_v34 = vcombine.low %v11401_v30, %v11401_v30 }
 0x21f   : > { %8049 = vmatpush1.bf16.msra.mxu0 %v9536_v35  ;;  %7722 = vmatprep.subr.bf16.mxu1 %v9541_v36  ;;  %v8502_v35 = vcombine.low %v11406_v31, %v11406_v31  ;;  %v9625_v36 = vld [vmem:[%s11078_s3 + $0x500] ss:$8 sps:$4 sm:$0xff]   ;;  %v8505_v30 = vcombine.high %v11482_v33, %v11482_v33  ;;  %v9633_v31 = vld [vmem:[%s11078_s3 + $0x510] ss:$8 sps:$4 sm:$0xff]  }
 0x220   : > { %8050 = vmatprep.subr.bf16.mxu0 %v9544_v37  ;;  %v9630_v37 = vld [vmem:[%s11078_s3 + $0xd00] ss:$8 sps:$4 sm:$0xff]  }
 0x222   : > { %7723 = vmatpush1.bf16.msra.mxu1 %v9539_v38  ;;  %v9635_v38 = vld [vmem:[%s11078_s3 + $0x514] ss:$8 sps:$4 sm:$0xff]  }
 0x223   : > { %8051 = vmatpush1.bf16.msra.mxu0 %v9542_v39  ;;  %7724 = vmatprep.subr.bf16.mxu1 %v9547_v40  ;;  %v9638_v39 = vld [vmem:[%s11078_s3 + $0xd14] ss:$8 sps:$4 sm:$0xff]   ;;  %v8489_v40 = vcombine.high %v11477_v23, %v11477_v23 }
 0x224   : > { %8052 = vmatprep.subr.bf16.mxu0 %v9550_v41  ;;  %v9636_v41 = vld [vmem:[%s11078_s3 + $0xd10] ss:$8 sps:$4 sm:$0xff]  }
 0x226   : > { %7725 = vmatpush1.bf16.msra.mxu1 %v9545_v42  ;;  %v9641_v42 = vld [vmem:[%s11078_s3 + $0x524] ss:$8 sps:$4 sm:$0xff]  }
 0x227   : > { %8053 = vmatpush1.bf16.msra.mxu0 %v9548_v43  ;;  %7726 = vmatprep.subr.bf16.mxu1 %v9553_v44  ;;  %v9644_v43 = vld [vmem:[%s11078_s3 + $0xd24] ss:$8 sps:$4 sm:$0xff]   ;;  %v9639_v44 = vld [vmem:[%s11078_s3 + $0x520] ss:$8 sps:$4 sm:$0xff]  }
 0x228   : > { %8054 = vmatprep.subr.bf16.mxu0 %v9556_v45  ;;  %v9642_v45 = vld [vmem:[%s11078_s3 + $0xd20] ss:$8 sps:$4 sm:$0xff]  }
 0x22a   : > { %7727 = vmatpush1.bf16.msra.mxu1 %v9551_v46  ;;  %v9647_v46 = vld [vmem:[%s11078_s3 + $0x534] ss:$8 sps:$4 sm:$0xff]  }
 0x22b   : > { %8055 = vmatpush1.bf16.msra.mxu0 %v9554_v47  ;;  %7728 = vmatprep.subr.bf16.mxu1 %v9559_v48  ;;  %v9650_v47 = vld [vmem:[%s11078_s3 + $0xd34] ss:$8 sps:$4 sm:$0xff]   ;;  %v9645_v48 = vld [vmem:[%s11078_s3 + $0x530] ss:$8 sps:$4 sm:$0xff]  }
 0x22c   : > { %8056 = vmatprep.subr.bf16.mxu0 %v9562_v49  ;;  %v9648_v49 = vld [vmem:[%s11078_s3 + $0xd30] ss:$8 sps:$4 sm:$0xff]  }
 0x22e   : > { %7729 = vmatpush1.bf16.msra.mxu1 %v9557_v50  ;;  %v9653_v50 = vld [vmem:[%s11078_s3 + $0x544] ss:$8 sps:$4 sm:$0xff]  }
 0x22f   : > { %8057 = vmatpush1.bf16.msra.mxu0 %v9560_v51  ;;  %7730 = vmatprep.subr.bf16.mxu1 %v9565_v52  ;;  %v9656_v51 = vld [vmem:[%s11078_s3 + $0xd44] ss:$8 sps:$4 sm:$0xff]   ;;  %v9651_v52 = vld [vmem:[%s11078_s3 + $0x540] ss:$8 sps:$4 sm:$0xff]  }
 0x230   : > { %8058 = vmatprep.subr.bf16.mxu0 %v9568_v53  ;;  %v9654_v53 = vld [vmem:[%s11078_s3 + $0xd40] ss:$8 sps:$4 sm:$0xff]  }
 0x232   : > { %7731 = vmatpush1.bf16.msra.mxu1 %v9563_v54  ;;  %v9659_v54 = vld [vmem:[%s11078_s3 + $0x554] ss:$8 sps:$4 sm:$0xff]  }
 0x233   : > { %8059 = vmatpush1.bf16.msra.mxu0 %v9566_v55  ;;  %7732 = vmatprep.subr.bf16.mxu1 %v9571_v56  ;;  %v9662_v55 = vld [vmem:[%s11078_s3 + $0xd54] ss:$8 sps:$4 sm:$0xff]   ;;  %v9657_v56 = vld [vmem:[%s11078_s3 + $0x550] ss:$8 sps:$4 sm:$0xff]  }
 0x234   : > { %8060 = vmatprep.subr.bf16.mxu0 %v9574_v57  ;;  %v9660_v57 = vld [vmem:[%s11078_s3 + $0xd50] ss:$8 sps:$4 sm:$0xff]  }
 0x236   : > { %7733 = vmatpush1.bf16.msra.mxu1 %v9569_v58  ;;  %v9665_v58 = vld [vmem:[%s11078_s3 + $0x564] ss:$8 sps:$4 sm:$0xff]  }
 0x237   : > { %8061 = vmatpush1.bf16.msra.mxu0 %v9572_v59  ;;  %7734 = vmatprep.subr.bf16.mxu1 %v9577_v60  ;;  %v9668_v59 = vld [vmem:[%s11078_s3 + $0xd64] ss:$8 sps:$4 sm:$0xff]   ;;  %v9663_v60 = vld [vmem:[%s11078_s3 + $0x560] ss:$8 sps:$4 sm:$0xff]  }
 0x238   : > { %8062 = vmatprep.subr.bf16.mxu0 %v9580_v61  ;;  %v9666_v61 = vld [vmem:[%s11078_s3 + $0xd60] ss:$8 sps:$4 sm:$0xff]  }
 0x23a   : > { %7735 = vmatpush1.bf16.msra.mxu1 %v9575_v62  ;;  %v9671_v62 = vld [vmem:[%s11078_s3 + $0x574] ss:$8 sps:$4 sm:$0xff]  }
 0x23b   : > { %8063 = vmatpush1.bf16.msra.mxu0 %v9578_v63  ;;  %7736 = vmatprep.subr.bf16.mxu1 %v9583_v2  ;;  %v9674_v63 = vld [vmem:[%s11078_s3 + $0xd74] ss:$8 sps:$4 sm:$0xff]   ;;  %v9669_v2 = vld [vmem:[%s11078_s3 + $0x570] ss:$8 sps:$4 sm:$0xff]  }
 0x23c   : > { %8064 = vmatprep.subr.bf16.mxu0 %v9586_v3  ;;  %v9672_v3 = vld [vmem:[%s11078_s3 + $0xd70] ss:$8 sps:$4 sm:$0xff]  }
 0x23e   : > { %7737 = vmatpush1.bf16.msra.mxu1 %v9581_v4  ;;  %v9677_v4 = vld [vmem:[%s11078_s3 + $0x584] ss:$8 sps:$4 sm:$0xff]  }
 0x23f   : > { %8065 = vmatpush1.bf16.msra.mxu0 %v9584_v5  ;;  %7738 = vmatprep.subr.bf16.mxu1 %v9589_v6  ;;  %v9680_v5 = vld [vmem:[%s11078_s3 + $0xd84] ss:$8 sps:$4 sm:$0xff]   ;;  %v9675_v6 = vld [vmem:[%s11078_s3 + $0x580] ss:$8 sps:$4 sm:$0xff]  }
 0x240   : > { %8066 = vmatprep.subr.bf16.mxu0 %v9592_v7  ;;  %v9678_v7 = vld [vmem:[%s11078_s3 + $0xd80] ss:$8 sps:$4 sm:$0xff]  }
 0x242   : > { %7739 = vmatpush1.bf16.msra.mxu1 %v9587_v8  ;;  %v9683_v8 = vld [vmem:[%s11078_s3 + $0x594] ss:$8 sps:$4 sm:$0xff]  }
 0x243   : > { %8067 = vmatpush1.bf16.msra.mxu0 %v9590_v9  ;;  %7740 = vmatprep.subr.bf16.mxu1 %v9595_v10  ;;  %v9686_v9 = vld [vmem:[%s11078_s3 + $0xd94] ss:$8 sps:$4 sm:$0xff]   ;;  %v9681_v10 = vld [vmem:[%s11078_s3 + $0x590] ss:$8 sps:$4 sm:$0xff]  }
 0x244   : > { %8068 = vmatprep.subr.bf16.mxu0 %v9598_v11  ;;  %v9684_v11 = vld [vmem:[%s11078_s3 + $0xd90] ss:$8 sps:$4 sm:$0xff]  }
 0x246   : > { %7741 = vmatpush1.bf16.msra.mxu1 %v9593_v12  ;;  %v9689_v12 = vld [vmem:[%s11078_s3 + $0x5a4] ss:$8 sps:$4 sm:$0xff]  }
 0x247   : > { %8069 = vmatpush1.bf16.msra.mxu0 %v9596_v13  ;;  %7742 = vmatprep.subr.bf16.mxu1 %v9601_v0  ;;  %v9692_v13 = vld [vmem:[%s11078_s3 + $0xda4] ss:$8 sps:$4 sm:$0xff]   ;;  %v9687_v0 = vld [vmem:[%s11078_s3 + $0x5a0] ss:$8 sps:$4 sm:$0xff]  }
 0x248   : > { %8070 = vmatprep.subr.bf16.mxu0 %v9604_v14  ;;  %v9690_v14 = vld [vmem:[%s11078_s3 + $0xda0] ss:$8 sps:$4 sm:$0xff]  }
 0x24a   : > { %7743 = vmatpush1.bf16.msra.mxu1 %v9599_v1  ;;  %v9695_v1 = vld [vmem:[%s11078_s3 + $0x5b4] ss:$8 sps:$4 sm:$0xff]  }
 0x24b   : > { %8071 = vmatpush1.bf16.msra.mxu0 %v9602_v15  ;;  %7744 = vmatprep.subr.bf16.mxu1 %v9607_v16  ;;  %v9698_v15 = vld [vmem:[%s11078_s3 + $0xdb4] ss:$8 sps:$4 sm:$0xff]   ;;  %v9693_v16 = vld [vmem:[%s11078_s3 + $0x5b0] ss:$8 sps:$4 sm:$0xff]  }
 0x24c   : > { %8072 = vmatprep.subr.bf16.mxu0 %v9610_v18  ;;  %v9696_v18 = vld [vmem:[%s11078_s3 + $0xdb0] ss:$8 sps:$4 sm:$0xff]  }
 0x24e   : > { %7745 = vmatpush1.bf16.msra.mxu1 %v9605_v21  ;;  %v9701_v21 = vld [vmem:[%s11078_s3 + $0x5c4] ss:$8 sps:$4 sm:$0xff]  }
 0x24f   : > { %8073 = vmatpush1.bf16.msra.mxu0 %v9608_v22  ;;  %7746 = vmatprep.subr.bf16.mxu1 %v9613_v24  ;;  %v9704_v22 = vld [vmem:[%s11078_s3 + $0xdc4] ss:$8 sps:$4 sm:$0xff]   ;;  %v9699_v24 = vld [vmem:[%s11078_s3 + $0x5c0] ss:$8 sps:$4 sm:$0xff]  }
 0x250   : > { %8074 = vmatprep.subr.bf16.mxu0 %v9616_v25  ;;  %v9702_v25 = vld [vmem:[%s11078_s3 + $0xdc0] ss:$8 sps:$4 sm:$0xff]  }
 0x252   : > { %7747 = vmatpush1.bf16.msra.mxu1 %v9611_v26  ;;  %v9707_v26 = vld [vmem:[%s11078_s3 + $0x5d4] ss:$8 sps:$4 sm:$0xff]  }
 0x253   : > { %8075 = vmatpush1.bf16.msra.mxu0 %v9614_v17  ;;  %7748 = vmatprep.subr.bf16.mxu1 %v9619_v20  ;;  %v9710_v17 = vld [vmem:[%s11078_s3 + $0xdd4] ss:$8 sps:$4 sm:$0xff]   ;;  %v9705_v20 = vld [vmem:[%s11078_s3 + $0x5d0] ss:$8 sps:$4 sm:$0xff]  }
 0x254   : > { %8076 = vmatprep.subr.bf16.mxu0 %v9622_v27  ;;  %v9708_v27 = vld [vmem:[%s11078_s3 + $0xdd0] ss:$8 sps:$4 sm:$0xff]  }
 0x256   : > { %7749 = vmatpush1.bf16.msra.mxu1 %v9617_v28  ;;  %v9713_v28 = vld [vmem:[%s11078_s3 + $0x5e4] ss:$8 sps:$4 sm:$0xff]  }
 0x257   : > { %8077 = vmatpush1.bf16.msra.mxu0 %v9620_v29  ;;  %7759 = vmatprep.subr.bf16.mxu1 %v9627_v19  ;;  %v9716_v29 = vld [vmem:[%s11078_s3 + $0xde4] ss:$8 sps:$4 sm:$0xff]   ;;  %v9711_v19 = vld [vmem:[%s11078_s3 + $0x5e0] ss:$8 sps:$4 sm:$0xff]  }
 0x258   : > { %8087 = vmatprep.subr.bf16.mxu0 %v9632_v32  ;;  %v9714_v32 = vld [vmem:[%s11078_s3 + $0xde0] ss:$8 sps:$4 sm:$0xff]  }
 0x259   : > { %7751 = vmatmul.mubr.bf16.vlgmr.msra.gmra.mrb[0].mxu1 %v8486_v34  ;;  %v9719_v34 = vld [vmem:[%s11078_s3 + $0x5f4] ss:$8 sps:$4 sm:$0xff]  }
 0x25a   : > { %8079 = vmatmul.mubr.bf16.vlgmr.msra.gmra.mrb[0].mxu0 %v8502_v35  ;;  %7760 = vmatpush1.bf16.msra.mxu1 %v9625_v36  ;;  %v9722_v35 = vld [vmem:[%s11078_s3 + $0xdf4] ss:$8 sps:$4 sm:$0xff]   ;;  %v9717_v36 = vld [vmem:[%s11078_s3 + $0x5f0] ss:$8 sps:$4 sm:$0xff]  }
 0x25b   : > { %8088 = vmatpush1.bf16.msra.mxu0 %v9630_v37  ;;  %7761 = vmatprep.subr.bf16.mxu1 %v9635_v38  ;;  %v9720_v37 = vld [vmem:[%s11078_s3 + $0xdf0] ss:$8 sps:$4 sm:$0xff]   ;;  %v9727_v38 = vld [vmem:[%s11078_s3 + $0x604] ss:$8 sps:$4 sm:$0xff]  }
 0x25c   : > { %8089 = vmatprep.subr.bf16.mxu0 %v9638_v39  ;;  %7791 = vmatprep.mubr.bf16.mxu1 %v8489_v40  ;;  %v9732_v39 = vld [vmem:[%s11078_s3 + $0xe04] ss:$8 sps:$4 sm:$0xff]   ;;  %v8488_v40 = vcombine.low %v11477_v23, %v11477_v23  ;;  %v9730_v23 = vld [vmem:[%s11078_s3 + $0xe00] ss:$8 sps:$4 sm:$0xff]  }
 0x25d   : > { %8119 = vmatprep.mubr.bf16.mxu0 %v8505_v30  ;;  %v8504_v30 = vcombine.low %v11482_v33, %v11482_v33  ;;  %v9735_v33 = vld [vmem:[%s11078_s3 + $0x614] ss:$8 sps:$4 sm:$0xff]  }
 0x25e   : > { %7762 = vmatpush1.bf16.msra.mxu1 %v9633_v31  ;;  %v11563_v31 = vld [vmem:[%s11761_s0 + $0x30] sm:$0xff] }
 0x25f   : > { %8090 = vmatpush1.bf16.msra.mxu0 %v9636_v41  ;;  %7763 = vmatprep.subr.bf16.mxu1 %v9641_v42  ;;  %v11568_v41 = vld [vmem:[%s11761_s0 + $0x70] sm:$0xff]  ;;  %v9725_v42 = vld [vmem:[%s11078_s3 + $0x600] ss:$8 sps:$4 sm:$0xff]  }
 0x260   : > { %8091 = vmatprep.subr.bf16.mxu0 %v9644_v43  ;;  %v9738_v43 = vld [vmem:[%s11078_s3 + $0xe14] ss:$8 sps:$4 sm:$0xff]  }
 0x262   : > { %7764 = vmatpush1.bf16.msra.mxu1 %v9639_v44  ;;  %v8491_v44 = vcombine.high %v11563_v31, %v11563_v31 }
 0x263   : > { %8092 = vmatpush1.bf16.msra.mxu0 %v9642_v45  ;;  %7765 = vmatprep.subr.bf16.mxu1 %v9647_v46  ;;  %v8507_v45 = vcombine.high %v11568_v41, %v11568_v41  ;;  %v9733_v46 = vld [vmem:[%s11078_s3 + $0x610] ss:$8 sps:$4 sm:$0xff]  }
 0x264   : > { %8093 = vmatprep.subr.bf16.mxu0 %v9650_v47  ;;  %v9736_v47 = vld [vmem:[%s11078_s3 + $0xe10] ss:$8 sps:$4 sm:$0xff]  }
 0x266   : > { %7766 = vmatpush1.bf16.msra.mxu1 %v9645_v48  ;;  %v9741_v48 = vld [vmem:[%s11078_s3 + $0x624] ss:$8 sps:$4 sm:$0xff]  }
 0x267   : > { %8094 = vmatpush1.bf16.msra.mxu0 %v9648_v49  ;;  %7767 = vmatprep.subr.bf16.mxu1 %v9653_v50  ;;  %v9744_v49 = vld [vmem:[%s11078_s3 + $0xe24] ss:$8 sps:$4 sm:$0xff]   ;;  %v9739_v50 = vld [vmem:[%s11078_s3 + $0x620] ss:$8 sps:$4 sm:$0xff]  }
 0x268   : > { %8095 = vmatprep.subr.bf16.mxu0 %v9656_v51  ;;  %v9742_v51 = vld [vmem:[%s11078_s3 + $0xe20] ss:$8 sps:$4 sm:$0xff]  }
 0x26a   : > { %7768 = vmatpush1.bf16.msra.mxu1 %v9651_v52  ;;  %v9747_v52 = vld [vmem:[%s11078_s3 + $0x634] ss:$8 sps:$4 sm:$0xff]  }
 0x26b   : > { %8096 = vmatpush1.bf16.msra.mxu0 %v9654_v53  ;;  %7769 = vmatprep.subr.bf16.mxu1 %v9659_v54  ;;  %v9750_v53 = vld [vmem:[%s11078_s3 + $0xe34] ss:$8 sps:$4 sm:$0xff]   ;;  %v9745_v54 = vld [vmem:[%s11078_s3 + $0x630] ss:$8 sps:$4 sm:$0xff]  }
 0x26c   : > { %8097 = vmatprep.subr.bf16.mxu0 %v9662_v55  ;;  %v9748_v55 = vld [vmem:[%s11078_s3 + $0xe30] ss:$8 sps:$4 sm:$0xff]  }
 0x26e   : > { %7770 = vmatpush1.bf16.msra.mxu1 %v9657_v56  ;;  %v9753_v56 = vld [vmem:[%s11078_s3 + $0x644] ss:$8 sps:$4 sm:$0xff]  }
 0x26f   : > { %8098 = vmatpush1.bf16.msra.mxu0 %v9660_v57  ;;  %7771 = vmatprep.subr.bf16.mxu1 %v9665_v58  ;;  %v9756_v57 = vld [vmem:[%s11078_s3 + $0xe44] ss:$8 sps:$4 sm:$0xff]   ;;  %v9751_v58 = vld [vmem:[%s11078_s3 + $0x640] ss:$8 sps:$4 sm:$0xff]  }
 0x270   : > { %8099 = vmatprep.subr.bf16.mxu0 %v9668_v59  ;;  %v9754_v59 = vld [vmem:[%s11078_s3 + $0xe40] ss:$8 sps:$4 sm:$0xff]  }
 0x272   : > { %7772 = vmatpush1.bf16.msra.mxu1 %v9663_v60  ;;  %v9759_v60 = vld [vmem:[%s11078_s3 + $0x654] ss:$8 sps:$4 sm:$0xff]  }
 0x273   : > { %8100 = vmatpush1.bf16.msra.mxu0 %v9666_v61  ;;  %7773 = vmatprep.subr.bf16.mxu1 %v9671_v62  ;;  %v9762_v61 = vld [vmem:[%s11078_s3 + $0xe54] ss:$8 sps:$4 sm:$0xff]   ;;  %v9757_v62 = vld [vmem:[%s11078_s3 + $0x650] ss:$8 sps:$4 sm:$0xff]  }
 0x274   : > { %8101 = vmatprep.subr.bf16.mxu0 %v9674_v63  ;;  %v9760_v63 = vld [vmem:[%s11078_s3 + $0xe50] ss:$8 sps:$4 sm:$0xff]  }
 0x276   : > { %7774 = vmatpush1.bf16.msra.mxu1 %v9669_v2  ;;  %v9765_v2 = vld [vmem:[%s11078_s3 + $0x664] ss:$8 sps:$4 sm:$0xff]  }
 0x277   : > { %8102 = vmatpush1.bf16.msra.mxu0 %v9672_v3  ;;  %7775 = vmatprep.subr.bf16.mxu1 %v9677_v4  ;;  %v9768_v3 = vld [vmem:[%s11078_s3 + $0xe64] ss:$8 sps:$4 sm:$0xff]   ;;  %v9763_v4 = vld [vmem:[%s11078_s3 + $0x660] ss:$8 sps:$4 sm:$0xff]  }
 0x278   : > { %8103 = vmatprep.subr.bf16.mxu0 %v9680_v5  ;;  %v9766_v5 = vld [vmem:[%s11078_s3 + $0xe60] ss:$8 sps:$4 sm:$0xff]  }
 0x27a   : > { %7776 = vmatpush1.bf16.msra.mxu1 %v9675_v6  ;;  %v9771_v6 = vld [vmem:[%s11078_s3 + $0x674] ss:$8 sps:$4 sm:$0xff]  }
 0x27b   : > { %8104 = vmatpush1.bf16.msra.mxu0 %v9678_v7  ;;  %7777 = vmatprep.subr.bf16.mxu1 %v9683_v8  ;;  %v9774_v7 = vld [vmem:[%s11078_s3 + $0xe74] ss:$8 sps:$4 sm:$0xff]   ;;  %v9769_v8 = vld [vmem:[%s11078_s3 + $0x670] ss:$8 sps:$4 sm:$0xff]  }
 0x27c   : > { %8105 = vmatprep.subr.bf16.mxu0 %v9686_v9  ;;  %v9772_v9 = vld [vmem:[%s11078_s3 + $0xe70] ss:$8 sps:$4 sm:$0xff]  }
 0x27e   : > { %7778 = vmatpush1.bf16.msra.mxu1 %v9681_v10  ;;  %v9777_v10 = vld [vmem:[%s11078_s3 + $0x684] ss:$8 sps:$4 sm:$0xff]  }
 0x27f   : > { %8106 = vmatpush1.bf16.msra.mxu0 %v9684_v11  ;;  %7779 = vmatprep.subr.bf16.mxu1 %v9689_v12  ;;  %v9780_v11 = vld [vmem:[%s11078_s3 + $0xe84] ss:$8 sps:$4 sm:$0xff]   ;;  %v9775_v12 = vld [vmem:[%s11078_s3 + $0x680] ss:$8 sps:$4 sm:$0xff]  }
 0x280   : > { %8107 = vmatprep.subr.bf16.mxu0 %v9692_v13  ;;  %v9778_v13 = vld [vmem:[%s11078_s3 + $0xe80] ss:$8 sps:$4 sm:$0xff]  }
 0x282   : > { %7780 = vmatpush1.bf16.msra.mxu1 %v9687_v0  ;;  %v9783_v0 = vld [vmem:[%s11078_s3 + $0x694] ss:$8 sps:$4 sm:$0xff]  }
 0x283   : > { %8108 = vmatpush1.bf16.msra.mxu0 %v9690_v14  ;;  %7781 = vmatprep.subr.bf16.mxu1 %v9695_v1  ;;  %v9786_v14 = vld [vmem:[%s11078_s3 + $0xe94] ss:$8 sps:$4 sm:$0xff]   ;;  %v9781_v1 = vld [vmem:[%s11078_s3 + $0x690] ss:$8 sps:$4 sm:$0xff]  }
 0x284   : > { %8109 = vmatprep.subr.bf16.mxu0 %v9698_v15  ;;  %v9784_v15 = vld [vmem:[%s11078_s3 + $0xe90] ss:$8 sps:$4 sm:$0xff]  }
 0x286   : > { %7782 = vmatpush1.bf16.msra.mxu1 %v9693_v16  ;;  %v9789_v16 = vld [vmem:[%s11078_s3 + $0x6a4] ss:$8 sps:$4 sm:$0xff]  }
 0x287   : > { %8110 = vmatpush1.bf16.msra.mxu0 %v9696_v18  ;;  %7783 = vmatprep.subr.bf16.mxu1 %v9701_v21  ;;  %v9792_v18 = vld [vmem:[%s11078_s3 + $0xea4] ss:$8 sps:$4 sm:$0xff]   ;;  %v9787_v21 = vld [vmem:[%s11078_s3 + $0x6a0] ss:$8 sps:$4 sm:$0xff]  }
 0x288   : > { %8111 = vmatprep.subr.bf16.mxu0 %v9704_v22  ;;  %v9790_v22 = vld [vmem:[%s11078_s3 + $0xea0] ss:$8 sps:$4 sm:$0xff]  }
 0x28a   : > { %7784 = vmatpush1.bf16.msra.mxu1 %v9699_v24  ;;  %v9795_v24 = vld [vmem:[%s11078_s3 + $0x6b4] ss:$8 sps:$4 sm:$0xff]  }
 0x28b   : > { %8112 = vmatpush1.bf16.msra.mxu0 %v9702_v25  ;;  %7785 = vmatprep.subr.bf16.mxu1 %v9707_v26  ;;  %v9798_v25 = vld [vmem:[%s11078_s3 + $0xeb4] ss:$8 sps:$4 sm:$0xff]   ;;  %v9793_v26 = vld [vmem:[%s11078_s3 + $0x6b0] ss:$8 sps:$4 sm:$0xff]  }
 0x28c   : > { %8113 = vmatprep.subr.bf16.mxu0 %v9710_v17  ;;  %v9796_v17 = vld [vmem:[%s11078_s3 + $0xeb0] ss:$8 sps:$4 sm:$0xff]  }
 0x28e   : > { %7786 = vmatpush1.bf16.msra.mxu1 %v9705_v20  ;;  %v9801_v20 = vld [vmem:[%s11078_s3 + $0x6c4] ss:$8 sps:$4 sm:$0xff]  }
 0x28f   : > { %8114 = vmatpush1.bf16.msra.mxu0 %v9708_v27  ;;  %7787 = vmatprep.subr.bf16.mxu1 %v9713_v28  ;;  %v9804_v27 = vld [vmem:[%s11078_s3 + $0xec4] ss:$8 sps:$4 sm:$0xff]   ;;  %v9799_v28 = vld [vmem:[%s11078_s3 + $0x6c0] ss:$8 sps:$4 sm:$0xff]  }
 0x290   : > { %8115 = vmatprep.subr.bf16.mxu0 %v9716_v29  ;;  %v9802_v29 = vld [vmem:[%s11078_s3 + $0xec0] ss:$8 sps:$4 sm:$0xff]  }
 0x292   : > { %7788 = vmatpush1.bf16.msra.mxu1 %v9711_v19  ;;  %v9807_v19 = vld [vmem:[%s11078_s3 + $0x6d4] ss:$8 sps:$4 sm:$0xff]  }
 0x293   : > { %8116 = vmatpush1.bf16.msra.mxu0 %v9714_v32  ;;  %7789 = vmatprep.subr.bf16.mxu1 %v9719_v34  ;;  %v9810_v32 = vld [vmem:[%s11078_s3 + $0xed4] ss:$8 sps:$4 sm:$0xff]   ;;  %v9805_v34 = vld [vmem:[%s11078_s3 + $0x6d0] ss:$8 sps:$4 sm:$0xff]  }
 0x294   : > { %8117 = vmatprep.subr.bf16.mxu0 %v9722_v35  ;;  %v9808_v35 = vld [vmem:[%s11078_s3 + $0xed0] ss:$8 sps:$4 sm:$0xff]  }
 0x296   : > { %7790 = vmatpush1.bf16.msra.mxu1 %v9717_v36  ;;  %v9813_v36 = vld [vmem:[%s11078_s3 + $0x6e4] ss:$8 sps:$4 sm:$0xff]  }
 0x297   : > { %8118 = vmatpush1.bf16.msra.mxu0 %v9720_v37  ;;  %7800 = vmatprep.subr.bf16.mxu1 %v9727_v38  ;;  %v9816_v37 = vld [vmem:[%s11078_s3 + $0xee4] ss:$8 sps:$4 sm:$0xff]   ;;  %v9811_v38 = vld [vmem:[%s11078_s3 + $0x6e0] ss:$8 sps:$4 sm:$0xff]  }
 0x298   : > { %8128 = vmatprep.subr.bf16.mxu0 %v9732_v39  ;;  %v9814_v39 = vld [vmem:[%s11078_s3 + $0xee0] ss:$8 sps:$4 sm:$0xff]  }
 0x299   : > { %7792 = vmatmul.mubr.bf16.vlgmr.msra.gmra.mrb[0].mxu1 %v8488_v40  ;;  %v9819_v40 = vld [vmem:[%s11078_s3 + $0x6f4] ss:$8 sps:$4 sm:$0xff]  }
 0x29a   : > { %8120 = vmatmul.mubr.bf16.vlgmr.msra.gmra.mrb[0].mxu0 %v8504_v30  ;;  %7801 = vmatpush1.bf16.msra.mxu1 %v9725_v42  ;;  %v9822_v30 = vld [vmem:[%s11078_s3 + $0xef4] ss:$8 sps:$4 sm:$0xff]   ;;  %v9817_v42 = vld [vmem:[%s11078_s3 + $0x6f0] ss:$8 sps:$4 sm:$0xff]  }
 0x29b   : > { %8129 = vmatpush1.bf16.msra.mxu0 %v9730_v23  ;;  %7802 = vmatprep.subr.bf16.mxu1 %v9735_v33  ;;  %v9820_v23 = vld [vmem:[%s11078_s3 + $0xef0] ss:$8 sps:$4 sm:$0xff]   ;;  %v9827_v33 = vld [vmem:[%s11078_s3 + $0x704] ss:$8 sps:$4 sm:$0xff]  }
 0x29c   : > { %8130 = vmatprep.subr.bf16.mxu0 %v9738_v43  ;;  %7832 = vmatprep.mubr.bf16.mxu1 %v8491_v44  ;;  %v9832_v43 = vld [vmem:[%s11078_s3 + $0xf04] ss:$8 sps:$4 sm:$0xff]   ;;  %v8490_v44 = vcombine.low %v11563_v31, %v11563_v31  ;;  %v9830_v31 = vld [vmem:[%s11078_s3 + $0xf00] ss:$8 sps:$4 sm:$0xff]  }
 0x29d   : > { %8160 = vmatprep.mubr.bf16.mxu0 %v8507_v45  ;;  %v8506_v45 = vcombine.low %v11568_v41, %v11568_v41  ;;  %v9835_v41 = vld [vmem:[%s11078_s3 + $0x714] ss:$8 sps:$4 sm:$0xff]  }
 0x29e   : > { %7803 = vmatpush1.bf16.msra.mxu1 %v9733_v46  ;;  %v11645_v46 = vld [vmem:[%s11761_s0 + $0x38] sm:$0xff] }
 0x29f   : > { %8131 = vmatpush1.bf16.msra.mxu0 %v9736_v47  ;;  %7804 = vmatprep.subr.bf16.mxu1 %v9741_v48  ;;  %v11650_v47 = vld [vmem:[%s11761_s0 + $0x78] sm:$0xff]  ;;  %v9825_v48 = vld [vmem:[%s11078_s3 + $0x700] ss:$8 sps:$4 sm:$0xff]  }
 0x2a0   : > { %8132 = vmatprep.subr.bf16.mxu0 %v9744_v49  ;;  %v9838_v49 = vld [vmem:[%s11078_s3 + $0xf14] ss:$8 sps:$4 sm:$0xff]  }
 0x2a2   : > { %7805 = vmatpush1.bf16.msra.mxu1 %v9739_v50  ;;  %v8493_v50 = vcombine.high %v11645_v46, %v11645_v46 }
 0x2a3   : > { %8133 = vmatpush1.bf16.msra.mxu0 %v9742_v51  ;;  %7806 = vmatprep.subr.bf16.mxu1 %v9747_v52  ;;  %v8509_v51 = vcombine.high %v11650_v47, %v11650_v47  ;;  %v9833_v52 = vld [vmem:[%s11078_s3 + $0x710] ss:$8 sps:$4 sm:$0xff]  }
 0x2a4   : > { %8134 = vmatprep.subr.bf16.mxu0 %v9750_v53  ;;  %v9836_v53 = vld [vmem:[%s11078_s3 + $0xf10] ss:$8 sps:$4 sm:$0xff]  }
 0x2a6   : > { %7807 = vmatpush1.bf16.msra.mxu1 %v9745_v54  ;;  %v9841_v54 = vld [vmem:[%s11078_s3 + $0x724] ss:$8 sps:$4 sm:$0xff]  }
 0x2a7   : > { %8135 = vmatpush1.bf16.msra.mxu0 %v9748_v55  ;;  %7808 = vmatprep.subr.bf16.mxu1 %v9753_v56  ;;  %v9844_v55 = vld [vmem:[%s11078_s3 + $0xf24] ss:$8 sps:$4 sm:$0xff]   ;;  %v9839_v56 = vld [vmem:[%s11078_s3 + $0x720] ss:$8 sps:$4 sm:$0xff]  }
 0x2a8   : > { %8136 = vmatprep.subr.bf16.mxu0 %v9756_v57  ;;  %v9842_v57 = vld [vmem:[%s11078_s3 + $0xf20] ss:$8 sps:$4 sm:$0xff]  }
 0x2aa   : > { %7809 = vmatpush1.bf16.msra.mxu1 %v9751_v58  ;;  %v9847_v58 = vld [vmem:[%s11078_s3 + $0x734] ss:$8 sps:$4 sm:$0xff]  }
 0x2ab   : > { %8137 = vmatpush1.bf16.msra.mxu0 %v9754_v59  ;;  %7810 = vmatprep.subr.bf16.mxu1 %v9759_v60  ;;  %v9850_v59 = vld [vmem:[%s11078_s3 + $0xf34] ss:$8 sps:$4 sm:$0xff]   ;;  %v9845_v60 = vld [vmem:[%s11078_s3 + $0x730] ss:$8 sps:$4 sm:$0xff]  }
 0x2ac   : > { %8138 = vmatprep.subr.bf16.mxu0 %v9762_v61  ;;  %v9848_v61 = vld [vmem:[%s11078_s3 + $0xf30] ss:$8 sps:$4 sm:$0xff]  }
 0x2ae   : > { %7811 = vmatpush1.bf16.msra.mxu1 %v9757_v62  ;;  %v9853_v62 = vld [vmem:[%s11078_s3 + $0x744] ss:$8 sps:$4 sm:$0xff]  }
 0x2af   : > { %8139 = vmatpush1.bf16.msra.mxu0 %v9760_v63  ;;  %7812 = vmatprep.subr.bf16.mxu1 %v9765_v2  ;;  %v9856_v63 = vld [vmem:[%s11078_s3 + $0xf44] ss:$8 sps:$4 sm:$0xff]   ;;  %v9851_v2 = vld [vmem:[%s11078_s3 + $0x740] ss:$8 sps:$4 sm:$0xff]  }
 0x2b0   : > { %8140 = vmatprep.subr.bf16.mxu0 %v9768_v3  ;;  %v9854_v3 = vld [vmem:[%s11078_s3 + $0xf40] ss:$8 sps:$4 sm:$0xff]  }
 0x2b2   : > { %7813 = vmatpush1.bf16.msra.mxu1 %v9763_v4  ;;  %v9859_v4 = vld [vmem:[%s11078_s3 + $0x754] ss:$8 sps:$4 sm:$0xff]  }
 0x2b3   : > { %8141 = vmatpush1.bf16.msra.mxu0 %v9766_v5  ;;  %7814 = vmatprep.subr.bf16.mxu1 %v9771_v6  ;;  %v9862_v5 = vld [vmem:[%s11078_s3 + $0xf54] ss:$8 sps:$4 sm:$0xff]   ;;  %v9857_v6 = vld [vmem:[%s11078_s3 + $0x750] ss:$8 sps:$4 sm:$0xff]  }
 0x2b4   : > { %8142 = vmatprep.subr.bf16.mxu0 %v9774_v7  ;;  %v9860_v7 = vld [vmem:[%s11078_s3 + $0xf50] ss:$8 sps:$4 sm:$0xff]  }
 0x2b6   : > { %7815 = vmatpush1.bf16.msra.mxu1 %v9769_v8  ;;  %v9865_v8 = vld [vmem:[%s11078_s3 + $0x764] ss:$8 sps:$4 sm:$0xff]  }
 0x2b7   : > { %8143 = vmatpush1.bf16.msra.mxu0 %v9772_v9  ;;  %7816 = vmatprep.subr.bf16.mxu1 %v9777_v10  ;;  %v9868_v9 = vld [vmem:[%s11078_s3 + $0xf64] ss:$8 sps:$4 sm:$0xff]   ;;  %v9863_v10 = vld [vmem:[%s11078_s3 + $0x760] ss:$8 sps:$4 sm:$0xff]  }
 0x2b8   : > { %8144 = vmatprep.subr.bf16.mxu0 %v9780_v11  ;;  %v9866_v11 = vld [vmem:[%s11078_s3 + $0xf60] ss:$8 sps:$4 sm:$0xff]  }
 0x2ba   : > { %7817 = vmatpush1.bf16.msra.mxu1 %v9775_v12  ;;  %v9871_v12 = vld [vmem:[%s11078_s3 + $0x774] ss:$8 sps:$4 sm:$0xff]  }
 0x2bb   : > { %8145 = vmatpush1.bf16.msra.mxu0 %v9778_v13  ;;  %7818 = vmatprep.subr.bf16.mxu1 %v9783_v0  ;;  %v9874_v13 = vld [vmem:[%s11078_s3 + $0xf74] ss:$8 sps:$4 sm:$0xff]   ;;  %v9869_v0 = vld [vmem:[%s11078_s3 + $0x770] ss:$8 sps:$4 sm:$0xff]  }
 0x2bc   : > { %8146 = vmatprep.subr.bf16.mxu0 %v9786_v14  ;;  %v9872_v14 = vld [vmem:[%s11078_s3 + $0xf70] ss:$8 sps:$4 sm:$0xff]  }
 0x2be   : > { %7819 = vmatpush1.bf16.msra.mxu1 %v9781_v1  ;;  %v9877_v1 = vld [vmem:[%s11078_s3 + $0x784] ss:$8 sps:$4 sm:$0xff]  }
 0x2bf   : > { %8147 = vmatpush1.bf16.msra.mxu0 %v9784_v15  ;;  %7820 = vmatprep.subr.bf16.mxu1 %v9789_v16  ;;  %v9880_v15 = vld [vmem:[%s11078_s3 + $0xf84] ss:$8 sps:$4 sm:$0xff]   ;;  %v9875_v16 = vld [vmem:[%s11078_s3 + $0x780] ss:$8 sps:$4 sm:$0xff]  }
 0x2c0   : > { %8148 = vmatprep.subr.bf16.mxu0 %v9792_v18  ;;  %v9878_v18 = vld [vmem:[%s11078_s3 + $0xf80] ss:$8 sps:$4 sm:$0xff]  }
 0x2c2   : > { %7821 = vmatpush1.bf16.msra.mxu1 %v9787_v21  ;;  %v9883_v21 = vld [vmem:[%s11078_s3 + $0x794] ss:$8 sps:$4 sm:$0xff]  }
 0x2c3   : > { %8149 = vmatpush1.bf16.msra.mxu0 %v9790_v22  ;;  %7822 = vmatprep.subr.bf16.mxu1 %v9795_v24  ;;  %v9886_v22 = vld [vmem:[%s11078_s3 + $0xf94] ss:$8 sps:$4 sm:$0xff]   ;;  %v9881_v24 = vld [vmem:[%s11078_s3 + $0x790] ss:$8 sps:$4 sm:$0xff]  }
 0x2c4   : > { %8150 = vmatprep.subr.bf16.mxu0 %v9798_v25  ;;  %v9884_v25 = vld [vmem:[%s11078_s3 + $0xf90] ss:$8 sps:$4 sm:$0xff]  }
 0x2c6   : > { %7823 = vmatpush1.bf16.msra.mxu1 %v9793_v26  ;;  %v9889_v26 = vld [vmem:[%s11078_s3 + $0x7a4] ss:$8 sps:$4 sm:$0xff]  }
 0x2c7   : > { %8151 = vmatpush1.bf16.msra.mxu0 %v9796_v17  ;;  %7824 = vmatprep.subr.bf16.mxu1 %v9801_v20  ;;  %v9892_v17 = vld [vmem:[%s11078_s3 + $0xfa4] ss:$8 sps:$4 sm:$0xff]   ;;  %v9887_v20 = vld [vmem:[%s11078_s3 + $0x7a0] ss:$8 sps:$4 sm:$0xff]  }
 0x2c8   : > { %8152 = vmatprep.subr.bf16.mxu0 %v9804_v27  ;;  %v9890_v27 = vld [vmem:[%s11078_s3 + $0xfa0] ss:$8 sps:$4 sm:$0xff]  }
 0x2ca   : > { %7825 = vmatpush1.bf16.msra.mxu1 %v9799_v28  ;;  %v9895_v28 = vld [vmem:[%s11078_s3 + $0x7b4] ss:$8 sps:$4 sm:$0xff]  }
 0x2cb   : > { %8153 = vmatpush1.bf16.msra.mxu0 %v9802_v29  ;;  %7826 = vmatprep.subr.bf16.mxu1 %v9807_v19  ;;  %v9898_v29 = vld [vmem:[%s11078_s3 + $0xfb4] ss:$8 sps:$4 sm:$0xff]   ;;  %v9893_v19 = vld [vmem:[%s11078_s3 + $0x7b0] ss:$8 sps:$4 sm:$0xff]  }
 0x2cc   : > { %8154 = vmatprep.subr.bf16.mxu0 %v9810_v32  ;;  %v9896_v32 = vld [vmem:[%s11078_s3 + $0xfb0] ss:$8 sps:$4 sm:$0xff]  }
 0x2ce   : > { %7827 = vmatpush1.bf16.msra.mxu1 %v9805_v34  ;;  %v9901_v34 = vld [vmem:[%s11078_s3 + $0x7c4] ss:$8 sps:$4 sm:$0xff]  }
 0x2cf   : > { %8155 = vmatpush1.bf16.msra.mxu0 %v9808_v35  ;;  %7828 = vmatprep.subr.bf16.mxu1 %v9813_v36  ;;  %v9904_v35 = vld [vmem:[%s11078_s3 + $0xfc4] ss:$8 sps:$4 sm:$0xff]   ;;  %v9899_v36 = vld [vmem:[%s11078_s3 + $0x7c0] ss:$8 sps:$4 sm:$0xff]  }
 0x2d0   : > { %8156 = vmatprep.subr.bf16.mxu0 %v9816_v37  ;;  %v9902_v37 = vld [vmem:[%s11078_s3 + $0xfc0] ss:$8 sps:$4 sm:$0xff]  }
 0x2d2   : > { %7829 = vmatpush1.bf16.msra.mxu1 %v9811_v38  ;;  %v9907_v38 = vld [vmem:[%s11078_s3 + $0x7d4] ss:$8 sps:$4 sm:$0xff]  }
 0x2d3   : > { %8157 = vmatpush1.bf16.msra.mxu0 %v9814_v39  ;;  %7830 = vmatprep.subr.bf16.mxu1 %v9819_v40  ;;  %v9910_v39 = vld [vmem:[%s11078_s3 + $0xfd4] ss:$8 sps:$4 sm:$0xff]   ;;  %v9905_v40 = vld [vmem:[%s11078_s3 + $0x7d0] ss:$8 sps:$4 sm:$0xff]  }
 0x2d4   : > { %8158 = vmatprep.subr.bf16.mxu0 %v9822_v30  ;;  %v9908_v30 = vld [vmem:[%s11078_s3 + $0xfd0] ss:$8 sps:$4 sm:$0xff]  }
 0x2d6   : > { %7831 = vmatpush1.bf16.msra.mxu1 %v9817_v42  ;;  %v9913_v42 = vld [vmem:[%s11078_s3 + $0x7e4] ss:$8 sps:$4 sm:$0xff]  }
 0x2d7   : > { %8159 = vmatpush1.bf16.msra.mxu0 %v9820_v23  ;;  %7841 = vmatprep.subr.bf16.mxu1 %v9827_v33  ;;  %v9916_v23 = vld [vmem:[%s11078_s3 + $0xfe4] ss:$8 sps:$4 sm:$0xff]   ;;  %v9911_v33 = vld [vmem:[%s11078_s3 + $0x7e0] ss:$8 sps:$4 sm:$0xff]  }
 0x2d8   : > { %8169 = vmatprep.subr.bf16.mxu0 %v9832_v43  ;;  %v9914_v43 = vld [vmem:[%s11078_s3 + $0xfe0] ss:$8 sps:$4 sm:$0xff]  }
 0x2d9   : > { %7833 = vmatmul.mubr.bf16.vlgmr.msra.gmra.mrb[0].mxu1 %v8490_v44  ;;  %v9919_v44 = vld [vmem:[%s11078_s3 + $0x7f4] ss:$8 sps:$4 sm:$0xff]  }
 0x2da   : > { %8161 = vmatmul.mubr.bf16.vlgmr.msra.gmra.mrb[0].mxu0 %v8506_v45  ;;  %7842 = vmatpush1.bf16.msra.mxu1 %v9825_v48  ;;  %v9922_v45 = vld [vmem:[%s11078_s3 + $0xff4] ss:$8 sps:$4 sm:$0xff]   ;;  %v9917_v48 = vld [vmem:[%s11078_s3 + $0x7f0] ss:$8 sps:$4 sm:$0xff]  }
 0x2db   : > { %8170 = vmatpush1.bf16.msra.mxu0 %v9830_v31  ;;  %7843 = vmatprep.subr.bf16.mxu1 %v9835_v41  ;;  %v9920_v31 = vld [vmem:[%s11078_s3 + $0xff0] ss:$8 sps:$4 sm:$0xff]   ;;  %v8492_v41 = vcombine.low %v11645_v46, %v11645_v46  ;;  %s8476_s3 = sshll.u32 %s9965_s11, 1 }
 0x2dc   : > { %8171 = vmatprep.subr.bf16.mxu0 %v9838_v49  ;;  %7873 = vmatprep.mubr.bf16.mxu1 %v8493_v50  ;;  %v8508_v49 = vcombine.low %v11650_v47, %v11650_v47  ;;  %p4347_p9 = scmp.lt.s32.totalorder %s8476_s3, 3 }
 0x2dd   : > { %8201 = vmatprep.mubr.bf16.mxu0 %v8509_v51 }
 0x2de   : > { %7844 = vmatpush1.bf16.msra.mxu1 %v9833_v52  ;;  %s11771_s3 = smov (!%p4347_p9, %s8476_s3), 3 }
 0x2df   : > { %8172 = vmatpush1.bf16.msra.mxu0 %v9836_v53  ;;  %7845 = vmatprep.subr.bf16.mxu1 %v9841_v54  ;;  %s8477_s16 = sshll.u32 %s11771_s3, 2 }
 0x2e0   : > { %8173 = vmatprep.subr.bf16.mxu0 %v9844_v55  ;;  %s4352_s19 = scalar_lea.vmem %s11763_s2, %s8477_s16 }
 0x2e2   : > { %7846 = vmatpush1.bf16.msra.mxu1 %v9839_v56 }
 0x2e3   : > { %8174 = vmatpush1.bf16.msra.mxu0 %v9842_v57  ;;  %7847 = vmatprep.subr.bf16.mxu1 %v9847_v58 }
 0x2e4   : > { %8175 = vmatprep.subr.bf16.mxu0 %v9850_v59 }
 0x2e6   : > { %7848 = vmatpush1.bf16.msra.mxu1 %v9845_v60 }
 0x2e7   : > { %8176 = vmatpush1.bf16.msra.mxu0 %v9848_v61  ;;  %7849 = vmatprep.subr.bf16.mxu1 %v9853_v62 }
 0x2e8   : > { %8177 = vmatprep.subr.bf16.mxu0 %v9856_v63 }
 0x2ea   : > { %7850 = vmatpush1.bf16.msra.mxu1 %v9851_v2 }
 0x2eb   : > { %8178 = vmatpush1.bf16.msra.mxu0 %v9854_v3  ;;  %7851 = vmatprep.subr.bf16.mxu1 %v9859_v4 }
 0x2ec   : > { %8179 = vmatprep.subr.bf16.mxu0 %v9862_v5 }
 0x2ee   : > { %7852 = vmatpush1.bf16.msra.mxu1 %v9857_v6 }
 0x2ef   : > { %8180 = vmatpush1.bf16.msra.mxu0 %v9860_v7  ;;  %7853 = vmatprep.subr.bf16.mxu1 %v9865_v8 }
 0x2f0   : > { %8181 = vmatprep.subr.bf16.mxu0 %v9868_v9 }
 0x2f2   : > { %7854 = vmatpush1.bf16.msra.mxu1 %v9863_v10 }
 0x2f3   : > { %8182 = vmatpush1.bf16.msra.mxu0 %v9866_v11  ;;  %7855 = vmatprep.subr.bf16.mxu1 %v9871_v12 }
 0x2f4   : > { %8183 = vmatprep.subr.bf16.mxu0 %v9874_v13 }
 0x2f6   : > { %7856 = vmatpush1.bf16.msra.mxu1 %v9869_v0 }
 0x2f7   : > { %8184 = vmatpush1.bf16.msra.mxu0 %v9872_v14  ;;  %7857 = vmatprep.subr.bf16.mxu1 %v9877_v1 }
 0x2f8   : > { %8185 = vmatprep.subr.bf16.mxu0 %v9880_v15 }
 0x2fa   : > { %7858 = vmatpush1.bf16.msra.mxu1 %v9875_v16 }
 0x2fb   : > { %8186 = vmatpush1.bf16.msra.mxu0 %v9878_v18  ;;  %7859 = vmatprep.subr.bf16.mxu1 %v9883_v21 }
 0x2fc   : > { %8187 = vmatprep.subr.bf16.mxu0 %v9886_v22 }
 0x2fe   : > { %7860 = vmatpush1.bf16.msra.mxu1 %v9881_v24 }
 0x2ff   : > { %8188 = vmatpush1.bf16.msra.mxu0 %v9884_v25  ;;  %7861 = vmatprep.subr.bf16.mxu1 %v9889_v26 }
 0x300   : > { %8189 = vmatprep.subr.bf16.mxu0 %v9892_v17 }
 0x302   : > { %7862 = vmatpush1.bf16.msra.mxu1 %v9887_v20 }
 0x303   : > { %8190 = vmatpush1.bf16.msra.mxu0 %v9890_v27  ;;  %7863 = vmatprep.subr.bf16.mxu1 %v9895_v28 }
 0x304   : > { %8191 = vmatprep.subr.bf16.mxu0 %v9898_v29 }
 0x306   : > { %7864 = vmatpush1.bf16.msra.mxu1 %v9893_v19 }
 0x307   : > { %8192 = vmatpush1.bf16.msra.mxu0 %v9896_v32  ;;  %7865 = vmatprep.subr.bf16.mxu1 %v9901_v34 }
 0x308   : > { %8193 = vmatprep.subr.bf16.mxu0 %v9904_v35 }
 0x30a   : > { %7866 = vmatpush1.bf16.msra.mxu1 %v9899_v36 }
 0x30b   : > { %8194 = vmatpush1.bf16.msra.mxu0 %v9902_v37  ;;  %7867 = vmatprep.subr.bf16.mxu1 %v9907_v38 }
 0x30c   : > { %8195 = vmatprep.subr.bf16.mxu0 %v9910_v39 }
 0x30e   : > { %7868 = vmatpush1.bf16.msra.mxu1 %v9905_v40 }
 0x30f   : > { %8196 = vmatpush1.bf16.msra.mxu0 %v9908_v30  ;;  %7869 = vmatprep.subr.bf16.mxu1 %v9913_v42 }
 0x310   : > { %8197 = vmatprep.subr.bf16.mxu0 %v9916_v23 }
 0x312   : > { %7870 = vmatpush1.bf16.msra.mxu1 %v9911_v33 }
 0x313   : > { %8198 = vmatpush1.bf16.msra.mxu0 %v9914_v43  ;;  %7871 = vmatprep.subr.bf16.mxu1 %v9919_v44 }
 0x314   : > { %8199 = vmatprep.subr.bf16.mxu0 %v9922_v45 }
 0x316   : > { %7872 = vmatpush1.bf16.msra.mxu1 %v9917_v48 }
 0x317   : > { %8200 = vmatpush1.bf16.msra.mxu0 %v9920_v31 }
 0x319   : > { %7874 = vmatmul.mubr.bf16.vlgmr.msra.gmra.mrb[0].mxu1 %v8492_v41 }
 0x31a   : > { %8202 = vmatmul.mubr.bf16.vlgmr.msra.gmra.mrb[0].mxu0 %v8508_v49 }
 0x3ec   : > { %v7875_v50 = vpop.f32.mrb[0].mxu1 }
 0x3ed   : > { %v8203_v51 = vpop.f32.mrb[0].mxu0  ;;  %v7877_v53 = vpop.f32.mrb[1].mxu1 }
 0x3ee   : > { %v9029_v52 = vadd.f32 %v8203_v51, %v7875_v50  ;;  %v8205_v54 = vpop.f32.mrb[1].mxu0  ;;  %v7879_v56 = vpop.f32.mrb[2].mxu1 }
 0x3ef   : > { %v9030_v55 = vadd.f32 %v8205_v54, %v7877_v53  ;;  %v8207_v57 = vpop.f32.mrb[2].mxu0  ;;  %v7880_v58 = vpop.f32.mrb[3].mxu1 }
 0x3f0   : > { %v8208_v59 = vpop.f32.mrb[3].mxu0 }
 0x3f1   : > { %v11722_v60 = vcombine.low %v9029_v52, %v9030_v55  ;;  %v11724_v46 = vcombine.high %v9029_v52, %v9030_v55  ;;  %v9022_v47 = vcombine.low %v9030_v55, %v9030_v55  ;;  %v9023_v61 = vcombine.high %v9030_v55, %v9030_v55 }
 0x3f3   : > { %v8221_v62 = vsel %vm8220_vm0, %v11722_v60, 0.0  ;;  %v8228_v63 = vsel %vm8220_vm0, %v9022_v47, 0.0  ;;  %v8235_v2 = vsel %vm8220_vm0, %v11724_v46, 0.0  ;;  %v8242_v3 = vsel %vm8220_vm0, %v9023_v61, 0.0 }
 0x3f4   : > { %v8222_v4 = vrot.slane %v8221_v62, 4  ;;  %v8229_v5 = vrot.slane %v8228_v63, 4  ;;  %v8236_v6 = vrot.slane %v8235_v2, 4  ;;  %v8243_v7 = vrot.slane %v8242_v3, 4 }
 0x3f5   : > { %v8254_v8 = vmul.f32 %v11722_v60, %v11722_v60  ;;  %v8255_v9 = vmul.f32 %v11724_v46, %v11724_v46 }
 0x3f6   : > { %v8223_v10 = vadd.f32 %v8222_v4, %v8221_v62  ;;  %v8230_v11 = vadd.f32 %v8229_v5, %v8228_v63  ;;  %v8237_v12 = vadd.f32 %v8236_v6, %v8235_v2  ;;  %v8244_v13 = vadd.f32 %v8243_v7, %v8242_v3 }
 0x3f7   : > { %v8258_v0 = vcombine.high %v8254_v8, %v8254_v8  ;;  %v8259_v14 = vcombine.high %v8255_v9, %v8255_v9  ;;  %v8262_v1 = vsel %vm8220_vm0, %v8254_v8, 0.0  ;;  %v8276_v15 = vsel %vm8220_vm0, %v8255_v9, 0.0 }
 0x3f8   : > { %v8224_v16 = vrot.slane %v8223_v10, 2  ;;  %v8231_v18 = vrot.slane %v8230_v11, 2  ;;  %v8238_v21 = vrot.slane %v8237_v12, 2  ;;  %v8245_v22 = vrot.slane %v8244_v13, 2 }
 0x3f9   : > { %v8263_v24 = vrot.slane %v8262_v1, 4  ;;  %v8269_v25 = vsel %vm8220_vm0, %v8258_v0, 0.0  ;;  %v8277_v26 = vrot.slane %v8276_v15, 4  ;;  %v8283_v17 = vsel %vm8220_vm0, %v8259_v14, 0.0 }
 0x3fa   : > { %v8225_v20 = vadd.f32 %v8224_v16, %v8223_v10  ;;  %v8232_v27 = vadd.f32 %v8231_v18, %v8230_v11  ;;  %v8239_v28 = vadd.f32 %v8238_v21, %v8237_v12  ;;  %v8246_v29 = vadd.f32 %v8245_v22, %v8244_v13 }
 0x3fb   : > { %v8264_v19 = vadd.f32 %v8263_v24, %v8262_v1  ;;  %v8270_v32 = vrot.slane %v8269_v25, 4  ;;  %v8278_v34 = vadd.f32 %v8277_v26, %v8276_v15  ;;  %v8284_v35 = vrot.slane %v8283_v17, 4 }
 0x3fc   : > { %v8226_v36 = vrot.slane %v8225_v20, 1  ;;  %v8233_v37 = vrot.slane %v8232_v27, 1  ;;  %v8240_v38 = vrot.slane %v8239_v28, 1  ;;  %v8247_v39 = vrot.slane %v8246_v29, 1 }
 0x3fd   : > { %v8265_v40 = vrot.slane %v8264_v19, 2  ;;  %v8271_v30 = vadd.f32 %v8270_v32, %v8269_v25  ;;  %v8279_v42 = vrot.slane %v8278_v34, 2  ;;  %v8285_v23 = vadd.f32 %v8284_v35, %v8283_v17 }
 0x3fe   : > { %v8227_v33 = vadd.f32 %v8226_v36, %v8225_v20  ;;  %v8234_v43 = vadd.f32 %v8233_v37, %v8232_v27  ;;  %v8241_v44 = vadd.f32 %v8240_v38, %v8239_v28  ;;  %v8248_v45 = vadd.f32 %v8247_v39, %v8246_v29 }
 0x3ff   : > { %v8266_v48 = vadd.f32 %v8265_v40, %v8264_v19  ;;  %v8272_v31 = vrot.slane %v8271_v30, 2  ;;  %v8280_v41 = vadd.f32 %v8279_v42, %v8278_v34  ;;  %v8286_v49 = vrot.slane %v8285_v23, 2 }
 0x400   : > { %v8250_v50 = vmul.f32 0.25, %v8227_v33  ;;  %v8251_v51 = vmul.f32 0.25, %v8234_v43  ;;  %v8252_v52 = vmul.f32 0.25, %v8241_v44  ;;  %v8253_v53 = vmul.f32 0.25, %v8248_v45 }
 0x401   : > { %v8267_v54 = vrot.slane %v8266_v48, 1  ;;  %v8273_v55 = vadd.f32 %v8272_v31, %v8271_v30  ;;  %v8281_v56 = vrot.slane %v8280_v41, 1  ;;  %v8287_v57 = vadd.f32 %v8286_v49, %v8285_v23 }
 0x402   : > { %v8294_v58 = vmul.f32 %v8250_v50, %v8250_v50  ;;  %v8296_v59 = vmul.f32 %v8252_v52, %v8252_v52  ;;  %v8310_v2 = vcombine.low %v8250_v50, %v8251_v51  ;;  %v8311_v3 = vcombine.low %v8252_v52, %v8253_v53 }
 0x403   : > { %v8268_v47 = vadd.f32 %v8267_v54, %v8266_v48  ;;  %v8274_v61 = vrot.slane %v8273_v55, 1  ;;  %v8282_v62 = vadd.f32 %v8281_v56, %v8280_v41  ;;  %v8288_v63 = vrot.slane %v8287_v57, 1 }
 0x404   : > { %v8295_v8 = vmul.f32 %v8251_v51, %v8251_v51  ;;  %v8297_v9 = vmul.f32 %v8253_v53, %v8253_v53  ;;  %v8314_v10 = vsub.f32 %v11722_v60, %v8310_v2  ;;  %v8315_v11 = vsub.f32 %v11724_v46, %v8311_v3 }
 0x405   : > { %v8275_v4 = vadd.f32 %v8274_v61, %v8273_v55  ;;  %v8289_v5 = vadd.f32 %v8288_v63, %v8287_v57  ;;  %v8290_v6 = vmul.f32 0.25, %v8268_v47  ;;  %v8292_v7 = vmul.f32 0.25, %v8282_v62 }
 0x407   : > { %v8291_v12 = vmul.f32 0.25, %v8275_v4  ;;  %v8293_v13 = vmul.f32 0.25, %v8289_v5  ;;  %v8298_v0 = vsub.f32 %v8290_v6, %v8294_v58  ;;  %v8300_v14 = vsub.f32 %v8292_v7, %v8296_v59 }
 0x409   : > { %v8299_v1 = vsub.f32 %v8291_v12, %v8295_v8  ;;  %v8301_v15 = vsub.f32 %v8293_v13, %v8297_v9  ;;  %v8302_v16 = vmax.f32 %v8298_v0, 0.0  ;;  %v8304_v18 = vmax.f32 %v8300_v14, 0.0 }
 0x40b   : > { %v8303_v21 = vmax.f32 %v8299_v1, 0.0  ;;  %v8305_v22 = vmax.f32 %v8301_v15, 0.0  ;;  %v8316_v24 = vadd.f32 1e-05, %v8302_v16  ;;  %v8318_v25 = vadd.f32 1e-05, %v8304_v18 }
 0x40d   : > { %v8317_v26 = vadd.f32 1e-05, %v8303_v21  ;;  %v8319_v17 = vadd.f32 1e-05, %v8305_v22  ;;  %9927 = vrsqrt.f32 %v8316_v24 }
 0x40e   : > { %9929 = vrsqrt.f32 %v8318_v25 }
 0x40f   : > { %9931 = vrsqrt.f32 %v8317_v26 }
 0x410   : > { %9933 = vrsqrt.f32 %v8319_v17 }
 0x417   : > { %v9928_v60 = vpop.eup %9927 }
 0x418   : > { %v9930_v46 = vpop.eup %9929 }
 0x419   : > { %v9932_v20 = vpop.eup %9931 }
 0x41a   : > { %v9934_v27 = vpop.eup %9933  ;;  %v8328_v28 = vcombine.low %v9928_v60, %v9932_v20 }
 0x41b   : > { %v8329_v29 = vcombine.low %v9930_v46, %v9934_v27 }
 0x41c   : > { %v8332_v19 = vmul.f32 %v8328_v28, %v8314_v10 }
 0x41d   : > { %v8333_v32 = vmul.f32 %v8329_v29, %v8315_v11 }
 0x41e   : > { %vm8334_vm1 = vcmp.gt.f32.partialorder %v8332_v19, 0.0  ;;  %v8336_v34 = vmul.f32 0.2, %v8332_v19 }
 0x41f   : > { %vm8335_vm2 = vcmp.gt.f32.partialorder %v8333_v32, 0.0  ;;  %v8337_v35 = vmul.f32 0.2, %v8333_v32 }
 0x420   : > { %v8338_v36 = vsel %vm8334_vm1, %v8332_v19, %v8336_v34 }
 0x421   : > { %v8339_v37 = vsel %vm8335_vm2, %v8333_v32, %v8337_v35 }
 0x422   : > { %v8342_v38 = vcombine.low %v8338_v36, %v8339_v37  ;;  %v8343_v39 = vcombine.high %v8338_v36, %v8339_v37 }
 0x424   : > { %v9028_v40 = vpack.c.bf16 %v8343_v39, %v8342_v38 }
 0x426   : > { %8354 = vst [vmem:[%s4352_s19] sm:$0xff] %v9028_v40 }
 0x427 PF: > { %s12_s13 = sadd.s32 1, %s9973_s13   ;;  %s11764_s9 = smov %s9961_s10 }
 0x428   : > { %p9_p10 = scmp.ge.s32.totalorder %s12_s13, 4   ;;  %s11765_s10 = smov %s10025_s17 }
 0x429   : > { %s11766_s11 = smov %s9969_s12  ;;  %s11767_s12 = smov %s11769_s14 }
 0x42a   :  { %11 = sbr.rel (!%p9_p10) target bundleno = 3 (0x3), region = 124 }

</bundles_post_ra>
